<compile_context>
chip_gen: v6e
topology: v6e:2x2x1
jax: 0.10.0
libtpu: 0.0.40
codegen_flags: <defaults>
</compile_context>

<pallas_src>
import functools
import math

import jax
import jax.numpy as jnp
from jax.experimental import pallas as pl
from jax.experimental.pallas import tpu as pltpu

_VMEM = functools.partial(pl.BlockSpec, memory_space=pltpu.MemorySpace.VMEM)


def _round_up(x, m):
    return ((x + m - 1) // m) * m


def _cpad(c):
    return _round_up(c, 128)


@functools.lru_cache(maxsize=None)
def _budget():
    """Chip-aware VMEM limit / tile caps (v5e,v6e: 128 MiB; v7x: 64 MiB)."""
    vmem = 64 << 20
    try:
        info = pltpu.get_tpu_info()
        for name in ("vmem_capacity_bytes", "vmem_bytes", "vmem_size_bytes"):
            v = getattr(info, name, None)
            if v:
                vmem = int(v)
                break
    except Exception:
        pass
    if vmem >= (96 << 20):                       # v5e / v6e
        return {"vmem_limit": 100 << 20, "tile_cap": 512, "tm": 512}
    return {"vmem_limit": 48 << 20, "tile_cap": 256, "tm": 256}   # v7x-safe


def _pick_tile(n, cap):
    if n <= cap:
        return n
    for c in (512, 384, 256, 128):
        if c <= cap and n % c == 0:
            return c
    return 128


def _pick_row_tile(ho, wo):
    """Largest divisor of Ho capped so a (rows*Wo, 256) f32 acc stays small."""
    cap = max(1, 4096 // max(wo, 1))
    cap = min(cap, 32, ho)
    for t in range(cap, 0, -1):
        if ho % t == 0:
            return t
    return 1


def _pick_hw_tile(hw, cap=1024):
    if hw <= cap:
        return hw
    for t in range(cap - cap % 8, 7, -8):
        if hw % t == 0:
            return t
    return hw


# ----------------------------- Pallas kernels -----------------------------

def _mm_kernel(*refs, act, has_gate, has_res, k_axis):
    """((x [* gate]) @ w_scaled) + bias [+ residual][, SiLU].  K-grid accum."""
    i = 0
    x_ref = refs[i]; i += 1
    w_ref = refs[i]; i += 1
    if has_gate:
        g_ref = refs[i]; i += 1
    b_ref = refs[i]; i += 1
    if has_res:
        r_ref = refs[i]; i += 1
    o_ref = refs[i]; i += 1
    acc_ref = refs[i]

    @pl.when(pl.program_id(k_axis) == 0)
    def _():
        acc_ref[...] = jnp.zeros_like(acc_ref)

    xv = x_ref[0]
    if has_gate:
        xv = xv * g_ref[0]
    acc_ref[...] += jnp.dot(xv, w_ref[...], preferred_element_type=jnp.float32)

    @pl.when(pl.program_id(k_axis) == pl.num_programs(k_axis) - 1)
    def _():
        y = acc_ref[...] + b_ref[...]
        if act:
            y = y * jax.nn.sigmoid(y)              # SiLU in f32
        if has_res:
            y = y + r_ref[0].astype(jnp.float32)
        o_ref[0] = y.astype(o_ref.dtype)


def _conv3_bn_silu_kernel(x_ref, w_ref, b_ref, o_ref, *, stride, th, Wo):
    """Full 3x3 conv (pad=1) + folded-BN bias + SiLU on one (b, row-tile, N-tile).

    x_ref: [P, 1, 1, win_rows, Wq, Cin] bf16 halo row-windows (phase split)
    w_ref: [9, Cin, tn] bf16 (BN scale folded);  b_ref: [1, tn] f32
    o_ref: [1, th, Wo, tn] bf16
    """
    cin = x_ref.shape[-1]
    tn = o_ref.shape[-1]
    acc = jnp.zeros((th * Wo, tn), jnp.float32)
    for ky in range(3):
        for kx in range(3):
            if stride == 1:
                tap = x_ref[0, 0, 0, ky:ky + th, kx:kx + Wo, :]
            else:
                p = (ky % 2) * 2 + (kx % 2)
                tap = x_ref[p, 0, 0, ky // 2:ky // 2 + th, kx // 2:kx // 2 + Wo, :]
            acc = acc + jnp.dot(tap.reshape(th * Wo, cin), w_ref[ky * 3 + kx],
                                preferred_element_type=jnp.float32)
    y = acc + b_ref[...]
    y = y * jax.nn.sigmoid(y)
    o_ref[0] = y.reshape(th, Wo, tn).astype(o_ref.dtype)


def _dwconv3_bn_silu_kernel(x_ref, w_ref, b_ref, o_ref, sum_ref, *, stride, th, Wo):
    """Depthwise 3x3 conv + folded-BN bias + SiLU, plus fused SE partial pool.

    x_ref: [P, 1, 1, win_rows, Wq, tc] bf16;  w_ref: [9, tc] f32 (scale folded)
    b_ref: [1, tc] f32;  o_ref: [1, th, Wo, tc] bf16;  sum_ref: [1, 1, 8, tc] f32
    """
    tc = o_ref.shape[-1]
    wv = w_ref[...]                                   # [9, tc], hoisted
    acc = jnp.zeros((th, Wo, tc), jnp.float32)
    for ky in range(3):
        for kx in range(3):
            if stride == 1:
                tap = x_ref[0, 0, 0, ky:ky + th, kx:kx + Wo, :]
            else:
                p = (ky % 2) * 2 + (kx % 2)
                tap = x_ref[p, 0, 0, ky // 2:ky // 2 + th, kx // 2:kx // 2 + Wo, :]
            acc = acc + tap.astype(jnp.float32) * wv[ky * 3 + kx].reshape(1, 1, tc)
    y = acc + b_ref[...].reshape(1, 1, tc)
    y = y * jax.nn.sigmoid(y)
    o_ref[0] = y.astype(o_ref.dtype)
    # Fused SE global-average-pool: partial channel sums for this (row, c) tile,
    # broadcast over 8 sublanes so the block satisfies the (8, 128) rule.
    s = jnp.sum(y, axis=(0, 1)).reshape(1, 1, 1, tc)
    sum_ref[...] = jnp.broadcast_to(s, (1, 1, 8, tc))


def _se_gate_kernel(sum_ref, w1_ref, b1_ref, w2_ref, b2_ref, o_ref, *, inv_count):
    """SE gate from fused partial pools: mean -> fc -> SiLU -> fc -> sigmoid."""
    pooled = jnp.sum(sum_ref[...], axis=(1, 2)) * inv_count          # [B, C]
    h = jnp.dot(pooled, w1_ref[...], preferred_element_type=jnp.float32) + b1_ref[...]
    h = h * jax.nn.sigmoid(h)
    g = jnp.dot(h, w2_ref[...], preferred_element_type=jnp.float32) + b2_ref[...]
    o_ref[...] = jax.nn.sigmoid(g)                                    # [B, C] f32


def _pool_fc_kernel(x_ref, w_ref, b_ref, o_ref, acc_ref, *, inv_count):
    """AdaptiveAvgPool2d((1,1)) + classifier Linear, tiled over HW."""
    @pl.when(pl.program_id(0) == 0)
    def _():
        acc_ref[...] = jnp.zeros_like(acc_ref)
    acc_ref[...] += jnp.sum(x_ref[...].astype(jnp.float32), axis=1)

    @pl.when(pl.program_id(0) == pl.num_programs(0) - 1)
    def _():
        y = acc_ref[...] * inv_count
        o_ref[...] = (jnp.dot(y, w_ref[...], preferred_element_type=jnp.float32)
                      + b_ref[...])


# ------------------------------ wrappers -----------------------------------

def matmul_bn(x, w, bias, *, act, gate=None, residual=None):
    """Tiled fused ((x[*gate]) @ w_scaled) + bias [+res][, SiLU].

    x: [B, M, K] bf16; w: [K, N] bf16 (BN scale pre-folded); bias: [N] f32;
    gate: [B, 1, K] bf16 or None; residual: [B, M, N] bf16 or None.
    """
    B, M, K = x.shape
    N = w.shape[1]
    bud = _budget()
    has_gate = gate is not None
    has_res = residual is not None

    if has_gate:
        x3, r3, nb, mtot = x, residual, B, M
    else:
        # Fold B into M -> bigger LHS tiles, fewer grid steps.
        x3 = x.reshape(1, B * M, K)
        r3 = residual.reshape(1, B * M, N) if has_res else None
        nb, mtot = 1, B * M

    tm = min(bud["tm"], _round_up(mtot, 16))
    mp = _round_up(mtot, tm)
    tn = _pick_tile(N, bud["tile_cap"])
    tk = _pick_tile(K, bud["tile_cap"])
    if mp != mtot:
        x3 = jnp.pad(x3, ((0, 0), (0, mp - mtot), (0, 0)))
        if has_res:
            r3 = jnp.pad(r3, ((0, 0), (0, mp - mtot), (0, 0)))
    bias2 = bias.reshape(1, N).astype(jnp.float32)

    if has_gate:
        grid = (nb, mp // tm, N // tn, K // tk)
        k_axis = 3
        dims = ("parallel", "parallel", "parallel", "arbitrary")
        x_map = lambda b, i, j, k: (b, i, k)
        w_map = lambda b, i, j, k: (k, j)
        g_map = lambda b, i, j, k: (b, 0, k)
        v_map = lambda b, i, j, k: (0, j)
        o_map = lambda b, i, j, k: (b, i, j)
    else:
        grid = (mp // tm, N // tn, K // tk)
        k_axis = 2
        dims = ("parallel", "parallel", "arbitrary")
        x_map = lambda i, j, k: (0, i, k)
        w_map = lambda i, j, k: (k, j)
        g_map = None
        v_map = lambda i, j, k: (0, j)
        o_map = lambda i, j, k: (0, i, j)

    in_specs = [pl.BlockSpec((1, tm, tk), x_map), pl.BlockSpec((tk, tn), w_map)]
    args = [x3, w]
    if has_gate:
        in_specs.append(pl.BlockSpec((1, 1, tk), g_map))
        args.append(gate)
    in_specs.append(pl.BlockSpec((1, tn), v_map))
    args.append(bias2)
    if has_res:
        in_specs.append(pl.BlockSpec((1, tm, tn), o_map))
        args.append(r3)

    cost = pl.CostEstimate(
        flops=int(2 * nb * mp * N * K),
        transcendentals=int(nb * mp * N) if act else 0,
        bytes_accessed=int(2 * (nb * mp * K + K * N + nb * mp * N) + 4 * N))

    out = pl.pallas_call(
        functools.partial(_mm_kernel, act=act, has_gate=has_gate,
                          has_res=has_res, k_axis=k_axis),
        grid=grid,
        in_specs=in_specs,
        out_specs=pl.BlockSpec((1, tm, tn), o_map),
        out_shape=jax.ShapeDtypeStruct((nb, mp, N), jnp.bfloat16),
        scratch_shapes=[pltpu.VMEM((tm, tn), jnp.float32)],
        compiler_params=pltpu.CompilerParams(
            dimension_semantics=dims, vmem_limit_bytes=bud["vmem_limit"]),
        cost_estimate=cost,
    )(*args)

    if has_gate:
        return out[:, :M, :] if mp != M else out
    out = out[0, :mtot, :] if mp != mtot else out[0]
    return out.reshape(B, M, N)


def _halo_windows(x, stride, th):
    """Overlapping halo row-windows of the zero-padded (phase-split) input.

    x: [B, H, W, C] -> win [P, B, R, win_rows, Wq, C], Ho, Wo, R, win_rows.
    stride 1: 1 phase, 2-row halo; stride 2: 4 even/odd phases, 1-row halo so
    every 3x3 tap is a contiguous (unstrided) slice inside the kernel.
    """
    B, H, W, C = x.shape
    Ho = (H - 1) // stride + 1
    Wo = (W - 1) // stride + 1
    xp = jnp.pad(x, ((0, 0), (1, 1), (1, 1), (0, 0)))
    if stride == 1:
        ph = xp[None]
        win_rows = th + 2
    else:
        Hp, Wp = H + 2, W + 2
        xp = jnp.pad(xp, ((0, 0), (0, Hp % 2), (0, Wp % 2), (0, 0)))
        ph = jnp.stack([xp[:, py::2, px::2, :] for py in (0, 1) for px in (0, 1)],
                       axis=0)
        win_rows = th + 1
    assert Ho % th == 0
    R = Ho // th
    win = jnp.stack([ph[:, :, i * th:i * th + win_rows] for i in range(R)], axis=2)
    return win, Ho, Wo, R, win_rows


def conv3x3_bn_silu(fmap, H, W, w9, bias, stride):
    """Full 3x3 conv (pad=1, bias=False) + folded BN + SiLU, row-tiled."""
    B, _, Cin = fmap.shape
    Np = w9.shape[2]
    x = fmap.reshape(B, H, W, Cin)
    Ho = (H - 1) // stride + 1
    Wo = (W - 1) // stride + 1
    th = _pick_row_tile(Ho, Wo)
    win, Ho, Wo, R, wr = _halo_windows(x, stride, th)
    P, Wq = win.shape[0], win.shape[4]
    bud = _budget()
    tn = _pick_tile(Np, bud["tile_cap"])
    bias2 = bias.reshape(1, Np).astype(jnp.float32)
    cost = pl.CostEstimate(
        flops=int(2 * 9 * B * Ho * Wo * Cin * Np),
        transcendentals=int(B * Ho * Wo * Np),
        bytes_accessed=int(2 * (P * B * R * wr * Wq * Cin + 9 * Cin * Np
                                + B * Ho * Wo * Np)))
    out = pl.pallas_call(
        functools.partial(_conv3_bn_silu_kernel, stride=stride, th=th, Wo=Wo),
        grid=(B, R, Np // tn),
        in_specs=[
            pl.BlockSpec((P, 1, 1, wr, Wq, Cin), lambda b, r, j: (0, b, r, 0, 0, 0)),
            pl.BlockSpec((9, Cin, tn), lambda b, r, j: (0, 0, j)),
            pl.BlockSpec((1, tn), lambda b, r, j: (0, j)),
        ],
        out_specs=pl.BlockSpec((1, th, Wo, tn), lambda b, r, j: (b, r, 0, j)),
        out_shape=jax.ShapeDtypeStruct((B, Ho, Wo, Np), jnp.bfloat16),
        compiler_params=pltpu.CompilerParams(
            dimension_semantics=("parallel", "parallel", "parallel"),
            vmem_limit_bytes=bud["vmem_limit"]),
        cost_estimate=cost,
    )(win, w9, bias2)
    return out.reshape(B, Ho * Wo, Np), Ho, Wo


def dwconv3x3_bn_silu(fmap, H, W, wdw, bias, stride):
    """Depthwise 3x3 conv + folded BN + SiLU (row-tiled) + fused SE pool sums."""
    B, _, C = fmap.shape
    assert C % 128 == 0
    x = fmap.reshape(B, H, W, C)
    Ho = (H - 1) // stride + 1
    Wo = (W - 1) // stride + 1
    th = _pick_row_tile(Ho, Wo)
    win, Ho, Wo, R, wr = _halo_windows(x, stride, th)
    P, Wq = win.shape[0], win.shape[4]
    tc = 128
    bud = _budget()
    bias2 = bias.reshape(1, C).astype(jnp.float32)
    cost = pl.CostEstimate(
        flops=int(2 * 9 * B * Ho * Wo * C),
        transcendentals=int(B * Ho * Wo * C),
        bytes_accessed=int(2 * (P * B * R * wr * Wq * C + B * Ho * Wo * C)
                           + 4 * 9 * C))
    out, sums = pl.pallas_call(
        functools.partial(_dwconv3_bn_silu_kernel, stride=stride, th=th, Wo=Wo),
        grid=(B, R, C // tc),
        in_specs=[
            pl.BlockSpec((P, 1, 1, wr, Wq, tc), lambda b, r, c: (0, b, r, 0, 0, c)),
            pl.BlockSpec((9, tc), lambda b, r, c: (0, c)),
            pl.BlockSpec((1, tc), lambda b, r, c: (0, c)),
        ],
        out_specs=(
            pl.BlockSpec((1, th, Wo, tc), lambda b, r, c: (b, r, 0, c)),
            pl.BlockSpec((1, 1, 8, tc), lambda b, r, c: (b, r, 0, c)),
        ),
        out_shape=(jax.ShapeDtypeStruct((B, Ho, Wo, C), jnp.bfloat16),
                   jax.ShapeDtypeStruct((B, R, 8, C), jnp.float32)),
        compiler_params=pltpu.CompilerParams(
            dimension_semantics=("parallel", "parallel", "parallel"),
            vmem_limit_bytes=bud["vmem_limit"]),
        cost_estimate=cost,
    )(win, wdw, bias2)
    return out.reshape(B, Ho * Wo, C), sums, Ho, Wo


def se_gate(sums, hw, w1, b1, w2, b2):
    """SE gate s[B,1,C] from fused partial pools (x*s is folded into project)."""
    B, _, _, C = sums.shape
    S = w1.shape[1]
    gate = pl.pallas_call(
        functools.partial(_se_gate_kernel, inv_count=1.0 / float(hw * 8)),
        out_shape=jax.ShapeDtypeStruct((B, C), jnp.float32),
        in_specs=[_VMEM()] * 5,
        out_specs=_VMEM(),
    )(sums, w1, b1.reshape(1, S), w2, b2.reshape(1, C))
    # Pad channels of the gate are sigmoid(0)=0.5, harmless: zero-padded
    # weights keep the corresponding activation channels exactly zero.
    return gate.astype(jnp.bfloat16).reshape(B, 1, C)


def avgpool_classifier(fmap, w, b):
    B, HW, C = fmap.shape
    Np = w.shape[1]
    thw = _pick_hw_tile(HW)
    bud = _budget()
    return pl.pallas_call(
        functools.partial(_pool_fc_kernel, inv_count=1.0 / float(HW)),
        grid=(HW // thw,),
        in_specs=[
            pl.BlockSpec((B, thw, C), lambda h: (0, h, 0)),
            pl.BlockSpec((C, Np), lambda h: (0, 0)),
            pl.BlockSpec((1, Np), lambda h: (0, 0)),
        ],
        out_specs=pl.BlockSpec((B, Np), lambda h: (0, 0)),
        out_shape=jax.ShapeDtypeStruct((B, Np), jnp.float32),
        scratch_shapes=[pltpu.VMEM((B, C), jnp.float32)],
        compiler_params=pltpu.CompilerParams(
            dimension_semantics=("arbitrary",),
            vmem_limit_bytes=bud["vmem_limit"]),
    )(fmap, w, b.reshape(1, Np))


def mbconv_forward(fmap, H, W, p):
    if p['use_se']:
        h = matmul_bn(fmap, p['w_exp'], p['b_bn1'], act=True)
        h, sums, Ho, Wo = dwconv3x3_bn_silu(h, H, W, p['w_dw'], p['b_bn2'],
                                            p['stride'])
        gate = se_gate(sums, Ho * Wo, p['se_w1'], p['se_b1'],
                       p['se_w2'], p['se_b2'])
        res = fmap if p['identity'] else None
        out = matmul_bn(h, p['w_proj'], p['b_bn3'], act=False,
                        gate=gate, residual=res)
        return out, Ho, Wo
    h, Ho, Wo = conv3x3_bn_silu(fmap, H, W, p['w_exp3'], p['b_bn1'], p['stride'])
    res = fmap if p['identity'] else None
    out = matmul_bn(h, p['w_proj'], p['b_bn2'], act=False, residual=res)
    return out, Ho, Wo


def effnetv2_forward(params, x_nchw):
    x = jnp.transpose(x_nchw, (0, 2, 3, 1))                 # NCHW -> NHWC
    B, H, W, C = x.shape
    cin_p = params['stem']['w'].shape[1]
    x = jnp.pad(x, ((0, 0), (0, 0), (0, 0), (0, cin_p - C))).astype(jnp.bfloat16)
    fmap = x.reshape(B, H * W, cin_p)

    stem = params['stem']
    fmap, H, W = conv3x3_bn_silu(fmap, H, W, stem['w'], stem['bias'], 2)
    for p in params['blocks']:
        fmap, H, W = mbconv_forward(fmap, H, W, p)

    hc = params['head_conv']
    fmap = matmul_bn(fmap, hc['w'], hc['bias'], act=True)

    cls = params['classifier']
    logits = avgpool_classifier(fmap, cls['w'], cls['b'])
    return logits[:, :params['num_classes']]


# --------------------------- parameter building ----------------------------

def _make_divisible(v, divisor, min_value=None):
    if min_value is None:
        min_value = divisor
    new_v = max(min_value, int(v + divisor / 2) // divisor * divisor)
    if new_v < 0.9 * v:
        new_v += divisor
    return new_v


def init_effnetv2_params(cfgs, num_classes=1000, width_mult=1.0, *, key):
    keys = iter(jax.random.split(key, 512))

    def conv_w(cout, cin, kh, kw):
        # PyTorch _initialize_weights: normal(0, sqrt(2 / (kh*kw*cout)))
        n = kh * kw * cout
        return (jax.random.normal(next(keys), (cout, cin, kh, kw), jnp.float32)
                * math.sqrt(2.0 / n))

    def linear_w(cout, cin):
        # PyTorch _initialize_weights: normal(0, 0.001), bias = 0
        return jax.random.normal(next(keys), (cout, cin), jnp.float32) * 0.001

    def bn_fold(c, cp, eps=1e-5):
        # TODO(synk): inference-form BN with __init__ running stats only.
        gamma = jnp.ones((c,), jnp.float32)
        beta = jnp.zeros((c,), jnp.float32)
        running_mean = jnp.zeros((c,), jnp.float32)
        running_var = jnp.ones((c,), jnp.float32)
        scale = gamma / jnp.sqrt(running_var + eps)
        bias = beta - running_mean * scale
        scale = jnp.concatenate([scale, jnp.ones((cp - c,), jnp.float32)])
        bias = jnp.concatenate([bias, jnp.zeros((cp - c,), jnp.float32)])
        return scale, bias

    def pad2(w, rp, cp):
        return jnp.pad(w, ((0, rp - w.shape[0]), (0, cp - w.shape[1])))

    def conv3_to_mat(w, cin_p, cout_p, scale):
        # torch [cout, cin, 3, 3] -> [9, cin_p, cout_p] bf16, BN scale folded.
        cout, cin = w.shape[0], w.shape[1]
        m = jnp.transpose(w, (2, 3, 1, 0)).reshape(9, cin, cout)
        m = jnp.pad(m, ((0, 0), (0, cin_p - cin), (0, cout_p - cout)))
        return (m * scale[None, None, :]).astype(jnp.bfloat16)

    def conv1_to_mat(w, cin_p, cout_p, scale):
        # torch [cout, cin, 1, 1] -> [cin_p, cout_p] bf16, BN scale folded.
        m = pad2(jnp.transpose(w[:, :, 0, 0]), cin_p, cout_p)
        return (m * scale[None, :]).astype(jnp.bfloat16)

    params = {'num_classes': num_classes}
    input_channel = _make_divisible(24 * width_mult, 8)
    stem_cin_p = 8    # image channels (3) padded; tiny-K stem stays memory-bound
    sw = conv_w(input_channel, 3, 3, 3)
    ss, sb = bn_fold(input_channel, _cpad(input_channel))
    params['stem'] = dict(
        w=conv3_to_mat(sw, stem_cin_p, _cpad(input_channel), ss), bias=sb)

    blocks = []
    for t, c, n, s, use_se in cfgs:
        output_channel = _make_divisible(c * width_mult, 8)
        for i in range(n):
            stride = s if i == 0 else 1
            inp, oup = input_channel, output_channel
            hidden = int(round(inp * t))
            identity = (stride == 1 and inp == oup)
            inp_p, oup_p, hid_p = _cpad(inp), _cpad(oup), _cpad(hidden)
            p = dict(stride=stride, use_se=bool(use_se), identity=identity)
            if use_se:
                s1, b1 = bn_fold(hidden, hid_p)
                p['w_exp'] = conv1_to_mat(conv_w(hidden, inp, 1, 1), inp_p, hid_p, s1)
                p['b_bn1'] = b1
                s2, b2 = bn_fold(hidden, hid_p)
                wdw = conv_w(hidden, 1, 3, 3)                      # [hid, 1, 3, 3]
                wdw9 = jnp.transpose(wdw[:, 0], (1, 2, 0)).reshape(9, hidden)
                p['w_dw'] = jnp.pad(wdw9, ((0, 0), (0, hid_p - hidden))) * s2[None, :]
                p['b_bn2'] = b2
                se_hid = _make_divisible(inp // 4, 8)
                se_hid_p = _cpad(se_hid)
                w1 = linear_w(se_hid, hidden)                      # torch [out, in]
                w2 = linear_w(hidden, se_hid)
                p['se_w1'] = pad2(jnp.transpose(w1), hid_p, se_hid_p)
                p['se_b1'] = jnp.zeros((se_hid_p,), jnp.float32)
                p['se_w2'] = pad2(jnp.transpose(w2), se_hid_p, hid_p)
                p['se_b2'] = jnp.zeros((hid_p,), jnp.float32)
                s3, b3 = bn_fold(oup, oup_p)
                p['w_proj'] = conv1_to_mat(conv_w(oup, hidden, 1, 1), hid_p, oup_p, s3)
                p['b_bn3'] = b3
            else:
                s1, b1 = bn_fold(hidden, hid_p)
                p['w_exp3'] = conv3_to_mat(conv_w(hidden, inp, 3, 3), inp_p, hid_p, s1)
                p['b_bn1'] = b1
                s2, b2 = bn_fold(oup, oup_p)
                p['w_proj'] = conv1_to_mat(conv_w(oup, hidden, 1, 1), hid_p, oup_p, s2)
                p['b_bn2'] = b2
            blocks.append(p)
            input_channel = output_channel
    params['blocks'] = blocks

    head_ch = _make_divisible(1792 * width_mult, 8) if width_mult > 1.0 else 1792
    head_p = _cpad(head_ch)
    hs, hb = bn_fold(head_ch, head_p)
    params['head_conv'] = dict(
        w=conv1_to_mat(conv_w(head_ch, input_channel, 1, 1),
                       _cpad(input_channel), head_p, hs),
        bias=hb)

    ncls_p = _cpad(num_classes)
    cw = linear_w(num_classes, head_ch)
    params['classifier'] = dict(w=pad2(jnp.transpose(cw), head_p, ncls_p),
                                b=jnp.zeros((ncls_p,), jnp.float32))
    return params


# --------------------------------- main -------------------------------------

if __name__ == "__main__":
    key = jax.random.PRNGKey(0)
    pkey, xkey = jax.random.split(key)

    # Small EffNetV2-style config: (expand t, channels c, repeats n, stride s, use_se)
    cfgs = [
        [1, 24, 1, 1, 0],   # fused MBConv, no SE, identity residual
        [2, 32, 2, 2, 1],   # MBConv with SE; 2nd repeat exercises residual add
    ]
    params = init_effnetv2_params(cfgs, num_classes=10, width_mult=1.0, key=pkey)

    # PyTorch-style NCHW input
    x = jax.random.normal(xkey, (2, 3, 16, 16), jnp.float32)

    fwd = jax.jit(functools.partial(effnetv2_forward, params))
    logits = fwd(x)
    jax.block_until_ready(logits)
    assert logits.shape == (2, 10) and logits.dtype == jnp.float32
    print("KERNEL_OK")
</pallas_src>

<mosaic_0001>
module attributes {stable_mosaic.version = 11 : i64} {
  func.func @_conv3_bn_silu_kernel(%arg0: i32, %arg1: i32, %arg2: i32, %arg3: memref<4x1x1x9x9x8xbf16, #tpu.memory_space<vmem>>, %arg4: memref<9x8x128xbf16, #tpu.memory_space<vmem>>, %arg5: memref<1x128xf32, #tpu.memory_space<vmem>>, %arg6: memref<1x8x8x128xbf16, #tpu.memory_space<vmem>>) attributes {dimension_semantics = [#tpu.dimension_semantics<parallel>, #tpu.dimension_semantics<parallel>, #tpu.dimension_semantics<parallel>], iteration_bounds = array<i64: 2, 1, 1>, scalar_prefetch = 0 : i64, scratch_operands = 0 : i64, tpu.core_type = #tpu.core_type<tc>, window_params = [{transform_indices = @transform_0, window_bounds = array<i64: 4, 1, 1, 9, 9, 8>}, {transform_indices = @transform_1, window_bounds = array<i64: 9, 8, 128>}, {transform_indices = @transform_2, window_bounds = array<i64: 1, 128>}, {transform_indices = @transform_3, window_bounds = array<i64: 1, 8, 8, 128>}]} {
    %cst = arith.constant 0.000000e+00 : f32
    %0 = vector.broadcast %cst : f32 to vector<64x128xf32>
    %c0 = arith.constant 0 : index
    %c0_0 = arith.constant 0 : index
    %c0_1 = arith.constant 0 : index
    %c0_2 = arith.constant 0 : index
    %c0_3 = arith.constant 0 : index
    %c0_4 = arith.constant 0 : index
    %1 = vector.load %arg3[%c0, %c0_0, %c0_1, %c0_2, %c0_3, %c0_4] : memref<4x1x1x9x9x8xbf16, #tpu.memory_space<vmem>>, vector<1x1x1x8x8x8xbf16>
    %2 = vector.shape_cast %1 : vector<1x1x1x8x8x8xbf16> to vector<8x8x8xbf16>
    %3 = vector.shape_cast %2 : vector<8x8x8xbf16> to vector<64x8xbf16>
    %c0_5 = arith.constant 0 : index
    %c0_6 = arith.constant 0 : index
    %c0_7 = arith.constant 0 : index
    %4 = vector.load %arg4[%c0_5, %c0_6, %c0_7] : memref<9x8x128xbf16, #tpu.memory_space<vmem>>, vector<1x8x128xbf16>
    %5 = vector.shape_cast %4 : vector<1x8x128xbf16> to vector<8x128xbf16>
    %cst_8 = arith.constant dense<0.000000e+00> : vector<64x128xf32>
    %6 = tpu.matmul %3, %5, %cst_8 {dimension_numbers = #tpu.dot_dimension_numbers<[1], [0], [0], [1], [0, 0, 1, 1], [], []>} : vector<64x8xbf16>, vector<8x128xbf16>, vector<64x128xf32> -> vector<64x128xf32>
    %7 = arith.addf %0, %6 : vector<64x128xf32>
    %c1 = arith.constant 1 : index
    %c0_9 = arith.constant 0 : index
    %c0_10 = arith.constant 0 : index
    %c0_11 = arith.constant 0 : index
    %c0_12 = arith.constant 0 : index
    %c0_13 = arith.constant 0 : index
    %8 = vector.load %arg3[%c1, %c0_9, %c0_10, %c0_11, %c0_12, %c0_13] : memref<4x1x1x9x9x8xbf16, #tpu.memory_space<vmem>>, vector<1x1x1x8x8x8xbf16>
    %9 = vector.shape_cast %8 : vector<1x1x1x8x8x8xbf16> to vector<8x8x8xbf16>
    %10 = vector.shape_cast %9 : vector<8x8x8xbf16> to vector<64x8xbf16>
    %c1_14 = arith.constant 1 : index
    %c0_15 = arith.constant 0 : index
    %c0_16 = arith.constant 0 : index
    %11 = vector.load %arg4[%c1_14, %c0_15, %c0_16] : memref<9x8x128xbf16, #tpu.memory_space<vmem>>, vector<1x8x128xbf16>
    %12 = vector.shape_cast %11 : vector<1x8x128xbf16> to vector<8x128xbf16>
    %cst_17 = arith.constant dense<0.000000e+00> : vector<64x128xf32>
    %13 = tpu.matmul %10, %12, %cst_17 {dimension_numbers = #tpu.dot_dimension_numbers<[1], [0], [0], [1], [0, 0, 1, 1], [], []>} : vector<64x8xbf16>, vector<8x128xbf16>, vector<64x128xf32> -> vector<64x128xf32>
    %14 = arith.addf %7, %13 : vector<64x128xf32>
    %c0_18 = arith.constant 0 : index
    %c0_19 = arith.constant 0 : index
    %c0_20 = arith.constant 0 : index
    %c0_21 = arith.constant 0 : index
    %c1_22 = arith.constant 1 : index
    %c0_23 = arith.constant 0 : index
    %15 = vector.load %arg3[%c0_18, %c0_19, %c0_20, %c0_21, %c1_22, %c0_23] : memref<4x1x1x9x9x8xbf16, #tpu.memory_space<vmem>>, vector<1x1x1x8x8x8xbf16>
    %16 = vector.shape_cast %15 : vector<1x1x1x8x8x8xbf16> to vector<8x8x8xbf16>
    %17 = vector.shape_cast %16 : vector<8x8x8xbf16> to vector<64x8xbf16>
    %c2 = arith.constant 2 : index
    %c0_24 = arith.constant 0 : index
    %c0_25 = arith.constant 0 : index
    %18 = vector.load %arg4[%c2, %c0_24, %c0_25] : memref<9x8x128xbf16, #tpu.memory_space<vmem>>, vector<1x8x128xbf16>
    %19 = vector.shape_cast %18 : vector<1x8x128xbf16> to vector<8x128xbf16>
    %cst_26 = arith.constant dense<0.000000e+00> : vector<64x128xf32>
    %20 = tpu.matmul %17, %19, %cst_26 {dimension_numbers = #tpu.dot_dimension_numbers<[1], [0], [0], [1], [0, 0, 1, 1], [], []>} : vector<64x8xbf16>, vector<8x128xbf16>, vector<64x128xf32> -> vector<64x128xf32>
    %21 = arith.addf %14, %20 : vector<64x128xf32>
    %c2_27 = arith.constant 2 : index
    %c0_28 = arith.constant 0 : index
    %c0_29 = arith.constant 0 : index
    %c0_30 = arith.constant 0 : index
    %c0_31 = arith.constant 0 : index
    %c0_32 = arith.constant 0 : index
    %22 = vector.load %arg3[%c2_27, %c0_28, %c0_29, %c0_30, %c0_31, %c0_32] : memref<4x1x1x9x9x8xbf16, #tpu.memory_space<vmem>>, vector<1x1x1x8x8x8xbf16>
    %23 = vector.shape_cast %22 : vector<1x1x1x8x8x8xbf16> to vector<8x8x8xbf16>
    %24 = vector.shape_cast %23 : vector<8x8x8xbf16> to vector<64x8xbf16>
    %c3 = arith.constant 3 : index
    %c0_33 = arith.constant 0 : index
    %c0_34 = arith.constant 0 : index
    %25 = vector.load %arg4[%c3, %c0_33, %c0_34] : memref<9x8x128xbf16, #tpu.memory_space<vmem>>, vector<1x8x128xbf16>
    %26 = vector.shape_cast %25 : vector<1x8x128xbf16> to vector<8x128xbf16>
    %cst_35 = arith.constant dense<0.000000e+00> : vector<64x128xf32>
    %27 = tpu.matmul %24, %26, %cst_35 {dimension_numbers = #tpu.dot_dimension_numbers<[1], [0], [0], [1], [0, 0, 1, 1], [], []>} : vector<64x8xbf16>, vector<8x128xbf16>, vector<64x128xf32> -> vector<64x128xf32>
    %28 = arith.addf %21, %27 : vector<64x128xf32>
    %c3_36 = arith.constant 3 : index
    %c0_37 = arith.constant 0 : index
    %c0_38 = arith.constant 0 : index
    %c0_39 = arith.constant 0 : index
    %c0_40 = arith.constant 0 : index
    %c0_41 = arith.constant 0 : index
    %29 = vector.load %arg3[%c3_36, %c0_37, %c0_38, %c0_39, %c0_40, %c0_41] : memref<4x1x1x9x9x8xbf16, #tpu.memory_space<vmem>>, vector<1x1x1x8x8x8xbf16>
    %30 = vector.shape_cast %29 : vector<1x1x1x8x8x8xbf16> to vector<8x8x8xbf16>
    %31 = vector.shape_cast %30 : vector<8x8x8xbf16> to vector<64x8xbf16>
    %c4 = arith.constant 4 : index
    %c0_42 = arith.constant 0 : index
    %c0_43 = arith.constant 0 : index
    %32 = vector.load %arg4[%c4, %c0_42, %c0_43] : memref<9x8x128xbf16, #tpu.memory_space<vmem>>, vector<1x8x128xbf16>
    %33 = vector.shape_cast %32 : vector<1x8x128xbf16> to vector<8x128xbf16>
    %cst_44 = arith.constant dense<0.000000e+00> : vector<64x128xf32>
    %34 = tpu.matmul %31, %33, %cst_44 {dimension_numbers = #tpu.dot_dimension_numbers<[1], [0], [0], [1], [0, 0, 1, 1], [], []>} : vector<64x8xbf16>, vector<8x128xbf16>, vector<64x128xf32> -> vector<64x128xf32>
    %35 = arith.addf %28, %34 : vector<64x128xf32>
    %c2_45 = arith.constant 2 : index
    %c0_46 = arith.constant 0 : index
    %c0_47 = arith.constant 0 : index
    %c0_48 = arith.constant 0 : index
    %c1_49 = arith.constant 1 : index
    %c0_50 = arith.constant 0 : index
    %36 = vector.load %arg3[%c2_45, %c0_46, %c0_47, %c0_48, %c1_49, %c0_50] : memref<4x1x1x9x9x8xbf16, #tpu.memory_space<vmem>>, vector<1x1x1x8x8x8xbf16>
    %37 = vector.shape_cast %36 : vector<1x1x1x8x8x8xbf16> to vector<8x8x8xbf16>
    %38 = vector.shape_cast %37 : vector<8x8x8xbf16> to vector<64x8xbf16>
    %c5 = arith.constant 5 : index
    %c0_51 = arith.constant 0 : index
    %c0_52 = arith.constant 0 : index
    %39 = vector.load %arg4[%c5, %c0_51, %c0_52] : memref<9x8x128xbf16, #tpu.memory_space<vmem>>, vector<1x8x128xbf16>
    %40 = vector.shape_cast %39 : vector<1x8x128xbf16> to vector<8x128xbf16>
    %cst_53 = arith.constant dense<0.000000e+00> : vector<64x128xf32>
    %41 = tpu.matmul %38, %40, %cst_53 {dimension_numbers = #tpu.dot_dimension_numbers<[1], [0], [0], [1], [0, 0, 1, 1], [], []>} : vector<64x8xbf16>, vector<8x128xbf16>, vector<64x128xf32> -> vector<64x128xf32>
    %42 = arith.addf %35, %41 : vector<64x128xf32>
    %c0_54 = arith.constant 0 : index
    %c0_55 = arith.constant 0 : index
    %c0_56 = arith.constant 0 : index
    %c1_57 = arith.constant 1 : index
    %c0_58 = arith.constant 0 : index
    %c0_59 = arith.constant 0 : index
    %43 = vector.load %arg3[%c0_54, %c0_55, %c0_56, %c1_57, %c0_58, %c0_59] : memref<4x1x1x9x9x8xbf16, #tpu.memory_space<vmem>>, vector<1x1x1x8x8x8xbf16>
    %44 = vector.shape_cast %43 : vector<1x1x1x8x8x8xbf16> to vector<8x8x8xbf16>
    %45 = vector.shape_cast %44 : vector<8x8x8xbf16> to vector<64x8xbf16>
    %c6 = arith.constant 6 : index
    %c0_60 = arith.constant 0 : index
    %c0_61 = arith.constant 0 : index
    %46 = vector.load %arg4[%c6, %c0_60, %c0_61] : memref<9x8x128xbf16, #tpu.memory_space<vmem>>, vector<1x8x128xbf16>
    %47 = vector.shape_cast %46 : vector<1x8x128xbf16> to vector<8x128xbf16>
    %cst_62 = arith.constant dense<0.000000e+00> : vector<64x128xf32>
    %48 = tpu.matmul %45, %47, %cst_62 {dimension_numbers = #tpu.dot_dimension_numbers<[1], [0], [0], [1], [0, 0, 1, 1], [], []>} : vector<64x8xbf16>, vector<8x128xbf16>, vector<64x128xf32> -> vector<64x128xf32>
    %49 = arith.addf %42, %48 : vector<64x128xf32>
    %c1_63 = arith.constant 1 : index
    %c0_64 = arith.constant 0 : index
    %c0_65 = arith.constant 0 : index
    %c1_66 = arith.constant 1 : index
    %c0_67 = arith.constant 0 : index
    %c0_68 = arith.constant 0 : index
    %50 = vector.load %arg3[%c1_63, %c0_64, %c0_65, %c1_66, %c0_67, %c0_68] : memref<4x1x1x9x9x8xbf16, #tpu.memory_space<vmem>>, vector<1x1x1x8x8x8xbf16>
    %51 = vector.shape_cast %50 : vector<1x1x1x8x8x8xbf16> to vector<8x8x8xbf16>
    %52 = vector.shape_cast %51 : vector<8x8x8xbf16> to vector<64x8xbf16>
    %c7 = arith.constant 7 : index
    %c0_69 = arith.constant 0 : index
    %c0_70 = arith.constant 0 : index
    %53 = vector.load %arg4[%c7, %c0_69, %c0_70] : memref<9x8x128xbf16, #tpu.memory_space<vmem>>, vector<1x8x128xbf16>
    %54 = vector.shape_cast %53 : vector<1x8x128xbf16> to vector<8x128xbf16>
    %cst_71 = arith.constant dense<0.000000e+00> : vector<64x128xf32>
    %55 = tpu.matmul %52, %54, %cst_71 {dimension_numbers = #tpu.dot_dimension_numbers<[1], [0], [0], [1], [0, 0, 1, 1], [], []>} : vector<64x8xbf16>, vector<8x128xbf16>, vector<64x128xf32> -> vector<64x128xf32>
    %56 = arith.addf %49, %55 : vector<64x128xf32>
    %c0_72 = arith.constant 0 : index
    %c0_73 = arith.constant 0 : index
    %c0_74 = arith.constant 0 : index
    %c1_75 = arith.constant 1 : index
    %c1_76 = arith.constant 1 : index
    %c0_77 = arith.constant 0 : index
    %57 = vector.load %arg3[%c0_72, %c0_73, %c0_74, %c1_75, %c1_76, %c0_77] : memref<4x1x1x9x9x8xbf16, #tpu.memory_space<vmem>>, vector<1x1x1x8x8x8xbf16>
    %58 = vector.shape_cast %57 : vector<1x1x1x8x8x8xbf16> to vector<8x8x8xbf16>
    %59 = vector.shape_cast %58 : vector<8x8x8xbf16> to vector<64x8xbf16>
    %c8 = arith.constant 8 : index
    %c0_78 = arith.constant 0 : index
    %c0_79 = arith.constant 0 : index
    %60 = vector.load %arg4[%c8, %c0_78, %c0_79] : memref<9x8x128xbf16, #tpu.memory_space<vmem>>, vector<1x8x128xbf16>
    %61 = vector.shape_cast %60 : vector<1x8x128xbf16> to vector<8x128xbf16>
    %cst_80 = arith.constant dense<0.000000e+00> : vector<64x128xf32>
    %62 = tpu.matmul %59, %61, %cst_80 {dimension_numbers = #tpu.dot_dimension_numbers<[1], [0], [0], [1], [0, 0, 1, 1], [], []>} : vector<64x8xbf16>, vector<8x128xbf16>, vector<64x128xf32> -> vector<64x128xf32>
    %63 = arith.addf %56, %62 : vector<64x128xf32>
    %c0_81 = arith.constant 0 : index
    %c0_82 = arith.constant 0 : index
    %64 = vector.load %arg5[%c0_81, %c0_82] : memref<1x128xf32, #tpu.memory_space<vmem>>, vector<1x128xf32>
    %65 = vector.broadcast %64 : vector<1x128xf32> to vector<64x128xf32>
    %66 = arith.addf %63, %65 : vector<64x128xf32>
    %67 = arith.negf %66 : vector<64x128xf32>
    %68 = math.exp %67 : vector<64x128xf32>
    %cst_83 = arith.constant 1.000000e+00 : f32
    %69 = vector.broadcast %cst_83 : f32 to vector<64x128xf32>
    %70 = arith.addf %69, %68 : vector<64x128xf32>
    %71 = arith.divf %69, %70 : vector<64x128xf32>
    %72 = arith.mulf %66, %71 : vector<64x128xf32>
    %73 = vector.shape_cast %72 : vector<64x128xf32> to vector<8x8x128xf32>
    %74 = arith.truncf %73 : vector<8x8x128xf32> to vector<8x8x128xbf16>
    %c0_84 = arith.constant 0 : index
    %c0_85 = arith.constant 0 : index
    %c0_86 = arith.constant 0 : index
    %c0_87 = arith.constant 0 : index
    %75 = vector.load %arg6[%c0_84, %c0_85, %c0_86, %c0_87] : memref<1x8x8x128xbf16, #tpu.memory_space<vmem>>, vector<1x8x8x128xbf16>
    %76 = vector.shape_cast %75 : vector<1x8x8x128xbf16> to vector<8x8x128xbf16>
    %77 = vector.shape_cast %74 : vector<8x8x128xbf16> to vector<1x8x8x128xbf16>
    tpu.vector_store %arg6[%c0_84, %c0_85, %c0_86, %c0_87], %77 {strides = array<i32>} : memref<1x8x8x128xbf16, #tpu.memory_space<vmem>>, vector<1x8x8x128xbf16>,
    return
  }
  func.func @transform_0(%arg0: i32, %arg1: i32, %arg2: i32) -> (i32, i32, i32, i32, i32, i32) {
    %c0_i32 = arith.constant 0 : i32
    %c0_i32_0 = arith.constant 0 : i32
    %c0_i32_1 = arith.constant 0 : i32
    %c0_i32_2 = arith.constant 0 : i32
    %c0_i32_3 = arith.constant 0 : i32
    return %c0_i32, %arg0, %arg1, %c0_i32_0, %c0_i32_1, %c0_i32_2 : i32, i32, i32, i32, i32, i32
  }
  func.func @transform_1(%arg0: i32, %arg1: i32, %arg2: i32) -> (i32, i32, i32) {
    %c0_i32 = arith.constant 0 : i32
    %c0_i32_0 = arith.constant 0 : i32
    %c0_i32_1 = arith.constant 0 : i32
    return %c0_i32, %c0_i32_0, %arg2 : i32, i32, i32
  }
  func.func @transform_2(%arg0: i32, %arg1: i32, %arg2: i32) -> (i32, i32) {
    %c0_i32 = arith.constant 0 : i32
    %c0_i32_0 = arith.constant 0 : i32
    return %c0_i32, %arg2 : i32, i32
  }
  func.func @transform_3(%arg0: i32, %arg1: i32, %arg2: i32) -> (i32, i32, i32, i32) {
    %c0_i32 = arith.constant 0 : i32
    %c0_i32_0 = arith.constant 0 : i32
    return %arg0, %arg1, %c0_i32, %arg2 : i32, i32, i32, i32
  }
}

module attributes {stable_mosaic.version = 11 : i64} {
  func.func @_conv3_bn_silu_kernel(%arg0: i32, %arg1: i32, %arg2: i32, %arg3: memref<1x1x1x10x10x128xbf16, #tpu.memory_space<vmem>>, %arg4: memref<9x128x128xbf16, #tpu.memory_space<vmem>>, %arg5: memref<1x128xf32, #tpu.memory_space<vmem>>, %arg6: memref<1x8x8x128xbf16, #tpu.memory_space<vmem>>) attributes {dimension_semantics = [#tpu.dimension_semantics<parallel>, #tpu.dimension_semantics<parallel>, #tpu.dimension_semantics<parallel>], iteration_bounds = array<i64: 2, 1, 1>, scalar_prefetch = 0 : i64, scratch_operands = 0 : i64, tpu.core_type = #tpu.core_type<tc>, window_params = [{transform_indices = @transform_0, window_bounds = array<i64: 1, 1, 1, 10, 10, 128>}, {transform_indices = @transform_1, window_bounds = array<i64: 9, 128, 128>}, {transform_indices = @transform_2, window_bounds = array<i64: 1, 128>}, {transform_indices = @transform_3, window_bounds = array<i64: 1, 8, 8, 128>}]} {
    %cst = arith.constant 0.000000e+00 : f32
    %0 = vector.broadcast %cst : f32 to vector<64x128xf32>
    %c0 = arith.constant 0 : index
    %c0_0 = arith.constant 0 : index
    %c0_1 = arith.constant 0 : index
    %c0_2 = arith.constant 0 : index
    %c0_3 = arith.constant 0 : index
    %c0_4 = arith.constant 0 : index
    %1 = vector.load %arg3[%c0, %c0_0, %c0_1, %c0_2, %c0_3, %c0_4] : memref<1x1x1x10x10x128xbf16, #tpu.memory_space<vmem>>, vector<1x1x1x8x8x128xbf16>
    %2 = vector.shape_cast %1 : vector<1x1x1x8x8x128xbf16> to vector<8x8x128xbf16>
    %3 = vector.shape_cast %2 : vector<8x8x128xbf16> to vector<64x128xbf16>
    %c0_5 = arith.constant 0 : index
    %c0_6 = arith.constant 0 : index
    %c0_7 = arith.constant 0 : index
    %4 = vector.load %arg4[%c0_5, %c0_6, %c0_7] : memref<9x128x128xbf16, #tpu.memory_space<vmem>>, vector<1x128x128xbf16>
    %5 = vector.shape_cast %4 : vector<1x128x128xbf16> to vector<128x128xbf16>
    %cst_8 = arith.constant dense<0.000000e+00> : vector<64x128xf32>
    %6 = tpu.matmul %3, %5, %cst_8 {dimension_numbers = #tpu.dot_dimension_numbers<[1], [0], [0], [1], [0, 0, 1, 1], [], []>} : vector<64x128xbf16>, vector<128x128xbf16>, vector<64x128xf32> -> vector<64x128xf32>
    %7 = arith.addf %0, %6 : vector<64x128xf32>
    %c0_9 = arith.constant 0 : index
    %c0_10 = arith.constant 0 : index
    %c0_11 = arith.constant 0 : index
    %c0_12 = arith.constant 0 : index
    %c1 = arith.constant 1 : index
    %c0_13 = arith.constant 0 : index
    %8 = vector.load %arg3[%c0_9, %c0_10, %c0_11, %c0_12, %c1, %c0_13] : memref<1x1x1x10x10x128xbf16, #tpu.memory_space<vmem>>, vector<1x1x1x8x8x128xbf16>
    %9 = vector.shape_cast %8 : vector<1x1x1x8x8x128xbf16> to vector<8x8x128xbf16>
    %10 = vector.shape_cast %9 : vector<8x8x128xbf16> to vector<64x128xbf16>
    %c1_14 = arith.constant 1 : index
    %c0_15 = arith.constant 0 : index
    %c0_16 = arith.constant 0 : index
    %11 = vector.load %arg4[%c1_14, %c0_15, %c0_16] : memref<9x128x128xbf16, #tpu.memory_space<vmem>>, vector<1x128x128xbf16>
    %12 = vector.shape_cast %11 : vector<1x128x128xbf16> to vector<128x128xbf16>
    %cst_17 = arith.constant dense<0.000000e+00> : vector<64x128xf32>
    %13 = tpu.matmul %10, %12, %cst_17 {dimension_numbers = #tpu.dot_dimension_numbers<[1], [0], [0], [1], [0, 0, 1, 1], [], []>} : vector<64x128xbf16>, vector<128x128xbf16>, vector<64x128xf32> -> vector<64x128xf32>
    %14 = arith.addf %7, %13 : vector<64x128xf32>
    %c0_18 = arith.constant 0 : index
    %c0_19 = arith.constant 0 : index
    %c0_20 = arith.constant 0 : index
    %c0_21 = arith.constant 0 : index
    %c2 = arith.constant 2 : index
    %c0_22 = arith.constant 0 : index
    %15 = vector.load %arg3[%c0_18, %c0_19, %c0_20, %c0_21, %c2, %c0_22] : memref<1x1x1x10x10x128xbf16, #tpu.memory_space<vmem>>, vector<1x1x1x8x8x128xbf16>
    %16 = vector.shape_cast %15 : vector<1x1x1x8x8x128xbf16> to vector<8x8x128xbf16>
    %17 = vector.shape_cast %16 : vector<8x8x128xbf16> to vector<64x128xbf16>
    %c2_23 = arith.constant 2 : index
    %c0_24 = arith.constant 0 : index
    %c0_25 = arith.constant 0 : index
    %18 = vector.load %arg4[%c2_23, %c0_24, %c0_25] : memref<9x128x128xbf16, #tpu.memory_space<vmem>>, vector<1x128x128xbf16>
    %19 = vector.shape_cast %18 : vector<1x128x128xbf16> to vector<128x128xbf16>
    %cst_26 = arith.constant dense<0.000000e+00> : vector<64x128xf32>
    %20 = tpu.matmul %17, %19, %cst_26 {dimension_numbers = #tpu.dot_dimension_numbers<[1], [0], [0], [1], [0, 0, 1, 1], [], []>} : vector<64x128xbf16>, vector<128x128xbf16>, vector<64x128xf32> -> vector<64x128xf32>
    %21 = arith.addf %14, %20 : vector<64x128xf32>
    %c0_27 = arith.constant 0 : index
    %c0_28 = arith.constant 0 : index
    %c0_29 = arith.constant 0 : index
    %c1_30 = arith.constant 1 : index
    %c0_31 = arith.constant 0 : index
    %c0_32 = arith.constant 0 : index
    %22 = vector.load %arg3[%c0_27, %c0_28, %c0_29, %c1_30, %c0_31, %c0_32] : memref<1x1x1x10x10x128xbf16, #tpu.memory_space<vmem>>, vector<1x1x1x8x8x128xbf16>
    %23 = vector.shape_cast %22 : vector<1x1x1x8x8x128xbf16> to vector<8x8x128xbf16>
    %24 = vector.shape_cast %23 : vector<8x8x128xbf16> to vector<64x128xbf16>
    %c3 = arith.constant 3 : index
    %c0_33 = arith.constant 0 : index
    %c0_34 = arith.constant 0 : index
    %25 = vector.load %arg4[%c3, %c0_33, %c0_34] : memref<9x128x128xbf16, #tpu.memory_space<vmem>>, vector<1x128x128xbf16>
    %26 = vector.shape_cast %25 : vector<1x128x128xbf16> to vector<128x128xbf16>
    %cst_35 = arith.constant dense<0.000000e+00> : vector<64x128xf32>
    %27 = tpu.matmul %24, %26, %cst_35 {dimension_numbers = #tpu.dot_dimension_numbers<[1], [0], [0], [1], [0, 0, 1, 1], [], []>} : vector<64x128xbf16>, vector<128x128xbf16>, vector<64x128xf32> -> vector<64x128xf32>
    %28 = arith.addf %21, %27 : vector<64x128xf32>
    %c0_36 = arith.constant 0 : index
    %c0_37 = arith.constant 0 : index
    %c0_38 = arith.constant 0 : index
    %c1_39 = arith.constant 1 : index
    %c1_40 = arith.constant 1 : index
    %c0_41 = arith.constant 0 : index
    %29 = vector.load %arg3[%c0_36, %c0_37, %c0_38, %c1_39, %c1_40, %c0_41] : memref<1x1x1x10x10x128xbf16, #tpu.memory_space<vmem>>, vector<1x1x1x8x8x128xbf16>
    %30 = vector.shape_cast %29 : vector<1x1x1x8x8x128xbf16> to vector<8x8x128xbf16>
    %31 = vector.shape_cast %30 : vector<8x8x128xbf16> to vector<64x128xbf16>
    %c4 = arith.constant 4 : index
    %c0_42 = arith.constant 0 : index
    %c0_43 = arith.constant 0 : index
    %32 = vector.load %arg4[%c4, %c0_42, %c0_43] : memref<9x128x128xbf16, #tpu.memory_space<vmem>>, vector<1x128x128xbf16>
    %33 = vector.shape_cast %32 : vector<1x128x128xbf16> to vector<128x128xbf16>
    %cst_44 = arith.constant dense<0.000000e+00> : vector<64x128xf32>
    %34 = tpu.matmul %31, %33, %cst_44 {dimension_numbers = #tpu.dot_dimension_numbers<[1], [0], [0], [1], [0, 0, 1, 1], [], []>} : vector<64x128xbf16>, vector<128x128xbf16>, vector<64x128xf32> -> vector<64x128xf32>
    %35 = arith.addf %28, %34 : vector<64x128xf32>
    %c0_45 = arith.constant 0 : index
    %c0_46 = arith.constant 0 : index
    %c0_47 = arith.constant 0 : index
    %c1_48 = arith.constant 1 : index
    %c2_49 = arith.constant 2 : index
    %c0_50 = arith.constant 0 : index
    %36 = vector.load %arg3[%c0_45, %c0_46, %c0_47, %c1_48, %c2_49, %c0_50] : memref<1x1x1x10x10x128xbf16, #tpu.memory_space<vmem>>, vector<1x1x1x8x8x128xbf16>
    %37 = vector.shape_cast %36 : vector<1x1x1x8x8x128xbf16> to vector<8x8x128xbf16>
    %38 = vector.shape_cast %37 : vector<8x8x128xbf16> to vector<64x128xbf16>
    %c5 = arith.constant 5 : index
    %c0_51 = arith.constant 0 : index
    %c0_52 = arith.constant 0 : index
    %39 = vector.load %arg4[%c5, %c0_51, %c0_52] : memref<9x128x128xbf16, #tpu.memory_space<vmem>>, vector<1x128x128xbf16>
    %40 = vector.shape_cast %39 : vector<1x128x128xbf16> to vector<128x128xbf16>
    %cst_53 = arith.constant dense<0.000000e+00> : vector<64x128xf32>
    %41 = tpu.matmul %38, %40, %cst_53 {dimension_numbers = #tpu.dot_dimension_numbers<[1], [0], [0], [1], [0, 0, 1, 1], [], []>} : vector<64x128xbf16>, vector<128x128xbf16>, vector<64x128xf32> -> vector<64x128xf32>
    %42 = arith.addf %35, %41 : vector<64x128xf32>
    %c0_54 = arith.constant 0 : index
    %c0_55 = arith.constant 0 : index
    %c0_56 = arith.constant 0 : index
    %c2_57 = arith.constant 2 : index
    %c0_58 = arith.constant 0 : index
    %c0_59 = arith.constant 0 : index
    %43 = vector.load %arg3[%c0_54, %c0_55, %c0_56, %c2_57, %c0_58, %c0_59] : memref<1x1x1x10x10x128xbf16, #tpu.memory_space<vmem>>, vector<1x1x1x8x8x128xbf16>
    %44 = vector.shape_cast %43 : vector<1x1x1x8x8x128xbf16> to vector<8x8x128xbf16>
    %45 = vector.shape_cast %44 : vector<8x8x128xbf16> to vector<64x128xbf16>
    %c6 = arith.constant 6 : index
    %c0_60 = arith.constant 0 : index
    %c0_61 = arith.constant 0 : index
    %46 = vector.load %arg4[%c6, %c0_60, %c0_61] : memref<9x128x128xbf16, #tpu.memory_space<vmem>>, vector<1x128x128xbf16>
    %47 = vector.shape_cast %46 : vector<1x128x128xbf16> to vector<128x128xbf16>
    %cst_62 = arith.constant dense<0.000000e+00> : vector<64x128xf32>
    %48 = tpu.matmul %45, %47, %cst_62 {dimension_numbers = #tpu.dot_dimension_numbers<[1], [0], [0], [1], [0, 0, 1, 1], [], []>} : vector<64x128xbf16>, vector<128x128xbf16>, vector<64x128xf32> -> vector<64x128xf32>
    %49 = arith.addf %42, %48 : vector<64x128xf32>
    %c0_63 = arith.constant 0 : index
    %c0_64 = arith.constant 0 : index
    %c0_65 = arith.constant 0 : index
    %c2_66 = arith.constant 2 : index
    %c1_67 = arith.constant 1 : index
    %c0_68 = arith.constant 0 : index
    %50 = vector.load %arg3[%c0_63, %c0_64, %c0_65, %c2_66, %c1_67, %c0_68] : memref<1x1x1x10x10x128xbf16, #tpu.memory_space<vmem>>, vector<1x1x1x8x8x128xbf16>
    %51 = vector.shape_cast %50 : vector<1x1x1x8x8x128xbf16> to vector<8x8x128xbf16>
    %52 = vector.shape_cast %51 : vector<8x8x128xbf16> to vector<64x128xbf16>
    %c7 = arith.constant 7 : index
    %c0_69 = arith.constant 0 : index
    %c0_70 = arith.constant 0 : index
    %53 = vector.load %arg4[%c7, %c0_69, %c0_70] : memref<9x128x128xbf16, #tpu.memory_space<vmem>>, vector<1x128x128xbf16>
    %54 = vector.shape_cast %53 : vector<1x128x128xbf16> to vector<128x128xbf16>
    %cst_71 = arith.constant dense<0.000000e+00> : vector<64x128xf32>
    %55 = tpu.matmul %52, %54, %cst_71 {dimension_numbers = #tpu.dot_dimension_numbers<[1], [0], [0], [1], [0, 0, 1, 1], [], []>} : vector<64x128xbf16>, vector<128x128xbf16>, vector<64x128xf32> -> vector<64x128xf32>
    %56 = arith.addf %49, %55 : vector<64x128xf32>
    %c0_72 = arith.constant 0 : index
    %c0_73 = arith.constant 0 : index
    %c0_74 = arith.constant 0 : index
    %c2_75 = arith.constant 2 : index
    %c2_76 = arith.constant 2 : index
    %c0_77 = arith.constant 0 : index
    %57 = vector.load %arg3[%c0_72, %c0_73, %c0_74, %c2_75, %c2_76, %c0_77] : memref<1x1x1x10x10x128xbf16, #tpu.memory_space<vmem>>, vector<1x1x1x8x8x128xbf16>
    %58 = vector.shape_cast %57 : vector<1x1x1x8x8x128xbf16> to vector<8x8x128xbf16>
    %59 = vector.shape_cast %58 : vector<8x8x128xbf16> to vector<64x128xbf16>
    %c8 = arith.constant 8 : index
    %c0_78 = arith.constant 0 : index
    %c0_79 = arith.constant 0 : index
    %60 = vector.load %arg4[%c8, %c0_78, %c0_79] : memref<9x128x128xbf16, #tpu.memory_space<vmem>>, vector<1x128x128xbf16>
    %61 = vector.shape_cast %60 : vector<1x128x128xbf16> to vector<128x128xbf16>
    %cst_80 = arith.constant dense<0.000000e+00> : vector<64x128xf32>
    %62 = tpu.matmul %59, %61, %cst_80 {dimension_numbers = #tpu.dot_dimension_numbers<[1], [0], [0], [1], [0, 0, 1, 1], [], []>} : vector<64x128xbf16>, vector<128x128xbf16>, vector<64x128xf32> -> vector<64x128xf32>
    %63 = arith.addf %56, %62 : vector<64x128xf32>
    %c0_81 = arith.constant 0 : index
    %c0_82 = arith.constant 0 : index
    %64 = vector.load %arg5[%c0_81, %c0_82] : memref<1x128xf32, #tpu.memory_space<vmem>>, vector<1x128xf32>
    %65 = vector.broadcast %64 : vector<1x128xf32> to vector<64x128xf32>
    %66 = arith.addf %63, %65 : vector<64x128xf32>
    %67 = arith.negf %66 : vector<64x128xf32>
    %68 = math.exp %67 : vector<64x128xf32>
    %cst_83 = arith.constant 1.000000e+00 : f32
    %69 = vector.broadcast %cst_83 : f32 to vector<64x128xf32>
    %70 = arith.addf %69, %68 : vector<64x128xf32>
    %71 = arith.divf %69, %70 : vector<64x128xf32>
    %72 = arith.mulf %66, %71 : vector<64x128xf32>
    %73 = vector.shape_cast %72 : vector<64x128xf32> to vector<8x8x128xf32>
    %74 = arith.truncf %73 : vector<8x8x128xf32> to vector<8x8x128xbf16>
    %c0_84 = arith.constant 0 : index
    %c0_85 = arith.constant 0 : index
    %c0_86 = arith.constant 0 : index
    %c0_87 = arith.constant 0 : index
    %75 = vector.load %arg6[%c0_84, %c0_85, %c0_86, %c0_87] : memref<1x8x8x128xbf16, #tpu.memory_space<vmem>>, vector<1x8x8x128xbf16>
    %76 = vector.shape_cast %75 : vector<1x8x8x128xbf16> to vector<8x8x128xbf16>
    %77 = vector.shape_cast %74 : vector<8x8x128xbf16> to vector<1x8x8x128xbf16>
    tpu.vector_store %arg6[%c0_84, %c0_85, %c0_86, %c0_87], %77 {strides = array<i32>} : memref<1x8x8x128xbf16, #tpu.memory_space<vmem>>, vector<1x8x8x128xbf16>,
    return
  }
  func.func @transform_0(%arg0: i32, %arg1: i32, %arg2: i32) -> (i32, i32, i32, i32, i32, i32) {
    %c0_i32 = arith.constant 0 : i32
    %c0_i32_0 = arith.constant 0 : i32
    %c0_i32_1 = arith.constant 0 : i32
    %c0_i32_2 = arith.constant 0 : i32
    %c0_i32_3 = arith.constant 0 : i32
    return %c0_i32, %arg0, %arg1, %c0_i32_0, %c0_i32_1, %c0_i32_2 : i32, i32, i32, i32, i32, i32
  }
  func.func @transform_1(%arg0: i32, %arg1: i32, %arg2: i32) -> (i32, i32, i32) {
    %c0_i32 = arith.constant 0 : i32
    %c0_i32_0 = arith.constant 0 : i32
    %c0_i32_1 = arith.constant 0 : i32
    return %c0_i32, %c0_i32_0, %arg2 : i32, i32, i32
  }
  func.func @transform_2(%arg0: i32, %arg1: i32, %arg2: i32) -> (i32, i32) {
    %c0_i32 = arith.constant 0 : i32
    %c0_i32_0 = arith.constant 0 : i32
    return %c0_i32, %arg2 : i32, i32
  }
  func.func @transform_3(%arg0: i32, %arg1: i32, %arg2: i32) -> (i32, i32, i32, i32) {
    %c0_i32 = arith.constant 0 : i32
    %c0_i32_0 = arith.constant 0 : i32
    return %arg0, %arg1, %c0_i32, %arg2 : i32, i32, i32, i32
  }
}

module attributes {stable_mosaic.version = 11 : i64} {
  func.func @_mm_kernel(%arg0: i32, %arg1: i32, %arg2: i32, %arg3: memref<1x128x128xbf16, #tpu.memory_space<vmem>>, %arg4: memref<128x128xbf16, #tpu.memory_space<vmem>>, %arg5: memref<1x128xf32, #tpu.memory_space<vmem>>, %arg6: memref<1x128x128xbf16, #tpu.memory_space<vmem>>, %arg7: memref<1x128x128xbf16, #tpu.memory_space<vmem>>, %arg8: memref<128x128xf32, #tpu.memory_space<vmem>>) attributes {dimension_semantics = [#tpu.dimension_semantics<parallel>, #tpu.dimension_semantics<parallel>, #tpu.dimension_semantics<arbitrary>], iteration_bounds = array<i64: 1, 1, 1>, scalar_prefetch = 0 : i64, scratch_operands = 1 : i64, tpu.core_type = #tpu.core_type<tc>, window_params = [{transform_indices = @transform_0, window_bounds = array<i64: 1, 128, 128>}, {transform_indices = @transform_1, window_bounds = array<i64: 128, 128>}, {transform_indices = @transform_2, window_bounds = array<i64: 1, 128>}, {transform_indices = @transform_3, window_bounds = array<i64: 1, 128, 128>}, {transform_indices = @transform_4, window_bounds = array<i64: 1, 128, 128>}]} {
    %c0_i32 = arith.constant 0 : i32
    %0 = arith.cmpi eq, %arg2, %c0_i32 : i32
    %1 = arith.extui %0 : i1 to i32
    %c0_i32_0 = arith.constant 0 : i32
    %2 = arith.cmpi ne, %1, %c0_i32_0 : i32
    scf.if %2 {
      %cst_11 = arith.constant 0.000000e+00 : f32
      %13 = vector.broadcast %cst_11 : f32 to vector<128x128xf32>
      %c0_12 = arith.constant 0 : index
      %c0_13 = arith.constant 0 : index
      %14 = vector.load %arg8[%c0_12, %c0_13] : memref<128x128xf32, #tpu.memory_space<vmem>>, vector<128x128xf32>
      tpu.vector_store %arg8[%c0_12, %c0_13], %13 {strides = array<i32>} : memref<128x128xf32, #tpu.memory_space<vmem>>, vector<128x128xf32>,
    } else {
    }
    %c0 = arith.constant 0 : index
    %c0_1 = arith.constant 0 : index
    %c0_2 = arith.constant 0 : index
    %3 = vector.load %arg3[%c0, %c0_1, %c0_2] : memref<1x128x128xbf16, #tpu.memory_space<vmem>>, vector<1x128x128xbf16>
    %4 = vector.shape_cast %3 : vector<1x128x128xbf16> to vector<128x128xbf16>
    %c0_3 = arith.constant 0 : index
    %c0_4 = arith.constant 0 : index
    %5 = vector.load %arg8[%c0_3, %c0_4] : memref<128x128xf32, #tpu.memory_space<vmem>>, vector<128x128xf32>
    %c0_5 = arith.constant 0 : index
    %c0_6 = arith.constant 0 : index
    %6 = vector.load %arg4[%c0_5, %c0_6] : memref<128x128xbf16, #tpu.memory_space<vmem>>, vector<128x128xbf16>
    %cst = arith.constant dense<0.000000e+00> : vector<128x128xf32>
    %7 = tpu.matmul %4, %6, %cst {dimension_numbers = #tpu.dot_dimension_numbers<[1], [0], [0], [1], [0, 0, 1, 1], [], []>} : vector<128x128xbf16>, vector<128x128xbf16>, vector<128x128xf32> -> vector<128x128xf32>
    %8 = arith.addf %5, %7 : vector<128x128xf32>
    %c0_7 = arith.constant 0 : index
    %c0_8 = arith.constant 0 : index
    %9 = vector.load %arg8[%c0_7, %c0_8] : memref<128x128xf32, #tpu.memory_space<vmem>>, vector<128x128xf32>
    tpu.vector_store %arg8[%c0_7, %c0_8], %8 {strides = array<i32>} : memref<128x128xf32, #tpu.memory_space<vmem>>, vector<128x128xf32>,
    %c0_i32_9 = arith.constant 0 : i32
    %10 = arith.cmpi eq, %arg2, %c0_i32_9 : i32
    %11 = arith.extui %10 : i1 to i32
    %c0_i32_10 = arith.constant 0 : i32
    %12 = arith.cmpi ne, %11, %c0_i32_10 : i32
    scf.if %12 {
      %c0_11 = arith.constant 0 : index
      %c0_12 = arith.constant 0 : index
      %13 = vector.load %arg8[%c0_11, %c0_12] : memref<128x128xf32, #tpu.memory_space<vmem>>, vector<128x128xf32>
      %c0_13 = arith.constant 0 : index
      %c0_14 = arith.constant 0 : index
      %14 = vector.load %arg5[%c0_13, %c0_14] : memref<1x128xf32, #tpu.memory_space<vmem>>, vector<1x128xf32>
      %15 = vector.broadcast %14 : vector<1x128xf32> to vector<128x128xf32>
      %16 = arith.addf %13, %15 : vector<128x128xf32>
      %c0_15 = arith.constant 0 : index
      %c0_16 = arith.constant 0 : index
      %c0_17 = arith.constant 0 : index
      %17 = vector.load %arg6[%c0_15, %c0_16, %c0_17] : memref<1x128x128xbf16, #tpu.memory_space<vmem>>, vector<1x128x128xbf16>
      %18 = vector.shape_cast %17 : vector<1x128x128xbf16> to vector<128x128xbf16>
      %19 = arith.extf %18 : vector<128x128xbf16> to vector<128x128xf32>
      %20 = arith.addf %16, %19 : vector<128x128xf32>
      %21 = arith.truncf %20 : vector<128x128xf32> to vector<128x128xbf16>
      %c0_18 = arith.constant 0 : index
      %c0_19 = arith.constant 0 : index
      %c0_20 = arith.constant 0 : index
      %22 = vector.load %arg7[%c0_18, %c0_19, %c0_20] : memref<1x128x128xbf16, #tpu.memory_space<vmem>>, vector<1x128x128xbf16>
      %23 = vector.shape_cast %22 : vector<1x128x128xbf16> to vector<128x128xbf16>
      %24 = vector.shape_cast %21 : vector<128x128xbf16> to vector<1x128x128xbf16>
      tpu.vector_store %arg7[%c0_18, %c0_19, %c0_20], %24 {strides = array<i32>} : memref<1x128x128xbf16, #tpu.memory_space<vmem>>, vector<1x128x128xbf16>,
    } else {
    }
    return
  }
  func.func @transform_0(%arg0: i32, %arg1: i32, %arg2: i32) -> (i32, i32, i32) {
    %c0_i32 = arith.constant 0 : i32
    %c0_i32_0 = arith.constant 0 : i32
    return %c0_i32, %arg0, %arg2 : i32, i32, i32
  }
  func.func @transform_1(%arg0: i32, %arg1: i32, %arg2: i32) -> (i32, i32) {
    %c0_i32 = arith.constant 0 : i32
    return %arg2, %arg1 : i32, i32
  }
  func.func @transform_2(%arg0: i32, %arg1: i32, %arg2: i32) -> (i32, i32) {
    %c0_i32 = arith.constant 0 : i32
    %c0_i32_0 = arith.constant 0 : i32
    return %c0_i32, %arg1 : i32, i32
  }
  func.func @transform_3(%arg0: i32, %arg1: i32, %arg2: i32) -> (i32, i32, i32) {
    %c0_i32 = arith.constant 0 : i32
    %c0_i32_0 = arith.constant 0 : i32
    return %c0_i32, %arg0, %arg1 : i32, i32, i32
  }
  func.func @transform_4(%arg0: i32, %arg1: i32, %arg2: i32) -> (i32, i32, i32) {
    %c0_i32 = arith.constant 0 : i32
    %c0_i32_0 = arith.constant 0 : i32
    return %c0_i32, %arg0, %arg1 : i32, i32, i32
  }
}

module attributes {stable_mosaic.version = 11 : i64} {
  func.func @_mm_kernel(%arg0: i32, %arg1: i32, %arg2: i32, %arg3: memref<1x128x128xbf16, #tpu.memory_space<vmem>>, %arg4: memref<128x128xbf16, #tpu.memory_space<vmem>>, %arg5: memref<1x128xf32, #tpu.memory_space<vmem>>, %arg6: memref<1x128x128xbf16, #tpu.memory_space<vmem>>, %arg7: memref<128x128xf32, #tpu.memory_space<vmem>>) attributes {dimension_semantics = [#tpu.dimension_semantics<parallel>, #tpu.dimension_semantics<parallel>, #tpu.dimension_semantics<arbitrary>], iteration_bounds = array<i64: 1, 1, 1>, scalar_prefetch = 0 : i64, scratch_operands = 1 : i64, tpu.core_type = #tpu.core_type<tc>, window_params = [{transform_indices = @transform_0, window_bounds = array<i64: 1, 128, 128>}, {transform_indices = @transform_1, window_bounds = array<i64: 128, 128>}, {transform_indices = @transform_2, window_bounds = array<i64: 1, 128>}, {transform_indices = @transform_3, window_bounds = array<i64: 1, 128, 128>}]} {
    %c0_i32 = arith.constant 0 : i32
    %0 = arith.cmpi eq, %arg2, %c0_i32 : i32
    %1 = arith.extui %0 : i1 to i32
    %c0_i32_0 = arith.constant 0 : i32
    %2 = arith.cmpi ne, %1, %c0_i32_0 : i32
    scf.if %2 {
      %cst_11 = arith.constant 0.000000e+00 : f32
      %13 = vector.broadcast %cst_11 : f32 to vector<128x128xf32>
      %c0_12 = arith.constant 0 : index
      %c0_13 = arith.constant 0 : index
      %14 = vector.load %arg7[%c0_12, %c0_13] : memref<128x128xf32, #tpu.memory_space<vmem>>, vector<128x128xf32>
      tpu.vector_store %arg7[%c0_12, %c0_13], %13 {strides = array<i32>} : memref<128x128xf32, #tpu.memory_space<vmem>>, vector<128x128xf32>,
    } else {
    }
    %c0 = arith.constant 0 : index
    %c0_1 = arith.constant 0 : index
    %c0_2 = arith.constant 0 : index
    %3 = vector.load %arg3[%c0, %c0_1, %c0_2] : memref<1x128x128xbf16, #tpu.memory_space<vmem>>, vector<1x128x128xbf16>
    %4 = vector.shape_cast %3 : vector<1x128x128xbf16> to vector<128x128xbf16>
    %c0_3 = arith.constant 0 : index
    %c0_4 = arith.constant 0 : index
    %5 = vector.load %arg7[%c0_3, %c0_4] : memref<128x128xf32, #tpu.memory_space<vmem>>, vector<128x128xf32>
    %c0_5 = arith.constant 0 : index
    %c0_6 = arith.constant 0 : index
    %6 = vector.load %arg4[%c0_5, %c0_6] : memref<128x128xbf16, #tpu.memory_space<vmem>>, vector<128x128xbf16>
    %cst = arith.constant dense<0.000000e+00> : vector<128x128xf32>
    %7 = tpu.matmul %4, %6, %cst {dimension_numbers = #tpu.dot_dimension_numbers<[1], [0], [0], [1], [0, 0, 1, 1], [], []>} : vector<128x128xbf16>, vector<128x128xbf16>, vector<128x128xf32> -> vector<128x128xf32>
    %8 = arith.addf %5, %7 : vector<128x128xf32>
    %c0_7 = arith.constant 0 : index
    %c0_8 = arith.constant 0 : index
    %9 = vector.load %arg7[%c0_7, %c0_8] : memref<128x128xf32, #tpu.memory_space<vmem>>, vector<128x128xf32>
    tpu.vector_store %arg7[%c0_7, %c0_8], %8 {strides = array<i32>} : memref<128x128xf32, #tpu.memory_space<vmem>>, vector<128x128xf32>,
    %c0_i32_9 = arith.constant 0 : i32
    %10 = arith.cmpi eq, %arg2, %c0_i32_9 : i32
    %11 = arith.extui %10 : i1 to i32
    %c0_i32_10 = arith.constant 0 : i32
    %12 = arith.cmpi ne, %11, %c0_i32_10 : i32
    scf.if %12 {
      %c0_11 = arith.constant 0 : index
      %c0_12 = arith.constant 0 : index
      %13 = vector.load %arg7[%c0_11, %c0_12] : memref<128x128xf32, #tpu.memory_space<vmem>>, vector<128x128xf32>
      %c0_13 = arith.constant 0 : index
      %c0_14 = arith.constant 0 : index
      %14 = vector.load %arg5[%c0_13, %c0_14] : memref<1x128xf32, #tpu.memory_space<vmem>>, vector<1x128xf32>
      %15 = vector.broadcast %14 : vector<1x128xf32> to vector<128x128xf32>
      %16 = arith.addf %13, %15 : vector<128x128xf32>
      %17 = arith.negf %16 : vector<128x128xf32>
      %18 = math.exp %17 : vector<128x128xf32>
      %cst_15 = arith.constant 1.000000e+00 : f32
      %19 = vector.broadcast %cst_15 : f32 to vector<128x128xf32>
      %20 = arith.addf %19, %18 : vector<128x128xf32>
      %21 = arith.divf %19, %20 : vector<128x128xf32>
      %22 = arith.mulf %16, %21 : vector<128x128xf32>
      %23 = arith.truncf %22 : vector<128x128xf32> to vector<128x128xbf16>
      %c0_16 = arith.constant 0 : index
      %c0_17 = arith.constant 0 : index
      %c0_18 = arith.constant 0 : index
      %24 = vector.load %arg6[%c0_16, %c0_17, %c0_18] : memref<1x128x128xbf16, #tpu.memory_space<vmem>>, vector<1x128x128xbf16>
      %25 = vector.shape_cast %24 : vector<1x128x128xbf16> to vector<128x128xbf16>
      %26 = vector.shape_cast %23 : vector<128x128xbf16> to vector<1x128x128xbf16>
      tpu.vector_store %arg6[%c0_16, %c0_17, %c0_18], %26 {strides = array<i32>} : memref<1x128x128xbf16, #tpu.memory_space<vmem>>, vector<1x128x128xbf16>,
    } else {
    }
    return
  }
  func.func @transform_0(%arg0: i32, %arg1: i32, %arg2: i32) -> (i32, i32, i32) {
    %c0_i32 = arith.constant 0 : i32
    %c0_i32_0 = arith.constant 0 : i32
    return %c0_i32, %arg0, %arg2 : i32, i32, i32
  }
  func.func @transform_1(%arg0: i32, %arg1: i32, %arg2: i32) -> (i32, i32) {
    %c0_i32 = arith.constant 0 : i32
    return %arg2, %arg1 : i32, i32
  }
  func.func @transform_2(%arg0: i32, %arg1: i32, %arg2: i32) -> (i32, i32) {
    %c0_i32 = arith.constant 0 : i32
    %c0_i32_0 = arith.constant 0 : i32
    return %c0_i32, %arg1 : i32, i32
  }
  func.func @transform_3(%arg0: i32, %arg1: i32, %arg2: i32) -> (i32, i32, i32) {
    %c0_i32 = arith.constant 0 : i32
    %c0_i32_0 = arith.constant 0 : i32
    return %c0_i32, %arg0, %arg1 : i32, i32, i32
  }
}

module attributes {stable_mosaic.version = 11 : i64} {
  func.func @_dwconv3_bn_silu_kernel(%arg0: i32, %arg1: i32, %arg2: i32, %arg3: memref<4x1x1x5x5x128xbf16, #tpu.memory_space<vmem>>, %arg4: memref<9x128xf32, #tpu.memory_space<vmem>>, %arg5: memref<1x128xf32, #tpu.memory_space<vmem>>, %arg6: memref<1x4x4x128xbf16, #tpu.memory_space<vmem>>, %arg7: memref<1x1x8x128xf32, #tpu.memory_space<vmem>>) attributes {dimension_semantics = [#tpu.dimension_semantics<parallel>, #tpu.dimension_semantics<parallel>, #tpu.dimension_semantics<parallel>], iteration_bounds = array<i64: 2, 1, 1>, scalar_prefetch = 0 : i64, scratch_operands = 0 : i64, tpu.core_type = #tpu.core_type<tc>, window_params = [{transform_indices = @transform_0, window_bounds = array<i64: 4, 1, 1, 5, 5, 128>}, {transform_indices = @transform_1, window_bounds = array<i64: 9, 128>}, {transform_indices = @transform_2, window_bounds = array<i64: 1, 128>}, {transform_indices = @transform_3, window_bounds = array<i64: 1, 4, 4, 128>}, {transform_indices = @transform_4, window_bounds = array<i64: 1, 1, 8, 128>}]} {
    %c0 = arith.constant 0 : index
    %c0_0 = arith.constant 0 : index
    %0 = vector.load %arg4[%c0, %c0_0] : memref<9x128xf32, #tpu.memory_space<vmem>>, vector<9x128xf32>
    %cst = arith.constant 0.000000e+00 : f32
    %1 = vector.broadcast %cst : f32 to vector<4x4x128xf32>
    %c0_1 = arith.constant 0 : index
    %c0_2 = arith.constant 0 : index
    %c0_3 = arith.constant 0 : index
    %c0_4 = arith.constant 0 : index
    %c0_5 = arith.constant 0 : index
    %c0_6 = arith.constant 0 : index
    %2 = vector.load %arg3[%c0_1, %c0_2, %c0_3, %c0_4, %c0_5, %c0_6] : memref<4x1x1x5x5x128xbf16, #tpu.memory_space<vmem>>, vector<1x1x1x4x4x128xbf16>
    %3 = vector.shape_cast %2 : vector<1x1x1x4x4x128xbf16> to vector<4x4x128xbf16>
    %4 = arith.extf %3 : vector<4x4x128xbf16> to vector<4x4x128xf32>
    %5 = vector.extract_strided_slice %0 {offsets = [0, 0], sizes = [1, 128], strides = [1, 1]} : vector<9x128xf32> to vector<1x128xf32>
    %6 = vector.shape_cast %5 : vector<1x128xf32> to vector<128xf32>
    %7 = vector.shape_cast %6 : vector<128xf32> to vector<1x1x128xf32>
    %8 = vector.broadcast %7 : vector<1x1x128xf32> to vector<4x4x128xf32>
    %9 = arith.mulf %4, %8 : vector<4x4x128xf32>
    %10 = arith.addf %1, %9 : vector<4x4x128xf32>
    %c1 = arith.constant 1 : index
    %c0_7 = arith.constant 0 : index
    %c0_8 = arith.constant 0 : index
    %c0_9 = arith.constant 0 : index
    %c0_10 = arith.constant 0 : index
    %c0_11 = arith.constant 0 : index
    %11 = vector.load %arg3[%c1, %c0_7, %c0_8, %c0_9, %c0_10, %c0_11] : memref<4x1x1x5x5x128xbf16, #tpu.memory_space<vmem>>, vector<1x1x1x4x4x128xbf16>
    %12 = vector.shape_cast %11 : vector<1x1x1x4x4x128xbf16> to vector<4x4x128xbf16>
    %13 = arith.extf %12 : vector<4x4x128xbf16> to vector<4x4x128xf32>
    %14 = vector.extract_strided_slice %0 {offsets = [1, 0], sizes = [1, 128], strides = [1, 1]} : vector<9x128xf32> to vector<1x128xf32>
    %15 = vector.shape_cast %14 : vector<1x128xf32> to vector<128xf32>
    %16 = vector.shape_cast %15 : vector<128xf32> to vector<1x1x128xf32>
    %17 = vector.broadcast %16 : vector<1x1x128xf32> to vector<4x4x128xf32>
    %18 = arith.mulf %13, %17 : vector<4x4x128xf32>
    %19 = arith.addf %10, %18 : vector<4x4x128xf32>
    %c0_12 = arith.constant 0 : index
    %c0_13 = arith.constant 0 : index
    %c0_14 = arith.constant 0 : index
    %c0_15 = arith.constant 0 : index
    %c1_16 = arith.constant 1 : index
    %c0_17 = arith.constant 0 : index
    %20 = vector.load %arg3[%c0_12, %c0_13, %c0_14, %c0_15, %c1_16, %c0_17] : memref<4x1x1x5x5x128xbf16, #tpu.memory_space<vmem>>, vector<1x1x1x4x4x128xbf16>
    %21 = vector.shape_cast %20 : vector<1x1x1x4x4x128xbf16> to vector<4x4x128xbf16>
    %22 = arith.extf %21 : vector<4x4x128xbf16> to vector<4x4x128xf32>
    %23 = vector.extract_strided_slice %0 {offsets = [2, 0], sizes = [1, 128], strides = [1, 1]} : vector<9x128xf32> to vector<1x128xf32>
    %24 = vector.shape_cast %23 : vector<1x128xf32> to vector<128xf32>
    %25 = vector.shape_cast %24 : vector<128xf32> to vector<1x1x128xf32>
    %26 = vector.broadcast %25 : vector<1x1x128xf32> to vector<4x4x128xf32>
    %27 = arith.mulf %22, %26 : vector<4x4x128xf32>
    %28 = arith.addf %19, %27 : vector<4x4x128xf32>
    %c2 = arith.constant 2 : index
    %c0_18 = arith.constant 0 : index
    %c0_19 = arith.constant 0 : index
    %c0_20 = arith.constant 0 : index
    %c0_21 = arith.constant 0 : index
    %c0_22 = arith.constant 0 : index
    %29 = vector.load %arg3[%c2, %c0_18, %c0_19, %c0_20, %c0_21, %c0_22] : memref<4x1x1x5x5x128xbf16, #tpu.memory_space<vmem>>, vector<1x1x1x4x4x128xbf16>
    %30 = vector.shape_cast %29 : vector<1x1x1x4x4x128xbf16> to vector<4x4x128xbf16>
    %31 = arith.extf %30 : vector<4x4x128xbf16> to vector<4x4x128xf32>
    %32 = vector.extract_strided_slice %0 {offsets = [3, 0], sizes = [1, 128], strides = [1, 1]} : vector<9x128xf32> to vector<1x128xf32>
    %33 = vector.shape_cast %32 : vector<1x128xf32> to vector<128xf32>
    %34 = vector.shape_cast %33 : vector<128xf32> to vector<1x1x128xf32>
    %35 = vector.broadcast %34 : vector<1x1x128xf32> to vector<4x4x128xf32>
    %36 = arith.mulf %31, %35 : vector<4x4x128xf32>
    %37 = arith.addf %28, %36 : vector<4x4x128xf32>
    %c3 = arith.constant 3 : index
    %c0_23 = arith.constant 0 : index
    %c0_24 = arith.constant 0 : index
    %c0_25 = arith.constant 0 : index
    %c0_26 = arith.constant 0 : index
    %c0_27 = arith.constant 0 : index
    %38 = vector.load %arg3[%c3, %c0_23, %c0_24, %c0_25, %c0_26, %c0_27] : memref<4x1x1x5x5x128xbf16, #tpu.memory_space<vmem>>, vector<1x1x1x4x4x128xbf16>
    %39 = vector.shape_cast %38 : vector<1x1x1x4x4x128xbf16> to vector<4x4x128xbf16>
    %40 = arith.extf %39 : vector<4x4x128xbf16> to vector<4x4x128xf32>
    %41 = vector.extract_strided_slice %0 {offsets = [4, 0], sizes = [1, 128], strides = [1, 1]} : vector<9x128xf32> to vector<1x128xf32>
    %42 = vector.shape_cast %41 : vector<1x128xf32> to vector<128xf32>
    %43 = vector.shape_cast %42 : vector<128xf32> to vector<1x1x128xf32>
    %44 = vector.broadcast %43 : vector<1x1x128xf32> to vector<4x4x128xf32>
    %45 = arith.mulf %40, %44 : vector<4x4x128xf32>
    %46 = arith.addf %37, %45 : vector<4x4x128xf32>
    %c2_28 = arith.constant 2 : index
    %c0_29 = arith.constant 0 : index
    %c0_30 = arith.constant 0 : index
    %c0_31 = arith.constant 0 : index
    %c1_32 = arith.constant 1 : index
    %c0_33 = arith.constant 0 : index
    %47 = vector.load %arg3[%c2_28, %c0_29, %c0_30, %c0_31, %c1_32, %c0_33] : memref<4x1x1x5x5x128xbf16, #tpu.memory_space<vmem>>, vector<1x1x1x4x4x128xbf16>
    %48 = vector.shape_cast %47 : vector<1x1x1x4x4x128xbf16> to vector<4x4x128xbf16>
    %49 = arith.extf %48 : vector<4x4x128xbf16> to vector<4x4x128xf32>
    %50 = vector.extract_strided_slice %0 {offsets = [5, 0], sizes = [1, 128], strides = [1, 1]} : vector<9x128xf32> to vector<1x128xf32>
    %51 = vector.shape_cast %50 : vector<1x128xf32> to vector<128xf32>
    %52 = vector.shape_cast %51 : vector<128xf32> to vector<1x1x128xf32>
    %53 = vector.broadcast %52 : vector<1x1x128xf32> to vector<4x4x128xf32>
    %54 = arith.mulf %49, %53 : vector<4x4x128xf32>
    %55 = arith.addf %46, %54 : vector<4x4x128xf32>
    %c0_34 = arith.constant 0 : index
    %c0_35 = arith.constant 0 : index
    %c0_36 = arith.constant 0 : index
    %c1_37 = arith.constant 1 : index
    %c0_38 = arith.constant 0 : index
    %c0_39 = arith.constant 0 : index
    %56 = vector.load %arg3[%c0_34, %c0_35, %c0_36, %c1_37, %c0_38, %c0_39] : memref<4x1x1x5x5x128xbf16, #tpu.memory_space<vmem>>, vector<1x1x1x4x4x128xbf16>
    %57 = vector.shape_cast %56 : vector<1x1x1x4x4x128xbf16> to vector<4x4x128xbf16>
    %58 = arith.extf %57 : vector<4x4x128xbf16> to vector<4x4x128xf32>
    %59 = vector.extract_strided_slice %0 {offsets = [6, 0], sizes = [1, 128], strides = [1, 1]} : vector<9x128xf32> to vector<1x128xf32>
    %60 = vector.shape_cast %59 : vector<1x128xf32> to vector<128xf32>
    %61 = vector.shape_cast %60 : vector<128xf32> to vector<1x1x128xf32>
    %62 = vector.broadcast %61 : vector<1x1x128xf32> to vector<4x4x128xf32>
    %63 = arith.mulf %58, %62 : vector<4x4x128xf32>
    %64 = arith.addf %55, %63 : vector<4x4x128xf32>
    %c1_40 = arith.constant 1 : index
    %c0_41 = arith.constant 0 : index
    %c0_42 = arith.constant 0 : index
    %c1_43 = arith.constant 1 : index
    %c0_44 = arith.constant 0 : index
    %c0_45 = arith.constant 0 : index
    %65 = vector.load %arg3[%c1_40, %c0_41, %c0_42, %c1_43, %c0_44, %c0_45] : memref<4x1x1x5x5x128xbf16, #tpu.memory_space<vmem>>, vector<1x1x1x4x4x128xbf16>
    %66 = vector.shape_cast %65 : vector<1x1x1x4x4x128xbf16> to vector<4x4x128xbf16>
    %67 = arith.extf %66 : vector<4x4x128xbf16> to vector<4x4x128xf32>
    %68 = vector.extract_strided_slice %0 {offsets = [7, 0], sizes = [1, 128], strides = [1, 1]} : vector<9x128xf32> to vector<1x128xf32>
    %69 = vector.shape_cast %68 : vector<1x128xf32> to vector<128xf32>
    %70 = vector.shape_cast %69 : vector<128xf32> to vector<1x1x128xf32>
    %71 = vector.broadcast %70 : vector<1x1x128xf32> to vector<4x4x128xf32>
    %72 = arith.mulf %67, %71 : vector<4x4x128xf32>
    %73 = arith.addf %64, %72 : vector<4x4x128xf32>
    %c0_46 = arith.constant 0 : index
    %c0_47 = arith.constant 0 : index
    %c0_48 = arith.constant 0 : index
    %c1_49 = arith.constant 1 : index
    %c1_50 = arith.constant 1 : index
    %c0_51 = arith.constant 0 : index
    %74 = vector.load %arg3[%c0_46, %c0_47, %c0_48, %c1_49, %c1_50, %c0_51] : memref<4x1x1x5x5x128xbf16, #tpu.memory_space<vmem>>, vector<1x1x1x4x4x128xbf16>
    %75 = vector.shape_cast %74 : vector<1x1x1x4x4x128xbf16> to vector<4x4x128xbf16>
    %76 = arith.extf %75 : vector<4x4x128xbf16> to vector<4x4x128xf32>
    %77 = vector.extract_strided_slice %0 {offsets = [8, 0], sizes = [1, 128], strides = [1, 1]} : vector<9x128xf32> to vector<1x128xf32>
    %78 = vector.shape_cast %77 : vector<1x128xf32> to vector<128xf32>
    %79 = vector.shape_cast %78 : vector<128xf32> to vector<1x1x128xf32>
    %80 = vector.broadcast %79 : vector<1x1x128xf32> to vector<4x4x128xf32>
    %81 = arith.mulf %76, %80 : vector<4x4x128xf32>
    %82 = arith.addf %73, %81 : vector<4x4x128xf32>
    %c0_52 = arith.constant 0 : index
    %c0_53 = arith.constant 0 : index
    %83 = vector.load %arg5[%c0_52, %c0_53] : memref<1x128xf32, #tpu.memory_space<vmem>>, vector<1x128xf32>
    %84 = vector.shape_cast %83 : vector<1x128xf32> to vector<1x1x128xf32>
    %85 = vector.broadcast %84 : vector<1x1x128xf32> to vector<4x4x128xf32>
    %86 = arith.addf %82, %85 : vector<4x4x128xf32>
    %87 = arith.negf %86 : vector<4x4x128xf32>
    %88 = math.exp %87 : vector<4x4x128xf32>
    %cst_54 = arith.constant 1.000000e+00 : f32
    %89 = vector.broadcast %cst_54 : f32 to vector<4x4x128xf32>
    %90 = arith.addf %89, %88 : vector<4x4x128xf32>
    %91 = arith.divf %89, %90 : vector<4x4x128xf32>
    %92 = arith.mulf %86, %91 : vector<4x4x128xf32>
    %93 = arith.truncf %92 : vector<4x4x128xf32> to vector<4x4x128xbf16>
    %c0_55 = arith.constant 0 : index
    %c0_56 = arith.constant 0 : index
    %c0_57 = arith.constant 0 : index
    %c0_58 = arith.constant 0 : index
    %94 = vector.load %arg6[%c0_55, %c0_56, %c0_57, %c0_58] : memref<1x4x4x128xbf16, #tpu.memory_space<vmem>>, vector<1x4x4x128xbf16>
    %95 = vector.shape_cast %94 : vector<1x4x4x128xbf16> to vector<4x4x128xbf16>
    %96 = vector.shape_cast %93 : vector<4x4x128xbf16> to vector<1x4x4x128xbf16>
    tpu.vector_store %arg6[%c0_55, %c0_56, %c0_57, %c0_58], %96 {strides = array<i32>} : memref<1x4x4x128xbf16, #tpu.memory_space<vmem>>, vector<1x4x4x128xbf16>,
    %cst_59 = arith.constant dense<0.000000e+00> : vector<128xf32>
    %97 = vector.multi_reduction <add>, %92, %cst_59 [0, 1] : vector<4x4x128xf32> to vector<128xf32>
    %98 = vector.shape_cast %97 : vector<128xf32> to vector<1x1x1x128xf32>
    %99 = vector.shape_cast %98 : vector<1x1x1x128xf32> to vector<1x1x1x128xf32>
    %100 = vector.broadcast %99 : vector<1x1x1x128xf32> to vector<1x1x8x128xf32>
    %c0_60 = arith.constant 0 : index
    %c0_61 = arith.constant 0 : index
    %c0_62 = arith.constant 0 : index
    %c0_63 = arith.constant 0 : index
    %101 = vector.load %arg7[%c0_60, %c0_61, %c0_62, %c0_63] : memref<1x1x8x128xf32, #tpu.memory_space<vmem>>, vector<1x1x8x128xf32>
    tpu.vector_store %arg7[%c0_60, %c0_61, %c0_62, %c0_63], %100 {strides = array<i32>} : memref<1x1x8x128xf32, #tpu.memory_space<vmem>>, vector<1x1x8x128xf32>,
    return
  }
  func.func @transform_0(%arg0: i32, %arg1: i32, %arg2: i32) -> (i32, i32, i32, i32, i32, i32) {
    %c0_i32 = arith.constant 0 : i32
    %c0_i32_0 = arith.constant 0 : i32
    %c0_i32_1 = arith.constant 0 : i32
    %c0_i32_2 = arith.constant 0 : i32
    return %c0_i32, %arg0, %arg1, %c0_i32_0, %c0_i32_1, %arg2 : i32, i32, i32, i32, i32, i32
  }
  func.func @transform_1(%arg0: i32, %arg1: i32, %arg2: i32) -> (i32, i32) {
    %c0_i32 = arith.constant 0 : i32
    %c0_i32_0 = arith.constant 0 : i32
    return %c0_i32, %arg2 : i32, i32
  }
  func.func @transform_2(%arg0: i32, %arg1: i32, %arg2: i32) -> (i32, i32) {
    %c0_i32 = arith.constant 0 : i32
    %c0_i32_0 = arith.constant 0 : i32
    return %c0_i32, %arg2 : i32, i32
  }
  func.func @transform_3(%arg0: i32, %arg1: i32, %arg2: i32) -> (i32, i32, i32, i32) {
    %c0_i32 = arith.constant 0 : i32
    %c0_i32_0 = arith.constant 0 : i32
    return %arg0, %arg1, %c0_i32, %arg2 : i32, i32, i32, i32
  }
  func.func @transform_4(%arg0: i32, %arg1: i32, %arg2: i32) -> (i32, i32, i32, i32) {
    %c0_i32 = arith.constant 0 : i32
    %c0_i32_0 = arith.constant 0 : i32
    return %arg0, %arg1, %c0_i32, %arg2 : i32, i32, i32, i32
  }
}

module attributes {stable_mosaic.version = 11 : i64} {
  func.func @_mm_kernel(%arg0: i32, %arg1: i32, %arg2: i32, %arg3: i32, %arg4: memref<1x16x128xbf16, #tpu.memory_space<vmem>>, %arg5: memref<128x128xbf16, #tpu.memory_space<vmem>>, %arg6: memref<1x1x128xbf16, #tpu.memory_space<vmem>>, %arg7: memref<1x128xf32, #tpu.memory_space<vmem>>, %arg8: memref<1x16x128xbf16, #tpu.memory_space<vmem>>, %arg9: memref<16x128xf32, #tpu.memory_space<vmem>>) attributes {dimension_semantics = [#tpu.dimension_semantics<parallel>, #tpu.dimension_semantics<parallel>, #tpu.dimension_semantics<parallel>, #tpu.dimension_semantics<arbitrary>], iteration_bounds = array<i64: 2, 1, 1, 1>, scalar_prefetch = 0 : i64, scratch_operands = 1 : i64, tpu.core_type = #tpu.core_type<tc>, window_params = [{transform_indices = @transform_0, window_bounds = array<i64: 1, 16, 128>}, {transform_indices = @transform_1, window_bounds = array<i64: 128, 128>}, {transform_indices = @transform_2, window_bounds = array<i64: 1, 1, 128>}, {transform_indices = @transform_3, window_bounds = array<i64: 1, 128>}, {transform_indices = @transform_4, window_bounds = array<i64: 1, 16, 128>}]} {
    %c0_i32 = arith.constant 0 : i32
    %0 = arith.cmpi eq, %arg3, %c0_i32 : i32
    %1 = arith.extui %0 : i1 to i32
    %c0_i32_0 = arith.constant 0 : i32
    %2 = arith.cmpi ne, %1, %c0_i32_0 : i32
    scf.if %2 {
      %cst_14 = arith.constant 0.000000e+00 : f32
      %17 = vector.broadcast %cst_14 : f32 to vector<16x128xf32>
      %c0_15 = arith.constant 0 : index
      %c0_16 = arith.constant 0 : index
      %18 = vector.load %arg9[%c0_15, %c0_16] : memref<16x128xf32, #tpu.memory_space<vmem>>, vector<16x128xf32>
      tpu.vector_store %arg9[%c0_15, %c0_16], %17 {strides = array<i32>} : memref<16x128xf32, #tpu.memory_space<vmem>>, vector<16x128xf32>,
    } else {
    }
    %c0 = arith.constant 0 : index
    %c0_1 = arith.constant 0 : index
    %c0_2 = arith.constant 0 : index
    %3 = vector.load %arg4[%c0, %c0_1, %c0_2] : memref<1x16x128xbf16, #tpu.memory_space<vmem>>, vector<1x16x128xbf16>
    %4 = vector.shape_cast %3 : vector<1x16x128xbf16> to vector<16x128xbf16>
    %c0_3 = arith.constant 0 : index
    %c0_4 = arith.constant 0 : index
    %c0_5 = arith.constant 0 : index
    %5 = vector.load %arg6[%c0_3, %c0_4, %c0_5] : memref<1x1x128xbf16, #tpu.memory_space<vmem>>, vector<1x1x128xbf16>
    %6 = vector.shape_cast %5 : vector<1x1x128xbf16> to vector<1x128xbf16>
    %7 = vector.broadcast %6 : vector<1x128xbf16> to vector<16x128xbf16>
    %8 = arith.mulf %4, %7 : vector<16x128xbf16>
    %c0_6 = arith.constant 0 : index
    %c0_7 = arith.constant 0 : index
    %9 = vector.load %arg9[%c0_6, %c0_7] : memref<16x128xf32, #tpu.memory_space<vmem>>, vector<16x128xf32>
    %c0_8 = arith.constant 0 : index
    %c0_9 = arith.constant 0 : index
    %10 = vector.load %arg5[%c0_8, %c0_9] : memref<128x128xbf16, #tpu.memory_space<vmem>>, vector<128x128xbf16>
    %cst = arith.constant dense<0.000000e+00> : vector<16x128xf32>
    %11 = tpu.matmul %8, %10, %cst {dimension_numbers = #tpu.dot_dimension_numbers<[1], [0], [0], [1], [0, 0, 1, 1], [], []>} : vector<16x128xbf16>, vector<128x128xbf16>, vector<16x128xf32> -> vector<16x128xf32>
    %12 = arith.addf %9, %11 : vector<16x128xf32>
    %c0_10 = arith.constant 0 : index
    %c0_11 = arith.constant 0 : index
    %13 = vector.load %arg9[%c0_10, %c0_11] : memref<16x128xf32, #tpu.memory_space<vmem>>, vector<16x128xf32>
    tpu.vector_store %arg9[%c0_10, %c0_11], %12 {strides = array<i32>} : memref<16x128xf32, #tpu.memory_space<vmem>>, vector<16x128xf32>,
    %c0_i32_12 = arith.constant 0 : i32
    %14 = arith.cmpi eq, %arg3, %c0_i32_12 : i32
    %15 = arith.extui %14 : i1 to i32
    %c0_i32_13 = arith.constant 0 : i32
    %16 = arith.cmpi ne, %15, %c0_i32_13 : i32
    scf.if %16 {
      %c0_14 = arith.constant 0 : index
      %c0_15 = arith.constant 0 : index
      %17 = vector.load %arg9[%c0_14, %c0_15] : memref<16x128xf32, #tpu.memory_space<vmem>>, vector<16x128xf32>
      %c0_16 = arith.constant 0 : index
      %c0_17 = arith.constant 0 : index
      %18 = vector.load %arg7[%c0_16, %c0_17] : memref<1x128xf32, #tpu.memory_space<vmem>>, vector<1x128xf32>
      %19 = vector.broadcast %18 : vector<1x128xf32> to vector<16x128xf32>
      %20 = arith.addf %17, %19 : vector<16x128xf32>
      %21 = arith.truncf %20 : vector<16x128xf32> to vector<16x128xbf16>
      %c0_18 = arith.constant 0 : index
      %c0_19 = arith.constant 0 : index
      %c0_20 = arith.constant 0 : index
      %22 = vector.load %arg8[%c0_18, %c0_19, %c0_20] : memref<1x16x128xbf16, #tpu.memory_space<vmem>>, vector<1x16x128xbf16>
      %23 = vector.shape_cast %22 : vector<1x16x128xbf16> to vector<16x128xbf16>
      %24 = vector.shape_cast %21 : vector<16x128xbf16> to vector<1x16x128xbf16>
      tpu.vector_store %arg8[%c0_18, %c0_19, %c0_20], %24 {strides = array<i32>} : memref<1x16x128xbf16, #tpu.memory_space<vmem>>, vector<1x16x128xbf16>,
    } else {
    }
    return
  }
  func.func @transform_0(%arg0: i32, %arg1: i32, %arg2: i32, %arg3: i32) -> (i32, i32, i32) {
    %c0_i32 = arith.constant 0 : i32
    return %arg0, %arg1, %arg3 : i32, i32, i32
  }
  func.func @transform_1(%arg0: i32, %arg1: i32, %arg2: i32, %arg3: i32) -> (i32, i32) {
    %c0_i32 = arith.constant 0 : i32
    return %arg3, %arg2 : i32, i32
  }
  func.func @transform_2(%arg0: i32, %arg1: i32, %arg2: i32, %arg3: i32) -> (i32, i32, i32) {
    %c0_i32 = arith.constant 0 : i32
    %c0_i32_0 = arith.constant 0 : i32
    return %arg0, %c0_i32, %arg3 : i32, i32, i32
  }
  func.func @transform_3(%arg0: i32, %arg1: i32, %arg2: i32, %arg3: i32) -> (i32, i32) {
    %c0_i32 = arith.constant 0 : i32
    %c0_i32_0 = arith.constant 0 : i32
    return %c0_i32, %arg2 : i32, i32
  }
  func.func @transform_4(%arg0: i32, %arg1: i32, %arg2: i32, %arg3: i32) -> (i32, i32, i32) {
    %c0_i32 = arith.constant 0 : i32
    return %arg0, %arg1, %arg2 : i32, i32, i32
  }
}

module attributes {stable_mosaic.version = 11 : i64} {
  func.func @_se_gate_kernel(%arg0: memref<2x1x8x128xf32, #tpu.memory_space<vmem>>, %arg1: memref<128x128xf32, #tpu.memory_space<vmem>>, %arg2: memref<1x128xf32, #tpu.memory_space<vmem>>, %arg3: memref<128x128xf32, #tpu.memory_space<vmem>>, %arg4: memref<1x128xf32, #tpu.memory_space<vmem>>, %arg5: memref<2x128xf32, #tpu.memory_space<vmem>>) attributes {dimension_semantics = [], scalar_prefetch = 0 : i64, scratch_operands = 0 : i64, tpu.core_type = #tpu.core_type<tc>} {
    %c0 = arith.constant 0 : index
    %c0_0 = arith.constant 0 : index
    %c0_1 = arith.constant 0 : index
    %c0_2 = arith.constant 0 : index
    %0 = vector.load %arg0[%c0, %c0_0, %c0_1, %c0_2] : memref<2x1x8x128xf32, #tpu.memory_space<vmem>>, vector<2x1x8x128xf32>
    %cst = arith.constant dense<0.000000e+00> : vector<2x128xf32>
    %1 = vector.multi_reduction <add>, %0, %cst [1, 2] : vector<2x1x8x128xf32> to vector<2x128xf32>
    %cst_3 = arith.constant 7.812500e-03 : f32
    %2 = vector.broadcast %cst_3 : f32 to vector<2x128xf32>
    %3 = arith.mulf %1, %2 : vector<2x128xf32>
    %c0_4 = arith.constant 0 : index
    %c0_5 = arith.constant 0 : index
    %4 = vector.load %arg1[%c0_4, %c0_5] : memref<128x128xf32, #tpu.memory_space<vmem>>, vector<128x128xf32>
    %cst_6 = arith.constant dense<0.000000e+00> : vector<2x128xf32>
    %5 = tpu.matmul %3, %4, %cst_6 {dimension_numbers = #tpu.dot_dimension_numbers<[1], [0], [0], [1], [0, 0, 1, 1], [], []>} : vector<2x128xf32>, vector<128x128xf32>, vector<2x128xf32> -> vector<2x128xf32>
    %c0_7 = arith.constant 0 : index
    %c0_8 = arith.constant 0 : index
    %6 = vector.load %arg2[%c0_7, %c0_8] : memref<1x128xf32, #tpu.memory_space<vmem>>, vector<1x128xf32>
    %7 = vector.broadcast %6 : vector<1x128xf32> to vector<2x128xf32>
    %8 = arith.addf %5, %7 : vector<2x128xf32>
    %9 = arith.negf %8 : vector<2x128xf32>
    %10 = math.exp %9 : vector<2x128xf32>
    %cst_9 = arith.constant 1.000000e+00 : f32
    %11 = vector.broadcast %cst_9 : f32 to vector<2x128xf32>
    %12 = arith.addf %11, %10 : vector<2x128xf32>
    %13 = arith.divf %11, %12 : vector<2x128xf32>
    %14 = arith.mulf %8, %13 : vector<2x128xf32>
    %c0_10 = arith.constant 0 : index
    %c0_11 = arith.constant 0 : index
    %15 = vector.load %arg3[%c0_10, %c0_11] : memref<128x128xf32, #tpu.memory_space<vmem>>, vector<128x128xf32>
    %cst_12 = arith.constant dense<0.000000e+00> : vector<2x128xf32>
    %16 = tpu.matmul %14, %15, %cst_12 {dimension_numbers = #tpu.dot_dimension_numbers<[1], [0], [0], [1], [0, 0, 1, 1], [], []>} : vector<2x128xf32>, vector<128x128xf32>, vector<2x128xf32> -> vector<2x128xf32>
    %c0_13 = arith.constant 0 : index
    %c0_14 = arith.constant 0 : index
    %17 = vector.load %arg4[%c0_13, %c0_14] : memref<1x128xf32, #tpu.memory_space<vmem>>, vector<1x128xf32>
    %18 = vector.broadcast %17 : vector<1x128xf32> to vector<2x128xf32>
    %19 = arith.addf %16, %18 : vector<2x128xf32>
    %20 = arith.negf %19 : vector<2x128xf32>
    %21 = math.exp %20 : vector<2x128xf32>
    %cst_15 = arith.constant 1.000000e+00 : f32
    %22 = vector.broadcast %cst_15 : f32 to vector<2x128xf32>
    %23 = arith.addf %22, %21 : vector<2x128xf32>
    %24 = arith.divf %22, %23 : vector<2x128xf32>
    %c0_16 = arith.constant 0 : index
    %c0_17 = arith.constant 0 : index
    %25 = vector.load %arg5[%c0_16, %c0_17] : memref<2x128xf32, #tpu.memory_space<vmem>>, vector<2x128xf32>
    tpu.vector_store %arg5[%c0_16, %c0_17], %24 {strides = array<i32>} : memref<2x128xf32, #tpu.memory_space<vmem>>, vector<2x128xf32>,
    return
  }
}

module attributes {stable_mosaic.version = 11 : i64} {
  func.func @_mm_kernel(%arg0: i32, %arg1: i32, %arg2: i32, %arg3: memref<1x32x128xbf16, #tpu.memory_space<vmem>>, %arg4: memref<128x128xbf16, #tpu.memory_space<vmem>>, %arg5: memref<1x128xf32, #tpu.memory_space<vmem>>, %arg6: memref<1x32x128xbf16, #tpu.memory_space<vmem>>, %arg7: memref<32x128xf32, #tpu.memory_space<vmem>>) attributes {dimension_semantics = [#tpu.dimension_semantics<parallel>, #tpu.dimension_semantics<parallel>, #tpu.dimension_semantics<arbitrary>], iteration_bounds = array<i64: 1, 1, 1>, scalar_prefetch = 0 : i64, scratch_operands = 1 : i64, tpu.core_type = #tpu.core_type<tc>, window_params = [{transform_indices = @transform_0, window_bounds = array<i64: 1, 32, 128>}, {transform_indices = @transform_1, window_bounds = array<i64: 128, 128>}, {transform_indices = @transform_2, window_bounds = array<i64: 1, 128>}, {transform_indices = @transform_3, window_bounds = array<i64: 1, 32, 128>}]} {
    %c0_i32 = arith.constant 0 : i32
    %0 = arith.cmpi eq, %arg2, %c0_i32 : i32
    %1 = arith.extui %0 : i1 to i32
    %c0_i32_0 = arith.constant 0 : i32
    %2 = arith.cmpi ne, %1, %c0_i32_0 : i32
    scf.if %2 {
      %cst_11 = arith.constant 0.000000e+00 : f32
      %13 = vector.broadcast %cst_11 : f32 to vector<32x128xf32>
      %c0_12 = arith.constant 0 : index
      %c0_13 = arith.constant 0 : index
      %14 = vector.load %arg7[%c0_12, %c0_13] : memref<32x128xf32, #tpu.memory_space<vmem>>, vector<32x128xf32>
      tpu.vector_store %arg7[%c0_12, %c0_13], %13 {strides = array<i32>} : memref<32x128xf32, #tpu.memory_space<vmem>>, vector<32x128xf32>,
    } else {
    }
    %c0 = arith.constant 0 : index
    %c0_1 = arith.constant 0 : index
    %c0_2 = arith.constant 0 : index
    %3 = vector.load %arg3[%c0, %c0_1, %c0_2] : memref<1x32x128xbf16, #tpu.memory_space<vmem>>, vector<1x32x128xbf16>
    %4 = vector.shape_cast %3 : vector<1x32x128xbf16> to vector<32x128xbf16>
    %c0_3 = arith.constant 0 : index
    %c0_4 = arith.constant 0 : index
    %5 = vector.load %arg7[%c0_3, %c0_4] : memref<32x128xf32, #tpu.memory_space<vmem>>, vector<32x128xf32>
    %c0_5 = arith.constant 0 : index
    %c0_6 = arith.constant 0 : index
    %6 = vector.load %arg4[%c0_5, %c0_6] : memref<128x128xbf16, #tpu.memory_space<vmem>>, vector<128x128xbf16>
    %cst = arith.constant dense<0.000000e+00> : vector<32x128xf32>
    %7 = tpu.matmul %4, %6, %cst {dimension_numbers = #tpu.dot_dimension_numbers<[1], [0], [0], [1], [0, 0, 1, 1], [], []>} : vector<32x128xbf16>, vector<128x128xbf16>, vector<32x128xf32> -> vector<32x128xf32>
    %8 = arith.addf %5, %7 : vector<32x128xf32>
    %c0_7 = arith.constant 0 : index
    %c0_8 = arith.constant 0 : index
    %9 = vector.load %arg7[%c0_7, %c0_8] : memref<32x128xf32, #tpu.memory_space<vmem>>, vector<32x128xf32>
    tpu.vector_store %arg7[%c0_7, %c0_8], %8 {strides = array<i32>} : memref<32x128xf32, #tpu.memory_space<vmem>>, vector<32x128xf32>,
    %c0_i32_9 = arith.constant 0 : i32
    %10 = arith.cmpi eq, %arg2, %c0_i32_9 : i32
    %11 = arith.extui %10 : i1 to i32
    %c0_i32_10 = arith.constant 0 : i32
    %12 = arith.cmpi ne, %11, %c0_i32_10 : i32
    scf.if %12 {
      %c0_11 = arith.constant 0 : index
      %c0_12 = arith.constant 0 : index
      %13 = vector.load %arg7[%c0_11, %c0_12] : memref<32x128xf32, #tpu.memory_space<vmem>>, vector<32x128xf32>
      %c0_13 = arith.constant 0 : index
      %c0_14 = arith.constant 0 : index
      %14 = vector.load %arg5[%c0_13, %c0_14] : memref<1x128xf32, #tpu.memory_space<vmem>>, vector<1x128xf32>
      %15 = vector.broadcast %14 : vector<1x128xf32> to vector<32x128xf32>
      %16 = arith.addf %13, %15 : vector<32x128xf32>
      %17 = arith.negf %16 : vector<32x128xf32>
      %18 = math.exp %17 : vector<32x128xf32>
      %cst_15 = arith.constant 1.000000e+00 : f32
      %19 = vector.broadcast %cst_15 : f32 to vector<32x128xf32>
      %20 = arith.addf %19, %18 : vector<32x128xf32>
      %21 = arith.divf %19, %20 : vector<32x128xf32>
      %22 = arith.mulf %16, %21 : vector<32x128xf32>
      %23 = arith.truncf %22 : vector<32x128xf32> to vector<32x128xbf16>
      %c0_16 = arith.constant 0 : index
      %c0_17 = arith.constant 0 : index
      %c0_18 = arith.constant 0 : index
      %24 = vector.load %arg6[%c0_16, %c0_17, %c0_18] : memref<1x32x128xbf16, #tpu.memory_space<vmem>>, vector<1x32x128xbf16>
      %25 = vector.shape_cast %24 : vector<1x32x128xbf16> to vector<32x128xbf16>
      %26 = vector.shape_cast %23 : vector<32x128xbf16> to vector<1x32x128xbf16>
      tpu.vector_store %arg6[%c0_16, %c0_17, %c0_18], %26 {strides = array<i32>} : memref<1x32x128xbf16, #tpu.memory_space<vmem>>, vector<1x32x128xbf16>,
    } else {
    }
    return
  }
  func.func @transform_0(%arg0: i32, %arg1: i32, %arg2: i32) -> (i32, i32, i32) {
    %c0_i32 = arith.constant 0 : i32
    %c0_i32_0 = arith.constant 0 : i32
    return %c0_i32, %arg0, %arg2 : i32, i32, i32
  }
  func.func @transform_1(%arg0: i32, %arg1: i32, %arg2: i32) -> (i32, i32) {
    %c0_i32 = arith.constant 0 : i32
    return %arg2, %arg1 : i32, i32
  }
  func.func @transform_2(%arg0: i32, %arg1: i32, %arg2: i32) -> (i32, i32) {
    %c0_i32 = arith.constant 0 : i32
    %c0_i32_0 = arith.constant 0 : i32
    return %c0_i32, %arg1 : i32, i32
  }
  func.func @transform_3(%arg0: i32, %arg1: i32, %arg2: i32) -> (i32, i32, i32) {
    %c0_i32 = arith.constant 0 : i32
    %c0_i32_0 = arith.constant 0 : i32
    return %c0_i32, %arg0, %arg1 : i32, i32, i32
  }
}

module attributes {stable_mosaic.version = 11 : i64} {
  func.func @_mm_kernel(%arg0: i32, %arg1: i32, %arg2: i32, %arg3: i32, %arg4: memref<1x16x128xbf16, #tpu.memory_space<vmem>>, %arg5: memref<128x128xbf16, #tpu.memory_space<vmem>>, %arg6: memref<1x1x128xbf16, #tpu.memory_space<vmem>>, %arg7: memref<1x128xf32, #tpu.memory_space<vmem>>, %arg8: memref<1x16x128xbf16, #tpu.memory_space<vmem>>, %arg9: memref<1x16x128xbf16, #tpu.memory_space<vmem>>, %arg10: memref<16x128xf32, #tpu.memory_space<vmem>>) attributes {dimension_semantics = [#tpu.dimension_semantics<parallel>, #tpu.dimension_semantics<parallel>, #tpu.dimension_semantics<parallel>, #tpu.dimension_semantics<arbitrary>], iteration_bounds = array<i64: 2, 1, 1, 1>, scalar_prefetch = 0 : i64, scratch_operands = 1 : i64, tpu.core_type = #tpu.core_type<tc>, window_params = [{transform_indices = @transform_0, window_bounds = array<i64: 1, 16, 128>}, {transform_indices = @transform_1, window_bounds = array<i64: 128, 128>}, {transform_indices = @transform_2, window_bounds = array<i64: 1, 1, 128>}, {transform_indices = @transform_3, window_bounds = array<i64: 1, 128>}, {transform_indices = @transform_4, window_bounds = array<i64: 1, 16, 128>}, {transform_indices = @transform_5, window_bounds = array<i64: 1, 16, 128>}]} {
    %c0_i32 = arith.constant 0 : i32
    %0 = arith.cmpi eq, %arg3, %c0_i32 : i32
    %1 = arith.extui %0 : i1 to i32
    %c0_i32_0 = arith.constant 0 : i32
    %2 = arith.cmpi ne, %1, %c0_i32_0 : i32
    scf.if %2 {
      %cst_14 = arith.constant 0.000000e+00 : f32
      %17 = vector.broadcast %cst_14 : f32 to vector<16x128xf32>
      %c0_15 = arith.constant 0 : index
      %c0_16 = arith.constant 0 : index
      %18 = vector.load %arg10[%c0_15, %c0_16] : memref<16x128xf32, #tpu.memory_space<vmem>>, vector<16x128xf32>
      tpu.vector_store %arg10[%c0_15, %c0_16], %17 {strides = array<i32>} : memref<16x128xf32, #tpu.memory_space<vmem>>, vector<16x128xf32>,
    } else {
    }
    %c0 = arith.constant 0 : index
    %c0_1 = arith.constant 0 : index
    %c0_2 = arith.constant 0 : index
    %3 = vector.load %arg4[%c0, %c0_1, %c0_2] : memref<1x16x128xbf16, #tpu.memory_space<vmem>>, vector<1x16x128xbf16>
    %4 = vector.shape_cast %3 : vector<1x16x128xbf16> to vector<16x128xbf16>
    %c0_3 = arith.constant 0 : index
    %c0_4 = arith.constant 0 : index
    %c0_5 = arith.constant 0 : index
    %5 = vector.load %arg6[%c0_3, %c0_4, %c0_5] : memref<1x1x128xbf16, #tpu.memory_space<vmem>>, vector<1x1x128xbf16>
    %6 = vector.shape_cast %5 : vector<1x1x128xbf16> to vector<1x128xbf16>
    %7 = vector.broadcast %6 : vector<1x128xbf16> to vector<16x128xbf16>
    %8 = arith.mulf %4, %7 : vector<16x128xbf16>
    %c0_6 = arith.constant 0 : index
    %c0_7 = arith.constant 0 : index
    %9 = vector.load %arg10[%c0_6, %c0_7] : memref<16x128xf32, #tpu.memory_space<vmem>>, vector<16x128xf32>
    %c0_8 = arith.constant 0 : index
    %c0_9 = arith.constant 0 : index
    %10 = vector.load %arg5[%c0_8, %c0_9] : memref<128x128xbf16, #tpu.memory_space<vmem>>, vector<128x128xbf16>
    %cst = arith.constant dense<0.000000e+00> : vector<16x128xf32>
    %11 = tpu.matmul %8, %10, %cst {dimension_numbers = #tpu.dot_dimension_numbers<[1], [0], [0], [1], [0, 0, 1, 1], [], []>} : vector<16x128xbf16>, vector<128x128xbf16>, vector<16x128xf32> -> vector<16x128xf32>
    %12 = arith.addf %9, %11 : vector<16x128xf32>
    %c0_10 = arith.constant 0 : index
    %c0_11 = arith.constant 0 : index
    %13 = vector.load %arg10[%c0_10, %c0_11] : memref<16x128xf32, #tpu.memory_space<vmem>>, vector<16x128xf32>
    tpu.vector_store %arg10[%c0_10, %c0_11], %12 {strides = array<i32>} : memref<16x128xf32, #tpu.memory_space<vmem>>, vector<16x128xf32>,
    %c0_i32_12 = arith.constant 0 : i32
    %14 = arith.cmpi eq, %arg3, %c0_i32_12 : i32
    %15 = arith.extui %14 : i1 to i32
    %c0_i32_13 = arith.constant 0 : i32
    %16 = arith.cmpi ne, %15, %c0_i32_13 : i32
    scf.if %16 {
      %c0_14 = arith.constant 0 : index
      %c0_15 = arith.constant 0 : index
      %17 = vector.load %arg10[%c0_14, %c0_15] : memref<16x128xf32, #tpu.memory_space<vmem>>, vector<16x128xf32>
      %c0_16 = arith.constant 0 : index
      %c0_17 = arith.constant 0 : index
      %18 = vector.load %arg7[%c0_16, %c0_17] : memref<1x128xf32, #tpu.memory_space<vmem>>, vector<1x128xf32>
      %19 = vector.broadcast %18 : vector<1x128xf32> to vector<16x128xf32>
      %20 = arith.addf %17, %19 : vector<16x128xf32>
      %c0_18 = arith.constant 0 : index
      %c0_19 = arith.constant 0 : index
      %c0_20 = arith.constant 0 : index
      %21 = vector.load %arg8[%c0_18, %c0_19, %c0_20] : memref<1x16x128xbf16, #tpu.memory_space<vmem>>, vector<1x16x128xbf16>
      %22 = vector.shape_cast %21 : vector<1x16x128xbf16> to vector<16x128xbf16>
      %23 = arith.extf %22 : vector<16x128xbf16> to vector<16x128xf32>
      %24 = arith.addf %20, %23 : vector<16x128xf32>
      %25 = arith.truncf %24 : vector<16x128xf32> to vector<16x128xbf16>
      %c0_21 = arith.constant 0 : index
      %c0_22 = arith.constant 0 : index
      %c0_23 = arith.constant 0 : index
      %26 = vector.load %arg9[%c0_21, %c0_22, %c0_23] : memref<1x16x128xbf16, #tpu.memory_space<vmem>>, vector<1x16x128xbf16>
      %27 = vector.shape_cast %26 : vector<1x16x128xbf16> to vector<16x128xbf16>
      %28 = vector.shape_cast %25 : vector<16x128xbf16> to vector<1x16x128xbf16>
      tpu.vector_store %arg9[%c0_21, %c0_22, %c0_23], %28 {strides = array<i32>} : memref<1x16x128xbf16, #tpu.memory_space<vmem>>, vector<1x16x128xbf16>,
    } else {
    }
    return
  }
  func.func @transform_0(%arg0: i32, %arg1: i32, %arg2: i32, %arg3: i32) -> (i32, i32, i32) {
    %c0_i32 = arith.constant 0 : i32
    return %arg0, %arg1, %arg3 : i32, i32, i32
  }
  func.func @transform_1(%arg0: i32, %arg1: i32, %arg2: i32, %arg3: i32) -> (i32, i32) {
    %c0_i32 = arith.constant 0 : i32
    return %arg3, %arg2 : i32, i32
  }
  func.func @transform_2(%arg0: i32, %arg1: i32, %arg2: i32, %arg3: i32) -> (i32, i32, i32) {
    %c0_i32 = arith.constant 0 : i32
    %c0_i32_0 = arith.constant 0 : i32
    return %arg0, %c0_i32, %arg3 : i32, i32, i32
  }
  func.func @transform_3(%arg0: i32, %arg1: i32, %arg2: i32, %arg3: i32) -> (i32, i32) {
    %c0_i32 = arith.constant 0 : i32
    %c0_i32_0 = arith.constant 0 : i32
    return %c0_i32, %arg2 : i32, i32
  }
  func.func @transform_4(%arg0: i32, %arg1: i32, %arg2: i32, %arg3: i32) -> (i32, i32, i32) {
    %c0_i32 = arith.constant 0 : i32
    return %arg0, %arg1, %arg2 : i32, i32, i32
  }
  func.func @transform_5(%arg0: i32, %arg1: i32, %arg2: i32, %arg3: i32) -> (i32, i32, i32) {
    %c0_i32 = arith.constant 0 : i32
    return %arg0, %arg1, %arg2 : i32, i32, i32
  }
}

module attributes {stable_mosaic.version = 11 : i64} {
  func.func @_mm_kernel(%arg0: i32, %arg1: i32, %arg2: i32, %arg3: memref<1x32x128xbf16, #tpu.memory_space<vmem>>, %arg4: memref<128x256xbf16, #tpu.memory_space<vmem>>, %arg5: memref<1x256xf32, #tpu.memory_space<vmem>>, %arg6: memref<1x32x256xbf16, #tpu.memory_space<vmem>>, %arg7: memref<32x256xf32, #tpu.memory_space<vmem>>) attributes {dimension_semantics = [#tpu.dimension_semantics<parallel>, #tpu.dimension_semantics<parallel>, #tpu.dimension_semantics<arbitrary>], iteration_bounds = array<i64: 1, 7, 1>, scalar_prefetch = 0 : i64, scratch_operands = 1 : i64, tpu.core_type = #tpu.core_type<tc>, window_params = [{transform_indices = @transform_0, window_bounds = array<i64: 1, 32, 128>}, {transform_indices = @transform_1, window_bounds = array<i64: 128, 256>}, {transform_indices = @transform_2, window_bounds = array<i64: 1, 256>}, {transform_indices = @transform_3, window_bounds = array<i64: 1, 32, 256>}]} {
    %c0_i32 = arith.constant 0 : i32
    %0 = arith.cmpi eq, %arg2, %c0_i32 : i32
    %1 = arith.extui %0 : i1 to i32
    %c0_i32_0 = arith.constant 0 : i32
    %2 = arith.cmpi ne, %1, %c0_i32_0 : i32
    scf.if %2 {
      %cst_11 = arith.constant 0.000000e+00 : f32
      %13 = vector.broadcast %cst_11 : f32 to vector<32x256xf32>
      %c0_12 = arith.constant 0 : index
      %c0_13 = arith.constant 0 : index
      %14 = vector.load %arg7[%c0_12, %c0_13] : memref<32x256xf32, #tpu.memory_space<vmem>>, vector<32x256xf32>
      tpu.vector_store %arg7[%c0_12, %c0_13], %13 {strides = array<i32>} : memref<32x256xf32, #tpu.memory_space<vmem>>, vector<32x256xf32>,
    } else {
    }
    %c0 = arith.constant 0 : index
    %c0_1 = arith.constant 0 : index
    %c0_2 = arith.constant 0 : index
    %3 = vector.load %arg3[%c0, %c0_1, %c0_2] : memref<1x32x128xbf16, #tpu.memory_space<vmem>>, vector<1x32x128xbf16>
    %4 = vector.shape_cast %3 : vector<1x32x128xbf16> to vector<32x128xbf16>
    %c0_3 = arith.constant 0 : index
    %c0_4 = arith.constant 0 : index
    %5 = vector.load %arg7[%c0_3, %c0_4] : memref<32x256xf32, #tpu.memory_space<vmem>>, vector<32x256xf32>
    %c0_5 = arith.constant 0 : index
    %c0_6 = arith.constant 0 : index
    %6 = vector.load %arg4[%c0_5, %c0_6] : memref<128x256xbf16, #tpu.memory_space<vmem>>, vector<128x256xbf16>
    %cst = arith.constant dense<0.000000e+00> : vector<32x256xf32>
    %7 = tpu.matmul %4, %6, %cst {dimension_numbers = #tpu.dot_dimension_numbers<[1], [0], [0], [1], [0, 0, 1, 1], [], []>} : vector<32x128xbf16>, vector<128x256xbf16>, vector<32x256xf32> -> vector<32x256xf32>
    %8 = arith.addf %5, %7 : vector<32x256xf32>
    %c0_7 = arith.constant 0 : index
    %c0_8 = arith.constant 0 : index
    %9 = vector.load %arg7[%c0_7, %c0_8] : memref<32x256xf32, #tpu.memory_space<vmem>>, vector<32x256xf32>
    tpu.vector_store %arg7[%c0_7, %c0_8], %8 {strides = array<i32>} : memref<32x256xf32, #tpu.memory_space<vmem>>, vector<32x256xf32>,
    %c0_i32_9 = arith.constant 0 : i32
    %10 = arith.cmpi eq, %arg2, %c0_i32_9 : i32
    %11 = arith.extui %10 : i1 to i32
    %c0_i32_10 = arith.constant 0 : i32
    %12 = arith.cmpi ne, %11, %c0_i32_10 : i32
    scf.if %12 {
      %c0_11 = arith.constant 0 : index
      %c0_12 = arith.constant 0 : index
      %13 = vector.load %arg7[%c0_11, %c0_12] : memref<32x256xf32, #tpu.memory_space<vmem>>, vector<32x256xf32>
      %c0_13 = arith.constant 0 : index
      %c0_14 = arith.constant 0 : index
      %14 = vector.load %arg5[%c0_13, %c0_14] : memref<1x256xf32, #tpu.memory_space<vmem>>, vector<1x256xf32>
      %15 = vector.broadcast %14 : vector<1x256xf32> to vector<32x256xf32>
      %16 = arith.addf %13, %15 : vector<32x256xf32>
      %17 = arith.negf %16 : vector<32x256xf32>
      %18 = math.exp %17 : vector<32x256xf32>
      %cst_15 = arith.constant 1.000000e+00 : f32
      %19 = vector.broadcast %cst_15 : f32 to vector<32x256xf32>
      %20 = arith.addf %19, %18 : vector<32x256xf32>
      %21 = arith.divf %19, %20 : vector<32x256xf32>
      %22 = arith.mulf %16, %21 : vector<32x256xf32>
      %23 = arith.truncf %22 : vector<32x256xf32> to vector<32x256xbf16>
      %c0_16 = arith.constant 0 : index
      %c0_17 = arith.constant 0 : index
      %c0_18 = arith.constant 0 : index
      %24 = vector.load %arg6[%c0_16, %c0_17, %c0_18] : memref<1x32x256xbf16, #tpu.memory_space<vmem>>, vector<1x32x256xbf16>
      %25 = vector.shape_cast %24 : vector<1x32x256xbf16> to vector<32x256xbf16>
      %26 = vector.shape_cast %23 : vector<32x256xbf16> to vector<1x32x256xbf16>
      tpu.vector_store %arg6[%c0_16, %c0_17, %c0_18], %26 {strides = array<i32>} : memref<1x32x256xbf16, #tpu.memory_space<vmem>>, vector<1x32x256xbf16>,
    } else {
    }
    return
  }
  func.func @transform_0(%arg0: i32, %arg1: i32, %arg2: i32) -> (i32, i32, i32) {
    %c0_i32 = arith.constant 0 : i32
    %c0_i32_0 = arith.constant 0 : i32
    return %c0_i32, %arg0, %arg2 : i32, i32, i32
  }
  func.func @transform_1(%arg0: i32, %arg1: i32, %arg2: i32) -> (i32, i32) {
    %c0_i32 = arith.constant 0 : i32
    return %arg2, %arg1 : i32, i32
  }
  func.func @transform_2(%arg0: i32, %arg1: i32, %arg2: i32) -> (i32, i32) {
    %c0_i32 = arith.constant 0 : i32
    %c0_i32_0 = arith.constant 0 : i32
    return %c0_i32, %arg1 : i32, i32
  }
  func.func @transform_3(%arg0: i32, %arg1: i32, %arg2: i32) -> (i32, i32, i32) {
    %c0_i32 = arith.constant 0 : i32
    %c0_i32_0 = arith.constant 0 : i32
    return %c0_i32, %arg0, %arg1 : i32, i32, i32
  }
}

module attributes {stable_mosaic.version = 11 : i64} {
  func.func @_dwconv3_bn_silu_kernel(%arg0: i32, %arg1: i32, %arg2: i32, %arg3: memref<1x1x1x6x6x128xbf16, #tpu.memory_space<vmem>>, %arg4: memref<9x128xf32, #tpu.memory_space<vmem>>, %arg5: memref<1x128xf32, #tpu.memory_space<vmem>>, %arg6: memref<1x4x4x128xbf16, #tpu.memory_space<vmem>>, %arg7: memref<1x1x8x128xf32, #tpu.memory_space<vmem>>) attributes {dimension_semantics = [#tpu.dimension_semantics<parallel>, #tpu.dimension_semantics<parallel>, #tpu.dimension_semantics<parallel>], iteration_bounds = array<i64: 2, 1, 1>, scalar_prefetch = 0 : i64, scratch_operands = 0 : i64, tpu.core_type = #tpu.core_type<tc>, window_params = [{transform_indices = @transform_0, window_bounds = array<i64: 1, 1, 1, 6, 6, 128>}, {transform_indices = @transform_1, window_bounds = array<i64: 9, 128>}, {transform_indices = @transform_2, window_bounds = array<i64: 1, 128>}, {transform_indices = @transform_3, window_bounds = array<i64: 1, 4, 4, 128>}, {transform_indices = @transform_4, window_bounds = array<i64: 1, 1, 8, 128>}]} {
    %c0 = arith.constant 0 : index
    %c0_0 = arith.constant 0 : index
    %0 = vector.load %arg4[%c0, %c0_0] : memref<9x128xf32, #tpu.memory_space<vmem>>, vector<9x128xf32>
    %cst = arith.constant 0.000000e+00 : f32
    %1 = vector.broadcast %cst : f32 to vector<4x4x128xf32>
    %c0_1 = arith.constant 0 : index
    %c0_2 = arith.constant 0 : index
    %c0_3 = arith.constant 0 : index
    %c0_4 = arith.constant 0 : index
    %c0_5 = arith.constant 0 : index
    %c0_6 = arith.constant 0 : index
    %2 = vector.load %arg3[%c0_1, %c0_2, %c0_3, %c0_4, %c0_5, %c0_6] : memref<1x1x1x6x6x128xbf16, #tpu.memory_space<vmem>>, vector<1x1x1x4x4x128xbf16>
    %3 = vector.shape_cast %2 : vector<1x1x1x4x4x128xbf16> to vector<4x4x128xbf16>
    %4 = arith.extf %3 : vector<4x4x128xbf16> to vector<4x4x128xf32>
    %5 = vector.extract_strided_slice %0 {offsets = [0, 0], sizes = [1, 128], strides = [1, 1]} : vector<9x128xf32> to vector<1x128xf32>
    %6 = vector.shape_cast %5 : vector<1x128xf32> to vector<128xf32>
    %7 = vector.shape_cast %6 : vector<128xf32> to vector<1x1x128xf32>
    %8 = vector.broadcast %7 : vector<1x1x128xf32> to vector<4x4x128xf32>
    %9 = arith.mulf %4, %8 : vector<4x4x128xf32>
    %10 = arith.addf %1, %9 : vector<4x4x128xf32>
    %c0_7 = arith.constant 0 : index
    %c0_8 = arith.constant 0 : index
    %c0_9 = arith.constant 0 : index
    %c0_10 = arith.constant 0 : index
    %c1 = arith.constant 1 : index
    %c0_11 = arith.constant 0 : index
    %11 = vector.load %arg3[%c0_7, %c0_8, %c0_9, %c0_10, %c1, %c0_11] : memref<1x1x1x6x6x128xbf16, #tpu.memory_space<vmem>>, vector<1x1x1x4x4x128xbf16>
    %12 = vector.shape_cast %11 : vector<1x1x1x4x4x128xbf16> to vector<4x4x128xbf16>
    %13 = arith.extf %12 : vector<4x4x128xbf16> to vector<4x4x128xf32>
    %14 = vector.extract_strided_slice %0 {offsets = [1, 0], sizes = [1, 128], strides = [1, 1]} : vector<9x128xf32> to vector<1x128xf32>
    %15 = vector.shape_cast %14 : vector<1x128xf32> to vector<128xf32>
    %16 = vector.shape_cast %15 : vector<128xf32> to vector<1x1x128xf32>
    %17 = vector.broadcast %16 : vector<1x1x128xf32> to vector<4x4x128xf32>
    %18 = arith.mulf %13, %17 : vector<4x4x128xf32>
    %19 = arith.addf %10, %18 : vector<4x4x128xf32>
    %c0_12 = arith.constant 0 : index
    %c0_13 = arith.constant 0 : index
    %c0_14 = arith.constant 0 : index
    %c0_15 = arith.constant 0 : index
    %c2 = arith.constant 2 : index
    %c0_16 = arith.constant 0 : index
    %20 = vector.load %arg3[%c0_12, %c0_13, %c0_14, %c0_15, %c2, %c0_16] : memref<1x1x1x6x6x128xbf16, #tpu.memory_space<vmem>>, vector<1x1x1x4x4x128xbf16>
    %21 = vector.shape_cast %20 : vector<1x1x1x4x4x128xbf16> to vector<4x4x128xbf16>
    %22 = arith.extf %21 : vector<4x4x128xbf16> to vector<4x4x128xf32>
    %23 = vector.extract_strided_slice %0 {offsets = [2, 0], sizes = [1, 128], strides = [1, 1]} : vector<9x128xf32> to vector<1x128xf32>
    %24 = vector.shape_cast %23 : vector<1x128xf32> to vector<128xf32>
    %25 = vector.shape_cast %24 : vector<128xf32> to vector<1x1x128xf32>
    %26 = vector.broadcast %25 : vector<1x1x128xf32> to vector<4x4x128xf32>
    %27 = arith.mulf %22, %26 : vector<4x4x128xf32>
    %28 = arith.addf %19, %27 : vector<4x4x128xf32>
    %c0_17 = arith.constant 0 : index
    %c0_18 = arith.constant 0 : index
    %c0_19 = arith.constant 0 : index
    %c1_20 = arith.constant 1 : index
    %c0_21 = arith.constant 0 : index
    %c0_22 = arith.constant 0 : index
    %29 = vector.load %arg3[%c0_17, %c0_18, %c0_19, %c1_20, %c0_21, %c0_22] : memref<1x1x1x6x6x128xbf16, #tpu.memory_space<vmem>>, vector<1x1x1x4x4x128xbf16>
    %30 = vector.shape_cast %29 : vector<1x1x1x4x4x128xbf16> to vector<4x4x128xbf16>
    %31 = arith.extf %30 : vector<4x4x128xbf16> to vector<4x4x128xf32>
    %32 = vector.extract_strided_slice %0 {offsets = [3, 0], sizes = [1, 128], strides = [1, 1]} : vector<9x128xf32> to vector<1x128xf32>
    %33 = vector.shape_cast %32 : vector<1x128xf32> to vector<128xf32>
    %34 = vector.shape_cast %33 : vector<128xf32> to vector<1x1x128xf32>
    %35 = vector.broadcast %34 : vector<1x1x128xf32> to vector<4x4x128xf32>
    %36 = arith.mulf %31, %35 : vector<4x4x128xf32>
    %37 = arith.addf %28, %36 : vector<4x4x128xf32>
    %c0_23 = arith.constant 0 : index
    %c0_24 = arith.constant 0 : index
    %c0_25 = arith.constant 0 : index
    %c1_26 = arith.constant 1 : index
    %c1_27 = arith.constant 1 : index
    %c0_28 = arith.constant 0 : index
    %38 = vector.load %arg3[%c0_23, %c0_24, %c0_25, %c1_26, %c1_27, %c0_28] : memref<1x1x1x6x6x128xbf16, #tpu.memory_space<vmem>>, vector<1x1x1x4x4x128xbf16>
    %39 = vector.shape_cast %38 : vector<1x1x1x4x4x128xbf16> to vector<4x4x128xbf16>
    %40 = arith.extf %39 : vector<4x4x128xbf16> to vector<4x4x128xf32>
    %41 = vector.extract_strided_slice %0 {offsets = [4, 0], sizes = [1, 128], strides = [1, 1]} : vector<9x128xf32> to vector<1x128xf32>
    %42 = vector.shape_cast %41 : vector<1x128xf32> to vector<128xf32>
    %43 = vector.shape_cast %42 : vector<128xf32> to vector<1x1x128xf32>
    %44 = vector.broadcast %43 : vector<1x1x128xf32> to vector<4x4x128xf32>
    %45 = arith.mulf %40, %44 : vector<4x4x128xf32>
    %46 = arith.addf %37, %45 : vector<4x4x128xf32>
    %c0_29 = arith.constant 0 : index
    %c0_30 = arith.constant 0 : index
    %c0_31 = arith.constant 0 : index
    %c1_32 = arith.constant 1 : index
    %c2_33 = arith.constant 2 : index
    %c0_34 = arith.constant 0 : index
    %47 = vector.load %arg3[%c0_29, %c0_30, %c0_31, %c1_32, %c2_33, %c0_34] : memref<1x1x1x6x6x128xbf16, #tpu.memory_space<vmem>>, vector<1x1x1x4x4x128xbf16>
    %48 = vector.shape_cast %47 : vector<1x1x1x4x4x128xbf16> to vector<4x4x128xbf16>
    %49 = arith.extf %48 : vector<4x4x128xbf16> to vector<4x4x128xf32>
    %50 = vector.extract_strided_slice %0 {offsets = [5, 0], sizes = [1, 128], strides = [1, 1]} : vector<9x128xf32> to vector<1x128xf32>
    %51 = vector.shape_cast %50 : vector<1x128xf32> to vector<128xf32>
    %52 = vector.shape_cast %51 : vector<128xf32> to vector<1x1x128xf32>
    %53 = vector.broadcast %52 : vector<1x1x128xf32> to vector<4x4x128xf32>
    %54 = arith.mulf %49, %53 : vector<4x4x128xf32>
    %55 = arith.addf %46, %54 : vector<4x4x128xf32>
    %c0_35 = arith.constant 0 : index
    %c0_36 = arith.constant 0 : index
    %c0_37 = arith.constant 0 : index
    %c2_38 = arith.constant 2 : index
    %c0_39 = arith.constant 0 : index
    %c0_40 = arith.constant 0 : index
    %56 = vector.load %arg3[%c0_35, %c0_36, %c0_37, %c2_38, %c0_39, %c0_40] : memref<1x1x1x6x6x128xbf16, #tpu.memory_space<vmem>>, vector<1x1x1x4x4x128xbf16>
    %57 = vector.shape_cast %56 : vector<1x1x1x4x4x128xbf16> to vector<4x4x128xbf16>
    %58 = arith.extf %57 : vector<4x4x128xbf16> to vector<4x4x128xf32>
    %59 = vector.extract_strided_slice %0 {offsets = [6, 0], sizes = [1, 128], strides = [1, 1]} : vector<9x128xf32> to vector<1x128xf32>
    %60 = vector.shape_cast %59 : vector<1x128xf32> to vector<128xf32>
    %61 = vector.shape_cast %60 : vector<128xf32> to vector<1x1x128xf32>
    %62 = vector.broadcast %61 : vector<1x1x128xf32> to vector<4x4x128xf32>
    %63 = arith.mulf %58, %62 : vector<4x4x128xf32>
    %64 = arith.addf %55, %63 : vector<4x4x128xf32>
    %c0_41 = arith.constant 0 : index
    %c0_42 = arith.constant 0 : index
    %c0_43 = arith.constant 0 : index
    %c2_44 = arith.constant 2 : index
    %c1_45 = arith.constant 1 : index
    %c0_46 = arith.constant 0 : index
    %65 = vector.load %arg3[%c0_41, %c0_42, %c0_43, %c2_44, %c1_45, %c0_46] : memref<1x1x1x6x6x128xbf16, #tpu.memory_space<vmem>>, vector<1x1x1x4x4x128xbf16>
    %66 = vector.shape_cast %65 : vector<1x1x1x4x4x128xbf16> to vector<4x4x128xbf16>
    %67 = arith.extf %66 : vector<4x4x128xbf16> to vector<4x4x128xf32>
    %68 = vector.extract_strided_slice %0 {offsets = [7, 0], sizes = [1, 128], strides = [1, 1]} : vector<9x128xf32> to vector<1x128xf32>
    %69 = vector.shape_cast %68 : vector<1x128xf32> to vector<128xf32>
    %70 = vector.shape_cast %69 : vector<128xf32> to vector<1x1x128xf32>
    %71 = vector.broadcast %70 : vector<1x1x128xf32> to vector<4x4x128xf32>
    %72 = arith.mulf %67, %71 : vector<4x4x128xf32>
    %73 = arith.addf %64, %72 : vector<4x4x128xf32>
    %c0_47 = arith.constant 0 : index
    %c0_48 = arith.constant 0 : index
    %c0_49 = arith.constant 0 : index
    %c2_50 = arith.constant 2 : index
    %c2_51 = arith.constant 2 : index
    %c0_52 = arith.constant 0 : index
    %74 = vector.load %arg3[%c0_47, %c0_48, %c0_49, %c2_50, %c2_51, %c0_52] : memref<1x1x1x6x6x128xbf16, #tpu.memory_space<vmem>>, vector<1x1x1x4x4x128xbf16>
    %75 = vector.shape_cast %74 : vector<1x1x1x4x4x128xbf16> to vector<4x4x128xbf16>
    %76 = arith.extf %75 : vector<4x4x128xbf16> to vector<4x4x128xf32>
    %77 = vector.extract_strided_slice %0 {offsets = [8, 0], sizes = [1, 128], strides = [1, 1]} : vector<9x128xf32> to vector<1x128xf32>
    %78 = vector.shape_cast %77 : vector<1x128xf32> to vector<128xf32>
    %79 = vector.shape_cast %78 : vector<128xf32> to vector<1x1x128xf32>
    %80 = vector.broadcast %79 : vector<1x1x128xf32> to vector<4x4x128xf32>
    %81 = arith.mulf %76, %80 : vector<4x4x128xf32>
    %82 = arith.addf %73, %81 : vector<4x4x128xf32>
    %c0_53 = arith.constant 0 : index
    %c0_54 = arith.constant 0 : index
    %83 = vector.load %arg5[%c0_53, %c0_54] : memref<1x128xf32, #tpu.memory_space<vmem>>, vector<1x128xf32>
    %84 = vector.shape_cast %83 : vector<1x128xf32> to vector<1x1x128xf32>
    %85 = vector.broadcast %84 : vector<1x1x128xf32> to vector<4x4x128xf32>
    %86 = arith.addf %82, %85 : vector<4x4x128xf32>
    %87 = arith.negf %86 : vector<4x4x128xf32>
    %88 = math.exp %87 : vector<4x4x128xf32>
    %cst_55 = arith.constant 1.000000e+00 : f32
    %89 = vector.broadcast %cst_55 : f32 to vector<4x4x128xf32>
    %90 = arith.addf %89, %88 : vector<4x4x128xf32>
    %91 = arith.divf %89, %90 : vector<4x4x128xf32>
    %92 = arith.mulf %86, %91 : vector<4x4x128xf32>
    %93 = arith.truncf %92 : vector<4x4x128xf32> to vector<4x4x128xbf16>
    %c0_56 = arith.constant 0 : index
    %c0_57 = arith.constant 0 : index
    %c0_58 = arith.constant 0 : index
    %c0_59 = arith.constant 0 : index
    %94 = vector.load %arg6[%c0_56, %c0_57, %c0_58, %c0_59] : memref<1x4x4x128xbf16, #tpu.memory_space<vmem>>, vector<1x4x4x128xbf16>
    %95 = vector.shape_cast %94 : vector<1x4x4x128xbf16> to vector<4x4x128xbf16>
    %96 = vector.shape_cast %93 : vector<4x4x128xbf16> to vector<1x4x4x128xbf16>
    tpu.vector_store %arg6[%c0_56, %c0_57, %c0_58, %c0_59], %96 {strides = array<i32>} : memref<1x4x4x128xbf16, #tpu.memory_space<vmem>>, vector<1x4x4x128xbf16>,
    %cst_60 = arith.constant dense<0.000000e+00> : vector<128xf32>
    %97 = vector.multi_reduction <add>, %92, %cst_60 [0, 1] : vector<4x4x128xf32> to vector<128xf32>
    %98 = vector.shape_cast %97 : vector<128xf32> to vector<1x1x1x128xf32>
    %99 = vector.shape_cast %98 : vector<1x1x1x128xf32> to vector<1x1x1x128xf32>
    %100 = vector.broadcast %99 : vector<1x1x1x128xf32> to vector<1x1x8x128xf32>
    %c0_61 = arith.constant 0 : index
    %c0_62 = arith.constant 0 : index
    %c0_63 = arith.constant 0 : index
    %c0_64 = arith.constant 0 : index
    %101 = vector.load %arg7[%c0_61, %c0_62, %c0_63, %c0_64] : memref<1x1x8x128xf32, #tpu.memory_space<vmem>>, vector<1x1x8x128xf32>
    tpu.vector_store %arg7[%c0_61, %c0_62, %c0_63, %c0_64], %100 {strides = array<i32>} : memref<1x1x8x128xf32, #tpu.memory_space<vmem>>, vector<1x1x8x128xf32>,
    return
  }
  func.func @transform_0(%arg0: i32, %arg1: i32, %arg2: i32) -> (i32, i32, i32, i32, i32, i32) {
    %c0_i32 = arith.constant 0 : i32
    %c0_i32_0 = arith.constant 0 : i32
    %c0_i32_1 = arith.constant 0 : i32
    %c0_i32_2 = arith.constant 0 : i32
    return %c0_i32, %arg0, %arg1, %c0_i32_0, %c0_i32_1, %arg2 : i32, i32, i32, i32, i32, i32
  }
  func.func @transform_1(%arg0: i32, %arg1: i32, %arg2: i32) -> (i32, i32) {
    %c0_i32 = arith.constant 0 : i32
    %c0_i32_0 = arith.constant 0 : i32
    return %c0_i32, %arg2 : i32, i32
  }
  func.func @transform_2(%arg0: i32, %arg1: i32, %arg2: i32) -> (i32, i32) {
    %c0_i32 = arith.constant 0 : i32
    %c0_i32_0 = arith.constant 0 : i32
    return %c0_i32, %arg2 : i32, i32
  }
  func.func @transform_3(%arg0: i32, %arg1: i32, %arg2: i32) -> (i32, i32, i32, i32) {
    %c0_i32 = arith.constant 0 : i32
    %c0_i32_0 = arith.constant 0 : i32
    return %arg0, %arg1, %c0_i32, %arg2 : i32, i32, i32, i32
  }
  func.func @transform_4(%arg0: i32, %arg1: i32, %arg2: i32) -> (i32, i32, i32, i32) {
    %c0_i32 = arith.constant 0 : i32
    %c0_i32_0 = arith.constant 0 : i32
    return %arg0, %arg1, %c0_i32, %arg2 : i32, i32, i32, i32
  }
}

module attributes {stable_mosaic.version = 11 : i64} {
  func.func @_pool_fc_kernel(%arg0: i32, %arg1: memref<2x16x1792xbf16, #tpu.memory_space<vmem>>, %arg2: memref<1792x128xf32, #tpu.memory_space<vmem>>, %arg3: memref<1x128xf32, #tpu.memory_space<vmem>>, %arg4: memref<2x128xf32, #tpu.memory_space<vmem>>, %arg5: memref<2x1792xf32, #tpu.memory_space<vmem>>) attributes {dimension_semantics = [#tpu.dimension_semantics<arbitrary>], iteration_bounds = array<i64: 1>, scalar_prefetch = 0 : i64, scratch_operands = 1 : i64, tpu.core_type = #tpu.core_type<tc>, window_params = [{transform_indices = @transform_0, window_bounds = array<i64: 2, 16, 1792>}, {pipeline_mode = #tpu.pipeline_mode<synchronous>, transform_indices = @transform_1, window_bounds = array<i64: 1792, 128>}, {pipeline_mode = #tpu.pipeline_mode<synchronous>, transform_indices = @transform_2, window_bounds = array<i64: 1, 128>}, {pipeline_mode = #tpu.pipeline_mode<synchronous>, transform_indices = @transform_3, window_bounds = array<i64: 2, 128>}]} {
    %c0_i32 = arith.constant 0 : i32
    %0 = arith.cmpi eq, %arg0, %c0_i32 : i32
    %1 = arith.extui %0 : i1 to i32
    %c0_i32_0 = arith.constant 0 : i32
    %2 = arith.cmpi ne, %1, %c0_i32_0 : i32
    scf.if %2 {
      %cst_9 = arith.constant 0.000000e+00 : f32
      %12 = vector.broadcast %cst_9 : f32 to vector<2x1792xf32>
      %c0_10 = arith.constant 0 : index
      %c0_11 = arith.constant 0 : index
      %13 = vector.load %arg5[%c0_10, %c0_11] : memref<2x1792xf32, #tpu.memory_space<vmem>>, vector<2x1792xf32>
      tpu.vector_store %arg5[%c0_10, %c0_11], %12 {strides = array<i32>} : memref<2x1792xf32, #tpu.memory_space<vmem>>, vector<2x1792xf32>,
    } else {
    }
    %c0 = arith.constant 0 : index
    %c0_1 = arith.constant 0 : index
    %3 = vector.load %arg5[%c0, %c0_1] : memref<2x1792xf32, #tpu.memory_space<vmem>>, vector<2x1792xf32>
    %c0_2 = arith.constant 0 : index
    %c0_3 = arith.constant 0 : index
    %c0_4 = arith.constant 0 : index
    %4 = vector.load %arg1[%c0_2, %c0_3, %c0_4] : memref<2x16x1792xbf16, #tpu.memory_space<vmem>>, vector<2x16x1792xbf16>
    %5 = arith.extf %4 : vector<2x16x1792xbf16> to vector<2x16x1792xf32>
    %cst = arith.constant dense<0.000000e+00> : vector<2x1792xf32>
    %6 = vector.multi_reduction <add>, %5, %cst [1] : vector<2x16x1792xf32> to vector<2x1792xf32>
    %7 = arith.addf %3, %6 : vector<2x1792xf32>
    %c0_5 = arith.constant 0 : index
    %c0_6 = arith.constant 0 : index
    %8 = vector.load %arg5[%c0_5, %c0_6] : memref<2x1792xf32, #tpu.memory_space<vmem>>, vector<2x1792xf32>
    tpu.vector_store %arg5[%c0_5, %c0_6], %7 {strides = array<i32>} : memref<2x1792xf32, #tpu.memory_space<vmem>>, vector<2x1792xf32>,
    %c0_i32_7 = arith.constant 0 : i32
    %9 = arith.cmpi eq, %arg0, %c0_i32_7 : i32
    %10 = arith.extui %9 : i1 to i32
    %c0_i32_8 = arith.constant 0 : i32
    %11 = arith.cmpi ne, %10, %c0_i32_8 : i32
    scf.if %11 {
      %c0_9 = arith.constant 0 : index
      %c0_10 = arith.constant 0 : index
      %12 = vector.load %arg5[%c0_9, %c0_10] : memref<2x1792xf32, #tpu.memory_space<vmem>>, vector<2x1792xf32>
      %cst_11 = arith.constant 6.250000e-02 : f32
      %13 = vector.broadcast %cst_11 : f32 to vector<2x1792xf32>
      %14 = arith.mulf %12, %13 : vector<2x1792xf32>
      %c0_12 = arith.constant 0 : index
      %c0_13 = arith.constant 0 : index
      %15 = vector.load %arg2[%c0_12, %c0_13] : memref<1792x128xf32, #tpu.memory_space<vmem>>, vector<1792x128xf32>
      %cst_14 = arith.constant dense<0.000000e+00> : vector<2x128xf32>
      %16 = tpu.matmul %14, %15, %cst_14 {dimension_numbers = #tpu.dot_dimension_numbers<[1], [0], [0], [1], [0, 0, 1, 1], [], []>} : vector<2x1792xf32>, vector<1792x128xf32>, vector<2x128xf32> -> vector<2x128xf32>
      %c0_15 = arith.constant 0 : index
      %c0_16 = arith.constant 0 : index
      %17 = vector.load %arg3[%c0_15, %c0_16] : memref<1x128xf32, #tpu.memory_space<vmem>>, vector<1x128xf32>
      %18 = vector.broadcast %17 : vector<1x128xf32> to vector<2x128xf32>
      %19 = arith.addf %16, %18 : vector<2x128xf32>
      %c0_17 = arith.constant 0 : index
      %c0_18 = arith.constant 0 : index
      %20 = vector.load %arg4[%c0_17, %c0_18] : memref<2x128xf32, #tpu.memory_space<vmem>>, vector<2x128xf32>
      tpu.vector_store %arg4[%c0_17, %c0_18], %19 {strides = array<i32>} : memref<2x128xf32, #tpu.memory_space<vmem>>, vector<2x128xf32>,
    } else {
    }
    return
  }
  func.func @transform_0(%arg0: i32) -> (i32, i32, i32) {
    %c0_i32 = arith.constant 0 : i32
    %c0_i32_0 = arith.constant 0 : i32
    %c0_i32_1 = arith.constant 0 : i32
    return %c0_i32, %arg0, %c0_i32_0 : i32, i32, i32
  }
  func.func @transform_1(%arg0: i32) -> (i32, i32) {
    %c0_i32 = arith.constant 0 : i32
    %c0_i32_0 = arith.constant 0 : i32
    %c0_i32_1 = arith.constant 0 : i32
    return %c0_i32, %c0_i32_0 : i32, i32
  }
  func.func @transform_2(%arg0: i32) -> (i32, i32) {
    %c0_i32 = arith.constant 0 : i32
    %c0_i32_0 = arith.constant 0 : i32
    %c0_i32_1 = arith.constant 0 : i32
    return %c0_i32, %c0_i32_0 : i32, i32
  }
  func.func @transform_3(%arg0: i32) -> (i32, i32) {
    %c0_i32 = arith.constant 0 : i32
    %c0_i32_0 = arith.constant 0 : i32
    %c0_i32_1 = arith.constant 0 : i32
    return %c0_i32, %c0_i32_0 : i32, i32
  }
}

</mosaic_0001>

<bundles_post_ra>
// kernel: effnetv2_forward.15
= control target key start
LH: loop header
LB: loop body
LE: loop exit
PB: predicated region body
PF: predicated region fallthrough
CT: control target
= control target key end

     0   :  { %s842_s1 = inlined_call_operand.vmem [shape: bf16[128,128], index: 1, kind: input, shape index: {}]   ;;  %s843_s0 = inlined_call_operand.vmem [shape: bf16[1,128,128], index: 0, kind: input, shape index: {}]   ;;  %s844_s2 = inlined_call_operand.vmem [shape: f32[1,128], index: 2, kind: input, shape index: {}]   ;;  %s845_s3 = inlined_call_operand.vmem [shape: bf16[1,128,128], index: 3, kind: input, shape index: {}]   ;;  %s846_s4 = inlined_call_operand.vmem [shape: bf16[1,128,128], index: 4, kind: output, shape index: {}]  }
   0x1   :  { %v684_v0 = vld [vmem:[%s842_s1 + $0x38] sm:$0xff]   ;;  %v685_v1 = vld [vmem:[%s842_s1 + $0x30] sm:$0xff]   ;;  %v686_v2 = vld [vmem:[%s842_s1 + $0x28] sm:$0xff]  }
   0x2   :  { %636 = vmatprep.subr.bf16.mxu0 %v684_v0  ;;  %668 = vmatprep.subr.bf16.mxu1 %v684_v0  ;;  %v687_v3 = vld [vmem:[%s842_s1 + $0x20] sm:$0xff]   ;;  %v688_v6 = vld [vmem:[%s842_s1 + $0x18] sm:$0xff]   ;;  %v689_v7 = vld [vmem:[%s842_s1 + $0x10] sm:$0xff]  }
   0x3   :  { %637 = vmatpush3.bf16.msra.mxu0 %v684_v0  ;;  %676 = vmatpush3.bf16.msra.mxu1 %v684_v0  ;;  %v692_v4 = vld [vmem:[%s843_s0] sm:$0xff]   ;;  %v690_v8 = vld [vmem:[%s842_s1 + $0x8] sm:$0xff]   ;;  %v696_v12 = vld [vmem:[%s843_s0 + $0x10] sm:$0xff]  }
   0x4   :  { %638 = vmatprep.subr.bf16.mxu0 %v685_v1  ;;  %669 = vmatprep.subr.bf16.mxu1 %v685_v1  ;;  %v693_v5 = vld [vmem:[%s843_s0 + $0x20] sm:$0xff]   ;;  %v694_v10 = vld [vmem:[%s843_s0 + $0x8] sm:$0xff]   ;;  %v697_v13 = vld [vmem:[%s843_s0 + $0x30] sm:$0xff]  }
   0x5   :  { %652 = vmatprep.mubr.bf16.mxu0 %v692_v4  ;;  %660 = vmatprep.mubr.bf16.mxu1 %v693_v5  ;;  %v691_v9 = vld [vmem:[%s842_s1] sm:$0xff]   ;;  %v695_v11 = vld [vmem:[%s843_s0 + $0x28] sm:$0xff]   ;;  %v698_v14 = vld [vmem:[%s843_s0 + $0x18] sm:$0xff]  }
   0x6   :  { %v699_v15 = vld [vmem:[%s843_s0 + $0x38] sm:$0xff]   ;;  %v776_v16 = vld [vmem:[%s844_s2] ss:$0 sm:$0xff]  ;;  %v606_v17 = vld [vmem:[%s845_s3 + $0x8] sm:$0xff]  }
   0x7   :  { %639 = vmatpush3.bf16.msra.mxu0 %v685_v1  ;;  %677 = vmatpush3.bf16.msra.mxu1 %v685_v1  ;;  %v610_v18 = vld [vmem:[%s845_s3 + $0x28] sm:$0xff]   ;;  %v535_v21 = vld [vmem:[%s845_s3] sm:$0xff]   ;;  %v540_v24 = vunpack.c.l.bf16 %v606_v17  ;;  %v541_v29 = vunpack.c.h.bf16 %v606_v17  ;;  %v608_v49 = vld [vmem:[%s845_s3 + $0x18] sm:$0xff]  }
   0x8   :  { %640 = vmatprep.subr.bf16.mxu0 %v686_v2  ;;  %670 = vmatprep.subr.bf16.mxu1 %v686_v2  ;;  %v609_v22 = vld [vmem:[%s845_s3 + $0x20] sm:$0xff]   ;;  %v556_v26 = vunpack.c.l.bf16 %v610_v18  ;;  %v557_v30 = vunpack.c.h.bf16 %v610_v18  ;;  %v536_v32 = vunpack.c.l.bf16 %v535_v21  ;;  %v537_v39 = vunpack.c.h.bf16 %v535_v21  ;;  %v612_v50 = vld [vmem:[%s845_s3 + $0x38] sm:$0xff]   ;;  %v607_v59 = vld [vmem:[%s845_s3 + $0x10] sm:$0xff]  }
   0x9   :  { %v552_v34 = vunpack.c.l.bf16 %v609_v22  ;;  %v553_v40 = vunpack.c.h.bf16 %v609_v22  ;;  %v611_v60 = vld [vmem:[%s845_s3 + $0x30] sm:$0xff]   ;;  %v548_v62 = vunpack.c.l.bf16 %v608_v49  ;;  %v564_v0 = vunpack.c.l.bf16 %v612_v50 }
   0xa   :  { %v549_v5 = vunpack.c.h.bf16 %v608_v49  ;;  %v561_v17 = vunpack.c.h.bf16 %v611_v60 }
   0xb   :  { %641 = vmatpush3.bf16.msra.mxu0 %v686_v2  ;;  %678 = vmatpush3.bf16.msra.mxu1 %v686_v2 }
   0xc   :  { %642 = vmatprep.subr.bf16.mxu0 %v687_v3  ;;  %671 = vmatprep.subr.bf16.mxu1 %v687_v3 }
   0xf   :  { %643 = vmatpush3.bf16.msra.mxu0 %v687_v3  ;;  %679 = vmatpush3.bf16.msra.mxu1 %v687_v3 }
  0x10   :  { %644 = vmatprep.subr.bf16.mxu0 %v688_v6  ;;  %672 = vmatprep.subr.bf16.mxu1 %v688_v6 }
  0x13   :  { %645 = vmatpush3.bf16.msra.mxu0 %v688_v6  ;;  %680 = vmatpush3.bf16.msra.mxu1 %v688_v6  ;;  %v565_v6 = vunpack.c.h.bf16 %v612_v50 }
  0x14   :  { %646 = vmatprep.subr.bf16.mxu0 %v689_v7  ;;  %673 = vmatprep.subr.bf16.mxu1 %v689_v7 }
  0x17   :  { %647 = vmatpush3.bf16.msra.mxu0 %v689_v7  ;;  %681 = vmatpush3.bf16.msra.mxu1 %v689_v7 }
  0x18   :  { %648 = vmatprep.subr.bf16.mxu0 %v690_v8  ;;  %674 = vmatprep.subr.bf16.mxu1 %v690_v8 }
  0x1b   :  { %649 = vmatpush3.bf16.msra.mxu0 %v690_v8  ;;  %682 = vmatpush3.bf16.msra.mxu1 %v690_v8  ;;  %v544_v8 = vunpack.c.l.bf16 %v607_v59 }
  0x1c   :  { %650 = vmatprep.subr.bf16.mxu0 %v691_v9  ;;  %675 = vmatprep.subr.bf16.mxu1 %v691_v9 }
  0x1f   :  { %651 = vmatpush3.bf16.msra.mxu0 %v691_v9  ;;  %683 = vmatpush3.bf16.msra.mxu1 %v691_v9 }
  0x22   :  { %653 = vmatmul.mubr.bf16.vlgmr.msra.gmra.mxu0 %v694_v10  ;;  %661 = vmatmul.mubr.bf16.vlgmr.msra.gmra.mxu1 %v695_v11  ;;  %v560_v10 = vunpack.c.l.bf16 %v611_v60 }
  0x23   :  { %656 = vmatprep.mubr.bf16.mxu0 %v696_v12  ;;  %664 = vmatprep.mubr.bf16.mxu1 %v697_v13 }
  0x2a   :  { %657 = vmatmul.mubr.bf16.gmra.mxu0 %v698_v14  ;;  %665 = vmatmul.mubr.bf16.gmra.mxu1 %v699_v15  ;;  %v545_v15 = vunpack.c.h.bf16 %v607_v59 }
  0xe2   :  { %v654_v19 = vpop.f32.mrf.mxu0  ;;  %v662_v20 = vpop.f32.mrf.mxu1 }
  0xe3   :  { %v339_v23 = vadd.f32 %v654_v19, %v776_v16  ;;  %v347_v25 = vadd.f32 %v662_v20, %v776_v16 }
  0xe4   :  { %v216_v27 = vpop.f32.mrf.mxu0  ;;  %v248_v28 = vpop.f32.mrf.mxu1 }
  0xe5   :  { %v337_v31 = vadd.f32 %v776_v16, %v216_v27  ;;  %v345_v33 = vadd.f32 %v776_v16, %v248_v28  ;;  %v387_v41 = vadd.f32 %v540_v24, %v339_v23  ;;  %v395_v42 = vadd.f32 %v556_v26, %v347_v25 }
  0xe6   :  { %v655_v35 = vpop.f32.mrf.mxu0  ;;  %v663_v36 = vpop.f32.mrf.mxu1 }
  0xe7   :  { %v340_v37 = vadd.f32 %v655_v35, %v776_v16  ;;  %v348_v38 = vadd.f32 %v663_v36, %v776_v16  ;;  %v385_v51 = vadd.f32 %v536_v32, %v337_v31  ;;  %v393_v52 = vadd.f32 %v552_v34, %v345_v33 }
  0xe8   :  { %v219_v43 = vpop.f32.mrf.mxu0  ;;  %v251_v44 = vpop.f32.mrf.mxu1 }
  0xe9   :  { %v388_v45 = vadd.f32 %v541_v29, %v340_v37  ;;  %v396_v46 = vadd.f32 %v557_v30, %v348_v38  ;;  %v338_v47 = vadd.f32 %v776_v16, %v219_v43  ;;  %v346_v48 = vadd.f32 %v776_v16, %v251_v44 }
  0xea   :  { %v658_v53 = vpop.f32.mrf.mxu0  ;;  %v666_v54 = vpop.f32.mrf.mxu1 }
  0xeb   :  { %v574_v55 = vpack.c.bf16 %v388_v45, %v387_v41  ;;  %v594_v56 = vpack.c.bf16 %v396_v46, %v395_v42  ;;  %v386_v57 = vadd.f32 %v537_v39, %v338_v47  ;;  %v394_v58 = vadd.f32 %v553_v40, %v346_v48 }
  0xec   :  { %v343_v61 = vadd.f32 %v658_v53, %v776_v16  ;;  %v351_v63 = vadd.f32 %v666_v54, %v776_v16  ;;  %v232_v1 = vpop.f32.mrf.mxu0  ;;  %v264_v2 = vpop.f32.mrf.mxu1 }
  0xed   :  { %613 = vst [vmem:[%s846_s4 + $0x8] sm:$0xff] %v574_v55   ;;  %617 = vst [vmem:[%s846_s4 + $0x28] sm:$0xff] %v594_v56   ;;  %v569_v3 = vpack.c.bf16 %v386_v57, %v385_v51  ;;  %v589_v4 = vpack.c.bf16 %v394_v58, %v393_v52  ;;  %v341_v7 = vadd.f32 %v776_v16, %v232_v1 }
  0xee   :  { %v349_v9 = vadd.f32 %v776_v16, %v264_v2  ;;  %v659_v11 = vpop.f32.mrf.mxu0  ;;  %v667_v12 = vpop.f32.mrf.mxu1  ;;  %v391_v18 = vadd.f32 %v548_v62, %v343_v61  ;;  %v399_v19 = vadd.f32 %v564_v0, %v351_v63 }
  0xef   :  { %570 = vst [vmem:[%s846_s4] sm:$0xff] %v569_v3   ;;  %616 = vst [vmem:[%s846_s4 + $0x20] sm:$0xff] %v589_v4   ;;  %v344_v13 = vadd.f32 %v659_v11, %v776_v16  ;;  %v352_v14 = vadd.f32 %v667_v12, %v776_v16  ;;  %v389_v26 = vadd.f32 %v544_v8, %v341_v7 }
  0xf0   :  { %v235_v20 = vpop.f32.mrf.mxu0  ;;  %v267_v21 = vpop.f32.mrf.mxu1  ;;  %v397_v27 = vadd.f32 %v560_v10, %v349_v9 }
  0xf1   :  { %v392_v22 = vadd.f32 %v549_v5, %v344_v13  ;;  %v400_v23 = vadd.f32 %v565_v6, %v352_v14  ;;  %v342_v24 = vadd.f32 %v776_v16, %v235_v20  ;;  %v350_v25 = vadd.f32 %v776_v16, %v267_v21 }
  0xf3   :  { %v584_v28 = vpack.c.bf16 %v392_v22, %v391_v18  ;;  %v604_v29 = vpack.c.bf16 %v400_v23, %v399_v19  ;;  %v390_v30 = vadd.f32 %v545_v15, %v342_v24  ;;  %v398_v31 = vadd.f32 %v561_v17, %v350_v25 }
  0xf5   :  { %615 = vst [vmem:[%s846_s4 + $0x18] sm:$0xff] %v584_v28   ;;  %619 = vst [vmem:[%s846_s4 + $0x38] sm:$0xff] %v604_v29   ;;  %v579_v32 = vpack.c.bf16 %v390_v30, %v389_v26  ;;  %v599_v33 = vpack.c.bf16 %v398_v31, %v397_v27 }
  0xf7   :  { %614 = vst [vmem:[%s846_s4 + $0x10] sm:$0xff] %v579_v32   ;;  %618 = vst [vmem:[%s846_s4 + $0x30] sm:$0xff] %v599_v33  }

// kernel: effnetv2_forward.16
= control target key start
LH: loop header
LB: loop body
LE: loop exit
PB: predicated region body
PF: predicated region fallthrough
CT: control target
= control target key end

     0   :  { %s961_s1 = inlined_call_operand.vmem [shape: bf16[128,128], index: 1, kind: input, shape index: {}]   ;;  %s962_s0 = inlined_call_operand.vmem [shape: bf16[1,128,128], index: 0, kind: input, shape index: {}]   ;;  %s963_s2 = inlined_call_operand.vmem [shape: f32[1,128], index: 2, kind: input, shape index: {}]   ;;  %s964_s3 = inlined_call_operand.vmem [shape: bf16[1,128,128], index: 3, kind: output, shape index: {}]  }
   0x1   :  { %v722_v0 = vld [vmem:[%s961_s1 + $0x38] sm:$0xff]   ;;  %v723_v1 = vld [vmem:[%s961_s1 + $0x30] sm:$0xff]   ;;  %v724_v2 = vld [vmem:[%s961_s1 + $0x28] sm:$0xff]  }
   0x2   :  { %674 = vmatprep.subr.bf16.mxu0 %v722_v0  ;;  %706 = vmatprep.subr.bf16.mxu1 %v722_v0  ;;  %v725_v3 = vld [vmem:[%s961_s1 + $0x20] sm:$0xff]   ;;  %v726_v6 = vld [vmem:[%s961_s1 + $0x18] sm:$0xff]   ;;  %v727_v7 = vld [vmem:[%s961_s1 + $0x10] sm:$0xff]  }
   0x3   :  { %675 = vmatpush3.bf16.msra.mxu0 %v722_v0  ;;  %714 = vmatpush3.bf16.msra.mxu1 %v722_v0  ;;  %v730_v4 = vld [vmem:[%s962_s0] sm:$0xff]   ;;  %v728_v8 = vld [vmem:[%s961_s1 + $0x8] sm:$0xff]   ;;  %v734_v12 = vld [vmem:[%s962_s0 + $0x10] sm:$0xff]  }
   0x4   :  { %676 = vmatprep.subr.bf16.mxu0 %v723_v1  ;;  %707 = vmatprep.subr.bf16.mxu1 %v723_v1  ;;  %v731_v5 = vld [vmem:[%s962_s0 + $0x20] sm:$0xff]   ;;  %v732_v10 = vld [vmem:[%s962_s0 + $0x8] sm:$0xff]   ;;  %v735_v13 = vld [vmem:[%s962_s0 + $0x30] sm:$0xff]  }
   0x5   :  { %690 = vmatprep.mubr.bf16.mxu0 %v730_v4  ;;  %698 = vmatprep.mubr.bf16.mxu1 %v731_v5  ;;  %v729_v9 = vld [vmem:[%s961_s1] sm:$0xff]   ;;  %v733_v11 = vld [vmem:[%s962_s0 + $0x28] sm:$0xff]   ;;  %v736_v14 = vld [vmem:[%s962_s0 + $0x18] sm:$0xff]  }
   0x6   :  { %v737_v15 = vld [vmem:[%s962_s0 + $0x38] sm:$0xff]   ;;  %v562_v16 = vld [vmem:[%s963_s2] ss:$0 sm:$0xff] }
   0x7   :  { %677 = vmatpush3.bf16.msra.mxu0 %v723_v1  ;;  %715 = vmatpush3.bf16.msra.mxu1 %v723_v1 }
   0x8   :  { %678 = vmatprep.subr.bf16.mxu0 %v724_v2  ;;  %708 = vmatprep.subr.bf16.mxu1 %v724_v2 }
   0xb   :  { %679 = vmatpush3.bf16.msra.mxu0 %v724_v2  ;;  %716 = vmatpush3.bf16.msra.mxu1 %v724_v2 }
   0xc   :  { %680 = vmatprep.subr.bf16.mxu0 %v725_v3  ;;  %709 = vmatprep.subr.bf16.mxu1 %v725_v3 }
   0xf   :  { %681 = vmatpush3.bf16.msra.mxu0 %v725_v3  ;;  %717 = vmatpush3.bf16.msra.mxu1 %v725_v3 }
  0x10   :  { %682 = vmatprep.subr.bf16.mxu0 %v726_v6  ;;  %710 = vmatprep.subr.bf16.mxu1 %v726_v6 }
  0x13   :  { %683 = vmatpush3.bf16.msra.mxu0 %v726_v6  ;;  %718 = vmatpush3.bf16.msra.mxu1 %v726_v6 }
  0x14   :  { %684 = vmatprep.subr.bf16.mxu0 %v727_v7  ;;  %711 = vmatprep.subr.bf16.mxu1 %v727_v7 }
  0x17   :  { %685 = vmatpush3.bf16.msra.mxu0 %v727_v7  ;;  %719 = vmatpush3.bf16.msra.mxu1 %v727_v7 }
  0x18   :  { %686 = vmatprep.subr.bf16.mxu0 %v728_v8  ;;  %712 = vmatprep.subr.bf16.mxu1 %v728_v8 }
  0x1b   :  { %687 = vmatpush3.bf16.msra.mxu0 %v728_v8  ;;  %720 = vmatpush3.bf16.msra.mxu1 %v728_v8 }
  0x1c   :  { %688 = vmatprep.subr.bf16.mxu0 %v729_v9  ;;  %713 = vmatprep.subr.bf16.mxu1 %v729_v9 }
  0x1f   :  { %689 = vmatpush3.bf16.msra.mxu0 %v729_v9  ;;  %721 = vmatpush3.bf16.msra.mxu1 %v729_v9 }
  0x22   :  { %691 = vmatmul.mubr.bf16.vlgmr.msra.gmra.mxu0 %v732_v10  ;;  %699 = vmatmul.mubr.bf16.vlgmr.msra.gmra.mxu1 %v733_v11 }
  0x23   :  { %694 = vmatprep.mubr.bf16.mxu0 %v734_v12  ;;  %702 = vmatprep.mubr.bf16.mxu1 %v735_v13 }
  0x2a   :  { %695 = vmatmul.mubr.bf16.gmra.mxu0 %v736_v14  ;;  %703 = vmatmul.mubr.bf16.gmra.mxu1 %v737_v15 }
  0xe2   :  { %v692_v17 = vpop.f32.mrf.mxu0  ;;  %v700_v18 = vpop.f32.mrf.mxu1 }
  0xe3   :  { %v873_v19 = vadd.f32 %v692_v17, %v562_v16  ;;  %v875_v20 = vadd.f32 %v700_v18, %v562_v16 }
  0xe4   :  { %v213_v21 = vpop.f32.mrf.mxu0  ;;  %v245_v22 = vpop.f32.mrf.mxu1 }
  0xe5   :  { %v565_v23 = vmul.f32 -1.442695, %v873_v19  ;;  %v573_v24 = vmul.f32 -1.442695, %v875_v20  ;;  %v879_v25 = vadd.f32 %v562_v16, %v213_v21  ;;  %v881_v26 = vadd.f32 %v562_v16, %v245_v22 }
  0xe6   :  { %v693_v27 = vpop.f32.mrf.mxu0  ;;  %v701_v28 = vpop.f32.mrf.mxu1 }
  0xe7   :  { %738 = vpow2.f32 %v565_v23  ;;  %v563_v29 = vmul.f32 -1.442695, %v879_v25  ;;  %v571_v30 = vmul.f32 -1.442695, %v881_v26  ;;  %v885_v31 = vadd.f32 %v693_v27, %v562_v16 }
  0xe8   :  { %740 = vpow2.f32 %v573_v24  ;;  %v887_v32 = vadd.f32 %v701_v28, %v562_v16  ;;  %v216_v33 = vpop.f32.mrf.mxu0  ;;  %v248_v34 = vpop.f32.mrf.mxu1 }
  0xe9   :  { %742 = vpow2.f32 %v563_v29  ;;  %v566_v35 = vmul.f32 -1.442695, %v885_v31  ;;  %v890_v36 = vadd.f32 %v562_v16, %v216_v33  ;;  %v892_v37 = vadd.f32 %v562_v16, %v248_v34 }
  0xea   :  { %744 = vpow2.f32 %v571_v30  ;;  %v574_v38 = vmul.f32 -1.442695, %v887_v32  ;;  %v696_v39 = vpop.f32.mrf.mxu0  ;;  %v704_v40 = vpop.f32.mrf.mxu1 }
  0xeb   :  { %746 = vpow2.f32 %v566_v35  ;;  %v564_v41 = vmul.f32 -1.442695, %v890_v36  ;;  %v572_v42 = vmul.f32 -1.442695, %v892_v37  ;;  %v897_v43 = vadd.f32 %v696_v39, %v562_v16 }
  0xec   :  { %748 = vpow2.f32 %v574_v38  ;;  %v899_v44 = vadd.f32 %v704_v40, %v562_v16  ;;  %v229_v45 = vpop.f32.mrf.mxu0  ;;  %v261_v46 = vpop.f32.mrf.mxu1 }
  0xed   :  { %750 = vpow2.f32 %v564_v41  ;;  %v569_v47 = vmul.f32 -1.442695, %v897_v43  ;;  %v902_v48 = vadd.f32 %v562_v16, %v229_v45  ;;  %v904_v49 = vadd.f32 %v562_v16, %v261_v46 }
  0xee   :  { %752 = vpow2.f32 %v572_v42  ;;  %v577_v50 = vmul.f32 -1.442695, %v899_v44  ;;  %v697_v51 = vpop.f32.mrf.mxu0  ;;  %v705_v52 = vpop.f32.mrf.mxu1 }
  0xef   :  { %754 = vpow2.f32 %v569_v47  ;;  %v567_v53 = vmul.f32 -1.442695, %v902_v48  ;;  %v575_v54 = vmul.f32 -1.442695, %v904_v49  ;;  %v909_v55 = vadd.f32 %v697_v51, %v562_v16 }
  0xf0   :  { %756 = vpow2.f32 %v577_v50  ;;  %v911_v56 = vadd.f32 %v705_v52, %v562_v16  ;;  %v232_v57 = vpop.f32.mrf.mxu0  ;;  %v264_v58 = vpop.f32.mrf.mxu1 }
  0xf1   :  { %758 = vpow2.f32 %v567_v53  ;;  %v570_v59 = vmul.f32 -1.442695, %v909_v55  ;;  %v914_v60 = vadd.f32 %v562_v16, %v232_v57  ;;  %v916_v61 = vadd.f32 %v562_v16, %v264_v58 }
  0xf2   :  { %760 = vpow2.f32 %v575_v54  ;;  %v578_v62 = vmul.f32 -1.442695, %v911_v56 }
  0xf3   :  { %762 = vpow2.f32 %v570_v59  ;;  %v568_v63 = vmul.f32 -1.442695, %v914_v60  ;;  %v576_v0 = vmul.f32 -1.442695, %v916_v61 }
  0xf4   :  { %v739_v1 = vpop.eup %738  ;;  %764 = vpow2.f32 %v578_v62 }
  0xf5   :  { %v741_v2 = vpop.eup %740  ;;  %v400_v3 = vadd.f32 1.0, %v739_v1  ;;  %766 = vpow2.f32 %v568_v63 }
  0xf6   :  { %v743_v4 = vpop.eup %742  ;;  %v408_v5 = vadd.f32 1.0, %v741_v2  ;;  %768 = vpow2.f32 %v576_v0 }
  0xf7   :  { %v745_v6 = vpop.eup %744  ;;  %770 = vrcp.f32 %v400_v3  ;;  %v398_v7 = vadd.f32 1.0, %v743_v4 }
  0xf8   :  { %v747_v8 = vpop.eup %746  ;;  %772 = vrcp.f32 %v408_v5  ;;  %v406_v9 = vadd.f32 1.0, %v745_v6 }
  0xf9   :  { %v749_v10 = vpop.eup %748  ;;  %774 = vrcp.f32 %v398_v7  ;;  %v401_v11 = vadd.f32 1.0, %v747_v8 }
  0xfa   :  { %v751_v12 = vpop.eup %750  ;;  %776 = vrcp.f32 %v406_v9  ;;  %v409_v13 = vadd.f32 1.0, %v749_v10 }
  0xfb   :  { %v753_v14 = vpop.eup %752  ;;  %778 = vrcp.f32 %v401_v11  ;;  %v399_v15 = vadd.f32 1.0, %v751_v12 }
  0xfc   :  { %v755_v16 = vpop.eup %754  ;;  %780 = vrcp.f32 %v409_v13  ;;  %v407_v17 = vadd.f32 1.0, %v753_v14 }
  0xfd   :  { %v757_v18 = vpop.eup %756  ;;  %782 = vrcp.f32 %v399_v15  ;;  %v404_v21 = vadd.f32 1.0, %v755_v16 }
  0xfe   :  { %v759_v22 = vpop.eup %758  ;;  %784 = vrcp.f32 %v407_v17  ;;  %v412_v23 = vadd.f32 1.0, %v757_v18 }
  0xff   :  { %v761_v24 = vpop.eup %760  ;;  %786 = vrcp.f32 %v404_v21  ;;  %v402_v27 = vadd.f32 1.0, %v759_v22 }
 0x100   :  { %v763_v28 = vpop.eup %762  ;;  %788 = vrcp.f32 %v412_v23  ;;  %v410_v29 = vadd.f32 1.0, %v761_v24 }
 0x101   :  { %v765_v30 = vpop.eup %764  ;;  %790 = vrcp.f32 %v402_v27  ;;  %v405_v33 = vadd.f32 1.0, %v763_v28 }
 0x102   :  { %v767_v34 = vpop.eup %766  ;;  %792 = vrcp.f32 %v410_v29  ;;  %v413_v35 = vadd.f32 1.0, %v765_v30 }
 0x103   :  { %v769_v38 = vpop.eup %768  ;;  %794 = vrcp.f32 %v405_v33  ;;  %v403_v39 = vadd.f32 1.0, %v767_v34 }
 0x104   :  { %v771_v40 = vpop.eup %770  ;;  %796 = vrcp.f32 %v413_v35  ;;  %v411_v41 = vadd.f32 1.0, %v769_v38 }
 0x105   :  { %v773_v42 = vpop.eup %772  ;;  %798 = vrcp.f32 %v403_v39  ;;  %v448_v51 = vmul.f32 %v771_v40, %v873_v19 }
 0x106   :  { %v775_v45 = vpop.eup %774  ;;  %800 = vrcp.f32 %v411_v41  ;;  %v456_v54 = vmul.f32 %v773_v42, %v875_v20 }
 0x107   :  { %v777_v46 = vpop.eup %776  ;;  %v446_v59 = vmul.f32 %v775_v45, %v879_v25 }
 0x108   :  { %v779_v47 = vpop.eup %778  ;;  %v454_v1 = vmul.f32 %v777_v46, %v881_v26 }
 0x109   :  { %v781_v50 = vpop.eup %780  ;;  %v449_v52 = vmul.f32 %v779_v47, %v885_v31 }
 0x10a   :  { %v783_v53 = vpop.eup %782  ;;  %v457_v57 = vmul.f32 %v781_v50, %v887_v32 }
 0x10b   :  { %v785_v58 = vpop.eup %784  ;;  %v619_v62 = vpack.c.bf16 %v449_v52, %v448_v51  ;;  %v447_v63 = vmul.f32 %v783_v53, %v890_v36 }
 0x10c   :  { %v787_v0 = vpop.eup %786  ;;  %v639_v2 = vpack.c.bf16 %v457_v57, %v456_v54  ;;  %v455_v3 = vmul.f32 %v785_v58, %v892_v37 }
 0x10d   :  { %v789_v19 = vpop.eup %788  ;;  %651 = vst [vmem:[%s964_s3 + $0x8] sm:$0xff] %v619_v62   ;;  %v614_v20 = vpack.c.bf16 %v447_v63, %v446_v59  ;;  %v452_v37 = vmul.f32 %v787_v0, %v897_v43 }
 0x10e   :  { %v791_v31 = vpop.eup %790  ;;  %655 = vst [vmem:[%s964_s3 + $0x28] sm:$0xff] %v639_v2   ;;  %v634_v25 = vpack.c.bf16 %v455_v3, %v454_v1  ;;  %v460_v6 = vmul.f32 %v789_v19, %v899_v44 }
 0x10f   :  { %v793_v32 = vpop.eup %792  ;;  %615 = vst [vmem:[%s964_s3] sm:$0xff] %v614_v20   ;;  %v450_v9 = vmul.f32 %v791_v31, %v902_v48 }
 0x110   :  { %v795_v26 = vpop.eup %794  ;;  %654 = vst [vmem:[%s964_s3 + $0x20] sm:$0xff] %v634_v25   ;;  %v458_v12 = vmul.f32 %v793_v32, %v904_v49 }
 0x111   :  { %v797_v36 = vpop.eup %796  ;;  %v453_v4 = vmul.f32 %v795_v26, %v909_v55 }
 0x112   :  { %v799_v5 = vpop.eup %798  ;;  %v461_v7 = vmul.f32 %v797_v36, %v911_v56 }
 0x113   :  { %v801_v8 = vpop.eup %800  ;;  %v629_v10 = vpack.c.bf16 %v453_v4, %v452_v37  ;;  %v451_v11 = vmul.f32 %v799_v5, %v914_v60 }
 0x114   :  { %v649_v13 = vpack.c.bf16 %v461_v7, %v460_v6  ;;  %v459_v14 = vmul.f32 %v801_v8, %v916_v61 }
 0x115   :  { %653 = vst [vmem:[%s964_s3 + $0x18] sm:$0xff] %v629_v10   ;;  %v624_v43 = vpack.c.bf16 %v451_v11, %v450_v9 }
 0x116   :  { %657 = vst [vmem:[%s964_s3 + $0x38] sm:$0xff] %v649_v13   ;;  %v644_v44 = vpack.c.bf16 %v459_v14, %v458_v12 }
 0x117   :  { %652 = vst [vmem:[%s964_s3 + $0x10] sm:$0xff] %v624_v43  }
 0x118   :  { %656 = vst [vmem:[%s964_s3 + $0x30] sm:$0xff] %v644_v44  }

// kernel: effnetv2_forward.13
= control target key start
LH: loop header
LB: loop body
LE: loop exit
PB: predicated region body
PF: predicated region fallthrough
CT: control target
= control target key end

     0   :  { %s2684_s12 = smov 0   ;;  %s2686_s13 = smov 0   ;;  %s3085_s0 = inlined_call_operand.vmem [shape: bf16[4,2,1,9,9,8], index: 0, kind: input, shape index: {}]   ;;  %s3086_s1 = inlined_call_operand.vmem [shape: bf16[9,8,128], index: 1, kind: input, shape index: {}]   ;;  %s3087_s2 = inlined_call_operand.vmem [shape: f32[1,128], index: 2, kind: input, shape index: {}]   ;;  %s3088_s3 = inlined_call_operand.vmem [shape: bf16[2,8,8,128], index: 3, kind: output, shape index: {}]  }
   0x1   :  { %s2688_s14 = smov 0   ;;  %s2690_s15 = smov 0  }
   0x2   :  { %s2692_s16 = smov 0  }
   0x3 LB: > { %s32_s17 = sadd.s32 1, %s2658_s15  ;;  %p48_p1 = scmp.ne.s32.totalorder %s2650_s13, %s2646_s12  ;;  %s2662_s16 = sphi %s2692_s16, %s13_s16   ;;  %s2658_s15 = sphi %s2690_s15, %s3094_s15   ;;  %s2654_s14 = sphi %s2688_s14, %s3093_s14   ;;  %s2650_s13 = sphi %s2686_s13, %s3092_s13   ;;  %s2646_s12 = sphi %s2684_s12, %s3091_s12  }
   0x4   : > { %p34_p0 = scmp.ge.s32.totalorder %s32_s17, 2  ;;  %p49_p2 = scmp.eq.s32.totalorder %s2662_s16, 0 }
   0x5   : > { %s41_s19 = sadd.s32 1, %s2650_s13  ;;  %p2186_p5 = scmp.ge.s32.totalorder %s2662_s16, 2 }
   0x6   : > { %s3096_s17 = smov (%p34_p0, %s32_s17), 0  ;;  %p50_p3 = por %p49_p2, %p48_p1 }
   0x7   : > { %s36_s18 = ssub.s32 %s2658_s15, %s3096_s17  ;;  %169 = sbr.rel (%p2186_p5) target bundleno = 35 (0x23), region = 24 }
   0x8   : > { %p39_p4 = scmp.eq.s32.totalorder %s36_s18, 0 }
   0xa   : > { %s2719_s20 = scalar_select %p39_p4, %s2650_s13, %s41_s19  }
   0xc   : > { %172 = sbr.rel (!%p50_p3) target bundleno = 35 (0x23), region = 28  ;;  %s174_s21 = sand.u32 (%p50_p3), 1, %s2650_s13  }
   0xd   : > { %s2526_s22 = smul.u32 (%p50_p3), 72, %s2658_s15 }
   0xe   : > { %s2525_s23 = smul.u32 (%p50_p3), 288, %s174_s21 }
   0xf   : > { %s2727_s26 = scalar_lea.vmem (%p50_p3), %s3085_s0, %s2526_s22 }
  0x10   : > { %v198_v0 = vld [vmem:[%s2727_s26] sm:$0xff] (%p50_p3)   ;;  %v202_v1 = vld [vmem:[%s2727_s26 + $0x8] sm:$0xff] (%p50_p3)   ;;  %v206_v2 = vld [vmem:[%s2727_s26 + $0x10] sm:$0xff] (%p50_p3)   ;;  %s2732_s27 = scalar_lea.vmem (%p50_p3), [#allocation2], %s2525_s23 }
  0x11   : > { %199 = vst [vmem:[%s2732_s27] sm:$0xff] %v198_v0   ;;  %203 = vst [vmem:[%s2732_s27 + $0x8] sm:$0xff] %v202_v1   ;;  %v210_v3 = vld [vmem:[%s2727_s26 + $0x18] sm:$0xff]   ;;  %v214_v4 = vld [vmem:[%s2727_s26 + $0x20] sm:$0xff]  }
  0x12   : > { %207 = vst [vmem:[%s2732_s27 + $0x10] sm:$0xff] %v206_v2   ;;  %v218_v5 = vld [vmem:[%s2727_s26 + $0x28] sm:$0xff]   ;;  %211 = vst [vmem:[%s2732_s27 + $0x18] sm:$0xff] %v210_v3   ;;  %v222_v6 = vld [vmem:[%s2727_s26 + $0x30] sm:$0xff]  }
  0x13   : > { %215 = vst [vmem:[%s2732_s27 + $0x20] sm:$0xff] %v214_v4   ;;  %219 = vst [vmem:[%s2732_s27 + $0x28] sm:$0xff] %v218_v5   ;;  %v226_v7 = vld [vmem:[%s2727_s26 + $0x38] sm:$0xff]   ;;  %v230_v8 = vld [vmem:[%s2727_s26 + $0x40] sm:$0xff]  }
  0x14   : > { %223 = vst [vmem:[%s2732_s27 + $0x30] sm:$0xff] %v222_v6   ;;  %227 = vst [vmem:[%s2732_s27 + $0x38] sm:$0xff] %v226_v7   ;;  %v234_v9 = vld [vmem:[%s2727_s26 + $0x90] sm:$0xff]   ;;  %v238_v10 = vld [vmem:[%s2727_s26 + $0x98] sm:$0xff]  }
  0x15   : > { %231 = vst [vmem:[%s2732_s27 + $0x40] sm:$0xff] %v230_v8   ;;  %v242_v11 = vld [vmem:[%s2727_s26 + $0xa0] sm:$0xff]   ;;  %235 = vst [vmem:[%s2732_s27 + $0x48] sm:$0xff] %v234_v9   ;;  %v246_v12 = vld [vmem:[%s2727_s26 + $0xa8] sm:$0xff]  }
  0x16   : > { %239 = vst [vmem:[%s2732_s27 + $0x50] sm:$0xff] %v238_v10   ;;  %243 = vst [vmem:[%s2732_s27 + $0x58] sm:$0xff] %v242_v11   ;;  %v250_v13 = vld [vmem:[%s2727_s26 + $0xb0] sm:$0xff]   ;;  %v254_v14 = vld [vmem:[%s2727_s26 + $0xb8] sm:$0xff]  }
  0x17   : > { %247 = vst [vmem:[%s2732_s27 + $0x60] sm:$0xff] %v246_v12   ;;  %251 = vst [vmem:[%s2732_s27 + $0x68] sm:$0xff] %v250_v13   ;;  %v258_v15 = vld [vmem:[%s2727_s26 + $0xc0] sm:$0xff]   ;;  %v262_v16 = vld [vmem:[%s2727_s26 + $0xc8] sm:$0xff]  }
  0x18   : > { %255 = vst [vmem:[%s2732_s27 + $0x70] sm:$0xff] %v254_v14   ;;  %v266_v17 = vld [vmem:[%s2727_s26 + $0xd0] sm:$0xff]   ;;  %259 = vst [vmem:[%s2732_s27 + $0x78] sm:$0xff] %v258_v15   ;;  %v270_v18 = vld [vmem:[%s2727_s26 + $0x120] sm:$0xff]  }
  0x19   : > { %263 = vst [vmem:[%s2732_s27 + $0x80] sm:$0xff] %v262_v16   ;;  %267 = vst [vmem:[%s2732_s27 + $0x88] sm:$0xff] %v266_v17   ;;  %v274_v19 = vld [vmem:[%s2727_s26 + $0x128] sm:$0xff]   ;;  %v278_v20 = vld [vmem:[%s2727_s26 + $0x130] sm:$0xff]  }
  0x1a   : > { %271 = vst [vmem:[%s2732_s27 + $0x90] sm:$0xff] %v270_v18   ;;  %275 = vst [vmem:[%s2732_s27 + $0x98] sm:$0xff] %v274_v19   ;;  %v282_v21 = vld [vmem:[%s2727_s26 + $0x138] sm:$0xff]   ;;  %v286_v22 = vld [vmem:[%s2727_s26 + $0x140] sm:$0xff]  }
  0x1b   : > { %279 = vst [vmem:[%s2732_s27 + $0xa0] sm:$0xff] %v278_v20   ;;  %v290_v23 = vld [vmem:[%s2727_s26 + $0x148] sm:$0xff]   ;;  %283 = vst [vmem:[%s2732_s27 + $0xa8] sm:$0xff] %v282_v21   ;;  %v294_v24 = vld [vmem:[%s2727_s26 + $0x150] sm:$0xff]  }
  0x1c   : > { %287 = vst [vmem:[%s2732_s27 + $0xb0] sm:$0xff] %v286_v22   ;;  %291 = vst [vmem:[%s2732_s27 + $0xb8] sm:$0xff] %v290_v23   ;;  %v298_v25 = vld [vmem:[%s2727_s26 + $0x158] sm:$0xff]   ;;  %v302_v26 = vld [vmem:[%s2727_s26 + $0x160] sm:$0xff]  }
  0x1d   : > { %295 = vst [vmem:[%s2732_s27 + $0xc0] sm:$0xff] %v294_v24   ;;  %299 = vst [vmem:[%s2732_s27 + $0xc8] sm:$0xff] %v298_v25   ;;  %v306_v27 = vld [vmem:[%s2727_s26 + $0x1b0] sm:$0xff]   ;;  %v310_v28 = vld [vmem:[%s2727_s26 + $0x1b8] sm:$0xff]  }
  0x1e   : > { %303 = vst [vmem:[%s2732_s27 + $0xd0] sm:$0xff] %v302_v26   ;;  %v314_v29 = vld [vmem:[%s2727_s26 + $0x1c0] sm:$0xff]   ;;  %307 = vst [vmem:[%s2732_s27 + $0xd8] sm:$0xff] %v306_v27   ;;  %v318_v30 = vld [vmem:[%s2727_s26 + $0x1c8] sm:$0xff]  }
  0x1f   : > { %311 = vst [vmem:[%s2732_s27 + $0xe0] sm:$0xff] %v310_v28   ;;  %315 = vst [vmem:[%s2732_s27 + $0xe8] sm:$0xff] %v314_v29   ;;  %v322_v31 = vld [vmem:[%s2727_s26 + $0x1d0] sm:$0xff]   ;;  %v326_v32 = vld [vmem:[%s2727_s26 + $0x1d8] sm:$0xff]  }
  0x20   : > { %319 = vst [vmem:[%s2732_s27 + $0xf0] sm:$0xff] %v318_v30   ;;  %323 = vst [vmem:[%s2732_s27 + $0xf8] sm:$0xff] %v322_v31   ;;  %v330_v33 = vld [vmem:[%s2727_s26 + $0x1e0] sm:$0xff]   ;;  %v334_v34 = vld [vmem:[%s2727_s26 + $0x1e8] sm:$0xff]  }
  0x21   : > { %327 = vst [vmem:[%s2732_s27 + $0x100] sm:$0xff] %v326_v32   ;;  %v338_v35 = vld [vmem:[%s2727_s26 + $0x1f0] sm:$0xff]   ;;  %331 = vst [vmem:[%s2732_s27 + $0x108] sm:$0xff] %v330_v33  }
  0x22   : > { %335 = vst [vmem:[%s2732_s27 + $0x110] sm:$0xff] %v334_v34   ;;  %339 = vst [vmem:[%s2732_s27 + $0x118] sm:$0xff] %v338_v35  }
  0x23 PF: > { %p2188_p6 = scmp.ge.s32.totalorder %s2662_s16, 1  ;;  %p508_p7 = scmp.lt.s32.totalorder %s2662_s16, 3 }
  0x25   : > { %p509_p8 = pnand %p2188_p6, %p508_p7 }
  0x26   : > { %s515_s30 = sand.u32 (!%p509_p8), 1, %s2646_s12   ;;  %p560_p9 = scmp.lt.s32.totalorder (!%p509_p8), %s2654_s14, 1 }
  0x27   : > { %512 = sbr.rel (%p509_p8) target bundleno = 364 (0x16c), region = 69 }
  0x28   : > { %s2527_s4 = smul.u32 (!%p509_p8), 288, %s515_s30 }
  0x2a   : > { %s2822_s9 = scalar_lea.vmem (!%p509_p8), [#allocation2], %s2527_s4 }
  0x2c   : > { %v2199_v36 = vld [vmem:[%s3086_s1 + $0x4] sm:$0xf]  ;;  %vm626_vm0 = vcmask 1043456   ;;  %v581_v38 = vld [vmem:[%s3086_s1] sm:$0xf]  ;;  %vm613_vm1 = vcmask 64512  }
  0x2d   : > { %2516 = vmatprep.subr.msk.bf16.mxu1 %vm626_vm0, %v2199_v36  ;;  %2515 = vmatprep.subr.msk.bf16.mxu0 %vm626_vm0, %v2199_v36  ;;  %v628_v37 = vsel %vm626_vm0, %v2199_v36, 0  ;;  %v2216_v39 = vld [vmem:[%s3086_s1 + $0x8] sm:$0xf]  ;;  %v728_v40 = vsel %vm626_vm0, %v581_v38, 0  ;;  %v2568_v42 = vld [vmem:[%s2822_s9 + $0x48] ss:$8 sps:$4 sm:$0xff]  }
  0x2e   : > { %2514 = vmatpush3.bf16.msra.mxu1 %v628_v37  ;;  %2424 = vmatpush3.bf16.msra.mxu0 %v628_v37  ;;  %v953_v41 = vsel %vm626_vm0, %v2216_v39, 0  ;;  %v2233_v43 = vld [vmem:[%s3086_s1 + $0xc] sm:$0xf]  ;;  %v2569_v44 = vld [vmem:[%s2822_s9 + $0x68] ss:$8 sps:$4 sm:$0xff]   ;;  %s3098_s14 = smov (!%p560_p9, %s2654_s14), 1 }
  0x2f   : > { %2517 = vmatprep.subr.msk.bf16.mxu1 %vm626_vm0, %v581_v38  ;;  %2518 = vmatprep.subr.msk.bf16.mxu0 %vm626_vm0, %v2216_v39  ;;  %vm811_vm2 = vsmask.f32 3328  ;;  %vm812_vm3 = vsmask.f32 7440  ;;  %v2570_v45 = vld [vmem:[%s2822_s9 + $0x58] ss:$8 sps:$4 sm:$0xff]  }
  0x30   : > { %2425 = vmatprep.mubr.msk.bf16.mxu0 %vm613_vm1, %v2568_v42  ;;  %v2250_v46 = vld [vmem:[%s3086_s1 + $0x10] sm:$0xf]  ;;  %2429 = vmatprep.mubr.msk.bf16.mxu1 %vm613_vm1, %v2569_v44  ;;  %v2571_v47 = vld [vmem:[%s2822_s9 + $0x78] ss:$8 sps:$4 sm:$0xff]   ;;  %v1072_v49 = vsel %vm626_vm0, %v2233_v43, 0  ;;  %vm2854_vm4 = vmor %vm811_vm2, %vm812_vm3  ;;  %s2354_s30 = sshll.u32 %s3098_s14, 5 }
  0x31   : > { %2426 = vmatmul.mubr.msk.bf16.vlgmr.msra.gmra.mxu0 %vm613_vm1, %v2570_v45  ;;  %v2572_v48 = vld [vmem:[%s2822_s9] ss:$8 sps:$4 sm:$0xff]   ;;  %2430 = vmatmul.mubr.msk.bf16.vlgmr.msra.gmra.mxu1 %vm613_vm1, %v2571_v47  ;;  %v796_v51 = vld [vmem:[%s2822_s9 + $0x4] sm:$0x1]  ;;  %v2573_v53 = vld [vmem:[%s2822_s9 + $0x10] ss:$8 sps:$4 sm:$0xff]   ;;  %s570_s6 = scalar_lea.vmem %s3088_s3, %s2354_s30 }
  0x32   : > { %2444 = vmatpush3.bf16.msra.mxu0 %v953_v41  ;;  %2434 = vmatpush3.bf16.msra.mxu1 %v728_v40  ;;  %v795_v50 = vld [vmem:[%s2822_s9] sm:$0xf]  ;;  %v797_v52 = vld [vmem:[%s2822_s9 + $0x8] sm:$0xf]  ;;  %v798_v54 = vld [vmem:[%s2822_s9 + $0xc] sm:$0x1] }
  0x33   : > { %2435 = vmatprep.mubr.msk.bf16.mxu1 %vm613_vm1, %v2572_v48  ;;  %2519 = vmatprep.subr.msk.bf16.mxu1 %vm626_vm0, %v2233_v43  ;;  %v815_v55 = vshrl.u32 %v795_v50, 16  ;;  %v818_v56 = vshll.u32 %v795_v50, 16  ;;  %v824_v57 = vshll.u32 %v796_v51, 16  ;;  %v829_v58 = vshrl.u32 %v797_v52, 16  ;;  %v799_v61 = vld [vmem:[%s2822_s9 + $0x10] sm:$0xf] }
  0x34   : > { %2520 = vmatprep.subr.msk.bf16.mxu0 %vm626_vm0, %v2250_v46  ;;  %v832_v59 = vshll.u32 %v797_v52, 16  ;;  %v838_v60 = vshll.u32 %v798_v54, 16  ;;  %v800_v62 = vld [vmem:[%s2822_s9 + $0x14] sm:$0x1]  ;;  %v801_v3 = vld [vmem:[%s2822_s9 + $0x18] sm:$0xf] }
  0x35   : > { %v817_v63 = vrot.slane %v815_v55, 4  ;;  %v820_v0 = vrot.slane %v818_v56, 5  ;;  %v826_v1 = vrot.slane %v824_v57, 5  ;;  %v831_v2 = vrot.slane %v829_v58, 4  ;;  %v802_v6 = vld [vmem:[%s2822_s9 + $0x1c] sm:$0x1] }
  0x36   : > { %v834_v4 = vrot.slane %v832_v59, 5  ;;  %v840_v5 = vrot.slane %v838_v60, 5  ;;  %v843_v7 = vshrl.u32 %v799_v61, 16  ;;  %v846_v8 = vshll.u32 %v799_v61, 16  ;;  %v2574_v22 = vld [vmem:[%s2822_s9 + $0x20] ss:$8 sps:$4 sm:$0xff]  }
  0x37   : > { %v821_v9 = vor.u32 %v820_v0, %v817_v63  ;;  %v852_v10 = vshll.u32 %v800_v62, 16  ;;  %v857_v11 = vshrl.u32 %v801_v3, 16  ;;  %v860_v12 = vshll.u32 %v801_v3, 16  ;;  %v2575_v29 = vld [vmem:[%s2822_s9 + $0x30] ss:$8 sps:$4 sm:$0xff]  }
  0x38   : > { %v835_v14 = vor.u32 %v834_v4, %v831_v2  ;;  %v845_v15 = vrot.slane %v843_v7, 4  ;;  %v848_v16 = vrot.slane %v846_v8, 5  ;;  %v866_v17 = vshll.u32 %v802_v6, 16  ;;  %v803_v30 = vld [vmem:[%s2822_s9 + $0x20] sm:$0xf] }
  0x39   : > { %2436 = vmatmul.mubr.msk.bf16.vlgmr.msra.gmra.mxu1 %vm613_vm1, %v2573_v53  ;;  %v822_v18 = vrot.slane %v821_v9, 4  ;;  %v854_v19 = vrot.slane %v852_v10, 5  ;;  %v859_v20 = vrot.slane %v857_v11, 4  ;;  %v862_v21 = vrot.slane %v860_v12, 5  ;;  %v804_v33 = vld [vmem:[%s2822_s9 + $0x24] sm:$0x1] }
  0x3a   : > { %v836_v23 = vrot.slane %v835_v14, 4  ;;  %2454 = vmatpush3.bf16.msra.mxu1 %v1072_v49  ;;  %v849_v24 = vor.u32 %v848_v16, %v845_v15  ;;  %v868_v25 = vrot.slane %v866_v17, 5  ;;  %v1191_v26 = vsel %vm626_vm0, %v2250_v46, 0  ;;  %2439 = vmatprep.mubr.msk.bf16.mxu1 %vm613_vm1, %v2574_v22  ;;  %v805_v34 = vld [vmem:[%s2822_s9 + $0x28] sm:$0xf] }
  0x3b   : > { %v827_v27 = vsel %vm2854_vm4, %v822_v18, %v826_v1  ;;  %v863_v28 = vor.u32 %v862_v21, %v859_v20  ;;  %v871_v35 = vshrl.u32 %v803_v30, 16  ;;  %v806_v38 = vld [vmem:[%s2822_s9 + $0x2c] sm:$0x1]  ;;  %v874_v39 = vshll.u32 %v803_v30, 16  ;;  %v807_v45 = vld [vmem:[%s2822_s9 + $0x30] sm:$0xf] }
  0x3c   : > { %v841_v31 = vsel %vm2854_vm4, %v836_v23, %v840_v5  ;;  %v850_v32 = vrot.slane %v849_v24, 4  ;;  %v880_v40 = vshll.u32 %v804_v33, 16  ;;  %v885_v43 = vshrl.u32 %v805_v34, 16  ;;  %v808_v50 = vld [vmem:[%s2822_s9 + $0x34] sm:$0x1] }
  0x3d   : > { %v2217_v36 = vcombine.low %v827_v27, %v841_v31  ;;  %v864_v37 = vrot.slane %v863_v28, 4  ;;  %v873_v42 = vrot.slane %v871_v35, 4  ;;  %v888_v44 = vshll.u32 %v805_v34, 16  ;;  %v809_v54 = vld [vmem:[%s2822_s9 + $0x38] sm:$0xf] }
  0x3e   : > { %v855_v41 = vsel %vm2854_vm4, %v850_v32, %v854_v19  ;;  %v876_v47 = vrot.slane %v874_v39, 5  ;;  %v882_v48 = vrot.slane %v880_v40, 5  ;;  %v894_v49 = vshll.u32 %v806_v38, 16  ;;  %v810_v55 = vld [vmem:[%s2822_s9 + $0x3c] sm:$0x1] }
  0x3f   : > { %2445 = vmatprep.mubr.msk.bf16.mxu0 %vm613_vm1, %v2217_v36  ;;  %v869_v46 = vsel %vm2854_vm4, %v864_v37, %v868_v25  ;;  %v887_v52 = vrot.slane %v885_v43, 4  ;;  %v890_v53 = vrot.slane %v888_v44, 5  ;;  %v899_v58 = vshrl.u32 %v807_v45, 16  ;;  %v2576_v4 = vld [vmem:[%s2822_s9 + $0x90] ss:$8 sps:$4 sm:$0xff]  }
  0x40   : > { %v2218_v51 = vcombine.low %v855_v41, %v869_v46  ;;  %v877_v56 = vor.u32 %v876_v47, %v873_v42  ;;  %v896_v57 = vrot.slane %v894_v49, 5  ;;  %v902_v59 = vshll.u32 %v807_v45, 16  ;;  %v2275_v8 = vld [vmem:[%s3086_s1 + $0x14] sm:$0xf]  ;;  %v2577_v16 = vld [vmem:[%s2822_s9 + $0xa0] ss:$8 sps:$4 sm:$0xff]  }
  0x41   : > { %2440 = vmatmul.mubr.msk.bf16.gmra.mxu1 %vm613_vm1, %v2575_v29  ;;  %v891_v60 = vor.u32 %v890_v53, %v887_v52  ;;  %v908_v61 = vshll.u32 %v808_v50, 16  ;;  %v913_v62 = vshrl.u32 %v809_v54, 16  ;;  %v916_v63 = vshll.u32 %v809_v54, 16  ;;  %2521 = vmatprep.subr.msk.bf16.mxu1 %vm626_vm0, %v2275_v8  ;;  %v2292_v22 = vld [vmem:[%s3086_s1 + $0x18] sm:$0xf] }
  0x42   : > { %2446 = vmatmul.mubr.msk.bf16.vlgmr.msra.gmra.mxu0 %vm613_vm1, %v2218_v51  ;;  %v878_v0 = vrot.slane %v877_v56, 4  ;;  %v901_v1 = vrot.slane %v899_v58, 4  ;;  %v904_v2 = vrot.slane %v902_v59, 5  ;;  %v922_v3 = vshll.u32 %v810_v55, 16  ;;  %2455 = vmatprep.mubr.msk.bf16.mxu1 %vm613_vm1, %v2576_v4  ;;  %v2578_v24 = vld [vmem:[%s2822_s9 + $0xd8] ss:$8 sps:$4 sm:$0xff]  }
  0x43   : > { %2464 = vmatpush3.bf16.msra.mxu0 %v1191_v26  ;;  %v892_v5 = vrot.slane %v891_v60, 4  ;;  %v915_v6 = vrot.slane %v913_v62, 4  ;;  %v918_v7 = vrot.slane %v916_v63, 5  ;;  %v910_v11 = vrot.slane %v908_v61, 5  ;;  %v2580_v25 = vld [vmem:[%s2822_s9 + $0xb0] ss:$8 sps:$4 sm:$0xff]  }
  0x44   : > { %v883_v9 = vsel %vm2854_vm4, %v878_v0, %v882_v48  ;;  %v905_v10 = vor.u32 %v904_v2, %v901_v1  ;;  %v924_v12 = vrot.slane %v922_v3, 5  ;;  %v1421_v19 = vsel %vm626_vm0, %v2275_v8, 0  ;;  %2522 = vmatprep.subr.msk.bf16.mxu0 %vm626_vm0, %v2292_v22  ;;  %v2581_v28 = vld [vmem:[%s2822_s9 + $0xc0] ss:$8 sps:$4 sm:$0xff]   ;;  %v2259_v29 = vld [vmem:[%s2822_s9 + $0x90] sm:$0xf] }
  0x45   : > { %v897_v14 = vsel %vm2854_vm4, %v892_v5, %v896_v57  ;;  %v919_v15 = vor.u32 %v918_v7, %v915_v6  ;;  %v1540_v27 = vsel %vm626_vm0, %v2292_v22, 0  ;;  %v2260_v30 = vld [vmem:[%s2822_s9 + $0x94] sm:$0x1]  ;;  %v2261_v31 = vld [vmem:[%s2822_s9 + $0x98] sm:$0xf]  ;;  %v1283_v34 = vshrl.u32 %v2259_v29, 16 }
  0x46   : > { %v2219_v17 = vcombine.low %v883_v9, %v897_v14  ;;  %v906_v18 = vrot.slane %v905_v10, 4  ;;  %v2262_v32 = vld [vmem:[%s2822_s9 + $0x9c] sm:$0x1]  ;;  %v2579_v33 = vld [vmem:[%s2822_s9 + $0xe8] ss:$8 sps:$4 sm:$0xff]   ;;  %v1286_v35 = vshll.u32 %v2259_v29, 16 }
  0x47   : > { %v920_v20 = vrot.slane %v919_v15, 4  ;;  %v1292_v36 = vshll.u32 %v2260_v30, 16  ;;  %v1297_v37 = vshrl.u32 %v2261_v31, 16  ;;  %v2309_v38 = vld [vmem:[%s3086_s1 + $0x1c] sm:$0xf]  ;;  %v1300_v40 = vshll.u32 %v2261_v31, 16 }
  0x48   : > { %2449 = vmatprep.mubr.msk.bf16.mxu0 %vm613_vm1, %v2219_v17  ;;  %v911_v21 = vsel %vm2854_vm4, %v906_v18, %v910_v11  ;;  %v2582_v39 = vld [vmem:[%s2822_s9 + $0xf8] ss:$8 sps:$4 sm:$0xff]   ;;  %v1306_v41 = vshll.u32 %v2262_v32, 16  ;;  %v2264_v43 = vld [vmem:[%s2822_s9 + $0xa4] sm:$0x1]  ;;  %v1285_v44 = vrot.slane %v1283_v34, 4 }
  0x49   : > { %2456 = vmatmul.mubr.msk.bf16.vlgmr.msra.gmra.mxu1 %vm613_vm1, %v2577_v16  ;;  %v925_v23 = vsel %vm2854_vm4, %v920_v20, %v924_v12  ;;  %v2263_v42 = vld [vmem:[%s2822_s9 + $0xa0] sm:$0xf]  ;;  %v1288_v45 = vrot.slane %v1286_v35, 5  ;;  %v1294_v46 = vrot.slane %v1292_v36, 5  ;;  %v1299_v47 = vrot.slane %v1297_v37, 4 }
  0x4a   : > { %2474 = vmatpush3.bf16.msra.mxu1 %v1421_v19  ;;  %v2220_v26 = vcombine.low %v911_v21, %v925_v23  ;;  %2459 = vmatprep.mubr.msk.bf16.mxu1 %vm613_vm1, %v2580_v25  ;;  %v2265_v48 = vld [vmem:[%s2822_s9 + $0xa8] sm:$0xf]  ;;  %v1302_v49 = vrot.slane %v1300_v40, 5  ;;  %v1308_v50 = vrot.slane %v1306_v41, 5  ;;  %v2266_v51 = vld [vmem:[%s2822_s9 + $0xac] sm:$0x1] }
  0x4b   : > { %2523 = vmatprep.subr.msk.bf16.mxu1 %vm626_vm0, %v2309_v38  ;;  %v1311_v52 = vshrl.u32 %v2263_v42, 16  ;;  %v1314_v53 = vshll.u32 %v2263_v42, 16  ;;  %v1289_v54 = vor.u32 %v1288_v45, %v1285_v44  ;;  %v1320_v55 = vshll.u32 %v2264_v43, 16  ;;  %v2583_v4 = vld [vmem:[%s2822_s9 + $0x108] ss:$8 sps:$4 sm:$0xff]  }
  0x4c   : > { %2450 = vmatmul.mubr.msk.bf16.gmra.mxu0 %vm613_vm1, %v2220_v26  ;;  %v1325_v56 = vshrl.u32 %v2265_v48, 16  ;;  %v1328_v57 = vshll.u32 %v2265_v48, 16  ;;  %v1303_v58 = vor.u32 %v1302_v49, %v1299_v47  ;;  %v1334_v61 = vshll.u32 %v2266_v51, 16  ;;  %v2334_v8 = vld [vmem:[%s3086_s1 + $0x20] sm:$0xf] }
  0x4d   : > { %2465 = vmatprep.mubr.msk.bf16.mxu0 %vm613_vm1, %v2578_v24  ;;  %v1313_v59 = vrot.slane %v1311_v52, 4  ;;  %v1316_v60 = vrot.slane %v1314_v53, 5  ;;  %v1290_v62 = vrot.slane %v1289_v54, 4  ;;  %v1322_v3 = vrot.slane %v1320_v55, 5  ;;  %v2584_v11 = vld [vmem:[%s2822_s9 + $0x8] ss:$8 sps:$4 sm:$0xff]  }
  0x4e   : > { %v1327_v63 = vrot.slane %v1325_v56, 4  ;;  %v1330_v0 = vrot.slane %v1328_v57, 5  ;;  %v1304_v1 = vrot.slane %v1303_v58, 4  ;;  %v1336_v7 = vrot.slane %v1334_v61, 5  ;;  %v2267_v14 = vld [vmem:[%s2822_s9 + $0xb0] sm:$0xf] }
  0x4f   : > { %v1317_v2 = vor.u32 %v1316_v60, %v1313_v59  ;;  %v1295_v5 = vsel %vm2854_vm4, %v1290_v62, %v1294_v46  ;;  %v1659_v12 = vsel %vm626_vm0, %v2309_v38, 0  ;;  %v2268_v15 = vld [vmem:[%s2822_s9 + $0xb4] sm:$0x1]  ;;  %v2269_v18 = vld [vmem:[%s2822_s9 + $0xb8] sm:$0xf]  ;;  %v1339_v20 = vshrl.u32 %v2267_v14, 16 }
  0x50   : > { %v1331_v6 = vor.u32 %v1330_v0, %v1327_v63  ;;  %v1309_v9 = vsel %vm2854_vm4, %v1304_v1, %v1308_v50  ;;  %v2270_v19 = vld [vmem:[%s2822_s9 + $0xbc] sm:$0x1]  ;;  %v1342_v22 = vshll.u32 %v2267_v14, 16  ;;  %v1348_v23 = vshll.u32 %v2268_v15, 16  ;;  %v2271_v25 = vld [vmem:[%s2822_s9 + $0xc0] sm:$0xf] }
  0x51   : > { %2460 = vmatmul.mubr.msk.bf16.gmra.mxu1 %vm613_vm1, %v2581_v28  ;;  %v1318_v10 = vrot.slane %v1317_v2, 4  ;;  %v2276_v16 = vcombine.low %v1295_v5, %v1309_v9  ;;  %v1353_v24 = vshrl.u32 %v2269_v18, 16  ;;  %v1356_v28 = vshll.u32 %v2269_v18, 16  ;;  %v2272_v30 = vld [vmem:[%s2822_s9 + $0xc4] sm:$0x1] }
  0x52   : > { %v1332_v17 = vrot.slane %v1331_v6, 4  ;;  %v1362_v29 = vshll.u32 %v2270_v19, 16  ;;  %v1344_v32 = vrot.slane %v1342_v22, 5  ;;  %v2273_v35 = vld [vmem:[%s2822_s9 + $0xc8] sm:$0xf]  ;;  %v1370_v40 = vshll.u32 %v2271_v25, 16 }
  0x53   : > { %v1323_v21 = vsel %vm2854_vm4, %v1318_v10, %v1322_v3  ;;  %2475 = vmatprep.mubr.msk.bf16.mxu1 %vm613_vm1, %v2276_v16  ;;  %v1355_v34 = vrot.slane %v1353_v24, 4  ;;  %v1358_v36 = vrot.slane %v1356_v28, 5  ;;  %v2274_v38 = vld [vmem:[%s2822_s9 + $0xcc] sm:$0x1]  ;;  %v1376_v42 = vshll.u32 %v2272_v30, 16 }
  0x54   : > { %2466 = vmatmul.mubr.msk.bf16.vlgmr.msra.gmra.mxu0 %vm613_vm1, %v2579_v33  ;;  %v1337_v26 = vsel %vm2854_vm4, %v1332_v17, %v1336_v7  ;;  %v1350_v33 = vrot.slane %v1348_v23, 5  ;;  %v1364_v37 = vrot.slane %v1362_v29, 5  ;;  %v1381_v43 = vshrl.u32 %v2273_v35, 16  ;;  %v2585_v49 = vld [vmem:[%s2822_s9 + $0x18] ss:$8 sps:$4 sm:$0xff]  }
  0x55   : > { %2484 = vmatpush3.bf16.msra.mxu0 %v1540_v27  ;;  %2469 = vmatprep.mubr.msk.bf16.mxu0 %vm613_vm1, %v2582_v39  ;;  %v1341_v27 = vrot.slane %v1339_v20, 4  ;;  %v2277_v31 = vcombine.low %v1323_v21, %v1337_v26  ;;  %v1367_v39 = vshrl.u32 %v2271_v25, 16  ;;  %v1384_v44 = vshll.u32 %v2273_v35, 16  ;;  %v2586_v62 = vld [vmem:[%s2822_s9 + $0x28] ss:$8 sps:$4 sm:$0xff]  }
  0x56   : > { %2524 = vmatprep.subr.msk.bf16.mxu0 %vm626_vm0, %v2334_v8  ;;  %v1359_v45 = vor.u32 %v1358_v36, %v1355_v34  ;;  %v1372_v47 = vrot.slane %v1370_v40, 5  ;;  %v1390_v48 = vshll.u32 %v2274_v38, 16  ;;  %v1383_v51 = vrot.slane %v1381_v43, 4  ;;  %v2588_v1 = vld [vmem:[%s2822_s9 + $0x50] ss:$8 sps:$4 sm:$0xff]  }
  0x57   : > { %v1345_v41 = vor.u32 %v1344_v32, %v1341_v27  ;;  %v1369_v46 = vrot.slane %v1367_v39, 4  ;;  %v1386_v52 = vrot.slane %v1384_v44, 5  ;;  %v1378_v55 = vrot.slane %v1376_v42, 5  ;;  %v2318_v3 = vld [vmem:[%s2822_s9 + $0x8] sm:$0xf] }
  0x58   : > { %v1360_v53 = vrot.slane %v1359_v45, 4  ;;  %v1392_v58 = vrot.slane %v1390_v48, 5  ;;  %v1889_v59 = vsel %vm626_vm0, %v2334_v8, 0  ;;  %v2320_v5 = vld [vmem:[%s2822_s9 + $0x10] sm:$0xf]  ;;  %v1751_v8 = vshrl.u32 %v2318_v3, 16 }
  0x59   : > { %2476 = vmatmul.mubr.msk.bf16.vlgmr.msra.gmra.mxu1 %vm613_vm1, %v2277_v31  ;;  %v1346_v50 = vrot.slane %v1345_v41, 4  ;;  %v1373_v54 = vor.u32 %v1372_v47, %v1369_v46  ;;  %v1387_v57 = vor.u32 %v1386_v52, %v1383_v51  ;;  %v2321_v7 = vld [vmem:[%s2822_s9 + $0x14] sm:$0x1]  ;;  %v1754_v9 = vshll.u32 %v2318_v3, 16  ;;  %v2322_v17 = vld [vmem:[%s2822_s9 + $0x18] sm:$0xf] }
  0x5a   : > { %2494 = vmatpush3.bf16.msra.mxu1 %v1659_v12  ;;  %v1365_v60 = vsel %vm2854_vm4, %v1360_v53, %v1364_v37  ;;  %v2587_v12 = vld [vmem:[%s2822_s9 + $0x38] ss:$8 sps:$4 sm:$0xff]   ;;  %v1765_v14 = vshrl.u32 %v2320_v5, 16  ;;  %v1768_v15 = vshll.u32 %v2320_v5, 16  ;;  %v1774_v16 = vshll.u32 %v2321_v7, 16 }
  0x5b   : > { %v1351_v56 = vsel %vm2854_vm4, %v1346_v50, %v1350_v33  ;;  %v1374_v61 = vrot.slane %v1373_v54, 4  ;;  %v1388_v0 = vrot.slane %v1387_v57, 4  ;;  %v1753_v18 = vrot.slane %v1751_v8, 4  ;;  %v2323_v21 = vld [vmem:[%s2822_s9 + $0x1c] sm:$0x1] }
  0x5c   : > { %2470 = vmatmul.mubr.msk.bf16.gmra.mxu0 %vm613_vm1, %v2583_v4  ;;  %v2278_v63 = vcombine.low %v1351_v56, %v1365_v60  ;;  %v2319_v4 = vld [vmem:[%s2822_s9 + $0xc] sm:$0x1]  ;;  %v1756_v19 = vrot.slane %v1754_v9, 5  ;;  %v1779_v22 = vshrl.u32 %v2322_v17, 16  ;;  %v1767_v23 = vrot.slane %v1765_v14, 4 }
  0x5d   : > { %2485 = vmatprep.mubr.msk.bf16.mxu0 %vm613_vm1, %v2584_v11  ;;  %v1379_v2 = vsel %vm2854_vm4, %v1374_v61, %v1378_v55  ;;  %v1393_v6 = vsel %vm2854_vm4, %v1388_v0, %v1392_v58  ;;  %v1760_v10 = vshll.u32 %v2319_v4, 16  ;;  %v1770_v24 = vrot.slane %v1768_v15, 5  ;;  %v2324_v26 = vld [vmem:[%s2822_s9 + $0x20] sm:$0xf]  ;;  %v2325_v29 = vld [vmem:[%s2822_s9 + $0x24] sm:$0x1] }
  0x5e   : > { %2479 = vmatprep.mubr.msk.bf16.mxu1 %vm613_vm1, %v2278_v63  ;;  %v2279_v11 = vcombine.low %v1379_v2, %v1393_v6  ;;  %v1776_v25 = vrot.slane %v1774_v16, 5  ;;  %v1782_v27 = vshll.u32 %v2322_v17, 16  ;;  %v1757_v28 = vor.u32 %v1756_v19, %v1753_v18  ;;  %v2589_v39 = vld [vmem:[%s2822_s9 + $0x60] ss:$8 sps:$4 sm:$0xff]   ;;  %v2590_v45 = vld [vmem:[%s2822_s9 + $0x70] ss:$8 sps:$4 sm:$0xff]  }
  0x5f   : > { %v1762_v20 = vrot.slane %v1760_v10, 5  ;;  %v1781_v30 = vrot.slane %v1779_v22, 4  ;;  %v1788_v31 = vshll.u32 %v2323_v21, 16  ;;  %v1793_v32 = vshrl.u32 %v2324_v26, 16  ;;  %v2326_v50 = vld [vmem:[%s2822_s9 + $0x28] sm:$0xf] }
  0x60   : > { %v1771_v33 = vor.u32 %v1770_v24, %v1767_v23  ;;  %v1784_v34 = vrot.slane %v1782_v27, 5  ;;  %v1796_v35 = vshll.u32 %v2324_v26, 16  ;;  %v1802_v36 = vshll.u32 %v2325_v29, 16  ;;  %v2327_v51 = vld [vmem:[%s2822_s9 + $0x2c] sm:$0x1] }
  0x61   : > { %2480 = vmatmul.mubr.msk.bf16.gmra.mxu1 %vm613_vm1, %v2279_v11  ;;  %v1758_v37 = vrot.slane %v1757_v28, 4  ;;  %v1795_v38 = vrot.slane %v1793_v32, 4  ;;  %v1790_v42 = vrot.slane %v1788_v31, 5  ;;  %v2328_v53 = vld [vmem:[%s2822_s9 + $0x30] sm:$0xf]  ;;  %v1807_v55 = vshrl.u32 %v2326_v50, 16 }
  0x62   : > { %2495 = vmatprep.mubr.msk.bf16.mxu1 %vm613_vm1, %v2588_v1  ;;  %v1772_v40 = vrot.slane %v1771_v33, 4  ;;  %v1785_v41 = vor.u32 %v1784_v34, %v1781_v30  ;;  %v1798_v43 = vrot.slane %v1796_v35, 5  ;;  %v2329_v54 = vld [vmem:[%s2822_s9 + $0x34] sm:$0x1]  ;;  %v1810_v56 = vshll.u32 %v2326_v50, 16 }
  0x63   : > { %v1763_v44 = vsel %vm2854_vm4, %v1758_v37, %v1762_v20  ;;  %v1821_v60 = vshrl.u32 %v2328_v53, 16  ;;  %v2330_v61 = vld [vmem:[%s2822_s9 + $0x38] sm:$0xf]  ;;  %v1824_v0 = vshll.u32 %v2328_v53, 16  ;;  %v1830_v1 = vshll.u32 %v2329_v54, 16 }
  0x64   : > { %2486 = vmatmul.mubr.msk.bf16.vlgmr.msra.gmra.mxu0 %vm613_vm1, %v2585_v49  ;;  %v1777_v46 = vsel %vm2854_vm4, %v1772_v40, %v1776_v25  ;;  %v1786_v47 = vrot.slane %v1785_v41, 4  ;;  %v1799_v48 = vor.u32 %v1798_v43, %v1795_v38  ;;  %v1804_v49 = vrot.slane %v1802_v36, 5  ;;  %v2331_v2 = vld [vmem:[%s2822_s9 + $0x3c] sm:$0x1]  ;;  %v2332_v6 = vld [vmem:[%s2822_s9 + $0x40] sm:$0xf] }
  0x65   : > { %2504 = vmatpush3.bf16.msra.mxu0 %v1889_v59  ;;  %2489 = vmatprep.mubr.msk.bf16.mxu0 %vm613_vm1, %v2586_v62  ;;  %v2335_v52 = vcombine.low %v1763_v44, %v1777_v46  ;;  %v1816_v59 = vshll.u32 %v2327_v51, 16  ;;  %v1809_v62 = vrot.slane %v1807_v55, 4  ;;  %v1812_v63 = vrot.slane %v1810_v56, 5  ;;  %v2333_v7 = vld [vmem:[%s2822_s9 + $0x44] sm:$0x1] }
  0x66   : > { %v1791_v57 = vsel %vm2854_vm4, %v1786_v47, %v1790_v42  ;;  %v1800_v58 = vrot.slane %v1799_v48, 4  ;;  %v1823_v5 = vrot.slane %v1821_v60, 4  ;;  %v1826_v10 = vrot.slane %v1824_v0, 5 }
  0x67   : > { %v1818_v4 = vrot.slane %v1816_v59, 5  ;;  %v1813_v9 = vor.u32 %v1812_v63, %v1809_v62  ;;  %v1832_v11 = vrot.slane %v1830_v1, 5  ;;  %v1835_v14 = vshrl.u32 %v2330_v61, 16 }
  0x68   : > { %v1805_v3 = vsel %vm2854_vm4, %v1800_v58, %v1804_v49  ;;  %v1838_v15 = vshll.u32 %v2330_v61, 16  ;;  %v1844_v16 = vshll.u32 %v2331_v2, 16  ;;  %v1849_v17 = vshrl.u32 %v2332_v6, 16 }
  0x69   : > { %2496 = vmatmul.mubr.msk.bf16.vlgmr.msra.gmra.mxu1 %vm613_vm1, %v2589_v39  ;;  %v2336_v8 = vcombine.low %v1791_v57, %v1805_v3  ;;  %v1814_v18 = vrot.slane %v1813_v9, 4  ;;  %v1827_v19 = vor.u32 %v1826_v10, %v1823_v5  ;;  %v1852_v20 = vshll.u32 %v2332_v6, 16 }
  0x6a   : > { %2499 = vmatprep.mubr.msk.bf16.mxu1 %vm613_vm1, %v2590_v45  ;;  %v1858_v21 = vshll.u32 %v2333_v7, 16  ;;  %v1837_v22 = vrot.slane %v1835_v14, 4  ;;  %v1840_v23 = vrot.slane %v1838_v15, 5  ;;  %v1851_v24 = vrot.slane %v1849_v17, 4 }
  0x6b   : > { %v1819_v25 = vsel %vm2854_vm4, %v1814_v18, %v1818_v4  ;;  %v1828_v26 = vrot.slane %v1827_v19, 4  ;;  %v1854_v27 = vrot.slane %v1852_v20, 5  ;;  %v1846_v29 = vrot.slane %v1844_v16, 5 }
  0x6c   : > { %2490 = vmatmul.mubr.msk.bf16.gmra.mxu0 %vm613_vm1, %v2587_v12  ;;  %v2591_v12 = vld [vmem:[%s2822_s9 + $0x80] ss:$8 sps:$4 sm:$0xff]   ;;  %v1841_v28 = vor.u32 %v1840_v23, %v1837_v22  ;;  %v1860_v32 = vrot.slane %v1858_v21, 5 }
  0x6d   : > { %2505 = vmatprep.mubr.msk.bf16.mxu0 %vm613_vm1, %v2335_v52  ;;  %v1833_v30 = vsel %vm2854_vm4, %v1828_v26, %v1832_v11  ;;  %v1855_v31 = vor.u32 %v1854_v27, %v1851_v24 }
  0x6e   : > { %v2337_v33 = vcombine.low %v1819_v25, %v1833_v30  ;;  %v1842_v34 = vrot.slane %v1841_v28, 4 }
  0x6f   : > { %v1856_v35 = vrot.slane %v1855_v31, 4 }
  0x70   : > { %v1847_v36 = vsel %vm2854_vm4, %v1842_v34, %v1846_v29 }
  0x71   : > { %2500 = vmatmul.mubr.msk.bf16.gmra.mxu1 %vm613_vm1, %v2591_v12  ;;  %v1861_v37 = vsel %vm2854_vm4, %v1856_v35, %v1860_v32 }
  0x72   : > { %v2338_v38 = vcombine.low %v1847_v36, %v1861_v37 }
  0x74   : > { %2506 = vmatmul.mubr.msk.bf16.vlgmr.msra.gmra.mxu0 %vm613_vm1, %v2336_v8 }
  0x75   : > { %2509 = vmatprep.mubr.msk.bf16.mxu0 %vm613_vm1, %v2337_v33 }
  0x7c   : > { %2510 = vmatmul.mubr.msk.bf16.gmra.mxu0 %vm613_vm1, %v2338_v38 }
  0xf1   : > { %v2431_v39 = vpop.f32.mrf.mxu1  ;;  %v2427_v41 = vpop.f32.mrf.mxu0 }
  0xf3   : > { %v3016_v40 = vpop.f32.mrf.mxu1  ;;  %v664_v44 = vpop.f32.mrf.mxu0 }
  0xf5   : > { %v3018_v42 = vpop.f32.mrf.mxu1  ;;  %v2428_v47 = vpop.f32.mrf.mxu0 }
  0xf7   : > { %v3020_v43 = vpop.f32.mrf.mxu1  ;;  %v667_v50 = vpop.f32.mrf.mxu0 }
  0xf9   : > { %v2437_v45 = vpop.f32.mrf.mxu1 }
  0xfa   : > { %v773_v15 = vadd.f32 %v2437_v45, %v2427_v41 }
  0xfb   : > { %v764_v46 = vpop.f32.mrf.mxu1 }
  0xfc   : > { %v765_v18 = vadd.f32 %v764_v46, %v664_v44 }
  0xfd   : > { %v2438_v48 = vpop.f32.mrf.mxu1 }
  0xfe   : > { %v776_v21 = vadd.f32 %v2438_v48, %v2428_v47 }
  0xff   : > { %v767_v49 = vpop.f32.mrf.mxu1 }
 0x100   : > { %v768_v25 = vadd.f32 %v767_v49, %v667_v50 }
 0x101   : > { %v2441_v13 = vpop.f32.mrf.mxu1 }
 0x102   : > { %v2447_v51 = vpop.f32.mrf.mxu0  ;;  %v789_v37 = vadd.f32 %v2441_v13, %v2431_v39 }
 0x103   : > { %v780_v52 = vpop.f32.mrf.mxu1  ;;  %v1022_v20 = vadd.f32 %v2447_v51, %v773_v15 }
 0x104   : > { %v989_v53 = vpop.f32.mrf.mxu0  ;;  %v781_v47 = vadd.f32 %v780_v52, %v3016_v40 }
 0x105   : > { %v2442_v54 = vpop.f32.mrf.mxu1  ;;  %v1020_v24 = vadd.f32 %v989_v53, %v765_v18 }
 0x106   : > { %v2448_v55 = vpop.f32.mrf.mxu0 }
 0x107   : > { %v3022_v56 = vpop.f32.mrf.mxu1  ;;  %v1023_v28 = vadd.f32 %v2448_v55, %v776_v21  ;;  %v792_v55 = vadd.f32 %v2442_v54, %v3018_v42 }
 0x108   : > { %v992_v57 = vpop.f32.mrf.mxu0  ;;  %v784_v13 = vadd.f32 %v3022_v56, %v3020_v43  ;;  %v2343_v43 = vld [vmem:[%s3087_s2] ss:$0 sm:$0xff] }
 0x109   : > { %v2457_v58 = vpop.f32.mrf.mxu1  ;;  %v1021_v32 = vadd.f32 %v992_v57, %v768_v25 }
 0x10a   : > { %v1141_v26 = vadd.f32 %v2457_v58, %v1022_v20 }
 0x10b   : > { %v1108_v59 = vpop.f32.mrf.mxu1 }
 0x10c   : > { %v2451_v60 = vpop.f32.mrf.mxu0  ;;  %v1139_v29 = vadd.f32 %v1108_v59, %v1020_v24 }
 0x10d   : > { %v2458_v61 = vpop.f32.mrf.mxu1  ;;  %v1026_v53 = vadd.f32 %v2451_v60, %v789_v37 }
 0x10e   : > { %v1005_v62 = vpop.f32.mrf.mxu0  ;;  %v1142_v34 = vadd.f32 %v2458_v61, %v1023_v28 }
 0x10f   : > { %v1111_v63 = vpop.f32.mrf.mxu1  ;;  %v1024_v39 = vadd.f32 %v1005_v62, %v781_v47 }
 0x110   : > { %v2452_v0 = vpop.f32.mrf.mxu0  ;;  %v1140_v41 = vadd.f32 %v1111_v63, %v1021_v32 }
 0x111   : > { %v2461_v1 = vpop.f32.mrf.mxu1 }
 0x112   : > { %v3024_v2 = vpop.f32.mrf.mxu0  ;;  %v1145_v63 = vadd.f32 %v2461_v1, %v1026_v53 }
 0x113   : > { %v1124_v3 = vpop.f32.mrf.mxu1  ;;  %v1025_v54 = vadd.f32 %v3024_v2, %v784_v13 }
 0x114   : > { %v2467_v4 = vpop.f32.mrf.mxu0  ;;  %v1143_v15 = vadd.f32 %v1124_v3, %v1024_v39 }
 0x115   : > { %v3026_v5 = vpop.f32.mrf.mxu1  ;;  %v1260_v33 = vadd.f32 %v2467_v4, %v1141_v26 }
 0x116   : > { %v1227_v6 = vpop.f32.mrf.mxu0 }
 0x117   : > { %v3028_v8 = vpop.f32.mrf.mxu1  ;;  %v1258_v38 = vadd.f32 %v1227_v6, %v1139_v29 }
 0x118   : > { %v2468_v7 = vpop.f32.mrf.mxu0  ;;  %v1144_v3 = vadd.f32 %v3028_v8, %v1025_v54 }
 0x119   : > { %v2477_v11 = vpop.f32.mrf.mxu1  ;;  %v1261_v48 = vadd.f32 %v2468_v7, %v1142_v34 }
 0x11a   : > { %v1230_v9 = vpop.f32.mrf.mxu0  ;;  %v1490_v44 = vadd.f32 %v2477_v11, %v1260_v33 }
 0x11b   : > { %v1457_v14 = vpop.f32.mrf.mxu1  ;;  %v1259_v57 = vadd.f32 %v1230_v9, %v1140_v41 }
 0x11c   : > { %v2471_v10 = vpop.f32.mrf.mxu0  ;;  %v1488_v49 = vadd.f32 %v1457_v14, %v1258_v38  ;;  %v1027_v14 = vadd.f32 %v2452_v0, %v792_v55 }
 0x11d   : > { %v2478_v17 = vpop.f32.mrf.mxu1  ;;  %v1264_v9 = vadd.f32 %v2471_v10, %v1145_v63 }
 0x11e   : > { %v3030_v12 = vpop.f32.mrf.mxu0  ;;  %v1491_v59 = vadd.f32 %v2478_v17, %v1261_v48  ;;  %v1146_v17 = vadd.f32 %v3026_v5, %v1027_v14 }
 0x11f   : > { %v1460_v23 = vpop.f32.mrf.mxu1  ;;  %v1262_v0 = vadd.f32 %v3030_v12, %v1143_v15 }
 0x120   : > { %v3032_v16 = vpop.f32.mrf.mxu0  ;;  %v1489_v11 = vadd.f32 %v1460_v23, %v1259_v57 }
 0x121   : > { %v2481_v31 = vpop.f32.mrf.mxu1  ;;  %v1265_v25 = vadd.f32 %v3032_v16, %v1146_v17 }
 0x122   : > { %v3034_v19 = vpop.f32.mrf.mxu0 }
 0x123   : > { %v1473_v36 = vpop.f32.mrf.mxu1  ;;  %v1263_v12 = vadd.f32 %v3034_v19, %v1144_v3 }
 0x124   : > { %v2487_v22 = vpop.f32.mrf.mxu0  ;;  %v1492_v26 = vadd.f32 %v1473_v36, %v1262_v0 }
 0x125   : > { %v2482_v46 = vpop.f32.mrf.mxu1  ;;  %v1609_v58 = vadd.f32 %v2487_v22, %v1490_v44  ;;  %v1494_v22 = vadd.f32 %v2481_v31, %v1264_v9 }
 0x126   : > { %v1576_v27 = vpop.f32.mrf.mxu0  ;;  %v1495_v31 = vadd.f32 %v2482_v46, %v1265_v25 }
 0x127   : > { %v1476_v51 = vpop.f32.mrf.mxu1  ;;  %v1607_v6 = vadd.f32 %v1576_v27, %v1488_v49 }
 0x128   : > { %v2488_v30 = vpop.f32.mrf.mxu0  ;;  %v1493_v38 = vadd.f32 %v1476_v51, %v1263_v12 }
 0x129   : > { %v2497_v4 = vpop.f32.mrf.mxu1  ;;  %v1610_v60 = vadd.f32 %v2488_v30, %v1491_v59 }
 0x12a   : > { %v1579_v35 = vpop.f32.mrf.mxu0  ;;  %v1728_v52 = vadd.f32 %v2497_v4, %v1609_v58 }
 0x12b   : > { %v1695_v7 = vpop.f32.mrf.mxu1  ;;  %v1608_v56 = vadd.f32 %v1579_v35, %v1489_v11 }
 0x12c   : > { %v2491_v45 = vpop.f32.mrf.mxu0  ;;  %v1726_v18 = vadd.f32 %v1695_v7, %v1607_v6 }
 0x12d   : > { %v2498_v42 = vpop.f32.mrf.mxu1  ;;  %v1613_v8 = vadd.f32 %v2491_v45, %v1494_v22 }
 0x12e   : > { %v1592_v50 = vpop.f32.mrf.mxu0  ;;  %v1729_v20 = vadd.f32 %v2498_v42, %v1610_v60 }
 0x12f   : > { %v1698_v21 = vpop.f32.mrf.mxu1  ;;  %v1611_v36 = vadd.f32 %v1592_v50, %v1492_v26 }
 0x130   : > { %v2492_v61 = vpop.f32.mrf.mxu0  ;;  %v1727_v10 = vadd.f32 %v1698_v21, %v1608_v56 }
 0x131   : > { %v2501_v5 = vpop.f32.mrf.mxu1  ;;  %v1614_v48 = vadd.f32 %v2492_v61, %v1495_v31 }
 0x132   : > { %v1595_v40 = vpop.f32.mrf.mxu0  ;;  %v1732_v41 = vadd.f32 %v2501_v5, %v1613_v8 }
 0x133   : > { %v1711_v32 = vpop.f32.mrf.mxu1  ;;  %v1612_v53 = vadd.f32 %v1595_v40, %v1493_v38 }
 0x134   : > { %v2507_v62 = vpop.f32.mrf.mxu0  ;;  %v1730_v19 = vadd.f32 %v1711_v32, %v1611_v36 }
 0x135   : > { %v1958_v1 = vadd.f32 %v2507_v62, %v1728_v52  ;;  %v2502_v16 = vpop.f32.mrf.mxu1 }
 0x136   : > { %v1925_v23 = vpop.f32.mrf.mxu0  ;;  %v1733_v57 = vadd.f32 %v2502_v16, %v1614_v48 }
 0x137   : > { %v3047_v24 = vadd.f32 %v2343_v43, %v1958_v1  ;;  %v1956_v2 = vadd.f32 %v1925_v23, %v1726_v18  ;;  %v1714_v49 = vpop.f32.mrf.mxu1 }
 0x138   : > { %v2508_v27 = vpop.f32.mrf.mxu0  ;;  %v1731_v59 = vadd.f32 %v1714_v49, %v1612_v53 }
 0x139   : > { %v2346_v28 = vmul.f32 -1.442695, %v3047_v24  ;;  %v3051_v29 = vadd.f32 %v2343_v43, %v1956_v2  ;;  %v1959_v30 = vadd.f32 %v2508_v27, %v1729_v20 }
 0x13a   : > { %v1928_v33 = vpop.f32.mrf.mxu0 }
 0x13b   : > { %2592 = vpow2.f32 %v2346_v28  ;;  %v2344_v34 = vmul.f32 -1.442695, %v3051_v29  ;;  %v3055_v35 = vadd.f32 %v2343_v43, %v1959_v30  ;;  %v1957_v37 = vadd.f32 %v1928_v33, %v1727_v10 }
 0x13c   : > { %v2511_v46 = vpop.f32.mrf.mxu0 }
 0x13d   : > { %2594 = vpow2.f32 %v2344_v34  ;;  %v2347_v44 = vmul.f32 -1.442695, %v3055_v35  ;;  %v3058_v47 = vadd.f32 %v2343_v43, %v1957_v37  ;;  %v1962_v55 = vadd.f32 %v2511_v46, %v1732_v41 }
 0x13e   : > { %v1941_v58 = vpop.f32.mrf.mxu0 }
 0x13f   : > { %2596 = vpow2.f32 %v2347_v44  ;;  %v2345_v45 = vmul.f32 -1.442695, %v3058_v47  ;;  %v1977_v50 = vadd.f32 %v2343_v43, %v1962_v55  ;;  %v1960_v51 = vadd.f32 %v1941_v58, %v1730_v19 }
 0x140   : > { %v2512_v4 = vpop.f32.mrf.mxu0 }
 0x141   : > { %2598 = vpow2.f32 %v2345_v45  ;;  %v2350_v39 = vmul.f32 -1.442695, %v1977_v50  ;;  %v1975_v13 = vadd.f32 %v2343_v43, %v1960_v51  ;;  %v1963_v63 = vadd.f32 %v2512_v4, %v1733_v57 }
 0x142   : > { %v1944_v6 = vpop.f32.mrf.mxu0 }
 0x143   : > { %2600 = vpow2.f32 %v2350_v39  ;;  %v2348_v61 = vmul.f32 -1.442695, %v1975_v13  ;;  %v1978_v11 = vadd.f32 %v2343_v43, %v1963_v63  ;;  %v1961_v52 = vadd.f32 %v1944_v6, %v1731_v59 }
 0x145   : > { %2602 = vpow2.f32 %v2348_v61  ;;  %v2351_v14 = vmul.f32 -1.442695, %v1978_v11  ;;  %v1976_v40 = vadd.f32 %v2343_v43, %v1961_v52 }
 0x147   : > { %2604 = vpow2.f32 %v2351_v14  ;;  %v2349_v18 = vmul.f32 -1.442695, %v1976_v40 }
 0x148   : > { %v2593_v7 = vpop.eup %2592 }
 0x149   : > { %v2005_v15 = vadd.f32 1.0, %v2593_v7  ;;  %2606 = vpow2.f32 %v2349_v18 }
 0x14a   : > { %v2595_v60 = vpop.eup %2594 }
 0x14b   : > { %v2003_v42 = vadd.f32 1.0, %v2595_v60  ;;  %2608 = vrcp.f32 %v2005_v15 }
 0x14c   : > { %v2597_v54 = vpop.eup %2596 }
 0x14d   : > { %v2006_v9 = vadd.f32 1.0, %v2597_v54  ;;  %2610 = vrcp.f32 %v2003_v42 }
 0x14e   : > { %v2599_v17 = vpop.eup %2598 }
 0x14f   : > { %2612 = vrcp.f32 %v2006_v9  ;;  %v2004_v62 = vadd.f32 1.0, %v2599_v17 }
 0x150   : > { %v2601_v56 = vpop.eup %2600 }
 0x151   : > { %2614 = vrcp.f32 %v2004_v62  ;;  %v2009_v1 = vadd.f32 1.0, %v2601_v56 }
 0x152   : > { %v2603_v43 = vpop.eup %2602 }
 0x153   : > { %v2007_v20 = vadd.f32 1.0, %v2603_v43  ;;  %2616 = vrcp.f32 %v2009_v1 }
 0x154   : > { %v2605_v21 = vpop.eup %2604 }
 0x155   : > { %v2010_v0 = vadd.f32 1.0, %v2605_v21  ;;  %2618 = vrcp.f32 %v2007_v20 }
 0x156   : > { %v2607_v3 = vpop.eup %2606 }
 0x157   : > { %2620 = vrcp.f32 %v2010_v0  ;;  %v2008_v23 = vadd.f32 1.0, %v2607_v3 }
 0x158   : > { %v2609_v22 = vpop.eup %2608 }
 0x159   : > { %2622 = vrcp.f32 %v2008_v23  ;;  %v2029_v5 = vmul.f32 %v2609_v22, %v3047_v24 }
 0x15a   : > { %v2611_v2 = vpop.eup %2610 }
 0x15b   : > { %v2027_v27 = vmul.f32 %v2611_v2, %v3051_v29 }
 0x15c   : > { %v2613_v10 = vpop.eup %2612 }
 0x15d   : > { %v2030_v25 = vmul.f32 %v2613_v10, %v3055_v35 }
 0x15e   : > { %v2615_v26 = vpop.eup %2614 }
 0x15f   : > { %v2363_v28 = vpack.c.bf16 %v2030_v25, %v2029_v5  ;;  %v2028_v30 = vmul.f32 %v2615_v26, %v3058_v47 }
 0x160   : > { %v2617_v12 = vpop.eup %2616 }
 0x161   : > { %2375 = vst [vmem:[%s570_s6 + $0x8] sm:$0xff] %v2363_v28   ;;  %v2358_v32 = vpack.c.bf16 %v2028_v30, %v2027_v27  ;;  %v2033_v33 = vmul.f32 %v2617_v12, %v1977_v50 }
 0x162   : > { %v2619_v8 = vpop.eup %2618 }
 0x163   : > { %2359 = vst [vmem:[%s570_s6] sm:$0xff] %v2358_v32   ;;  %v2031_v35 = vmul.f32 %v2619_v8, %v1975_v13 }
 0x164   : > { %v2621_v31 = vpop.eup %2620 }
 0x165   : > { %v2034_v24 = vmul.f32 %v2621_v31, %v1978_v11 }
 0x166   : > { %v2623_v34 = vpop.eup %2622 }
 0x167   : > { %v2373_v37 = vpack.c.bf16 %v2034_v24, %v2033_v33  ;;  %v2032_v16 = vmul.f32 %v2623_v34, %v1976_v40 }
 0x169   : > { %2377 = vst [vmem:[%s570_s6 + $0x18] sm:$0xff] %v2373_v37   ;;  %v2368_v36 = vpack.c.bf16 %v2032_v16, %v2031_v35 }
 0x16b   : > { %2376 = vst [vmem:[%s570_s6 + $0x10] sm:$0xff] %v2368_v36  }
 0x16c PF: > { %s13_s16 = sadd.s32 1, %s2662_s16   ;;  %s3091_s12 = smov %s2650_s13 }
 0x16d   : > { %p10_p10 = scmp.ge.s32.totalorder %s13_s16, 4   ;;  %s3092_s13 = smov %s2719_s20 }
 0x16e   : > { %s3093_s14 = smov %s2658_s15  ;;  %s3094_s15 = smov %s3096_s17 }
 0x16f   :  { %12 = sbr.rel (!%p10_p10) target bundleno = 3 (0x3), region = 127 }

// kernel: effnetv2_forward.14
= control target key start
LH: loop header
LB: loop body
LE: loop exit
PB: predicated region body
PF: predicated region fallthrough
CT: control target
= control target key end

     0   :  { %s3335_s12 = smov 0   ;;  %s3337_s13 = smov 0   ;;  %s3916_s0 = inlined_call_operand.vmem [shape: bf16[1,2,1,10,10,128], index: 0, kind: input, shape index: {}]   ;;  %s3917_s1 = inlined_call_operand.vmem [shape: bf16[9,128,128], index: 1, kind: input, shape index: {}]   ;;  %s3918_s2 = inlined_call_operand.vmem [shape: f32[1,128], index: 2, kind: input, shape index: {}]   ;;  %s3919_s3 = inlined_call_operand.vmem [shape: bf16[2,8,8,128], index: 3, kind: output, shape index: {}]  }
   0x1   :  { %s3339_s14 = smov 0  }
   0x2 LB: > { %s32_s15 = sadd.s32 1, %s3309_s13  ;;  %p2447_p0 = scmp.ge.s32.totalorder %s3313_s14, 1  ;;  %s3313_s14 = sphi %s3339_s14, %s13_s14   ;;  %s3309_s13 = sphi %s3337_s13, %s3933_s13   ;;  %s3305_s12 = sphi %s3335_s12, %s3932_s12  }
   0x3   : > { %p34_p1 = scmp.ge.s32.totalorder %s32_s15, 2  ;;  %p183_p2 = scmp.lt.s32.totalorder %s3313_s14, 3 }
   0x5   : > { %s3935_s15 = smov (%p34_p1, %s32_s15), 0  ;;  %p184_p3 = pnand %p2447_p0, %p183_p2 }
   0x7   : > { %187 = sbr.rel (%p184_p3) target bundleno = 414 (0x19e), region = 32 }
   0xc   : > { %v3175_v0 = vld [vmem:[%s3917_s1 + $0x78] sm:$0xff]   ;;  %p225_p4 = scmp.lt.s32.totalorder %s3305_s12, 1  ;;  %v3177_v2 = vld [vmem:[%s3917_s1 + $0x70] sm:$0xff]   ;;  %v3179_v4 = vld [vmem:[%s3917_s1 + $0x68] sm:$0xff]   ;;  %vm287_vm0 = vsmask.f32 3328 }
   0xd   : > { %v3176_v1 = vld [vmem:[%s3917_s1 + $0x38] sm:$0xff]   ;;  %2918 = vmatprep.subr.bf16.mxu0 %v3175_v0  ;;  %v3178_v3 = vld [vmem:[%s3917_s1 + $0x30] sm:$0xff]   ;;  %v3180_v5 = vld [vmem:[%s3917_s1 + $0x28] sm:$0xff]   ;;  %vm288_vm1 = vsmask.f32 7440  ;;  %vm709_vm3 = vcmask 1042432  }
   0xe   : > { %2942 = vmatprep.subr.bf16.mxu1 %v3176_v1  ;;  %2919 = vmatpush3.bf16.msra.mxu0 %v3175_v0  ;;  %s3937_s12 = smov (!%p225_p4, %s3305_s12), 1  ;;  %v3181_v6 = vld [vmem:[%s3917_s1 + $0x60] sm:$0xff]   ;;  %v3183_v8 = vld [vmem:[%s3917_s1 + $0x58] sm:$0xff]   ;;  %v3185_v10 = vld [vmem:[%s3917_s1 + $0x50] sm:$0xff]   ;;  %vm710_vm4 = vcmask 1046532  }
   0xf   : > { %2943 = vmatpush3.bf16.msra.mxu1 %v3176_v1  ;;  %2920 = vmatprep.subr.bf16.mxu0 %v3177_v2  ;;  %v3182_v7 = vld [vmem:[%s3917_s1 + $0x20] sm:$0xff]   ;;  %s3150_s5 = smul.u32 80, %s3937_s12  ;;  %v3184_v9 = vld [vmem:[%s3917_s1 + $0x18] sm:$0xff]   ;;  %v3186_v14 = vld [vmem:[%s3917_s1 + $0x10] sm:$0xff]  }
  0x10   : > { %2944 = vmatprep.subr.bf16.mxu1 %v3178_v3  ;;  %v3187_v17 = vld [vmem:[%s3917_s1 + $0x48] sm:$0xff]   ;;  %vm3432_vm2 = vmor %vm287_vm0, %vm288_vm1  ;;  %v3189_v46 = vld [vmem:[%s3917_s1 + $0x40] sm:$0xff]  }
  0x11   : > { %s3389_s16 = scalar_lea.vmem %s3916_s0, %s3150_s5  ;;  %v3188_v23 = vld [vmem:[%s3917_s1 + $0x8] sm:$0xff]   ;;  %v3190_v50 = vld [vmem:[%s3917_s1] sm:$0xff]   ;;  %v3193_v59 = vld [vmem:[%s3917_s1 + $0xb8] sm:$0xff]   ;;  %s2786_s5 = sshll.u32 %s3937_s12, 5 }
  0x12   : > { %2921 = vmatpush3.bf16.msra.mxu0 %v3177_v2  ;;  %v255_v11 = vld [vmem:[%s3389_s16] sm:$0xf]  ;;  %v256_v12 = vld [vmem:[%s3389_s16 + $0x8] sm:$0xf]  ;;  %v3397_v13 = vld [vmem:[%s3389_s16 + $0x4] sm:$0x1]  ;;  %s252_s8 = scalar_lea.vmem %s3919_s3, %s2786_s5 }
  0x13   : > { %2945 = vmatpush3.bf16.msra.mxu1 %v3178_v3  ;;  %2922 = vmatprep.subr.bf16.mxu0 %v3179_v4  ;;  %v3403_v15 = vld [vmem:[%s3389_s16 + $0xc] sm:$0x1]  ;;  %v2479_v16 = vcombine.low %v255_v11, %v256_v12  ;;  %v291_v18 = vshrl.u32 %v255_v11, 16  ;;  %v294_v19 = vshll.u32 %v255_v11, 16  ;;  %v300_v20 = vshll.u32 %v3397_v13, 16  ;;  %v3194_v62 = vld [vmem:[%s3917_s1 + $0xf8] sm:$0xff]   ;;  %vm3515_vm5 = vmor %vm709_vm3, %vm710_vm4 }
  0x14   : > { %2946 = vmatprep.subr.bf16.mxu1 %v3180_v5  ;;  %v305_v21 = vshrl.u32 %v256_v12, 16  ;;  %v3410_v22 = vld [vmem:[%s3389_s16 + $0x10] sm:$0xf]  ;;  %v308_v24 = vshll.u32 %v256_v12, 16  ;;  %v314_v25 = vshll.u32 %v3403_v15, 16  ;;  %v3198_v11 = vld [vmem:[%s3917_s1 + $0xe8] sm:$0xff]  }
  0x15   : > { %2958 = vmatprep.mubr.bf16.mxu1 %v2479_v16  ;;  %v3417_v26 = vld [vmem:[%s3389_s16 + $0x18] sm:$0xf]  ;;  %v293_v27 = vrot.slane %v291_v18, 4  ;;  %v296_v28 = vrot.slane %v294_v19, 5  ;;  %v302_v29 = vrot.slane %v300_v20, 5  ;;  %v319_v35 = vshrl.u32 %v3410_v22, 16 }
  0x16   : > { %2923 = vmatpush3.bf16.msra.mxu0 %v3179_v4  ;;  %v307_v30 = vrot.slane %v305_v21, 4  ;;  %v3420_v31 = vld [vmem:[%s3389_s16 + $0x14] sm:$0x1]  ;;  %v310_v32 = vrot.slane %v308_v24, 5  ;;  %v316_v33 = vrot.slane %v314_v25, 5  ;;  %v322_v36 = vshll.u32 %v3410_v22, 16 }
  0x17   : > { %2947 = vmatpush3.bf16.msra.mxu1 %v3180_v5  ;;  %2924 = vmatprep.subr.bf16.mxu0 %v3181_v6  ;;  %v3423_v34 = vld [vmem:[%s3389_s16 + $0x1c] sm:$0x1]  ;;  %v297_v37 = vor.u32 %v296_v28, %v293_v27  ;;  %v328_v38 = vshll.u32 %v3420_v31, 16  ;;  %v333_v39 = vshrl.u32 %v3417_v26, 16  ;;  %v336_v40 = vshll.u32 %v3417_v26, 16  ;;  %v3195_v3 = vld [vmem:[%s3917_s1 + $0xb0] sm:$0xff]  }
  0x18   : > { %2948 = vmatprep.subr.bf16.mxu1 %v3182_v7  ;;  %v311_v42 = vor.u32 %v310_v32, %v307_v30  ;;  %v321_v43 = vrot.slane %v319_v35, 4  ;;  %v324_v44 = vrot.slane %v322_v36, 5  ;;  %v342_v45 = vshll.u32 %v3423_v34, 16  ;;  %v3196_v5 = vld [vmem:[%s3917_s1 + $0xf0] sm:$0xff]   ;;  %v3488_v28 = vld [vmem:[%s3389_s16 + $0x3c] sm:$0x1] }
  0x19   : > { %v298_v47 = vrot.slane %v297_v37, 4  ;;  %v335_v48 = vrot.slane %v333_v39, 4  ;;  %v338_v49 = vrot.slane %v336_v40, 5  ;;  %v330_v53 = vrot.slane %v328_v38, 5  ;;  %v261_v18 = vld [vmem:[%s3389_s16 + $0x30] sm:$0xf] }
  0x1a   : > { %2925 = vmatpush3.bf16.msra.mxu0 %v3181_v6  ;;  %v312_v51 = vrot.slane %v311_v42, 4  ;;  %v325_v52 = vor.u32 %v324_v44, %v321_v43  ;;  %v344_v56 = vrot.slane %v342_v45, 5  ;;  %v2480_v2 = vcombine.low %v3410_v22, %v3417_v26  ;;  %v259_v6 = vld [vmem:[%s3389_s16 + $0x20] sm:$0xf]  ;;  %v262_v22 = vld [vmem:[%s3389_s16 + $0x38] sm:$0xf] }
  0x1b   : > { %2949 = vmatpush3.bf16.msra.mxu1 %v3182_v7  ;;  %2926 = vmatprep.subr.bf16.mxu0 %v3183_v8  ;;  %v303_v54 = vsel %vm3432_vm2, %v298_v47, %v302_v29  ;;  %v339_v55 = vor.u32 %v338_v49, %v335_v48  ;;  %v714_v4 = vrot.slane %v3397_v13, 5  ;;  %v3197_v7 = vld [vmem:[%s3917_s1 + $0xa8] sm:$0xff]   ;;  %v347_v12 = vshrl.u32 %v259_v6, 16  ;;  %v3199_v39 = vld [vmem:[%s3917_s1 + $0xa0] sm:$0xff]   ;;  %v688_v13 = vld [vmem:[%s3389_s16 + $0x18] sm:$0xe] }
  0x1c   : > { %2950 = vmatprep.subr.bf16.mxu1 %v3184_v9  ;;  %v317_v57 = vsel %vm3432_vm2, %v312_v51, %v316_v33  ;;  %v326_v58 = vrot.slane %v325_v52, 4  ;;  %v375_v32 = vshrl.u32 %v261_v18, 16  ;;  %v378_v33 = vshll.u32 %v261_v18, 16  ;;  %v3200_v45 = vld [vmem:[%s3917_s1 + $0xe0] sm:$0xff]  }
  0x1d   : > { %v2467_v60 = vcombine.low %v303_v54, %v317_v57  ;;  %v340_v61 = vrot.slane %v339_v55, 4  ;;  %v349_v24 = vrot.slane %v347_v12, 4  ;;  %v389_v37 = vshrl.u32 %v262_v22, 16  ;;  %v3201_v57 = vld [vmem:[%s3917_s1 + $0x98] sm:$0xff]  }
  0x1e   : > { %2927 = vmatpush3.bf16.msra.mxu0 %v3183_v8  ;;  %v331_v63 = vsel %vm3432_vm2, %v326_v58, %v330_v53  ;;  %v260_v8 = vld [vmem:[%s3389_s16 + $0x28] sm:$0xf]  ;;  %v392_v38 = vshll.u32 %v262_v22, 16  ;;  %v377_v42 = vrot.slane %v375_v32, 4  ;;  %v380_v43 = vrot.slane %v378_v33, 5 }
  0x1f   : > { %2951 = vmatpush3.bf16.msra.mxu1 %v3184_v9  ;;  %2928 = vmatprep.subr.bf16.mxu0 %v3185_v10  ;;  %v345_v0 = vsel %vm3432_vm2, %v340_v61, %v344_v56  ;;  %v3472_v9 = vld [vmem:[%s3389_s16 + $0x24] sm:$0x1]  ;;  %v364_v19 = vshll.u32 %v260_v8, 16  ;;  %v2481_v21 = vcombine.low %v259_v6, %v260_v8  ;;  %v398_v44 = vshll.u32 %v3488_v28, 16 }
  0x20   : > { %2952 = vmatprep.subr.bf16.mxu1 %v3186_v14  ;;  %2934 = vmatprep.mubr.bf16.mxu0 %v2467_v60  ;;  %v2468_v1 = vcombine.low %v331_v63, %v345_v0  ;;  %v356_v16 = vshll.u32 %v3472_v9, 16  ;;  %v391_v47 = vrot.slane %v389_v37, 4  ;;  %v394_v48 = vrot.slane %v392_v38, 5  ;;  %v685_v63 = vld [vmem:[%s3389_s16] sm:$0xe] }
  0x21   : > { %v366_v29 = vrot.slane %v364_v19, 5  ;;  %v2482_v52 = vcombine.low %v261_v18, %v262_v22  ;;  %v718_v53 = vrot.slane %v3403_v15, 5  ;;  %v400_v56 = vrot.slane %v398_v44, 5  ;;  %v3202_v15 = vld [vmem:[%s3917_s1 + $0xd8] sm:$0xff]   ;;  %v686_v0 = vld [vmem:[%s3389_s16 + $0x8] sm:$0xe] }
  0x22   : > { %2929 = vmatpush3.bf16.msra.mxu0 %v3185_v10  ;;  %v3475_v10 = vld [vmem:[%s3389_s16 + $0x2c] sm:$0x1]  ;;  %v358_v26 = vrot.slane %v356_v16, 5  ;;  %v395_v55 = vor.u32 %v394_v48, %v391_v47  ;;  %v687_v18 = vld [vmem:[%s3389_s16 + $0x10] sm:$0xe]  ;;  %v722_v19 = vrot.slane %v3420_v31, 5 }
  0x23   : > { %2953 = vmatpush3.bf16.msra.mxu1 %v3186_v14  ;;  %2930 = vmatprep.subr.bf16.mxu0 %v3187_v17  ;;  %v350_v14 = vshll.u32 %v259_v6, 16  ;;  %v370_v20 = vshll.u32 %v3475_v10, 16  ;;  %v3207_v16 = vld [vmem:[%s3917_s1 + $0x88] sm:$0xff]   ;;  %v2494_v22 = vrot.slane %v688_v13, 9  ;;  %v3210_v31 = vld [vmem:[%s3917_s1 + $0xc0] sm:$0xff]  }
  0x24   : > { %2954 = vmatprep.subr.bf16.mxu1 %v3188_v23  ;;  %v396_v61 = vrot.slane %v395_v55, 4  ;;  %v3212_v37 = vld [vmem:[%s3389_s16 + $0x18] ss:$8 sps:$4 sm:$0xff]   ;;  %v3219_v48 = vld [vmem:[%s3389_s16 + $0x28] ss:$8 sps:$4 sm:$0xff]  }
  0x25   : > { %v352_v25 = vrot.slane %v350_v14, 5  ;;  %v372_v30 = vrot.slane %v370_v20, 5  ;;  %v726_v20 = vrot.slane %v3423_v34, 5  ;;  %v734_v34 = vrot.slane %v3475_v10, 5  ;;  %v3214_v10 = vld [vmem:[%s3917_s1 + $0x178] sm:$0xff]  }
  0x26   : > { %2931 = vmatpush3.bf16.msra.mxu0 %v3187_v17  ;;  %v361_v17 = vshrl.u32 %v260_v8, 16  ;;  %v3211_v8 = vld [vmem:[%s3389_s16 + $0x8] ss:$8 sps:$4 sm:$0xff]  }
  0x27   : > { %2955 = vmatpush3.bf16.msra.mxu1 %v3188_v23  ;;  %2932 = vmatprep.subr.bf16.mxu0 %v3189_v46  ;;  %v3485_v23 = vld [vmem:[%s3389_s16 + $0x34] sm:$0x1]  ;;  %v353_v35 = vor.u32 %v352_v25, %v349_v24  ;;  %v689_v24 = vld [vmem:[%s3389_s16 + $0x20] sm:$0xe]  ;;  %v690_v25 = vld [vmem:[%s3389_s16 + $0x28] sm:$0xe] }
  0x28   : > { %2956 = vmatprep.subr.bf16.mxu1 %v3190_v50  ;;  %v363_v27 = vrot.slane %v361_v17, 4  ;;  %v384_v36 = vshll.u32 %v3485_v23, 16  ;;  %v2496_v32 = vrot.slane %v690_v25, 9  ;;  %v738_v38 = vrot.slane %v3485_v23, 5  ;;  %v3216_v23 = vld [vmem:[%s3917_s1 + $0x170] sm:$0xff]  }
  0x29   : > { %v2563_v55 = vld [vmem:[%s3389_s16 + $0x8] sm:$0xf]  ;;  %v2570_v25 = vld [vmem:[%s3389_s16 + $0x24] sm:$0x1] }
  0x2a   : > { %2933 = vmatpush3.bf16.msra.mxu0 %v3189_v46  ;;  %v367_v40 = vor.u32 %v366_v29, %v363_v27  ;;  %v354_v46 = vrot.slane %v353_v35, 4  ;;  %v386_v51 = vrot.slane %v384_v36, 5  ;;  %v730_v27 = vrot.slane %v3472_v9, 5  ;;  %v3213_v29 = vld [vmem:[%s3917_s1 + $0x138] sm:$0xff]   ;;  %v691_v35 = vld [vmem:[%s3389_s16 + $0x30] sm:$0xe] }
  0x2b   : > { %2957 = vmatpush3.bf16.msra.mxu1 %v3190_v50  ;;  %2966 = vmatprep.subr.bf16.mxu0 %v3193_v59  ;;  %v381_v50 = vor.u32 %v380_v43, %v377_v42  ;;  %v727_v9 = vsel %vm3515_vm5, %v2494_v22, %v726_v20  ;;  %v692_v36 = vld [vmem:[%s3389_s16 + $0x38] sm:$0xe]  ;;  %v735_v42 = vsel %vm3515_vm5, %v2496_v32, %v734_v34  ;;  %v742_v43 = vrot.slane %v3488_v28, 5  ;;  %v2568_v20 = vld [vmem:[%s3389_s16 + $0x1c] sm:$0x1] }
  0x2c   : > { %2990 = vmatprep.subr.bf16.mxu1 %v3194_v62  ;;  %v368_v49 = vrot.slane %v367_v40, 4  ;;  %v359_v54 = vsel %vm3432_vm2, %v354_v46, %v358_v26  ;;  %v3209_v26 = vld [vmem:[%s3917_s1 + $0x80] sm:$0xff]   ;;  %v2497_v44 = vrot.slane %v691_v35, 9  ;;  %v3215_v46 = vld [vmem:[%s3917_s1 + $0x130] sm:$0xff]   ;;  %v3223_v22 = vld [vmem:[%s3917_s1 + $0x118] sm:$0xff]  }
  0x2d   : > { %2935 = vmatmul.mubr.bf16.vlgmr.msra.gmra.mxu0 %v2468_v1  ;;  %v3224_v34 = vld [vmem:[%s3917_s1 + $0x158] sm:$0xff]   ;;  %v3225_v35 = vld [vmem:[%s3917_s1 + $0x110] sm:$0xff]  }
  0x2e   : > { %2959 = vmatmul.mubr.bf16.vlgmr.msra.gmra.mxu1 %v2480_v2  ;;  %2967 = vmatpush3.bf16.msra.mxu0 %v3193_v59  ;;  %v373_v58 = vsel %vm3432_vm2, %v368_v49, %v372_v30  ;;  %v382_v59 = vrot.slane %v381_v50, 4  ;;  %v401_v2 = vsel %vm3432_vm2, %v396_v61, %v400_v56  ;;  %v2495_v30 = vrot.slane %v689_v24, 9  ;;  %v3217_v50 = vld [vmem:[%s3917_s1 + $0x128] sm:$0xff]  }
  0x2f   : > { %2991 = vmatpush3.bf16.msra.mxu1 %v3194_v62  ;;  %2968 = vmatprep.subr.bf16.mxu0 %v3195_v3  ;;  %v2469_v60 = vcombine.low %v359_v54, %v373_v58  ;;  %v739_v28 = vsel %vm3515_vm5, %v2497_v44, %v738_v38  ;;  %v3221_v54 = vld [vmem:[%s3917_s1 + $0x120] sm:$0xff]   ;;  %v2564_v56 = vld [vmem:[%s3389_s16 + $0xc] sm:$0x1]  ;;  %v2565_v58 = vld [vmem:[%s3389_s16 + $0x10] sm:$0xf] }
  0x30   : > { %2992 = vmatprep.subr.bf16.mxu1 %v3196_v5  ;;  %2962 = vmatprep.mubr.bf16.mxu1 %v2481_v21  ;;  %v387_v62 = vsel %vm3432_vm2, %v382_v59, %v386_v51  ;;  %v2493_v21 = vrot.slane %v687_v18, 9  ;;  %v731_v40 = vsel %vm3515_vm5, %v2495_v30, %v730_v27  ;;  %v3218_v51 = vld [vmem:[%s3917_s1 + $0x168] sm:$0xff]   ;;  %v2566_v59 = vld [vmem:[%s3389_s16 + $0x14] sm:$0x1]  ;;  %v1095_v61 = vshll.u32 %v2564_v56, 16 }
  0x31   : > { %2938 = vmatprep.mubr.bf16.mxu0 %v2469_v60  ;;  %v2470_v6 = vcombine.low %v387_v62, %v401_v2  ;;  %v2517_v47 = vcombine.low %v731_v40, %v735_v42  ;;  %v1089_v60 = vshll.u32 %v2563_v55, 16  ;;  %v1100_v62 = vshrl.u32 %v2565_v58, 16  ;;  %v2607_v2 = vld [vmem:[%s3389_s16 + $0x8] sm:$0xe]  ;;  %v3226_v40 = vld [vmem:[%s3917_s1 + $0x150] sm:$0xff]  }
  0x32   : > { %2969 = vmatpush3.bf16.msra.mxu0 %v3195_v3  ;;  %v2491_v3 = vrot.slane %v685_v63, 9  ;;  %v723_v33 = vsel %vm3515_vm5, %v2493_v21, %v722_v19  ;;  %v1103_v63 = vshll.u32 %v2565_v58, 16  ;;  %v1381_v19 = vrot.slane %v2566_v59, 5  ;;  %v2569_v21 = vld [vmem:[%s3389_s16 + $0x20] sm:$0xf] }
  0x33   : > { %2993 = vmatpush3.bf16.msra.mxu1 %v3196_v5  ;;  %2970 = vmatprep.subr.bf16.mxu0 %v3197_v7  ;;  %v2492_v5 = vrot.slane %v686_v0, 9  ;;  %v1109_v0 = vshll.u32 %v2566_v59, 16  ;;  %v1128_v32 = vshrl.u32 %v2569_v21, 16  ;;  %v2571_v59 = vld [vmem:[%s3389_s16 + $0x28] sm:$0xf] }
  0x34   : > { %2994 = vmatprep.subr.bf16.mxu1 %v3198_v11  ;;  %v715_v12 = vsel %vm3515_vm5, %v2491_v3, %v714_v4  ;;  %v3208_v4 = vld [vmem:[%s3917_s1 + $0xc8] sm:$0xff]  }
  0x35   : > { %v719_v14 = vsel %vm3515_vm5, %v2492_v5, %v718_v53  ;;  %2939 = vmatmul.mubr.bf16.gmra.mxu0 %v2470_v6  ;;  %v1091_v5 = vrot.slane %v1089_v60, 5  ;;  %v2608_v6 = vld [vmem:[%s3389_s16 + $0x10] sm:$0xe]  ;;  %v1130_v44 = vrot.slane %v1128_v32, 4 }
  0x36   : > { %2971 = vmatpush3.bf16.msra.mxu0 %v3197_v7  ;;  %2963 = vmatmul.mubr.bf16.gmra.mxu1 %v2482_v52  ;;  %v3205_v7 = vld [vmem:[%s3917_s1 + $0x90] sm:$0xff]   ;;  %v2515_v17 = vcombine.low %v715_v12, %v719_v14  ;;  %v3220_v52 = vld [vmem:[%s3389_s16 + $0x38] ss:$8 sps:$4 sm:$0xff]   ;;  %v1102_v12 = vrot.slane %v1100_v62, 4  ;;  %v1105_v14 = vrot.slane %v1103_v63, 5 }
  0x37   : > { %2995 = vmatpush3.bf16.msra.mxu1 %v3198_v11  ;;  %2972 = vmatprep.subr.bf16.mxu0 %v3199_v39  ;;  %v3206_v11 = vld [vmem:[%s3917_s1 + $0xd0] sm:$0xff]  }
  0x38   : > { %2996 = vmatprep.subr.bf16.mxu1 %v3200_v45  ;;  %3006 = vmatprep.mubr.bf16.mxu1 %v3211_v8  ;;  %v1377_v8 = vrot.slane %v2564_v56, 5  ;;  %v1106_v24 = vor.u32 %v1105_v14, %v1102_v12  ;;  %v3228_v56 = vld [vmem:[%s3917_s1 + $0x148] sm:$0xff]   ;;  %v2573_v60 = vld [vmem:[%s3389_s16 + $0x30] sm:$0xf]  ;;  %v3659_v63 = vld [vmem:[%s3389_s16 + $0x34] sm:$0x1] }
  0x39   : > { %2982 = vmatprep.mubr.bf16.mxu0 %v2515_v17  ;;  %v2567_v17 = vld [vmem:[%s3389_s16 + $0x18] sm:$0xf]  ;;  %v3670_v12 = vld [vmem:[%s3389_s16 + $0x3c] sm:$0x1] }
  0x3a   : > { %2973 = vmatpush3.bf16.msra.mxu0 %v3199_v39  ;;  %v2516_v39 = vcombine.low %v723_v33, %v727_v9  ;;  %v1117_v27 = vshll.u32 %v2567_v17, 16  ;;  %v1131_v33 = vshll.u32 %v2569_v21, 16  ;;  %v2609_v9 = vld [vmem:[%s3389_s16 + $0x18] sm:$0xe]  ;;  %v3675_v21 = vld [vmem:[%s3389_s16 + $0x44] sm:$0x1] }
  0x3b   : > { %2997 = vmatpush3.bf16.msra.mxu1 %v3200_v45  ;;  %2974 = vmatprep.subr.bf16.mxu0 %v3201_v57  ;;  %v2498_v45 = vrot.slane %v692_v36, 9  ;;  %v1107_v36 = vrot.slane %v1106_v24, 4  ;;  %v3230_v24 = vld [vmem:[%s3917_s1 + $0x140] sm:$0xff]  }
  0x3c   : > { %2998 = vmatprep.subr.bf16.mxu1 %v3202_v15  ;;  %v1119_v38 = vrot.slane %v1117_v27, 5 }
  0x3d   : > { %v743_v49 = vsel %vm3515_vm5, %v2498_v45, %v742_v43  ;;  %v1133_v45 = vrot.slane %v1131_v33, 5 }
  0x3e   : > { %2975 = vmatpush3.bf16.msra.mxu0 %v3201_v57  ;;  %v2518_v53 = vcombine.low %v739_v28, %v743_v49  ;;  %v3222_v57 = vld [vmem:[%s3917_s1 + $0x160] sm:$0xff]  }
  0x3f   : > { %2999 = vmatpush3.bf16.msra.mxu1 %v3202_v15  ;;  %2976 = vmatprep.subr.bf16.mxu0 %v3205_v7  ;;  %v1086_v15 = vshrl.u32 %v2563_v55, 16  ;;  %v1134_v49 = vor.u32 %v1133_v45, %v1130_v44  ;;  %v1389_v55 = vrot.slane %v2570_v25, 5 }
  0x40   : > { %3000 = vmatprep.subr.bf16.mxu1 %v3206_v11 }
  0x41   : > { %v1088_v3 = vrot.slane %v1086_v15, 4  ;;  %v3647_v15 = vld [vmem:[%s3389_s16 + $0x2c] sm:$0x1] }
  0x42   : > { %2977 = vmatpush3.bf16.msra.mxu0 %v3205_v7  ;;  %v2615_v7 = vrot.slane %v2607_v2, 9  ;;  %v1145_v2 = vshll.u32 %v2571_v59, 16 }
  0x43   : > { %3001 = vmatpush3.bf16.msra.mxu1 %v3206_v11  ;;  %2978 = vmatprep.subr.bf16.mxu0 %v3207_v16  ;;  %v1097_v11 = vrot.slane %v1095_v61, 5  ;;  %v1092_v18 = vor.u32 %v1091_v5, %v1088_v3  ;;  %v2575_v3 = vld [vmem:[%s3389_s16 + $0x38] sm:$0xf]  ;;  %v3229_v5 = vld [vmem:[%s3917_s1 + $0x100] sm:$0xff]  }
  0x44   : > { %3002 = vmatprep.subr.bf16.mxu1 %v3208_v4  ;;  %v1378_v13 = vsel %vm3515_vm5, %v2615_v7, %v1377_v8  ;;  %v1151_v7 = vshll.u32 %v3647_v15, 16  ;;  %v1156_v8 = vshrl.u32 %v2573_v60, 16 }
  0x46   : > { %2979 = vmatpush3.bf16.msra.mxu0 %v3207_v16  ;;  %v1111_v16 = vrot.slane %v1109_v0, 5  ;;  %v1142_v0 = vshrl.u32 %v2571_v59, 16 }
  0x47   : > { %3003 = vmatpush3.bf16.msra.mxu1 %v3208_v4  ;;  %2980 = vmatprep.subr.bf16.mxu0 %v3209_v26  ;;  %v2616_v4 = vrot.slane %v2608_v6, 9 }
  0x48   : > { %3004 = vmatprep.subr.bf16.mxu1 %v3210_v31  ;;  %v1144_v14 = vrot.slane %v1142_v0, 4  ;;  %v3235_v0 = vld [vmem:[%s3917_s1 + $0x1a8] sm:$0xff]  }
  0x49   : > { %v1382_v30 = vsel %vm3515_vm5, %v2616_v4, %v1381_v19  ;;  %v1153_v4 = vrot.slane %v1151_v7, 5  ;;  %v1158_v19 = vrot.slane %v1156_v8, 4  ;;  %v3236_v8 = vld [vmem:[%s3917_s1 + $0x1e8] sm:$0xff]  }
  0x4a   : > { %2981 = vmatpush3.bf16.msra.mxu0 %v3209_v26  ;;  %v1114_v26 = vshrl.u32 %v2567_v17, 16  ;;  %v1165_v17 = vshll.u32 %v3659_v63, 16 }
  0x4b   : > { %3005 = vmatpush3.bf16.msra.mxu1 %v3210_v31  ;;  %3014 = vmatprep.subr.bf16.mxu0 %v3213_v29  ;;  %v1123_v31 = vshll.u32 %v2568_v20, 16 }
  0x4c   : > { %3038 = vmatprep.subr.bf16.mxu1 %v3214_v10 }
  0x4d   : > { %2983 = vmatmul.mubr.bf16.vlgmr.msra.gmra.mxu0 %v2516_v39  ;;  %v2610_v39 = vld [vmem:[%s3389_s16 + $0x20] sm:$0xe]  ;;  %v3627_v43 = vrot.slane %v1123_v31, 5  ;;  %v1179_v31 = vshll.u32 %v3670_v12, 16 }
  0x4e   : > { %3007 = vmatmul.mubr.bf16.vlgmr.msra.gmra.mxu1 %v3212_v37  ;;  %3015 = vmatpush3.bf16.msra.mxu0 %v3213_v29  ;;  %v1093_v29 = vrot.slane %v1092_v18, 4  ;;  %v2639_v37 = vcombine.low %v1378_v13, %v1382_v30  ;;  %v2577_v18 = vld [vmem:[%s3389_s16 + $0x40] sm:$0xf]  ;;  %v1170_v13 = vshrl.u32 %v2575_v3, 16 }
  0x4f   : > { %3039 = vmatpush3.bf16.msra.mxu1 %v3214_v10  ;;  %3016 = vmatprep.subr.bf16.mxu0 %v3215_v46  ;;  %v1116_v10 = vrot.slane %v1114_v26, 4  ;;  %v1167_v26 = vrot.slane %v1165_v17, 5  ;;  %v1184_v30 = vshrl.u32 %v2577_v18, 16  ;;  %v1187_v32 = vshll.u32 %v2577_v18, 16  ;;  %v3247_v17 = vld [vmem:[%s3389_s16 + $0x10] ss:$8 sps:$4 sm:$0xff]  }
  0x50   : > { %3040 = vmatprep.subr.bf16.mxu1 %v3216_v23  ;;  %2986 = vmatprep.mubr.bf16.mxu0 %v2517_v47  ;;  %v1098_v42 = vsel %vm3432_vm2, %v1093_v29, %v1097_v11  ;;  %v1137_v47 = vshll.u32 %v2570_v25, 16  ;;  %v1159_v11 = vshll.u32 %v2573_v60, 16  ;;  %v1172_v27 = vrot.slane %v1170_v13, 4  ;;  %v3234_v60 = vld [vmem:[%s3917_s1 + $0x1f0] sm:$0xff]  }
  0x51   : > { %3010 = vmatprep.mubr.bf16.mxu1 %v3219_v48  ;;  %v2617_v48 = vrot.slane %v2609_v9, 9  ;;  %v3231_v9 = vld [vmem:[%s3917_s1 + $0x1b8] sm:$0xff]   ;;  %v1181_v45 = vrot.slane %v1179_v31, 5  ;;  %v2687_v18 = vld [vmem:[%s3389_s16 + $0x10] sm:$0xf] }
  0x52   : > { %3017 = vmatpush3.bf16.msra.mxu0 %v3215_v46  ;;  %v1112_v46 = vsel %vm3432_vm2, %v1107_v36, %v1111_v16  ;;  %v1147_v16 = vrot.slane %v1145_v2, 5  ;;  %v1193_v36 = vshll.u32 %v3675_v21, 16  ;;  %v3735_v13 = vld [vmem:[%s3389_s16 + $0x14] sm:$0x1] }
  0x53   : > { %3041 = vmatpush3.bf16.msra.mxu1 %v3216_v23  ;;  %3018 = vmatprep.subr.bf16.mxu0 %v3217_v50  ;;  %v1120_v23 = vor.u32 %v1119_v38, %v1116_v10  ;;  %v2595_v28 = vcombine.low %v1098_v42, %v1112_v46  ;;  %v3232_v10 = vld [vmem:[%s3917_s1 + $0x1f8] sm:$0xff]   ;;  %v1189_v42 = vrot.slane %v1187_v32, 5  ;;  %v2611_v46 = vld [vmem:[%s3389_s16 + $0x28] sm:$0xe] }
  0x54   : > { %3042 = vmatprep.subr.bf16.mxu1 %v3218_v51  ;;  %v1148_v25 = vor.u32 %v1147_v16, %v1144_v14  ;;  %v3237_v14 = vld [vmem:[%s3917_s1 + $0x1a0] sm:$0xff]  }
  0x55   : > { %2987 = vmatmul.mubr.bf16.gmra.mxu0 %v2518_v53  ;;  %v3634_v53 = vrot.slane %v1120_v23, 4  ;;  %v2612_v23 = vld [vmem:[%s3389_s16 + $0x30] sm:$0xe]  ;;  %v3238_v16 = vld [vmem:[%s3917_s1 + $0x1e0] sm:$0xff]  }
  0x56   : > { %3019 = vmatpush3.bf16.msra.mxu0 %v3217_v50  ;;  %3011 = vmatmul.mubr.bf16.gmra.mxu1 %v3220_v52  ;;  %v1385_v50 = vrot.slane %v2568_v20, 5  ;;  %v3227_v52 = vld [vmem:[%s3917_s1 + $0x108] sm:$0xff]   ;;  %v1161_v20 = vrot.slane %v1159_v11, 5 }
  0x57   : > { %3043 = vmatpush3.bf16.msra.mxu1 %v3218_v51  ;;  %3020 = vmatprep.subr.bf16.mxu0 %v3221_v54  ;;  %v2618_v51 = vrot.slane %v2610_v39, 9  ;;  %v1126_v61 = vsel %vm3432_vm2, %v3634_v53, %v3627_v43  ;;  %v2614_v53 = vld [vmem:[%s3389_s16 + $0x40] sm:$0xe] }
  0x58   : > { %3044 = vmatprep.subr.bf16.mxu1 %v3222_v57  ;;  %3054 = vmatprep.mubr.bf16.mxu1 %v2639_v37  ;;  %v3643_v58 = vsel %vm3515_vm5, %v2617_v48, %v1385_v50  ;;  %v1393_v37 = vrot.slane %v3647_v15, 5  ;;  %v3233_v48 = vld [vmem:[%s3917_s1 + $0x1b0] sm:$0xff]   ;;  %v1195_v50 = vrot.slane %v1193_v36, 5  ;;  %v2622_v15 = vrot.slane %v2614_v53, 9 }
  0x59   : > { %3030 = vmatprep.mubr.bf16.mxu0 %v2595_v28  ;;  %v3656_v62 = vsel %vm3515_vm5, %v2618_v51, %v1389_v55  ;;  %v2619_v51 = vrot.slane %v2611_v46, 9  ;;  %v2620_v55 = vrot.slane %v2612_v23, 9 }
  0x5a   : > { %3021 = vmatpush3.bf16.msra.mxu0 %v3221_v54  ;;  %v3636_v54 = vrot.slane %v1137_v47, 5  ;;  %v2640_v33 = vcombine.low %v3643_v58, %v3656_v62  ;;  %v1397_v47 = vrot.slane %v3659_v63, 5  ;;  %v1405_v63 = vrot.slane %v3675_v21, 5 }
  0x5b   : > { %3045 = vmatpush3.bf16.msra.mxu1 %v3222_v57  ;;  %3022 = vmatprep.subr.bf16.mxu0 %v3223_v22  ;;  %v1135_v57 = vrot.slane %v1134_v49, 4  ;;  %v1394_v59 = vsel %vm3515_vm5, %v2619_v51, %v1393_v37  ;;  %v1752_v21 = vshll.u32 %v2687_v18, 16  ;;  %v3754_v37 = vld [vmem:[%s3389_s16 + $0x24] sm:$0x1] }
  0x5c   : > { %3046 = vmatprep.subr.bf16.mxu1 %v3224_v34  ;;  %v1398_v62 = vsel %vm3515_vm5, %v2620_v55, %v1397_v47  ;;  %v1406_v7 = vsel %vm3515_vm5, %v2622_v15, %v1405_v63  ;;  %v1786_v46 = vshll.u32 %v3754_v37, 16  ;;  %v2695_v63 = vld [vmem:[%s3389_s16 + $0x30] sm:$0xf] }
  0x5d   : > { %v1140_v6 = vsel %vm3432_vm2, %v1135_v57, %v3636_v54  ;;  %v1401_v57 = vrot.slane %v3670_v12, 5  ;;  %v2641_v2 = vcombine.low %v1394_v59, %v1398_v62 }
  0x5e   : > { %3023 = vmatpush3.bf16.msra.mxu0 %v3223_v22  ;;  %v1173_v22 = vshll.u32 %v2575_v3, 16  ;;  %v2596_v43 = vcombine.low %v1126_v61, %v1140_v6  ;;  %v1788_v59 = vrot.slane %v1786_v46, 5  ;;  %v3250_v46 = vld [vmem:[%s3917_s1 + $0x230] sm:$0xff]  }
  0x5f   : > { %3047 = vmatpush3.bf16.msra.mxu1 %v3224_v34  ;;  %3024 = vmatprep.subr.bf16.mxu0 %v3225_v35  ;;  %v1162_v34 = vor.u32 %v1161_v20, %v1158_v19  ;;  %v3739_v19 = vld [vmem:[%s3389_s16 + $0x1c] sm:$0x1]  ;;  %v1749_v20 = vshrl.u32 %v2687_v18, 16 }
  0x60   : > { %3048 = vmatprep.subr.bf16.mxu1 %v3226_v40  ;;  %v1175_v29 = vrot.slane %v1173_v22, 5  ;;  %v1758_v22 = vshll.u32 %v3735_v13, 16 }
  0x61   : > { %v1163_v38 = vrot.slane %v1162_v34, 4  ;;  %v1751_v31 = vrot.slane %v1749_v20, 4  ;;  %v1754_v34 = vrot.slane %v1752_v21, 5 }
  0x62   : > { %3025 = vmatpush3.bf16.msra.mxu0 %v3225_v35  ;;  %v1149_v35 = vrot.slane %v1148_v25, 4  ;;  %v1176_v39 = vor.u32 %v1175_v29, %v1172_v27  ;;  %v3239_v27 = vld [vmem:[%s3917_s1 + $0x198] sm:$0xff]  }
  0x63   : > { %3049 = vmatpush3.bf16.msra.mxu1 %v3226_v40  ;;  %3026 = vmatprep.subr.bf16.mxu0 %v3227_v52  ;;  %v1186_v40 = vrot.slane %v1184_v30, 4  ;;  %v1168_v28 = vsel %vm3432_vm2, %v1163_v38, %v1167_v26  ;;  %v1772_v26 = vshll.u32 %v3739_v19, 16  ;;  %v3240_v29 = vld [vmem:[%s3917_s1 + $0x1d8] sm:$0xff]   ;;  %v1760_v30 = vrot.slane %v1758_v22, 5  ;;  %v3758_v38 = vld [vmem:[%s3389_s16 + $0x2c] sm:$0x1] }
  0x64   : > { %3050 = vmatprep.subr.bf16.mxu1 %v3228_v56  ;;  %v1154_v44 = vsel %vm3432_vm2, %v1149_v35, %v1153_v4  ;;  %v1177_v54 = vrot.slane %v1176_v39, 4  ;;  %v2689_v4 = vld [vmem:[%s3389_s16 + $0x18] sm:$0xf]  ;;  %v3241_v35 = vld [vmem:[%s3917_s1 + $0x190] sm:$0xff]   ;;  %v1755_v36 = vor.u32 %v1754_v34, %v1751_v31  ;;  %v3797_v22 = vld [vmem:[%s3389_s16 + $0x44] sm:$0x1] }
  0x65   : > { %v1190_v49 = vor.u32 %v1189_v42, %v1186_v40  ;;  %v2597_v61 = vcombine.low %v1154_v44, %v1168_v28  ;;  %v1766_v25 = vshll.u32 %v2689_v4, 16  ;;  %v3242_v39 = vld [vmem:[%s3917_s1 + $0x1d0] sm:$0xff]   ;;  %v1774_v42 = vrot.slane %v1772_v26, 5 }
  0x66   : > { %3027 = vmatpush3.bf16.msra.mxu0 %v3227_v52  ;;  %v2613_v52 = vld [vmem:[%s3389_s16 + $0x38] sm:$0xe]  ;;  %v1182_v3 = vsel %vm3432_vm2, %v1177_v54, %v1181_v45  ;;  %v1756_v45 = vrot.slane %v1755_v36, 4  ;;  %v3243_v54 = vld [vmem:[%s3917_s1 + $0x188] sm:$0xff]  }
  0x67   : > { %3051 = vmatpush3.bf16.msra.mxu1 %v3228_v56  ;;  %3028 = vmatprep.subr.bf16.mxu0 %v3229_v5  ;;  %v2621_v56 = vrot.slane %v2613_v52, 9  ;;  %v1191_v58 = vrot.slane %v1190_v49, 4 }
  0x68   : > { %3052 = vmatprep.subr.bf16.mxu1 %v3230_v24  ;;  %v1761_v51 = vsel %vm3432_vm2, %v1756_v45, %v1760_v30  ;;  %v3801_v30 = vld [vmem:[%s3389_s16 + $0x4c] sm:$0x1] }
  0x69   : > { %v1402_v6 = vsel %vm3515_vm5, %v2621_v56, %v1401_v57  ;;  %v3244_v57 = vld [vmem:[%s3917_s1 + $0x1c8] sm:$0xff]  }
  0x6a   : > { %3029 = vmatpush3.bf16.msra.mxu0 %v3229_v5  ;;  %v1196_v5 = vsel %vm3432_vm2, %v1191_v58, %v1195_v50  ;;  %v2642_v12 = vcombine.low %v1402_v6, %v1406_v7  ;;  %v1800_v50 = vshll.u32 %v3758_v38, 16  ;;  %v1808_v6 = vshll.u32 %v2695_v63, 16  ;;  %v3245_v7 = vld [vmem:[%s3917_s1 + $0x180] sm:$0xff]  }
  0x6b   : > { %3053 = vmatpush3.bf16.msra.mxu1 %v3230_v24  ;;  %3062 = vmatprep.subr.bf16.mxu0 %v3231_v9  ;;  %v2598_v11 = vcombine.low %v1182_v3, %v1196_v5  ;;  %v1763_v24 = vshrl.u32 %v2689_v4, 16  ;;  %v3781_v3 = vld [vmem:[%s3389_s16 + $0x3c] sm:$0x1]  ;;  %v1805_v5 = vshrl.u32 %v2695_v63, 16 }
  0x6c   : > { %3086 = vmatprep.subr.bf16.mxu1 %v3232_v10  ;;  %v1810_v20 = vrot.slane %v1808_v6, 5  ;;  %v1828_v21 = vshll.u32 %v3781_v3, 16 }
  0x6d   : > { %3031 = vmatmul.mubr.bf16.vlgmr.msra.gmra.mxu0 %v2596_v43  ;;  %v1765_v32 = vrot.slane %v1763_v24, 4  ;;  %v1807_v4 = vrot.slane %v1805_v5, 4  ;;  %v2736_v5 = vld [vmem:[%s3389_s16 + $0x38] sm:$0xe] }
  0x6e   : > { %3055 = vmatmul.mubr.bf16.vlgmr.msra.gmra.mxu1 %v2640_v33  ;;  %3063 = vmatpush3.bf16.msra.mxu0 %v3231_v9  ;;  %v1768_v33 = vrot.slane %v1766_v25, 5  ;;  %v2691_v9 = vld [vmem:[%s3389_s16 + $0x20] sm:$0xf] }
  0x6f   : > { %3087 = vmatpush3.bf16.msra.mxu1 %v3232_v10  ;;  %3064 = vmatprep.subr.bf16.mxu0 %v3233_v48  ;;  %v2693_v10 = vld [vmem:[%s3389_s16 + $0x28] sm:$0xf]  ;;  %v1777_v43 = vshrl.u32 %v2691_v9, 16  ;;  %v1780_v44 = vshll.u32 %v2691_v9, 16  ;;  %v1811_v34 = vor.u32 %v1810_v20, %v1807_v4  ;;  %v3255_v20 = vld [vmem:[%s3917_s1 + $0x218] sm:$0xff]  }
  0x70   : > { %3088 = vmatprep.subr.bf16.mxu1 %v3234_v60  ;;  %3034 = vmatprep.mubr.bf16.mxu0 %v2597_v61  ;;  %v1769_v40 = vor.u32 %v1768_v33, %v1765_v32  ;;  %v1791_v23 = vshrl.u32 %v2693_v10, 16  ;;  %v1794_v47 = vshll.u32 %v2693_v10, 16  ;;  %v1802_v61 = vrot.slane %v1800_v50, 5  ;;  %v3248_v9 = vld [vmem:[%s3389_s16 + $0x20] ss:$8 sps:$4 sm:$0xff]  }
  0x71   : > { %3058 = vmatprep.mubr.bf16.mxu1 %v2641_v2  ;;  %v1779_v28 = vrot.slane %v1777_v43, 4  ;;  %v1782_v49 = vrot.slane %v1780_v44, 5  ;;  %v2697_v2 = vld [vmem:[%s3389_s16 + $0x38] sm:$0xf]  ;;  %v1842_v33 = vshll.u32 %v3797_v22, 16  ;;  %v1856_v44 = vshll.u32 %v3801_v30, 16 }
  0x72   : > { %3065 = vmatpush3.bf16.msra.mxu0 %v3233_v48  ;;  %v1770_v48 = vrot.slane %v1769_v40, 4  ;;  %v1793_v52 = vrot.slane %v1791_v23, 4  ;;  %v1796_v53 = vrot.slane %v1794_v47, 5 }
  0x73   : > { %3089 = vmatpush3.bf16.msra.mxu1 %v3234_v60  ;;  %3066 = vmatprep.subr.bf16.mxu0 %v3235_v0  ;;  %v1783_v56 = vor.u32 %v1782_v49, %v1779_v28  ;;  %v3251_v28 = vld [vmem:[%s3389_s16 + $0x30] ss:$8 sps:$4 sm:$0xff]  }
  0x74   : > { %3090 = vmatprep.subr.bf16.mxu1 %v3236_v8  ;;  %v1775_v55 = vsel %vm3432_vm2, %v1770_v48, %v1774_v42  ;;  %v1797_v15 = vor.u32 %v1796_v53, %v1793_v52  ;;  %v1812_v42 = vrot.slane %v1811_v34, 4  ;;  %v1858_v52 = vrot.slane %v1856_v44, 5 }
  0x75   : > { %3035 = vmatmul.mubr.bf16.gmra.mxu0 %v2598_v11  ;;  %v2719_v58 = vcombine.low %v1761_v51, %v1775_v55  ;;  %v1784_v60 = vrot.slane %v1783_v56, 4  ;;  %v1844_v51 = vrot.slane %v1842_v33, 5  ;;  %v2040_v56 = vrot.slane %v3735_v13, 5  ;;  %v3253_v13 = vld [vmem:[%s3917_s1 + $0x228] sm:$0xff]  }
  0x76   : > { %3067 = vmatpush3.bf16.msra.mxu0 %v3235_v0  ;;  %3059 = vmatmul.mubr.bf16.gmra.mxu1 %v2642_v12  ;;  %v1798_v62 = vrot.slane %v1797_v15, 4  ;;  %v3777_v0 = vld [vmem:[%s3389_s16 + $0x34] sm:$0x1]  ;;  %v1819_v12 = vshrl.u32 %v2697_v2, 16  ;;  %v2732_v15 = vld [vmem:[%s3389_s16 + $0x18] sm:$0xe] }
  0x77   : > { %3091 = vmatpush3.bf16.msra.mxu1 %v3236_v8  ;;  %3068 = vmatprep.subr.bf16.mxu0 %v3237_v14  ;;  %v1789_v8 = vsel %vm3432_vm2, %v1784_v60, %v1788_v59  ;;  %v1814_v11 = vshll.u32 %v3777_v0, 16  ;;  %v2731_v59 = vld [vmem:[%s3389_s16 + $0x10] sm:$0xe]  ;;  %v2044_v60 = vrot.slane %v3739_v19, 5  ;;  %v2740_v63 = vrot.slane %v2732_v15, 9 }
  0x78   : > { %3092 = vmatprep.subr.bf16.mxu1 %v3238_v16  ;;  %3078 = vmatprep.mubr.bf16.mxu0 %v3247_v17  ;;  %v3246_v17 = vld [vmem:[%s3917_s1 + $0x1c0] sm:$0xff]   ;;  %v1803_v18 = vsel %vm3432_vm2, %v1798_v62, %v1802_v61  ;;  %v1821_v25 = vrot.slane %v1819_v12, 4  ;;  %v2739_v62 = vrot.slane %v2731_v59, 9  ;;  %v2052_v33 = vrot.slane %v3758_v38, 5 }
  0x79   : > { %3102 = vmatprep.mubr.bf16.mxu1 %v2719_v58  ;;  %v1816_v24 = vrot.slane %v1814_v11, 5  ;;  %v2720_v45 = vcombine.low %v1789_v8, %v1803_v18  ;;  %v2744_v8 = vrot.slane %v2736_v5, 9  ;;  %v2060_v11 = vrot.slane %v3781_v3, 5  ;;  %v3252_v12 = vld [vmem:[%s3389_s16 + $0x40] ss:$8 sps:$4 sm:$0xff]  }
  0x7a   : > { %3069 = vmatpush3.bf16.msra.mxu0 %v3237_v14  ;;  %v1822_v14 = vshll.u32 %v2697_v2, 16  ;;  %v2735_v2 = vld [vmem:[%s3389_s16 + $0x30] sm:$0xe]  ;;  %v3254_v3 = vld [vmem:[%s3917_s1 + $0x220] sm:$0xff]  }
  0x7b   : > { %3093 = vmatpush3.bf16.msra.mxu1 %v3238_v16  ;;  %3070 = vmatprep.subr.bf16.mxu0 %v3239_v27  ;;  %v2699_v16 = vld [vmem:[%s3389_s16 + $0x40] sm:$0xf]  ;;  %v1817_v49 = vsel %vm3432_vm2, %v1812_v42, %v1816_v24  ;;  %v2743_v19 = vrot.slane %v2735_v2, 9  ;;  %v3257_v24 = vld [vmem:[%s3917_s1 + $0x208] sm:$0xff]  }
  0x7c   : > { %3094 = vmatprep.subr.bf16.mxu1 %v3240_v29  ;;  %v1824_v26 = vrot.slane %v1822_v14, 5  ;;  %v1833_v31 = vshrl.u32 %v2699_v16, 16  ;;  %v1836_v32 = vshll.u32 %v2699_v16, 16  ;;  %v2041_v14 = vsel %vm3515_vm5, %v2739_v62, %v2040_v56 }
  0x7d   : > { %v2045_v16 = vsel %vm3515_vm5, %v2740_v63, %v2044_v60 }
  0x7e   : > { %3071 = vmatpush3.bf16.msra.mxu0 %v3239_v27  ;;  %v2701_v27 = vld [vmem:[%s3389_s16 + $0x48] sm:$0xf]  ;;  %v1825_v36 = vor.u32 %v1824_v26, %v1821_v25  ;;  %v1835_v10 = vrot.slane %v1833_v31, 4  ;;  %v1838_v43 = vrot.slane %v1836_v32, 5  ;;  %v2763_v18 = vcombine.low %v2041_v14, %v2045_v16  ;;  %v2733_v25 = vld [vmem:[%s3389_s16 + $0x20] sm:$0xe] }
  0x7f   : > { %3095 = vmatpush3.bf16.msra.mxu1 %v3240_v29  ;;  %3072 = vmatprep.subr.bf16.mxu0 %v3241_v35  ;;  %v1830_v29 = vrot.slane %v1828_v21, 5  ;;  %v1850_v40 = vshll.u32 %v2701_v27, 16  ;;  %v3256_v21 = vld [vmem:[%s3917_s1 + $0x210] sm:$0xff]   ;;  %v2734_v26 = vld [vmem:[%s3389_s16 + $0x28] sm:$0xe]  ;;  %v2741_v34 = vrot.slane %v2733_v25, 9 }
  0x80   : > { %3096 = vmatprep.subr.bf16.mxu1 %v3242_v39  ;;  %v1826_v23 = vrot.slane %v1825_v36, 4  ;;  %v1839_v50 = vor.u32 %v1838_v43, %v1835_v10  ;;  %v2738_v31 = vld [vmem:[%s3389_s16 + $0x48] sm:$0xe]  ;;  %v2742_v32 = vrot.slane %v2734_v26, 9  ;;  %v3258_v36 = vld [vmem:[%s3917_s1 + $0x200] sm:$0xff]  }
  0x81   : > { %v1852_v48 = vrot.slane %v1850_v40, 5 }
  0x82   : > { %3073 = vmatpush3.bf16.msra.mxu0 %v3241_v35  ;;  %v3249_v35 = vld [vmem:[%s3917_s1 + $0x238] sm:$0xff]   ;;  %v1831_v53 = vsel %vm3432_vm2, %v1826_v23, %v1830_v29  ;;  %v1840_v55 = vrot.slane %v1839_v50, 4  ;;  %v2048_v29 = vrot.slane %v3754_v37, 5  ;;  %v2053_v38 = vsel %vm3515_vm5, %v2742_v32, %v2052_v33 }
  0x83   : > { %3097 = vmatpush3.bf16.msra.mxu1 %v3242_v39  ;;  %3074 = vmatprep.subr.bf16.mxu0 %v3243_v54  ;;  %v1847_v39 = vshrl.u32 %v2701_v27, 16  ;;  %v2737_v27 = vld [vmem:[%s3389_s16 + $0x40] sm:$0xe] }
  0x84   : > { %3098 = vmatprep.subr.bf16.mxu1 %v3244_v57  ;;  %v1845_v61 = vsel %vm3432_vm2, %v1840_v55, %v1844_v51  ;;  %v2745_v10 = vrot.slane %v2737_v27, 9  ;;  %v2049_v37 = vsel %vm3515_vm5, %v2741_v34, %v2048_v29 }
  0x85   : > { %v1849_v47 = vrot.slane %v1847_v39, 4  ;;  %v2746_v39 = vrot.slane %v2738_v31, 9  ;;  %v2764_v40 = vcombine.low %v2049_v37, %v2053_v38 }
  0x86   : > { %3075 = vmatpush3.bf16.msra.mxu0 %v3243_v54 }
  0x87   : > { %3099 = vmatpush3.bf16.msra.mxu1 %v3244_v57  ;;  %3076 = vmatprep.subr.bf16.mxu0 %v3245_v7  ;;  %v1853_v54 = vor.u32 %v1852_v48, %v1849_v47  ;;  %v2721_v57 = vcombine.low %v1817_v49, %v1831_v53 }
  0x88   : > { %3100 = vmatprep.subr.bf16.mxu1 %v3246_v17 }
  0x89   : > { %v1854_v58 = vrot.slane %v1853_v54, 4 }
  0x8a   : > { %3077 = vmatpush3.bf16.msra.mxu0 %v3245_v7  ;;  %v2056_v7 = vrot.slane %v3777_v0, 5  ;;  %v2061_v0 = vsel %vm3515_vm5, %v2744_v8, %v2060_v11 }
  0x8b   : > { %3101 = vmatpush3.bf16.msra.mxu1 %v3246_v17  ;;  %3110 = vmatprep.subr.bf16.mxu0 %v3249_v35  ;;  %v1859_v6 = vsel %vm3432_vm2, %v1854_v58, %v1858_v52 }
  0x8c   : > { %3134 = vmatprep.subr.bf16.mxu1 %v3249_v35  ;;  %v2722_v17 = vcombine.low %v1845_v61, %v1859_v6  ;;  %v2057_v41 = vsel %vm3515_vm5, %v2743_v19, %v2056_v7 }
  0x8d   : > { %3079 = vmatmul.mubr.bf16.vlgmr.msra.gmra.mxu0 %v3248_v9  ;;  %v2765_v4 = vcombine.low %v2057_v41, %v2061_v0  ;;  %v2064_v9 = vrot.slane %v3797_v22, 5 }
  0x8e   : > { %3103 = vmatmul.mubr.bf16.vlgmr.msra.gmra.mxu1 %v2720_v45  ;;  %3111 = vmatpush3.bf16.msra.mxu0 %v3249_v35 }
  0x8f   : > { %3142 = vmatpush3.bf16.msra.mxu1 %v3249_v35  ;;  %3112 = vmatprep.subr.bf16.mxu0 %v3250_v46  ;;  %v2068_v35 = vrot.slane %v3801_v30, 5  ;;  %v2065_v22 = vsel %vm3515_vm5, %v2745_v10, %v2064_v9 }
  0x90   : > { %3135 = vmatprep.subr.bf16.mxu1 %v3250_v46  ;;  %3082 = vmatprep.mubr.bf16.mxu0 %v3251_v28 }
  0x91   : > { %3106 = vmatprep.mubr.bf16.mxu1 %v2721_v57  ;;  %v2069_v30 = vsel %vm3515_vm5, %v2746_v39, %v2068_v35 }
  0x92   : > { %3113 = vmatpush3.bf16.msra.mxu0 %v3250_v46  ;;  %v2766_v42 = vcombine.low %v2065_v22, %v2069_v30 }
  0x93   : > { %3143 = vmatpush3.bf16.msra.mxu1 %v3250_v46  ;;  %3114 = vmatprep.subr.bf16.mxu0 %v3253_v13 }
  0x94   : > { %3136 = vmatprep.subr.bf16.mxu1 %v3253_v13 }
  0x95   : > { %3083 = vmatmul.mubr.bf16.gmra.mxu0 %v3252_v12 }
  0x96   : > { %3115 = vmatpush3.bf16.msra.mxu0 %v3253_v13  ;;  %3107 = vmatmul.mubr.bf16.gmra.mxu1 %v2722_v17 }
  0x97   : > { %3144 = vmatpush3.bf16.msra.mxu1 %v3253_v13  ;;  %3116 = vmatprep.subr.bf16.mxu0 %v3254_v3 }
  0x98   : > { %3137 = vmatprep.subr.bf16.mxu1 %v3254_v3  ;;  %3126 = vmatprep.mubr.bf16.mxu0 %v2763_v18 }
  0x99   : > { %3130 = vmatprep.mubr.bf16.mxu1 %v2765_v4 }
  0x9a   : > { %3117 = vmatpush3.bf16.msra.mxu0 %v3254_v3 }
  0x9b   : > { %3145 = vmatpush3.bf16.msra.mxu1 %v3254_v3  ;;  %3118 = vmatprep.subr.bf16.mxu0 %v3255_v20 }
  0x9c   : > { %3138 = vmatprep.subr.bf16.mxu1 %v3255_v20 }
  0x9e   : > { %3119 = vmatpush3.bf16.msra.mxu0 %v3255_v20 }
  0x9f   : > { %3146 = vmatpush3.bf16.msra.mxu1 %v3255_v20  ;;  %3120 = vmatprep.subr.bf16.mxu0 %v3256_v21 }
  0xa0   : > { %3139 = vmatprep.subr.bf16.mxu1 %v3256_v21 }
  0xa2   : > { %3121 = vmatpush3.bf16.msra.mxu0 %v3256_v21 }
  0xa3   : > { %3147 = vmatpush3.bf16.msra.mxu1 %v3256_v21  ;;  %3122 = vmatprep.subr.bf16.mxu0 %v3257_v24 }
  0xa4   : > { %3140 = vmatprep.subr.bf16.mxu1 %v3257_v24 }
  0xa6   : > { %3123 = vmatpush3.bf16.msra.mxu0 %v3257_v24 }
  0xa7   : > { %3148 = vmatpush3.bf16.msra.mxu1 %v3257_v24  ;;  %3124 = vmatprep.subr.bf16.mxu0 %v3258_v36 }
  0xa8   : > { %3141 = vmatprep.subr.bf16.mxu1 %v3258_v36 }
  0xaa   : > { %3125 = vmatpush3.bf16.msra.mxu0 %v3258_v36 }
  0xab   : > { %3149 = vmatpush3.bf16.msra.mxu1 %v3258_v36 }
  0xad   : > { %3127 = vmatmul.mubr.bf16.vlgmr.msra.gmra.mxu0 %v2764_v40 }
  0xae   : > { %3131 = vmatmul.mubr.bf16.vlgmr.msra.gmra.mxu1 %v2766_v42 }
  0xed   : > { %v2936_v43 = vpop.f32.mrf.mxu0 }
  0xee   : > { %v2960_v45 = vpop.f32.mrf.mxu1 }
  0xef   : > { %v517_v44 = vpop.f32.mrf.mxu0  ;;  %v663_v9 = vadd.f32 %v2960_v45, %v2936_v43 }
  0xf0   : > { %v654_v23 = vpop.f32.mrf.mxu1 }
  0xf1   : > { %v2937_v46 = vpop.f32.mrf.mxu0  ;;  %v655_v39 = vadd.f32 %v654_v23, %v517_v44 }
  0xf2   : > { %v2961_v28 = vpop.f32.mrf.mxu1 }
  0xf3   : > { %v520_v47 = vpop.f32.mrf.mxu0  ;;  %v666_v30 = vadd.f32 %v2961_v28, %v2937_v46 }
  0xf4   : > { %v657_v50 = vpop.f32.mrf.mxu1 }
  0xf5   : > { %v2940_v48 = vpop.f32.mrf.mxu0  ;;  %v658_v45 = vadd.f32 %v657_v50, %v520_v47 }
  0xf6   : > { %v2964_v51 = vpop.f32.mrf.mxu1 }
  0xf7   : > { %v533_v49 = vpop.f32.mrf.mxu0  ;;  %v679_v36 = vadd.f32 %v2964_v51, %v2940_v48 }
  0xf8   : > { %v670_v52 = vpop.f32.mrf.mxu1 }
  0xf9   : > { %v2941_v1 = vpop.f32.mrf.mxu0  ;;  %v671_v38 = vadd.f32 %v670_v52, %v533_v49 }
  0xfa   : > { %v2965_v55 = vpop.f32.mrf.mxu1 }
  0xfb   : > { %v536_v53 = vpop.f32.mrf.mxu0 }
  0xfc   : > { %v673_v57 = vpop.f32.mrf.mxu1 }
  0xfd   : > { %v674_v23 = vadd.f32 %v673_v57, %v536_v53 }
 0x10d   : > { %v2984_v54 = vpop.f32.mrf.mxu0 }
 0x10e   : > { %v3008_v58 = vpop.f32.mrf.mxu1  ;;  %v892_v37 = vadd.f32 %v2984_v54, %v663_v9 }
 0x10f   : > { %v859_v56 = vpop.f32.mrf.mxu0 }
 0x110   : > { %v1030_v15 = vpop.f32.mrf.mxu1  ;;  %v890_v40 = vadd.f32 %v859_v56, %v655_v39 }
 0x111   : > { %v2985_v59 = vpop.f32.mrf.mxu0 }
 0x112   : > { %v3009_v61 = vpop.f32.mrf.mxu1  ;;  %v893_v48 = vadd.f32 %v2985_v59, %v666_v30  ;;  %v1061_v54 = vadd.f32 %v1030_v15, %v890_v40 }
 0x113   : > { %v862_v60 = vpop.f32.mrf.mxu0 }
 0x114   : > { %v1033_v63 = vpop.f32.mrf.mxu1  ;;  %v891_v49 = vadd.f32 %v862_v60, %v658_v45  ;;  %v1064_v56 = vadd.f32 %v3009_v61, %v893_v48 }
 0x115   : > { %v2988_v62 = vpop.f32.mrf.mxu0 }
 0x116   : > { %v3012_v5 = vpop.f32.mrf.mxu1  ;;  %v896_v22 = vadd.f32 %v2988_v62, %v679_v36 }
 0x117   : > { %v875_v2 = vpop.f32.mrf.mxu0 }
 0x118   : > { %v1046_v6 = vpop.f32.mrf.mxu1  ;;  %v1067_v44 = vadd.f32 %v3012_v5, %v896_v22 }
 0x119   : > { %v2989_v13 = vpop.f32.mrf.mxu0 }
 0x11a   : > { %v3013_v7 = vpop.f32.mrf.mxu1 }
 0x11b   : > { %v878_v19 = vpop.f32.mrf.mxu0 }
 0x11c   : > { %v1049_v11 = vpop.f32.mrf.mxu1  ;;  %v895_v62 = vadd.f32 %v878_v19, %v674_v23 }
 0x12d   : > { %v3032_v8 = vpop.f32.mrf.mxu0 }
 0x12e   : > { %v3056_v14 = vpop.f32.mrf.mxu1 }
 0x12f   : > { %v1312_v12 = vpop.f32.mrf.mxu0 }
 0x130   : > { %v1522_v17 = vpop.f32.mrf.mxu1  ;;  %v1343_v39 = vadd.f32 %v1312_v12, %v1061_v54 }
 0x131   : > { %v3033_v16 = vpop.f32.mrf.mxu0 }
 0x132   : > { %v3057_v0 = vpop.f32.mrf.mxu1  ;;  %v1346_v50 = vadd.f32 %v3033_v16, %v1064_v56  ;;  %v1553_v5 = vadd.f32 %v1522_v17, %v1343_v39 }
 0x133   : > { %v1315_v41 = vpop.f32.mrf.mxu0 }
 0x134   : > { %v3872_v18 = vpop.f32.mrf.mxu1 }
 0x135   : > { %v3036_v3 = vpop.f32.mrf.mxu0  ;;  %3924 = vst [vmem:[#allocation2_spill] sm:$0xff] %v3872_v18  ;;  %v682_v18 = vadd.f32 %v2965_v55, %v2941_v1 }
 0x136   : > { %v3060_v4 = vpop.f32.mrf.mxu1  ;;  %v1349_v28 = vadd.f32 %v3036_v3, %v1067_v44  ;;  %v1556_v3 = vadd.f32 %v3057_v0, %v1346_v50 }
 0x137   : > { %v1328_v20 = vpop.f32.mrf.mxu0  ;;  %v897_v9 = vadd.f32 %v2989_v13, %v682_v18 }
 0x138   : > { %v1538_v21 = vpop.f32.mrf.mxu1  ;;  %v1559_v59 = vadd.f32 %v3060_v4, %v1349_v28 }
 0x139   : > { %v3037_v24 = vpop.f32.mrf.mxu0  ;;  %v1068_v1 = vadd.f32 %v3013_v7, %v897_v9 }
 0x13a   : > { %v3061_v25 = vpop.f32.mrf.mxu1 }
 0x13b   : > { %v1331_v26 = vpop.f32.mrf.mxu0  ;;  %v1350_v53 = vadd.f32 %v3037_v24, %v1068_v1 }
 0x13c   : > { %v1541_v31 = vpop.f32.mrf.mxu1 }
 0x13d   : > { %v1560_v12 = vadd.f32 %v3061_v25, %v1350_v53 }
 0x14d   : > { %v3080_v27 = vpop.f32.mrf.mxu0 }
 0x14e   : > { %v3104_v34 = vpop.f32.mrf.mxu1 }
 0x14f   : > { %v1693_v29 = vpop.f32.mrf.mxu0 }
 0x150   : > { %v3874_v32 = vpop.f32.mrf.mxu1  ;;  %v1724_v61 = vadd.f32 %v1693_v29, %v1553_v5 }
 0x151   : > { %3925 = vst [vmem:[#allocation3_spill] sm:$0xff] %v3874_v32  ;;  %v3081_v33 = vpop.f32.mrf.mxu0  ;;  %v894_v32 = vadd.f32 %v875_v2, %v671_v38  ;;  %v1062_v2 = vadd.f32 %v1033_v63, %v891_v49 }
 0x152   : > { %v3876_v35 = vpop.f32.mrf.mxu1  ;;  %v1727_v16 = vadd.f32 %v3081_v33, %v1556_v3 }
 0x153   : > { %3926 = vst [vmem:[#allocation4_spill] sm:$0xff] %v3876_v35  ;;  %v1696_v10 = vpop.f32.mrf.mxu0  ;;  %v1063_v35 = vadd.f32 %v3008_v58, %v892_v37  ;;  %v1065_v36 = vadd.f32 %v1046_v6, %v894_v32  ;;  %v1066_v58 = vadd.f32 %v1049_v11, %v895_v62  ;;  %v1344_v15 = vadd.f32 %v1315_v41, %v1062_v2  ;;  %v2775_v41 = vld [vmem:[%s3918_s2] ss:$0 sm:$0xff] }
 0x154   : > { %v3878_v42 = vpop.f32.mrf.mxu1 }
 0x155   : > { %3927 = vst [vmem:[#allocation5_spill] sm:$0xff] %v3878_v42  ;;  %v3084_v43 = vpop.f32.mrf.mxu0  ;;  %v1345_v52 = vadd.f32 %v3032_v8, %v1063_v35  ;;  %v1347_v55 = vadd.f32 %v1328_v20, %v1065_v36  ;;  %v1348_v19 = vadd.f32 %v1331_v26, %v1066_v58  ;;  %v3928_v20 = vld [vmem:[#allocation2_spill] sm:$0xff] }
 0x156   : > { %v3108_v51 = vpop.f32.mrf.mxu1  ;;  %v1730_v8 = vadd.f32 %v3084_v43, %v1559_v59  ;;  %v1554_v63 = vadd.f32 %v3928_v20, %v1344_v15 }
 0x157   : > { %v1709_v46 = vpop.f32.mrf.mxu0  ;;  %v1555_v47 = vadd.f32 %v3056_v14, %v1345_v52  ;;  %v1557_v6 = vadd.f32 %v1538_v21, %v1347_v55  ;;  %v1558_v4 = vadd.f32 %v1541_v31, %v1348_v19 }
 0x158   : > { %v1991_v42 = vpop.f32.mrf.mxu1  ;;  %v2012_v24 = vadd.f32 %v3108_v51, %v1730_v8  ;;  %v3929_v21 = vld [vmem:[#allocation3_spill] sm:$0xff]  ;;  %v1725_v0 = vadd.f32 %v1696_v10, %v1554_v63 }
 0x159   : > { %v3085_v57 = vpop.f32.mrf.mxu0  ;;  %v1726_v60 = vadd.f32 %v3080_v27, %v1555_v47  ;;  %v1728_v18 = vadd.f32 %v1709_v46, %v1557_v6  ;;  %v2006_v26 = vadd.f32 %v3929_v21, %v1724_v61 }
 0x15a   : > { %v3109_v13 = vpop.f32.mrf.mxu1  ;;  %v1731_v32 = vadd.f32 %v3085_v57, %v1560_v12 }
 0x15b   : > { %v1712_v7 = vpop.f32.mrf.mxu0  ;;  %v2008_v14 = vadd.f32 %v3104_v34, %v1726_v60  ;;  %v2010_v29 = vadd.f32 %v1991_v42, %v1728_v18  ;;  %v3930_v34 = vld [vmem:[#allocation4_spill] sm:$0xff] }
 0x15c   : > { %v1994_v11 = vpop.f32.mrf.mxu1  ;;  %v1729_v35 = vadd.f32 %v1712_v7, %v1558_v4  ;;  %v2009_v33 = vadd.f32 %v3930_v34, %v1727_v16  ;;  %v2013_v40 = vadd.f32 %v3109_v13, %v1731_v32  ;;  %v3931_v51 = vld [vmem:[#allocation5_spill] sm:$0xff] }
 0x15d   : > { %v2007_v23 = vadd.f32 %v3931_v51, %v1725_v0 }
 0x15e   : > { %v2011_v54 = vadd.f32 %v1994_v11, %v1729_v35 }
 0x16d   : > { %v3128_v17 = vpop.f32.mrf.mxu0 }
 0x16e   : > { %v2218_v27 = vadd.f32 %v3128_v17, %v2008_v14  ;;  %v3132_v25 = vpop.f32.mrf.mxu1 }
 0x16f   : > { %v2222_v37 = vadd.f32 %v3132_v25, %v2012_v24  ;;  %v2185_v38 = vpop.f32.mrf.mxu0 }
 0x170   : > { %v3886_v22 = vadd.f32 %v2775_v41, %v2218_v27  ;;  %v2216_v31 = vadd.f32 %v2185_v38, %v2006_v26  ;;  %v2201_v30 = vpop.f32.mrf.mxu1 }
 0x171   : > { %v3888_v43 = vadd.f32 %v2775_v41, %v2222_v37  ;;  %v2220_v45 = vadd.f32 %v2201_v30, %v2010_v29  ;;  %v3129_v48 = vpop.f32.mrf.mxu0 }
 0x172   : > { %v2778_v10 = vmul.f32 -1.442695, %v3886_v22  ;;  %v3892_v44 = vadd.f32 %v2775_v41, %v2216_v31  ;;  %v2219_v42 = vadd.f32 %v3129_v48, %v2009_v33  ;;  %v3133_v9 = vpop.f32.mrf.mxu1 }
 0x173   : > { %v2782_v49 = vmul.f32 -1.442695, %v3888_v43  ;;  %v3895_v52 = vadd.f32 %v2775_v41, %v2220_v45  ;;  %v2223_v36 = vadd.f32 %v3133_v9, %v2013_v40  ;;  %v2188_v62 = vpop.f32.mrf.mxu0 }
 0x174   : > { %3259 = vpow2.f32 %v2778_v10  ;;  %v2776_v28 = vmul.f32 -1.442695, %v3892_v44  ;;  %v2234_v46 = vadd.f32 %v2775_v41, %v2219_v42  ;;  %v2217_v56 = vadd.f32 %v2188_v62, %v2007_v23  ;;  %v2204_v39 = vpop.f32.mrf.mxu1 }
 0x175   : > { %3261 = vpow2.f32 %v2782_v49  ;;  %v2780_v1 = vmul.f32 -1.442695, %v3895_v52  ;;  %v2238_v55 = vadd.f32 %v2775_v41, %v2223_v36  ;;  %v2221_v2 = vadd.f32 %v2204_v39, %v2011_v54 }
 0x176   : > { %3263 = vpow2.f32 %v2776_v28  ;;  %v2779_v47 = vmul.f32 -1.442695, %v2234_v46  ;;  %v2232_v50 = vadd.f32 %v2775_v41, %v2217_v56 }
 0x177   : > { %3265 = vpow2.f32 %v2780_v1  ;;  %v2783_v58 = vmul.f32 -1.442695, %v2238_v55  ;;  %v2236_v59 = vadd.f32 %v2775_v41, %v2221_v2 }
 0x178   : > { %3267 = vpow2.f32 %v2779_v47  ;;  %v2777_v53 = vmul.f32 -1.442695, %v2232_v50 }
 0x179   : > { %3269 = vpow2.f32 %v2783_v58  ;;  %v2781_v57 = vmul.f32 -1.442695, %v2236_v59 }
 0x17a   : > { %3271 = vpow2.f32 %v2777_v53 }
 0x17b   : > { %3273 = vpow2.f32 %v2781_v57 }
 0x181   : > { %v3260_v5 = vpop.eup %3259 }
 0x182   : > { %v3262_v15 = vpop.eup %3261  ;;  %v2265_v60 = vadd.f32 1.0, %v3260_v5 }
 0x183   : > { %v3264_v13 = vpop.eup %3263  ;;  %v2269_v6 = vadd.f32 1.0, %v3262_v15 }
 0x184   : > { %v3266_v19 = vpop.eup %3265  ;;  %3275 = vrcp.f32 %v2265_v60  ;;  %v2263_v8 = vadd.f32 1.0, %v3264_v13 }
 0x185   : > { %v3268_v3 = vpop.eup %3267  ;;  %3277 = vrcp.f32 %v2269_v6  ;;  %v2267_v61 = vadd.f32 1.0, %v3266_v19 }
 0x186   : > { %v3270_v12 = vpop.eup %3269  ;;  %3279 = vrcp.f32 %v2263_v8  ;;  %v2266_v18 = vadd.f32 1.0, %v3268_v3 }
 0x187   : > { %v3272_v7 = vpop.eup %3271  ;;  %3281 = vrcp.f32 %v2267_v61  ;;  %v2270_v20 = vadd.f32 1.0, %v3270_v12 }
 0x188   : > { %v3274_v63 = vpop.eup %3273  ;;  %3283 = vrcp.f32 %v2266_v18  ;;  %v2264_v14 = vadd.f32 1.0, %v3272_v7 }
 0x189   : > { %3285 = vrcp.f32 %v2270_v20  ;;  %v2268_v16 = vadd.f32 1.0, %v3274_v63 }
 0x18a   : > { %3287 = vrcp.f32 %v2264_v14 }
 0x18b   : > { %3289 = vrcp.f32 %v2268_v16 }
 0x191   : > { %v3276_v11 = vpop.eup %3275 }
 0x192   : > { %v3278_v4 = vpop.eup %3277  ;;  %v2289_v21 = vmul.f32 %v3276_v11, %v3886_v22 }
 0x193   : > { %v3280_v24 = vpop.eup %3279  ;;  %v2293_v27 = vmul.f32 %v3278_v4, %v3888_v43 }
 0x194   : > { %v3282_v32 = vpop.eup %3281  ;;  %v2287_v35 = vmul.f32 %v3280_v24, %v3892_v44 }
 0x195   : > { %v3284_v17 = vpop.eup %3283  ;;  %v2291_v34 = vmul.f32 %v3282_v32, %v3895_v52 }
 0x196   : > { %v3286_v41 = vpop.eup %3285  ;;  %v2290_v26 = vmul.f32 %v3284_v17, %v2234_v46 }
 0x197   : > { %v3288_v0 = vpop.eup %3287  ;;  %v2294_v25 = vmul.f32 %v3286_v41, %v2238_v55 }
 0x198   : > { %v3290_v29 = vpop.eup %3289  ;;  %v2795_v37 = vpack.c.bf16 %v2290_v26, %v2289_v21  ;;  %v2288_v38 = vmul.f32 %v3288_v0, %v2232_v50 }
 0x199   : > { %v2805_v33 = vpack.c.bf16 %v2294_v25, %v2293_v27  ;;  %v2292_v31 = vmul.f32 %v3290_v29, %v2236_v59 }
 0x19a   : > { %2807 = vst [vmem:[%s252_s8 + $0x8] sm:$0xff] %v2795_v37   ;;  %v2790_v22 = vpack.c.bf16 %v2288_v38, %v2287_v35 }
 0x19b   : > { %2809 = vst [vmem:[%s252_s8 + $0x18] sm:$0xff] %v2805_v33   ;;  %v2800_v30 = vpack.c.bf16 %v2292_v31, %v2291_v34 }
 0x19c   : > { %2791 = vst [vmem:[%s252_s8] sm:$0xff] %v2790_v22  }
 0x19d   : > { %2808 = vst [vmem:[%s252_s8 + $0x10] sm:$0xff] %v2800_v30  }
 0x19e PF: > { %s13_s14 = sadd.s32 1, %s3313_s14   ;;  %s3932_s12 = smov %s3309_s13 }
 0x19f   : > { %p10_p5 = scmp.ge.s32.totalorder %s13_s14, 4   ;;  %s3933_s13 = smov %s3935_s15 }
 0x1a1   :  { %12 = sbr.rel (!%p10_p5) target bundleno = 2 (0x2), region = 78 }

// kernel: effnetv2_forward.19
= control target key start
LH: loop header
LB: loop body
LE: loop exit
PB: predicated region body
PF: predicated region fallthrough
CT: control target
= control target key end

     0   :  { %s803_s15 = smov 0   ;;  %s805_s16 = smov 0   ;;  %s870_s0 = inlined_call_operand.vmem [shape: bf16[2,16,128], index: 0, kind: input, shape index: {}]   ;;  %s871_s1 = inlined_call_operand.vmem [shape: bf16[128,128], index: 1, kind: input, shape index: {}]   ;;  %s872_s2 = inlined_call_operand.vmem [shape: bf16[2,1,128], index: 2, kind: input, shape index: {}]   ;;  %s873_s3 = inlined_call_operand.vmem [shape: f32[1,128], index: 3, kind: input, shape index: {}]   ;;  %s874_s4 = inlined_call_operand.vmem [shape: bf16[2,16,128], index: 4, kind: output, shape index: {}]  }
   0x1   :  { %s807_s17 = smov 0  }
   0x2 LB: > { %s40_s18 = sadd.s32 1, %s770_s16  ;;  %p660_p0 = scmp.ge.s32.totalorder %s774_s17, 1  ;;  %s774_s17 = sphi %s807_s17, %s14_s17   ;;  %s770_s16 = sphi %s805_s16, %s876_s16   ;;  %s766_s15 = sphi %s803_s15, %s875_s15  }
   0x3   : > { %p42_p1 = scmp.ge.s32.totalorder %s40_s18, 2  ;;  %p241_p2 = scmp.lt.s32.totalorder %s774_s17, 3 }
   0x5   : > { %s878_s18 = smov (%p42_p1, %s40_s18), 0  ;;  %p242_p3 = pnand %p660_p0, %p241_p2 }
   0x6   : > { %p299_p4 = scmp.lt.s32.totalorder (!%p242_p3), %s766_s15, 1 }
   0x7   : > { %245 = sbr.rel (%p242_p3) target bundleno = 247 (0xf7), region = 36 }
   0xc   : > { %v744_v0 = vld [vmem:[%s871_s1 + $0x38] sm:$0xff]   ;;  %v776_v1 = vmov 0.0   ;;  %v745_v2 = vld [vmem:[%s871_s1 + $0x30] sm:$0xff]   ;;  %vm777_vm0 = vmmov 0   ;;  %s880_s15 = smov (!%p299_p4, %s766_s15), 1  ;;  %v355_v3 = vlaneseq  ;;  %v746_v4 = vld [vmem:[%s871_s1 + $0x28] sm:$0xff]  }
   0xd   : > { %698 = vmatprep.subr.bf16.mxu0 %v776_v1  ;;  %714 = vmatprep.mubr.msk.bf16.mxu0 %vm777_vm0, %v776_v1  ;;  %s325_s27 = scalar_lea.vmem %s872_s2, %s880_s15  ;;  %v747_v6 = vld [vmem:[%s871_s1 + $0x20] sm:$0xff]   ;;  %v748_v10 = vld [vmem:[%s871_s1 + $0x18] sm:$0xff]   ;;  %s680_s6 = sshll.u32 %s880_s15, 3  ;;  %v749_v12 = vld [vmem:[%s871_s1 + $0x10] sm:$0xff]  }
   0xe   : > { %699 = vmatpush3.bf16.msra.mxu0 %v744_v0  ;;  %v356_v5 = vshrl.u32 %v355_v3, 7  ;;  %v351_v7 = vld [vmem:[%s325_s27] sm:$0x1]  ;;  %s309_s11 = scalar_lea.vmem %s870_s0, %s680_s6  ;;  %v750_v14 = vld [vmem:[%s871_s1 + $0x8] sm:$0xff]   ;;  %s340_s23 = scalar_lea.vmem %s874_s4, %s680_s6 }
   0xf   : > { %700 = vmatprep.subr.bf16.mxu0 %v776_v1  ;;  %v353_v8 = vpack.i.b16 %v351_v7, %v351_v7  ;;  %v349_v15 = vld [vmem:[%s309_s11] sm:$0xf]  ;;  %v350_v16 = vld [vmem:[%s309_s11 + $0x4] sm:$0xf] }
  0x10   : > { %v357_v9 = vsub.s32 0, %v356_v5  ;;  %v751_v19 = vld [vmem:[%s871_s1] sm:$0xff]  }
  0x11   : > { %v675_v22 = vld [vmem:[%s873_s3] ss:$0 sm:$0xff] }
  0x12   : > { %701 = vmatpush3.bf16.msra.mxu0 %v745_v2  ;;  %v358_v11 = vrot.slane %v353_v8, %v357_v9 }
  0x13   : > { %702 = vmatprep.subr.bf16.mxu0 %v776_v1 }
  0x14   : > { %v665_v13 = vcombine.low %v358_v11, %v358_v11 }
  0x16   : > { %703 = vmatpush3.bf16.msra.mxu0 %v746_v4  ;;  %v363_v17 = vmul.bf16 %v665_v13, %v349_v15  ;;  %v364_v18 = vmul.bf16 %v665_v13, %v350_v16 }
  0x17   : > { %704 = vmatprep.subr.bf16.mxu0 %v776_v1 }
  0x18   : > { %v666_v20 = vcombine.low %v363_v17, %v364_v18 }
  0x1a   : > { %705 = vmatpush3.bf16.msra.mxu0 %v747_v6 }
  0x1b   : > { %706 = vmatprep.subr.bf16.mxu0 %v776_v1 }
  0x1e   : > { %707 = vmatpush3.bf16.msra.mxu0 %v748_v10 }
  0x1f   : > { %708 = vmatprep.subr.bf16.mxu0 %v776_v1 }
  0x22   : > { %709 = vmatpush3.bf16.msra.mxu0 %v749_v12 }
  0x23   : > { %710 = vmatprep.subr.bf16.mxu0 %v776_v1 }
  0x26   : > { %711 = vmatpush3.bf16.msra.mxu0 %v750_v14 }
  0x27   : > { %712 = vmatprep.subr.bf16.mxu0 %v776_v1 }
  0x2a   : > { %713 = vmatpush3.bf16.msra.mxu0 %v751_v19 }
  0x2d   : > { %715 = vmatmul.mubr.bf16.vlgmr.msra.gmra.mxu0 %v666_v20 }
  0xed   : > { %v471_v21 = vpop.f32.mrf.mxu0 }
  0xee   : > { %v494_v25 = vadd.f32 %v675_v22, %v471_v21 }
  0xef   : > { %v716_v23 = vpop.f32.mrf.mxu0 }
  0xf1   : > { %v474_v24 = vpop.f32.mrf.mxu0 }
  0xf2   : > { %v495_v26 = vadd.f32 %v675_v22, %v474_v24 }
  0xf3   : > { %v717_v27 = vpop.f32.mrf.mxu0 }
  0xf4   : > { %v687_v28 = vpack.c.bf16 %v495_v26, %v494_v25 }
  0xf6   : > { %688 = vst [vmem:[%s340_s23] sm:$0xff] %v687_v28  }
  0xf7 PF: > { %s14_s17 = sadd.s32 1, %s774_s17   ;;  %s875_s15 = smov %s770_s16 }
  0xf8   : > { %p11_p5 = scmp.ge.s32.totalorder %s14_s17, 4   ;;  %s876_s16 = smov %s878_s18 }
  0xfa   :  { %13 = sbr.rel (!%p11_p5) target bundleno = 2 (0x2), region = 83 }

// kernel: effnetv2_forward.17
= control target key start
LH: loop header
LB: loop body
LE: loop exit
PB: predicated region body
PF: predicated region fallthrough
CT: control target
= control target key end

     0   :  { %s1060_s15 = smov 0   ;;  %s1062_s16 = smov 0   ;;  %s1247_s0 = inlined_call_operand.vmem [shape: bf16[4,2,1,5,5,128], index: 0, kind: input, shape index: {}]   ;;  %s1248_s1 = inlined_call_operand.vmem [shape: f32[9,128], index: 1, kind: input, shape index: {}]   ;;  %s1249_s2 = inlined_call_operand.vmem [shape: f32[1,128], index: 2, kind: input, shape index: {}]   ;;  %s1250_s3 = inlined_call_operand.vmem [shape: bf16[2,4,4,128], index: 3, kind: output, shape index: {0}]   ;;  %s1251_s4 = inlined_call_operand.vmem [shape: f32[2,1,8,128], index: 4, kind: output, shape index: {1}]  }
   0x1   :  { %s1064_s17 = smov 0   ;;  %s1066_s18 = smov 0  }
   0x2   :  { %s1068_s19 = smov 0  }
   0x3 LB: > { %s34_s20 = sadd.s32 1, %s1029_s18  ;;  %p52_p1 = scmp.ne.s32.totalorder %s1021_s16, %s1017_s15  ;;  %s1033_s19 = sphi %s1068_s19, %s15_s19   ;;  %s1029_s18 = sphi %s1066_s18, %s1255_s18   ;;  %s1025_s17 = sphi %s1064_s17, %s1254_s17   ;;  %s1021_s16 = sphi %s1062_s16, %s1253_s16   ;;  %s1017_s15 = sphi %s1060_s15, %s1252_s15  }
   0x4   : > { %p36_p0 = scmp.ge.s32.totalorder %s34_s20, 2  ;;  %p53_p2 = scmp.eq.s32.totalorder %s1033_s19, 0 }
   0x5   : > { %s45_s22 = sadd.s32 1, %s1021_s16  ;;  %p893_p5 = scmp.ge.s32.totalorder %s1033_s19, 2 }
   0x6   : > { %s1257_s20 = smov (%p36_p0, %s34_s20), 0  ;;  %p54_p3 = por %p53_p2, %p52_p1 }
   0x7   : > { %s38_s21 = ssub.s32 %s1029_s18, %s1257_s20  ;;  %203 = sbr.rel (%p893_p5) target bundleno = 23 (0x17), region = 24 }
   0x8   : > { %p43_p4 = scmp.eq.s32.totalorder %s38_s21, 0 }
   0xa   : > { %s1095_s23 = scalar_select %p43_p4, %s1021_s16, %s45_s22  }
   0xc   : > { %206 = sbr.rel (!%p54_p3) target bundleno = 23 (0x17), region = 28  ;;  %s208_s24 = sand.u32 (%p54_p3), 1, %s1021_s16  }
   0xd   : > { %s937_s25 = smul.u32 (%p54_p3), 20, %s1029_s18 }
   0xe   : > { %s936_s26 = smul.u32 (%p54_p3), 80, %s208_s24 }
   0xf   : > { %s216_s29 = scalar_lea.vmem (%p54_p3), %s1247_s0, %s937_s25 }
  0x10   : > { %v233_v0 = vld [vmem:[%s216_s29] sm:$0xff] (%p54_p3)   ;;  %v237_v1 = vld [vmem:[%s216_s29 + $0x8] sm:$0xff] (%p54_p3)   ;;  %v241_v2 = vld [vmem:[%s216_s29 + $0x10] sm:$0xf] (%p54_p3)  ;;  %s210_s30 = scalar_lea.vmem (%p54_p3), [#allocation2], %s936_s26 }
  0x11   : > { %234 = vst [vmem:[%s210_s30] sm:$0xff] %v233_v0   ;;  %238 = vst [vmem:[%s210_s30 + $0x8] sm:$0xff] %v237_v1   ;;  %v243_v3 = vld [vmem:[%s216_s29 + $0x28] sm:$0xff]   ;;  %v247_v4 = vld [vmem:[%s216_s29 + $0x30] sm:$0xff]  }
  0x12   : > { %242 = vst [vmem:[%s210_s30 + $0x10] sm:$0xf] %v241_v2  ;;  %v251_v5 = vld [vmem:[%s216_s29 + $0x38] sm:$0xf]  ;;  %244 = vst [vmem:[%s210_s30 + $0x14] sm:$0xff] %v243_v3   ;;  %v253_v6 = vld [vmem:[%s216_s29 + $0x50] sm:$0xff]  }
  0x13   : > { %248 = vst [vmem:[%s210_s30 + $0x1c] sm:$0xff] %v247_v4   ;;  %252 = vst [vmem:[%s210_s30 + $0x24] sm:$0xf] %v251_v5  ;;  %v257_v7 = vld [vmem:[%s216_s29 + $0x58] sm:$0xff]   ;;  %v261_v8 = vld [vmem:[%s216_s29 + $0x60] sm:$0xf] }
  0x14   : > { %254 = vst [vmem:[%s210_s30 + $0x28] sm:$0xff] %v253_v6   ;;  %258 = vst [vmem:[%s210_s30 + $0x30] sm:$0xff] %v257_v7   ;;  %v263_v9 = vld [vmem:[%s216_s29 + $0x78] sm:$0xff]   ;;  %v267_v10 = vld [vmem:[%s216_s29 + $0x80] sm:$0xff]  }
  0x15   : > { %262 = vst [vmem:[%s210_s30 + $0x38] sm:$0xf] %v261_v8  ;;  %v271_v11 = vld [vmem:[%s216_s29 + $0x88] sm:$0xf]  ;;  %264 = vst [vmem:[%s210_s30 + $0x3c] sm:$0xff] %v263_v9  }
  0x16   : > { %268 = vst [vmem:[%s210_s30 + $0x44] sm:$0xff] %v267_v10   ;;  %272 = vst [vmem:[%s210_s30 + $0x4c] sm:$0xf] %v271_v11 }
  0x17 PF: > { %p895_p6 = scmp.ge.s32.totalorder %s1033_s19, 1  ;;  %p335_p7 = scmp.lt.s32.totalorder %s1033_s19, 3 }
  0x19   : > { %p336_p8 = pnand %p895_p6, %p335_p7 }
  0x1a   : > { %s342_s5 = sand.u32 (!%p336_p8), 1, %s1017_s15   ;;  %p399_p9 = scmp.lt.s32.totalorder (!%p336_p8), %s1025_s17, 1 }
  0x1b   : > { %339 = sbr.rel (%p336_p8) target bundleno = 132 (0x84), region = 69 }
  0x1c   : > { %s938_s6 = smul.u32 (!%p336_p8), 80, %s342_s5 }
  0x1e   : > { %s1109_s9 = scalar_lea.vmem (!%p336_p8), [#allocation2], %s938_s6 }
  0x20   : > { %v431_v12 = vlaneseq  ;;  %v421_v14 = vld [vmem:[%s1248_s1] sm:$0xff]  ;;  %v423_v15 = vld [vmem:[%s1109_s9] sm:$0x3]  ;;  %v899_v17 = vld [vmem:[%s1109_s9 + $0x14] sm:$0x3]  ;;  %s1259_s17 = smov (!%p399_p9, %s1025_s17), 1 }
  0x21   : > { %v427_v18 = vunpack.c.l.bf16 %v423_v15  ;;  %v448_v19 = vunpack.c.l.bf16 %v899_v17  ;;  %v464_v21 = vld [vmem:[%s1109_s9] sm:$0x7]  ;;  %v903_v23 = vld [vmem:[%s1109_s9 + $0x28] sm:$0x3]  ;;  %v907_v28 = vld [vmem:[%s1109_s9 + $0x3c] sm:$0x3] }
  0x22   : > { %v432_v13 = vshrl.u32 %v431_v12, 7  ;;  %v468_v25 = vunpack.c.l.bf16 %v464_v21  ;;  %v501_v26 = vunpack.c.l.bf16 %v903_v23  ;;  %v911_v29 = vld [vmem:[%s1109_s9 + $0x28] sm:$0x7]  ;;  %v522_v32 = vunpack.c.l.bf16 %v907_v28  ;;  %v915_v34 = vld [vmem:[%s1109_s9 + $0x4] sm:$0x3]  ;;  %s935_s14 = sshll.u32 %s1259_s17, 3 }
  0x23   : > { %v919_v35 = vld [vmem:[%s1109_s9 + $0x18] sm:$0x3]  ;;  %v542_v38 = vunpack.c.l.bf16 %v911_v29  ;;  %v575_v43 = vunpack.c.l.bf16 %v915_v34  ;;  %v923_v44 = vld [vmem:[%s1109_s9 + $0x4] sm:$0x7]  ;;  %v1142_v52 = vld [vmem:[%s1248_s1 + $0x8] ss:$0 sm:$0xff]  ;;  %s409_s22 = scalar_lea.vmem %s1250_s3, %s935_s14  ;;  %s420_s26 = scalar_lea.vmem %s1251_s4, %s935_s14 }
  0x24   : > { %v433_v16 = vsub.s32 0, %v432_v13  ;;  %v454_v20 = vsub.s32 1, %v432_v13  ;;  %v474_v22 = vsub.s32 2, %v432_v13  ;;  %v507_v27 = vsub.s32 3, %v432_v13  ;;  %v424_v45 = vld [vmem:[%s1109_s9 + $0x4] sm:$0x3] }
  0x25   : > { %v528_v33 = vsub.s32 4, %v432_v13  ;;  %v548_v39 = vsub.s32 5, %v432_v13  ;;  %v581_v48 = vsub.s32 6, %v432_v13  ;;  %v596_v49 = vunpack.c.l.bf16 %v919_v35  ;;  %v900_v50 = vld [vmem:[%s1109_s9 + $0x18] sm:$0x3] }
  0x26   : > { %v1115_v24 = vrot.slane %v421_v14, %v433_v16  ;;  %v1119_v30 = vrot.slane %v421_v14, %v454_v20  ;;  %v1121_v31 = vrot.slane %v421_v14, %v474_v22  ;;  %v1126_v37 = vrot.slane %v421_v14, %v507_v27  ;;  %v465_v51 = vld [vmem:[%s1109_s9 + $0x4] sm:$0x7]  ;;  %v904_v1 = vld [vmem:[%s1109_s9 + $0x2c] sm:$0x3]  ;;  %v908_v2 = vld [vmem:[%s1109_s9 + $0x40] sm:$0x3] }
  0x27   : > { %v1130_v42 = vrot.slane %v421_v14, %v528_v33  ;;  %v1135_v47 = vrot.slane %v421_v14, %v548_v39  ;;  %v602_v56 = vsub.s32 7, %v432_v13  ;;  %v1146_v58 = vrot.slane %v421_v14, %v581_v48  ;;  %v912_v3 = vld [vmem:[%s1109_s9 + $0x2c] sm:$0x7]  ;;  %v916_v10 = vld [vmem:[%s1109_s9 + $0x8] sm:$0x3] }
  0x28   : > { %v435_v36 = vmul.f32 %v1115_v24, %v427_v18  ;;  %v456_v40 = vmul.f32 %v1119_v30, %v448_v19  ;;  %v476_v41 = vmul.f32 %v1121_v31, %v468_v25  ;;  %v509_v46 = vmul.f32 %v1126_v37, %v501_v26  ;;  %v920_v15 = vld [vmem:[%s1109_s9 + $0x1c] sm:$0x3]  ;;  %v924_v16 = vld [vmem:[%s1109_s9 + $0x8] sm:$0x7]  ;;  %v905_v35 = vld [vmem:[%s1109_s9 + $0x30] sm:$0x3] }
  0x29   : > { %v530_v55 = vmul.f32 %v1130_v42, %v522_v32  ;;  %v550_v57 = vmul.f32 %v1135_v47, %v542_v38  ;;  %v616_v59 = vunpack.c.l.bf16 %v923_v44  ;;  %v428_v60 = vunpack.c.l.bf16 %v424_v45  ;;  %v425_v21 = vld [vmem:[%s1109_s9 + $0x8] sm:$0x3]  ;;  %v901_v22 = vld [vmem:[%s1109_s9 + $0x1c] sm:$0x3]  ;;  %v913_v48 = vld [vmem:[%s1109_s9 + $0x30] sm:$0x7] }
  0x2a   : > { %v460_v53 = vadd.f32 %v456_v40, %v435_v36  ;;  %v484_v54 = vrot.slane %v476_v41, 1  ;;  %v1148_v62 = vrot.slane %v421_v14, %v602_v56  ;;  %v449_v63 = vunpack.c.l.bf16 %v900_v50  ;;  %v466_v28 = vld [vmem:[%s1109_s9 + $0x8] sm:$0x7]  ;;  %v909_v41 = vld [vmem:[%s1109_s9 + $0x44] sm:$0x3] }
  0x2b   : > { %v469_v0 = vunpack.c.l.bf16 %v465_v51  ;;  %v624_v4 = vmul.f32 %v1142_v52, %v616_v59  ;;  %v436_v5 = vmul.f32 %v1115_v24, %v428_v60  ;;  %v558_v7 = vrot.slane %v550_v57, 1  ;;  %v917_v59 = vld [vmem:[%s1109_s9 + $0xc] sm:$0x3] }
  0x2c   : > { %v492_v61 = vadd.f32 %v484_v54, %v460_v53  ;;  %v457_v8 = vmul.f32 %v1119_v30, %v449_v63  ;;  %v583_v11 = vmul.f32 %v1146_v58, %v575_v43  ;;  %v502_v12 = vunpack.c.l.bf16 %v904_v1  ;;  %v925_v60 = vld [vmem:[%s1109_s9 + $0xc] sm:$0x7]  ;;  %v1182_v63 = vld [vmem:[%s1249_s2] ss:$0 sm:$0xff] }
  0x2d   : > { %v477_v9 = vmul.f32 %v1121_v31, %v469_v0  ;;  %v523_v13 = vunpack.c.l.bf16 %v908_v2  ;;  %v543_v14 = vunpack.c.l.bf16 %v912_v3  ;;  %v604_v18 = vmul.f32 %v1148_v62, %v596_v49 }
  0x2e   : > { %v513_v6 = vadd.f32 %v509_v46, %v492_v61  ;;  %v461_v19 = vadd.f32 %v457_v8, %v436_v5  ;;  %v632_v23 = vrot.slane %v624_v4, 1  ;;  %v510_v25 = vmul.f32 %v1126_v37, %v502_v12  ;;  %v426_v61 = vld [vmem:[%s1109_s9 + $0xc] sm:$0x3]  ;;  %v921_v8 = vld [vmem:[%s1109_s9 + $0x20] sm:$0x3] }
  0x2f   : > { %v485_v20 = vrot.slane %v477_v9, 1  ;;  %v551_v26 = vmul.f32 %v1135_v47, %v543_v14  ;;  %v576_v27 = vunpack.c.l.bf16 %v916_v10  ;;  %v531_v33 = vmul.f32 %v1130_v42, %v523_v13  ;;  %v902_v13 = vld [vmem:[%s1109_s9 + $0x20] sm:$0x3] }
  0x30   : > { %v534_v17 = vadd.f32 %v530_v55, %v513_v6  ;;  %v617_v34 = vunpack.c.l.bf16 %v924_v16  ;;  %v597_v38 = vunpack.c.l.bf16 %v920_v15  ;;  %v429_v39 = vunpack.c.l.bf16 %v425_v21 }
  0x31   : > { %v493_v32 = vadd.f32 %v485_v20, %v461_v19  ;;  %v559_v36 = vrot.slane %v551_v26, 1  ;;  %v450_v40 = vunpack.c.l.bf16 %v901_v22  ;;  %v470_v46 = vunpack.c.l.bf16 %v466_v28  ;;  %v906_v19 = vld [vmem:[%s1109_s9 + $0x34] sm:$0x3]  ;;  %v910_v28 = vld [vmem:[%s1109_s9 + $0x48] sm:$0x3] }
  0x32   : > { %v566_v29 = vadd.f32 %v558_v7, %v534_v17  ;;  %v625_v45 = vmul.f32 %v1142_v52, %v617_v34  ;;  %v584_v49 = vmul.f32 %v1146_v58, %v576_v27  ;;  %v437_v50 = vmul.f32 %v1115_v24, %v429_v39 }
  0x33   : > { %v514_v44 = vadd.f32 %v510_v25, %v493_v32  ;;  %v458_v51 = vmul.f32 %v1119_v30, %v450_v40  ;;  %v503_v53 = vunpack.c.l.bf16 %v905_v35  ;;  %v478_v56 = vmul.f32 %v1121_v31, %v470_v46 }
  0x34   : > { %v587_v43 = vadd.f32 %v583_v11, %v566_v29  ;;  %v524_v57 = vunpack.c.l.bf16 %v909_v41  ;;  %v605_v0 = vmul.f32 %v1148_v62, %v597_v38  ;;  %v633_v1 = vrot.slane %v625_v45, 1  ;;  %v914_v29 = vld [vmem:[%s1109_s9 + $0x34] sm:$0x7] }
  0x35   : > { %v535_v55 = vadd.f32 %v531_v33, %v514_v44  ;;  %v462_v2 = vadd.f32 %v458_v51, %v437_v50  ;;  %v544_v3 = vunpack.c.l.bf16 %v913_v48  ;;  %v486_v6 = vrot.slane %v478_v56, 1  ;;  %v918_v48 = vld [vmem:[%s1109_s9 + $0x10] sm:$0x3]  ;;  %v922_v56 = vld [vmem:[%s1109_s9 + $0x24] sm:$0x3] }
  0x36   : > { %v608_v54 = vadd.f32 %v604_v18, %v587_v43  ;;  %v511_v7 = vmul.f32 %v1126_v37, %v503_v53  ;;  %v577_v10 = vunpack.c.l.bf16 %v917_v59  ;;  %v618_v11 = vunpack.c.l.bf16 %v925_v60  ;;  %v467_v18 = vld [vmem:[%s1109_s9 + $0xc] sm:$0x7] }
  0x37   : > { %v567_v5 = vadd.f32 %v559_v36, %v535_v55  ;;  %v552_v9 = vmul.f32 %v1135_v47, %v544_v3  ;;  %v430_v12 = vunpack.c.l.bf16 %v426_v61  ;;  %v494_v16 = vadd.f32 %v486_v6, %v462_v2 }
  0x38   : > { %v640_v4 = vadd.f32 %v632_v23, %v608_v54  ;;  %v532_v17 = vmul.f32 %v1130_v42, %v524_v57  ;;  %v598_v21 = vunpack.c.l.bf16 %v921_v8  ;;  %v451_v27 = vunpack.c.l.bf16 %v902_v13 }
  0x39   : > { %v588_v15 = vadd.f32 %v584_v49, %v567_v5  ;;  %v560_v20 = vrot.slane %v552_v9, 1  ;;  %v438_v22 = vmul.f32 %v1115_v24, %v430_v12  ;;  %v515_v26 = vadd.f32 %v511_v7, %v494_v16  ;;  %v926_v49 = vld [vmem:[%s1109_s9 + $0x10] sm:$0x7] }
  0x3a   : > { %v1190_v14 = vadd.f32 %v1182_v63, %v640_v4  ;;  %v585_v32 = vmul.f32 %v1146_v58, %v577_v10  ;;  %v626_v33 = vmul.f32 %v1142_v52, %v618_v11  ;;  %v471_v34 = vunpack.c.l.bf16 %v467_v18 }
  0x3b   : > { %v609_v25 = vadd.f32 %v605_v0, %v588_v15  ;;  %v504_v35 = vunpack.c.l.bf16 %v906_v19  ;;  %v536_v38 = vadd.f32 %v532_v17, %v515_v26  ;;  %v459_v24 = vmul.f32 %v1119_v30, %v451_v27 }
  0x3c   : > { %v929_v23 = vmul.f32 -1.442695, %v1190_v14  ;;  %v479_v39 = vmul.f32 %v1121_v31, %v471_v34  ;;  %v525_v40 = vunpack.c.l.bf16 %v910_v28  ;;  %v545_v41 = vunpack.c.l.bf16 %v914_v29 }
  0x3d   : > { %v641_v36 = vadd.f32 %v633_v1, %v609_v25  ;;  %v568_v44 = vadd.f32 %v560_v20, %v536_v38  ;;  %v606_v45 = vmul.f32 %v1148_v62, %v598_v21  ;;  %v463_v46 = vadd.f32 %v459_v24, %v438_v22 }
  0x3e   : > { %979 = vpow2.f32 %v929_v23  ;;  %v487_v50 = vrot.slane %v479_v39, 1  ;;  %v512_v51 = vmul.f32 %v1126_v37, %v504_v35  ;;  %v553_v53 = vmul.f32 %v1135_v47, %v545_v41 }
  0x3f   : > { %v652_v43 = vadd.f32 %v1182_v63, %v641_v36  ;;  %v589_v30 = vadd.f32 %v585_v32, %v568_v44  ;;  %v634_v55 = vrot.slane %v626_v33, 1  ;;  %v533_v57 = vmul.f32 %v1130_v42, %v525_v40 }
  0x40   : > { %v495_v31 = vadd.f32 %v487_v50, %v463_v46  ;;  %v578_v59 = vunpack.c.l.bf16 %v918_v48  ;;  %v619_v60 = vunpack.c.l.bf16 %v926_v49  ;;  %v561_v1 = vrot.slane %v553_v53, 1 }
  0x41   : > { %v930_v54 = vmul.f32 -1.442695, %v652_v43  ;;  %v610_v61 = vadd.f32 %v606_v45, %v589_v30  ;;  %v599_v2 = vunpack.c.l.bf16 %v922_v56  ;;  %vm691_vm0 = vcmask 1043456  }
  0x42   : > { %v516_v0 = vadd.f32 %v512_v51, %v495_v31  ;;  %v586_v37 = vmul.f32 %v1146_v58, %v578_v59  ;;  %v627_v47 = vmul.f32 %v1142_v52, %v619_v60 }
  0x43   : > { %981 = vpow2.f32 %v930_v54  ;;  %v642_v3 = vadd.f32 %v634_v55, %v610_v61  ;;  %v607_v7 = vmul.f32 %v1148_v62, %v599_v2 }
  0x44   : > { %v537_v4 = vadd.f32 %v533_v57, %v516_v0  ;;  %v635_v10 = vrot.slane %v627_v47, 1 }
  0x45   : > { %v653_v5 = vadd.f32 %v1182_v63, %v642_v3 }
  0x46   : > { %v569_v6 = vadd.f32 %v561_v1, %v537_v4 }
  0x47   : > { %v931_v42 = vmul.f32 -1.442695, %v653_v5 }
  0x48   : > { %v590_v9 = vadd.f32 %v586_v37, %v569_v6 }
  0x49   : > { %983 = vpow2.f32 %v931_v42 }
  0x4a   : > { %v611_v12 = vadd.f32 %v607_v7, %v590_v9 }
  0x4b   : > { %v980_v8 = vpop.eup %979 }
  0x4c   : > { %v667_v11 = vadd.f32 1.0, %v980_v8  ;;  %v643_v13 = vadd.f32 %v635_v10, %v611_v12 }
  0x4e   : > { %985 = vrcp.f32 %v667_v11  ;;  %v654_v58 = vadd.f32 %v1182_v63, %v643_v13 }
  0x50   : > { %v982_v15 = vpop.eup %981  ;;  %v932_v16 = vmul.f32 -1.442695, %v654_v58 }
  0x51   : > { %v668_v52 = vadd.f32 1.0, %v982_v15 }
  0x53   : > { %987 = vrcp.f32 %v668_v52 }
  0x54   : > { %989 = vpow2.f32 %v932_v16 }
  0x56   : > { %v984_v62 = vpop.eup %983 }
  0x57   : > { %v669_v17 = vadd.f32 1.0, %v984_v62 }
  0x59   : > { %991 = vrcp.f32 %v669_v17 }
  0x5b   : > { %v986_v18 = vpop.eup %985 }
  0x5c   : > { %v679_v19 = vmul.f32 %v986_v18, %v1190_v14 }
  0x5e   : > { %v683_v63 = vpack.c.bf16 %v679_v19, %v679_v19  ;;  %v692_v28 = vsel %vm691_vm0, %v679_v19, 0.0 }
  0x60   : > { %687 = vst [vmem:[%s409_s22] sm:$0x3] %v683_v63  ;;  %v988_v20 = vpop.eup %987 }
  0x61   : > { %v990_v21 = vpop.eup %989  ;;  %v680_v22 = vmul.f32 %v988_v20, %v652_v43 }
  0x62   : > { %v670_v23 = vadd.f32 1.0, %v990_v21 }
  0x63   : > { %v684_v25 = vpack.c.bf16 %v680_v22, %v680_v22  ;;  %v693_v14 = vsel %vm691_vm0, %v680_v22, 0.0 }
  0x64   : > { %993 = vrcp.f32 %v670_v23  ;;  %v694_v32 = vadd.f32 %v693_v14, %v692_v28 }
  0x65   : > { %688 = vst [vmem:[%s409_s22 + $0x2] sm:$0x3] %v684_v25 }
  0x66   : > { %v992_v26 = vpop.eup %991 }
  0x67   : > { %v681_v27 = vmul.f32 %v992_v26, %v653_v5 }
  0x69   : > { %v685_v29 = vpack.c.bf16 %v681_v27, %v681_v27  ;;  %v695_v33 = vsel %vm691_vm0, %v681_v27, 0.0 }
  0x6a   : > { %v696_v35 = vadd.f32 %v695_v33, %v694_v32 }
  0x6b   : > { %689 = vst [vmem:[%s409_s22 + $0x4] sm:$0x3] %v685_v29 }
  0x71   : > { %v994_v34 = vpop.eup %993 }
  0x72   : > { %v682_v36 = vmul.f32 %v994_v34, %v654_v58 }
  0x74   : > { %v686_v38 = vpack.c.bf16 %v682_v36, %v682_v36  ;;  %v697_v24 = vsel %vm691_vm0, %v682_v36, 0.0 }
  0x75   : > { %v698_v39 = vadd.f32 %v697_v24, %v696_v35 }
  0x76   : > { %690 = vst [vmem:[%s409_s22 + $0x6] sm:$0x3] %v686_v38 }
  0x77   : > { %v699_v40 = vrot.slane %v698_v39, 4 }
  0x79   : > { %v700_v41 = vadd.f32 %v699_v40, %v698_v39 }
  0x7b   : > { %v701_v43 = vrot.slane %v700_v41, 2 }
  0x7d   : > { %v702_v44 = vadd.f32 %v701_v43, %v700_v41 }
  0x7f   : > { %v703_v45 = vrot.slane %v702_v44, 1 }
  0x81   : > { %v704_v46 = vadd.f32 %v703_v45, %v702_v44 }
  0x83   : > { %705 = vst [vmem:[%s420_s26] sm:$0xff] %v704_v46 }
  0x84 PF: > { %s15_s19 = sadd.s32 1, %s1033_s19   ;;  %s1252_s15 = smov %s1021_s16 }
  0x85   : > { %p12_p10 = scmp.ge.s32.totalorder %s15_s19, 4   ;;  %s1253_s16 = smov %s1095_s23 }
  0x86   : > { %s1254_s17 = smov %s1029_s18  ;;  %s1255_s18 = smov %s1257_s20 }
  0x87   :  { %14 = sbr.rel (!%p12_p10) target bundleno = 3 (0x3), region = 131 }

// kernel: effnetv2_forward.18
= control target key start
LH: loop header
LB: loop body
LE: loop exit
PB: predicated region body
PF: predicated region fallthrough
CT: control target
= control target key end

     0   :  { %v363_v0 = vmov 0.0   ;;  %vm364_vm0 = vmmov 0   ;;  %vm61_vm1 = vcmask 1041409   ;;  %s540_s1 = inlined_call_operand.vmem [shape: f32[128,128], index: 1, kind: input, shape index: {}]   ;;  %s541_s0 = inlined_call_operand.vmem [shape: f32[2,1,8,128], index: 0, kind: input, shape index: {}]   ;;  %s542_s3 = inlined_call_operand.vmem [shape: f32[128,128], index: 3, kind: input, shape index: {}]   ;;  %s543_s2 = inlined_call_operand.vmem [shape: f32[1,128], index: 2, kind: input, shape index: {}, may-alias: {2,4}]   ;;  %s544_s4 = inlined_call_operand.vmem [shape: f32[1,128], index: 4, kind: input, shape index: {}, may-alias: {2,4}]   ;;  %s545_s5 = inlined_call_operand.vmem [shape: f32[2,128], index: 5, kind: output, shape index: {}]  }
   0x1   :  { %283 = vmatprep.subr.mxu0 %v363_v0  ;;  %v51_v1 = vld [vmem:[%s540_s1 + $0x78] sm:$0xff]  ;;  %v50_v2 = vld [vmem:[%s540_s1 + $0x70] sm:$0xff]  ;;  %315 = vmatprep.mubr.msk.f32.mxu0 %vm364_vm0, %v363_v0  ;;  %v49_v3 = vld [vmem:[%s540_s1 + $0x68] sm:$0xff] }
   0x2   :  { %284 = vmatpush3.msra.mxu0 %v51_v1  ;;  %318 = vmatprep.subr.mxu1 %v363_v0  ;;  %v48_v4 = vld [vmem:[%s540_s1 + $0x60] sm:$0xff]  ;;  %v21_v6 = vld [vmem:[%s541_s0 + $0x8] sm:$0xff]  ;;  %v47_v7 = vld [vmem:[%s540_s1 + $0x58] sm:$0xff] }
   0x3   :  { %285 = vmatprep.subr.mxu0 %v363_v0  ;;  %350 = vmatprep.mubr.msk.f32.mxu1 %vm364_vm0, %v363_v0  ;;  %v20_v5 = vld [vmem:[%s541_s0] sm:$0xff]  ;;  %v28_v9 = vrot.slane %v21_v6, 4  ;;  %v46_v10 = vld [vmem:[%s540_s1 + $0x50] sm:$0xff]  ;;  %v45_v13 = vld [vmem:[%s540_s1 + $0x48] sm:$0xff] }
   0x4   :  { %286 = vmatpush3.msra.mxu0 %v50_v2  ;;  %v22_v8 = vrot.slane %v20_v5, 4  ;;  %v44_v16 = vld [vmem:[%s540_s1 + $0x40] sm:$0xff]  ;;  %v43_v19 = vld [vmem:[%s540_s1 + $0x38] sm:$0xff]  ;;  %v42_v20 = vld [vmem:[%s540_s1 + $0x30] sm:$0xff] }
   0x5   :  { %287 = vmatprep.subr.mxu0 %v363_v0  ;;  %v29_v12 = vadd.f32 %v28_v9, %v21_v6  ;;  %v41_v23 = vld [vmem:[%s540_s1 + $0x28] sm:$0xff]  ;;  %v40_v24 = vld [vmem:[%s540_s1 + $0x20] sm:$0xff]  ;;  %v39_v27 = vld [vmem:[%s540_s1 + $0x18] sm:$0xff] }
   0x6   :  { %288 = vmatpush3.msra.mxu0 %v49_v3  ;;  %v23_v11 = vadd.f32 %v22_v8, %v20_v5  ;;  %v38_v28 = vld [vmem:[%s540_s1 + $0x10] sm:$0xff]  ;;  %v37_v31 = vld [vmem:[%s540_s1 + $0x8] sm:$0xff]  ;;  %v36_v32 = vld [vmem:[%s540_s1] sm:$0xff] }
   0x7   :  { %289 = vmatprep.subr.mxu0 %v363_v0  ;;  %v30_v15 = vrot.slane %v29_v12, 2  ;;  %v156_v34 = vld [vmem:[%s542_s3 + $0x78] sm:$0xff]  ;;  %v155_v35 = vld [vmem:[%s542_s3 + $0x70] sm:$0xff]  ;;  %v154_v36 = vld [vmem:[%s542_s3 + $0x68] sm:$0xff] }
   0x8   :  { %290 = vmatpush3.msra.mxu0 %v48_v4  ;;  %v24_v14 = vrot.slane %v23_v11, 2  ;;  %319 = vmatpush3.msra.mxu1 %v156_v34  ;;  %v153_v37 = vld [vmem:[%s542_s3 + $0x60] sm:$0xff]  ;;  %v152_v38 = vld [vmem:[%s542_s3 + $0x58] sm:$0xff]  ;;  %v151_v39 = vld [vmem:[%s542_s3 + $0x50] sm:$0xff] }
   0x9   :  { %291 = vmatprep.subr.mxu0 %v363_v0  ;;  %v31_v18 = vadd.f32 %v30_v15, %v29_v12  ;;  %320 = vmatprep.subr.mxu1 %v363_v0  ;;  %v150_v40 = vld [vmem:[%s542_s3 + $0x48] sm:$0xff]  ;;  %v149_v41 = vld [vmem:[%s542_s3 + $0x40] sm:$0xff]  ;;  %v148_v42 = vld [vmem:[%s542_s3 + $0x38] sm:$0xff] }
   0xa   :  { %292 = vmatpush3.msra.mxu0 %v47_v7  ;;  %v25_v17 = vadd.f32 %v24_v14, %v23_v11  ;;  %321 = vmatpush3.msra.mxu1 %v155_v35  ;;  %v147_v43 = vld [vmem:[%s542_s3 + $0x30] sm:$0xff]  ;;  %v146_v44 = vld [vmem:[%s542_s3 + $0x28] sm:$0xff]  ;;  %v145_v45 = vld [vmem:[%s542_s3 + $0x20] sm:$0xff] }
   0xb   :  { %293 = vmatprep.subr.mxu0 %v363_v0  ;;  %v32_v22 = vrot.slane %v31_v18, 1  ;;  %322 = vmatprep.subr.mxu1 %v363_v0  ;;  %v144_v46 = vld [vmem:[%s542_s3 + $0x18] sm:$0xff]  ;;  %v143_v47 = vld [vmem:[%s542_s3 + $0x10] sm:$0xff]  ;;  %v142_v48 = vld [vmem:[%s542_s3 + $0x8] sm:$0xff] }
   0xc   :  { %294 = vmatpush3.msra.mxu0 %v46_v10  ;;  %v26_v21 = vrot.slane %v25_v17, 1  ;;  %323 = vmatpush3.msra.mxu1 %v154_v36  ;;  %v141_v49 = vld [vmem:[%s542_s3] sm:$0xff] }
   0xd   :  { %295 = vmatprep.subr.mxu0 %v363_v0  ;;  %v33_v26 = vadd.f32 %v32_v22, %v31_v18  ;;  %324 = vmatprep.subr.mxu1 %v363_v0  ;;  %v245_v50 = vld [vmem:[%s543_s2] ss:$0 sm:$0xff] }
   0xe   :  { %296 = vmatpush3.msra.mxu0 %v45_v13  ;;  %v27_v25 = vadd.f32 %v26_v21, %v25_v17  ;;  %325 = vmatpush3.msra.mxu1 %v153_v37  ;;  %v247_v59 = vld [vmem:[%s544_s4] ss:$0 sm:$0xff] }
   0xf   :  { %297 = vmatprep.subr.mxu0 %v363_v0  ;;  %v35_v30 = vmul.f32 0.0078125, %v33_v26  ;;  %326 = vmatprep.subr.mxu1 %v363_v0 }
  0x10   :  { %298 = vmatpush3.msra.mxu0 %v44_v16  ;;  %v34_v29 = vmul.f32 0.0078125, %v27_v25  ;;  %327 = vmatpush3.msra.mxu1 %v152_v38 }
  0x11   :  { %299 = vmatprep.subr.mxu0 %v363_v0  ;;  %328 = vmatprep.subr.mxu1 %v363_v0 }
  0x12   :  { %300 = vmatpush3.msra.mxu0 %v43_v19  ;;  %v62_v33 = vsel %vm61_vm1, %v35_v30, %v34_v29  ;;  %329 = vmatpush3.msra.mxu1 %v151_v39 }
  0x13   :  { %301 = vmatprep.subr.mxu0 %v363_v0  ;;  %330 = vmatprep.subr.mxu1 %v363_v0 }
  0x14   :  { %302 = vmatpush3.msra.mxu0 %v42_v20  ;;  %331 = vmatpush3.msra.mxu1 %v150_v40 }
  0x15   :  { %303 = vmatprep.subr.mxu0 %v363_v0  ;;  %332 = vmatprep.subr.mxu1 %v363_v0 }
  0x16   :  { %304 = vmatpush3.msra.mxu0 %v41_v23  ;;  %333 = vmatpush3.msra.mxu1 %v149_v41 }
  0x17   :  { %305 = vmatprep.subr.mxu0 %v363_v0  ;;  %334 = vmatprep.subr.mxu1 %v363_v0 }
  0x18   :  { %306 = vmatpush3.msra.mxu0 %v40_v24  ;;  %335 = vmatpush3.msra.mxu1 %v148_v42 }
  0x19   :  { %307 = vmatprep.subr.mxu0 %v363_v0  ;;  %336 = vmatprep.subr.mxu1 %v363_v0 }
  0x1a   :  { %308 = vmatpush3.msra.mxu0 %v39_v27  ;;  %337 = vmatpush3.msra.mxu1 %v147_v43 }
  0x1b   :  { %309 = vmatprep.subr.mxu0 %v363_v0  ;;  %338 = vmatprep.subr.mxu1 %v363_v0 }
  0x1c   :  { %310 = vmatpush3.msra.mxu0 %v38_v28  ;;  %339 = vmatpush3.msra.mxu1 %v146_v44 }
  0x1d   :  { %311 = vmatprep.subr.mxu0 %v363_v0  ;;  %340 = vmatprep.subr.mxu1 %v363_v0 }
  0x1e   :  { %312 = vmatpush3.msra.mxu0 %v37_v31  ;;  %341 = vmatpush3.msra.mxu1 %v145_v45 }
  0x1f   :  { %313 = vmatprep.subr.mxu0 %v363_v0  ;;  %342 = vmatprep.subr.mxu1 %v363_v0 }
  0x20   :  { %314 = vmatpush3.msra.mxu0 %v36_v32  ;;  %343 = vmatpush3.msra.mxu1 %v144_v46 }
  0x21   :  { %316 = vmatmul.mubr.f32.vlgmr.msra.gmra.mxu0 %v62_v33  ;;  %344 = vmatprep.subr.mxu1 %v363_v0 }
  0x22   :  { %345 = vmatpush3.msra.mxu1 %v143_v47 }
  0x23   :  { %346 = vmatprep.subr.mxu1 %v363_v0 }
  0x24   :  { %347 = vmatpush3.msra.mxu1 %v142_v48 }
  0x25   :  { %348 = vmatprep.subr.mxu1 %v363_v0 }
  0x26   :  { %349 = vmatpush3.msra.mxu1 %v141_v49 }
  0xe1   :  { %v130_v51 = vpop.f32.mrf.mxu0 }
  0xe2   :  { %v131_v52 = vadd.f32 %v245_v50, %v130_v51 }
  0xe3   :  { %v317_v53 = vpop.f32.mrf.mxu0 }
  0xe4   :  { %v246_v54 = vmul.f32 -1.442695, %v131_v52 }
  0xe6   :  { %355 = vpow2.f32 %v246_v54 }
  0xf3   :  { %v356_v55 = vpop.eup %355 }
  0xf4   :  { %v137_v56 = vadd.f32 1.0, %v356_v55 }
  0xf6   :  { %357 = vrcp.f32 %v137_v56 }
 0x103   :  { %v358_v57 = vpop.eup %357 }
 0x104   :  { %v140_v58 = vmul.f32 %v358_v57, %v131_v52 }
 0x106   :  { %351 = vmatmul.mubr.f32.vlgmr.msra.gmra.mxu1 %v140_v58 }
 0x1c6   :  { %v230_v60 = vpop.f32.mrf.mxu1 }
 0x1c7   :  { %v231_v61 = vadd.f32 %v247_v59, %v230_v60 }
 0x1c8   :  { %v352_v62 = vpop.f32.mrf.mxu1 }
 0x1c9   :  { %v248_v63 = vmul.f32 -1.442695, %v231_v61 }
 0x1cb   :  { %359 = vpow2.f32 %v248_v63 }
 0x1d8   :  { %v360_v0 = vpop.eup %359 }
 0x1d9   :  { %v237_v1 = vadd.f32 1.0, %v360_v0 }
 0x1db   :  { %361 = vrcp.f32 %v237_v1 }
 0x1e8   :  { %v362_v2 = vpop.eup %361 }
 0x1e9   :  { %240 = vst [vmem:[%s545_s5] sm:$0x3] %v362_v2 }

// kernel: effnetv2_forward.20
= control target key start
LH: loop header
LB: loop body
LE: loop exit
PB: predicated region body
PF: predicated region fallthrough
CT: control target
= control target key end

     0   :  { %s383_s1 = inlined_call_operand.vmem [shape: bf16[128,128], index: 1, kind: input, shape index: {}]   ;;  %s384_s0 = inlined_call_operand.vmem [shape: bf16[1,32,128], index: 0, kind: input, shape index: {}]   ;;  %s385_s2 = inlined_call_operand.vmem [shape: f32[1,128], index: 2, kind: input, shape index: {}]   ;;  %s386_s3 = inlined_call_operand.vmem [shape: bf16[1,32,128], index: 3, kind: output, shape index: {}]  }
   0x1   :  { %v298_v0 = vld [vmem:[%s383_s1 + $0x38] sm:$0xff]   ;;  %v299_v1 = vld [vmem:[%s383_s1 + $0x30] sm:$0xff]   ;;  %v300_v2 = vld [vmem:[%s383_s1 + $0x28] sm:$0xff]  }
   0x2   :  { %278 = vmatprep.subr.bf16.mxu0 %v298_v0  ;;  %v301_v3 = vld [vmem:[%s383_s1 + $0x20] sm:$0xff]   ;;  %v302_v5 = vld [vmem:[%s383_s1 + $0x18] sm:$0xff]   ;;  %v303_v6 = vld [vmem:[%s383_s1 + $0x10] sm:$0xff]  }
   0x3   :  { %279 = vmatpush3.bf16.msra.mxu0 %v298_v0  ;;  %v306_v4 = vld [vmem:[%s384_s0] sm:$0xff]   ;;  %v304_v7 = vld [vmem:[%s383_s1 + $0x8] sm:$0xff]  }
   0x4   :  { %280 = vmatprep.subr.bf16.mxu0 %v299_v1  ;;  %294 = vmatprep.mubr.bf16.mxu0 %v306_v4  ;;  %v305_v8 = vld [vmem:[%s383_s1] sm:$0xff]   ;;  %v307_v9 = vld [vmem:[%s384_s0 + $0x8] sm:$0xff]  }
   0x5   :  { %v244_v10 = vld [vmem:[%s385_s2] ss:$0 sm:$0xff] }
   0x7   :  { %281 = vmatpush3.bf16.msra.mxu0 %v299_v1 }
   0x8   :  { %282 = vmatprep.subr.bf16.mxu0 %v300_v2 }
   0xb   :  { %283 = vmatpush3.bf16.msra.mxu0 %v300_v2 }
   0xc   :  { %284 = vmatprep.subr.bf16.mxu0 %v301_v3 }
   0xf   :  { %285 = vmatpush3.bf16.msra.mxu0 %v301_v3 }
  0x10   :  { %286 = vmatprep.subr.bf16.mxu0 %v302_v5 }
  0x13   :  { %287 = vmatpush3.bf16.msra.mxu0 %v302_v5 }
  0x14   :  { %288 = vmatprep.subr.bf16.mxu0 %v303_v6 }
  0x17   :  { %289 = vmatpush3.bf16.msra.mxu0 %v303_v6 }
  0x18   :  { %290 = vmatprep.subr.bf16.mxu0 %v304_v7 }
  0x1b   :  { %291 = vmatpush3.bf16.msra.mxu0 %v304_v7 }
  0x1c   :  { %292 = vmatprep.subr.bf16.mxu0 %v305_v8 }
  0x1f   :  { %293 = vmatpush3.bf16.msra.mxu0 %v305_v8 }
  0x22   :  { %295 = vmatmul.mubr.bf16.vlgmr.msra.gmra.mxu0 %v307_v9 }
  0xe2   :  { %v296_v11 = vpop.f32.mrf.mxu0 }
  0xe3   :  { %v180_v12 = vadd.f32 %v296_v11, %v244_v10 }
  0xe4   :  { %v141_v13 = vpop.f32.mrf.mxu0 }
  0xe5   :  { %v247_v14 = vmul.f32 -1.442695, %v180_v12  ;;  %v178_v15 = vadd.f32 %v244_v10, %v141_v13 }
  0xe6   :  { %v297_v16 = vpop.f32.mrf.mxu0 }
  0xe7   :  { %308 = vpow2.f32 %v247_v14  ;;  %v245_v17 = vmul.f32 -1.442695, %v178_v15  ;;  %v181_v18 = vadd.f32 %v297_v16, %v244_v10 }
  0xe8   :  { %v144_v19 = vpop.f32.mrf.mxu0 }
  0xe9   :  { %310 = vpow2.f32 %v245_v17  ;;  %v248_v20 = vmul.f32 -1.442695, %v181_v18  ;;  %v179_v21 = vadd.f32 %v244_v10, %v144_v19 }
  0xeb   :  { %312 = vpow2.f32 %v248_v20  ;;  %v246_v22 = vmul.f32 -1.442695, %v179_v21 }
  0xed   :  { %314 = vpow2.f32 %v246_v22 }
  0xf4   :  { %v309_v23 = vpop.eup %308 }
  0xf5   :  { %v196_v24 = vadd.f32 1.0, %v309_v23 }
  0xf6   :  { %v311_v25 = vpop.eup %310 }
  0xf7   :  { %v194_v26 = vadd.f32 1.0, %v311_v25  ;;  %316 = vrcp.f32 %v196_v24 }
  0xf8   :  { %v313_v27 = vpop.eup %312 }
  0xf9   :  { %v197_v28 = vadd.f32 1.0, %v313_v27  ;;  %318 = vrcp.f32 %v194_v26 }
  0xfa   :  { %v315_v29 = vpop.eup %314 }
  0xfb   :  { %320 = vrcp.f32 %v197_v28  ;;  %v195_v30 = vadd.f32 1.0, %v315_v29 }
  0xfd   :  { %322 = vrcp.f32 %v195_v30 }
 0x104   :  { %v317_v31 = vpop.eup %316 }
 0x105   :  { %v208_v34 = vmul.f32 %v317_v31, %v180_v12 }
 0x106   :  { %v319_v32 = vpop.eup %318 }
 0x107   :  { %v206_v37 = vmul.f32 %v319_v32, %v178_v15 }
 0x108   :  { %v321_v33 = vpop.eup %320 }
 0x109   :  { %v209_v35 = vmul.f32 %v321_v33, %v181_v18 }
 0x10a   :  { %v323_v36 = vpop.eup %322 }
 0x10b   :  { %v265_v38 = vpack.c.bf16 %v209_v35, %v208_v34  ;;  %v207_v39 = vmul.f32 %v323_v36, %v179_v21 }
 0x10d   :  { %267 = vst [vmem:[%s386_s3 + $0x8] sm:$0xff] %v265_v38   ;;  %v260_v40 = vpack.c.bf16 %v207_v39, %v206_v37 }
 0x10f   :  { %261 = vst [vmem:[%s386_s3] sm:$0xff] %v260_v40  }

// kernel: effnetv2_forward.23
= control target key start
LH: loop header
LB: loop body
LE: loop exit
PB: predicated region body
PF: predicated region fallthrough
CT: control target
= control target key end

     0   :  { %s916_s18 = smov 0   ;;  %s918_s19 = smov 0   ;;  %s987_s0 = inlined_call_operand.vmem [shape: bf16[2,16,128], index: 0, kind: input, shape index: {}]   ;;  %s988_s1 = inlined_call_operand.vmem [shape: bf16[128,128], index: 1, kind: input, shape index: {}]   ;;  %s989_s2 = inlined_call_operand.vmem [shape: bf16[2,1,128], index: 2, kind: input, shape index: {}]   ;;  %s990_s3 = inlined_call_operand.vmem [shape: f32[1,128], index: 3, kind: input, shape index: {}]   ;;  %s991_s4 = inlined_call_operand.vmem [shape: bf16[2,16,128], index: 4, kind: input, shape index: {}]   ;;  %s992_s5 = inlined_call_operand.vmem [shape: bf16[2,16,128], index: 5, kind: output, shape index: {}]  }
   0x1   :  { %s920_s20 = smov 0  }
   0x2 LB: > { %s41_s21 = sadd.s32 1, %s878_s19  ;;  %p761_p0 = scmp.ge.s32.totalorder %s882_s20, 1  ;;  %s882_s20 = sphi %s920_s20, %s15_s20   ;;  %s878_s19 = sphi %s918_s19, %s994_s19   ;;  %s874_s18 = sphi %s916_s18, %s993_s18  }
   0x3   : > { %p43_p1 = scmp.ge.s32.totalorder %s41_s21, 2  ;;  %p288_p2 = scmp.lt.s32.totalorder %s882_s20, 3 }
   0x5   : > { %s996_s21 = smov (%p43_p1, %s41_s21), 0  ;;  %p289_p3 = pnand %p761_p0, %p288_p2 }
   0x6   : > { %p360_p4 = scmp.lt.s32.totalorder (!%p289_p3), %s874_s18, 1 }
   0x7   : > { %292 = sbr.rel (%p289_p3) target bundleno = 249 (0xf9), region = 40 }
   0xc   : > { %v852_v0 = vld [vmem:[%s988_s1 + $0x38] sm:$0xff]   ;;  %v884_v1 = vmov 0.0   ;;  %v853_v2 = vld [vmem:[%s988_s1 + $0x30] sm:$0xff]   ;;  %vm885_vm0 = vmmov 0   ;;  %s998_s18 = smov (!%p360_p4, %s874_s18), 1  ;;  %v429_v3 = vlaneseq  ;;  %v854_v4 = vld [vmem:[%s988_s1 + $0x28] sm:$0xff]  }
   0xd   : > { %806 = vmatprep.subr.bf16.mxu0 %v884_v1  ;;  %822 = vmatprep.mubr.msk.bf16.mxu0 %vm885_vm0, %v884_v1  ;;  %s386_s30 = scalar_lea.vmem %s989_s2, %s998_s18  ;;  %v855_v6 = vld [vmem:[%s988_s1 + $0x20] sm:$0xff]   ;;  %v856_v10 = vld [vmem:[%s988_s1 + $0x18] sm:$0xff]   ;;  %s952_s10 = sshll.u32 %s998_s18, 3  ;;  %v857_v12 = vld [vmem:[%s988_s1 + $0x10] sm:$0xff]  }
   0xe   : > { %807 = vmatpush3.bf16.msra.mxu0 %v852_v0  ;;  %v430_v5 = vshrl.u32 %v429_v3, 7  ;;  %v425_v7 = vld [vmem:[%s386_s30] sm:$0x1]  ;;  %s370_s15 = scalar_lea.vmem %s987_s0, %s952_s10  ;;  %v858_v14 = vld [vmem:[%s988_s1 + $0x8] sm:$0xff]   ;;  %s401_s25 = scalar_lea.vmem %s991_s4, %s952_s10 }
   0xf   : > { %808 = vmatprep.subr.bf16.mxu0 %v884_v1  ;;  %v427_v8 = vpack.i.b16 %v425_v7, %v425_v7  ;;  %v423_v15 = vld [vmem:[%s370_s15] sm:$0xf]  ;;  %v424_v16 = vld [vmem:[%s370_s15 + $0x4] sm:$0xf]  ;;  %s414_s30 = scalar_lea.vmem %s992_s5, %s952_s10 }
  0x10   : > { %v431_v9 = vsub.s32 0, %v430_v5  ;;  %v859_v19 = vld [vmem:[%s988_s1] sm:$0xff]  }
  0x11   : > { %v778_v22 = vld [vmem:[%s990_s3] ss:$0 sm:$0xff] }
  0x12   : > { %809 = vmatpush3.bf16.msra.mxu0 %v853_v2  ;;  %v432_v11 = vrot.slane %v427_v8, %v431_v9  ;;  %v789_v23 = vld [vmem:[%s401_s25] sm:$0xff]  }
  0x13   : > { %810 = vmatprep.subr.bf16.mxu0 %v884_v1  ;;  %v790_v26 = vunpack.c.l.bf16 %v789_v23  ;;  %v791_v27 = vunpack.c.h.bf16 %v789_v23 }
  0x14   : > { %v768_v13 = vcombine.low %v432_v11, %v432_v11 }
  0x16   : > { %811 = vmatpush3.bf16.msra.mxu0 %v854_v4  ;;  %v437_v17 = vmul.bf16 %v768_v13, %v423_v15  ;;  %v438_v18 = vmul.bf16 %v768_v13, %v424_v16 }
  0x17   : > { %812 = vmatprep.subr.bf16.mxu0 %v884_v1 }
  0x18   : > { %v769_v20 = vcombine.low %v437_v17, %v438_v18 }
  0x1a   : > { %813 = vmatpush3.bf16.msra.mxu0 %v855_v6 }
  0x1b   : > { %814 = vmatprep.subr.bf16.mxu0 %v884_v1 }
  0x1e   : > { %815 = vmatpush3.bf16.msra.mxu0 %v856_v10 }
  0x1f   : > { %816 = vmatprep.subr.bf16.mxu0 %v884_v1 }
  0x22   : > { %817 = vmatpush3.bf16.msra.mxu0 %v857_v12 }
  0x23   : > { %818 = vmatprep.subr.bf16.mxu0 %v884_v1 }
  0x26   : > { %819 = vmatpush3.bf16.msra.mxu0 %v858_v14 }
  0x27   : > { %820 = vmatprep.subr.bf16.mxu0 %v884_v1 }
  0x2a   : > { %821 = vmatpush3.bf16.msra.mxu0 %v859_v19 }
  0x2d   : > { %823 = vmatmul.mubr.bf16.vlgmr.msra.gmra.mxu0 %v769_v20 }
  0xed   : > { %v545_v21 = vpop.f32.mrf.mxu0 }
  0xee   : > { %v568_v25 = vadd.f32 %v778_v22, %v545_v21 }
  0xef   : > { %v824_v24 = vpop.f32.mrf.mxu0 }
  0xf0   : > { %v574_v31 = vadd.f32 %v790_v26, %v568_v25 }
  0xf1   : > { %v548_v28 = vpop.f32.mrf.mxu0 }
  0xf2   : > { %v569_v29 = vadd.f32 %v778_v22, %v548_v28 }
  0xf3   : > { %v825_v30 = vpop.f32.mrf.mxu0 }
  0xf4   : > { %v575_v32 = vadd.f32 %v791_v27, %v569_v29 }
  0xf6   : > { %v795_v33 = vpack.c.bf16 %v575_v32, %v574_v31 }
  0xf8   : > { %796 = vst [vmem:[%s414_s30] sm:$0xff] %v795_v33  }
  0xf9 PF: > { %s15_s20 = sadd.s32 1, %s882_s20   ;;  %s993_s18 = smov %s878_s19 }
  0xfa   : > { %p12_p5 = scmp.ge.s32.totalorder %s15_s20, 4   ;;  %s994_s19 = smov %s996_s21 }
  0xfc   :  { %14 = sbr.rel (!%p12_p5) target bundleno = 2 (0x2), region = 90 }

// kernel: effnetv2_forward.24
= control target key start
LH: loop header
LB: loop body
LE: loop exit
PB: predicated region body
PF: predicated region fallthrough
CT: control target
= control target key end

     0   :  { %s1048_s12 = smov 0   ;;  %s1050_s13 = smov 0   ;;  %s1170_s0 = inlined_call_operand.vmem [shape: bf16[1,32,128], index: 0, kind: input, shape index: {}]   ;;  %s1171_s1 = inlined_call_operand.vmem [shape: bf16[128,1792], index: 1, kind: input, shape index: {}]   ;;  %s1172_s2 = inlined_call_operand.vmem [shape: f32[1,1792], index: 2, kind: input, shape index: {}]   ;;  %s1173_s3 = inlined_call_operand.vmem [shape: bf16[1,32,1792], index: 3, kind: output, shape index: {}]  }
   0x1   :  { %s1052_s14 = smov 0   ;;  %s1054_s15 = smov 0  }
   0x2   :  { %s1056_s16 = smov 0  }
   0x3 LB: > { %s28_s17 = sadd.s32 1, %s1021_s15  ;;  %s819_s18 = sadd.s32 4294967295, %s1025_s16   ;;  %s1025_s16 = sphi %s1056_s16, %s13_s16   ;;  %s1021_s15 = sphi %s1054_s15, %s1178_s15   ;;  %s1017_s14 = sphi %s1052_s14, %s1177_s14   ;;  %s1013_s13 = sphi %s1050_s13, %s1176_s13   ;;  %s1009_s12 = sphi %s1048_s12, %s1175_s12  }
   0x4   : > { %p30_p0 = scmp.ge.s32.totalorder %s28_s17, 7  ;;  %p76_p1 = scmp.ne.s32.totalorder %s1013_s13, %s1009_s12 }
   0x5   : > { %p77_p2 = scmp.eq.s32.totalorder %s1025_s16, 0  ;;  %p134_p4 = scmp.eq.s32.totalorder %s819_s18, 6 }
   0x6   : > { %s1180_s17 = smov (%p30_p0, %s28_s17), 0  ;;  %s69_s20 = sadd.s32 1, %s1013_s13 }
   0x7   : > { %p78_p3 = por %p77_p2, %p76_p1  ;;  %s65_s19 = ssub.s32 %s1021_s15, %s1180_s17 }
   0x8   : > { %p67_p5 = scmp.eq.s32.totalorder %s65_s19, 0  ;;  %p1083_p6 = por %p134_p4, %p76_p1 }
   0x9   : > { %p823_p7 = scmp.ge.s32.totalorder %s1025_s16, 7 }
   0xa   : > { %s1088_s22 = scalar_select %p67_p5, %s1013_s13, %s69_s20  }
   0xb   : > { %168 = sbr.rel (%p823_p7) target bundleno = 28 (0x1c), region = 20 }
  0x10   : > { %171 = sbr.rel (!%p78_p3) target bundleno = 28 (0x1c), region = 24  ;;  %s173_s23 = sand.u32 (%p78_p3), 1, %s1013_s13  }
  0x11   : > { %s866_s24 = sshll.u32 (%p78_p3), %s1021_s15, 3  ;;  %s824_s25 = sshll.u32 (%p78_p3), %s173_s23, 7 }
  0x12   : > { %s1096_s28 = scalar_lea.vmem (%p78_p3), %s1171_s1, %s866_s24  ;;  %s175_s29 = scalar_lea.vmem (%p78_p3), [#allocation3], %s824_s25 }
  0x13   : > { %v240_v0 = vld [vmem:[%s1096_s28] sm:$0xff] (%p78_p3)  ;;  %v242_v1 = vld [vmem:[%s1096_s28 + $0x38] sm:$0xff] (%p78_p3)  ;;  %v244_v2 = vld [vmem:[%s1096_s28 + $0x70] sm:$0xff] (%p78_p3) }
  0x14   : > { %241 = vst [vmem:[%s175_s29] sm:$0xff] (%p78_p3), %v240_v0  ;;  %243 = vst [vmem:[%s175_s29 + $0x8] sm:$0xff] (%p78_p3), %v242_v1  ;;  %v246_v3 = vld [vmem:[%s1096_s28 + $0xa8] sm:$0xff] (%p78_p3)  ;;  %v248_v4 = vld [vmem:[%s1096_s28 + $0xe0] sm:$0xff] (%p78_p3) }
  0x15   : > { %245 = vst [vmem:[%s175_s29 + $0x10] sm:$0xff] %v244_v2  ;;  %v250_v5 = vld [vmem:[%s1096_s28 + $0x118] sm:$0xff]  ;;  %247 = vst [vmem:[%s175_s29 + $0x18] sm:$0xff] %v246_v3  ;;  %v252_v6 = vld [vmem:[%s1096_s28 + $0x150] sm:$0xff] }
  0x16   : > { %249 = vst [vmem:[%s175_s29 + $0x20] sm:$0xff] %v248_v4  ;;  %251 = vst [vmem:[%s175_s29 + $0x28] sm:$0xff] %v250_v5  ;;  %v254_v7 = vld [vmem:[%s1096_s28 + $0x188] sm:$0xff]  ;;  %v256_v8 = vld [vmem:[%s1096_s28 + $0x1c0] sm:$0xff] }
  0x17   : > { %253 = vst [vmem:[%s175_s29 + $0x30] sm:$0xff] %v252_v6  ;;  %255 = vst [vmem:[%s175_s29 + $0x38] sm:$0xff] %v254_v7  ;;  %v258_v9 = vld [vmem:[%s1096_s28 + $0x1f8] sm:$0xff]  ;;  %v260_v10 = vld [vmem:[%s1096_s28 + $0x230] sm:$0xff] }
  0x18   : > { %257 = vst [vmem:[%s175_s29 + $0x40] sm:$0xff] %v256_v8  ;;  %v262_v11 = vld [vmem:[%s1096_s28 + $0x268] sm:$0xff]  ;;  %259 = vst [vmem:[%s175_s29 + $0x48] sm:$0xff] %v258_v9  ;;  %v264_v12 = vld [vmem:[%s1096_s28 + $0x2a0] sm:$0xff] }
  0x19   : > { %261 = vst [vmem:[%s175_s29 + $0x50] sm:$0xff] %v260_v10  ;;  %263 = vst [vmem:[%s175_s29 + $0x58] sm:$0xff] %v262_v11  ;;  %v266_v13 = vld [vmem:[%s1096_s28 + $0x2d8] sm:$0xff]  ;;  %v268_v14 = vld [vmem:[%s1096_s28 + $0x310] sm:$0xff] }
  0x1a   : > { %265 = vst [vmem:[%s175_s29 + $0x60] sm:$0xff] %v264_v12  ;;  %267 = vst [vmem:[%s175_s29 + $0x68] sm:$0xff] %v266_v13  ;;  %v270_v15 = vld [vmem:[%s1096_s28 + $0x348] sm:$0xff] }
  0x1b   : > { %269 = vst [vmem:[%s175_s29 + $0x70] sm:$0xff] %v268_v14  ;;  %271 = vst [vmem:[%s175_s29 + $0x78] sm:$0xff] %v270_v15 }
  0x1c PF: > { %p827_p8 = scmp.ge.s32.totalorder %s1025_s16, 1  ;;  %p284_p9 = scmp.lt.s32.totalorder %s1025_s16, 8 }
  0x1e   : > { %p285_p10 = pnand %p827_p8, %p284_p9 }
  0x1f   : > { %s291_s30 = sand.u32 (!%p285_p10), 1, %s1009_s12   ;;  %s830_s10 = sshll.u32 (!%p285_p10), %s1017_s14, 1 }
  0x20   : > { %288 = sbr.rel (%p285_p10) target bundleno = 318 (0x13e), region = 66  ;;  %s828_s4 = sshll.u32 (!%p285_p10), %s291_s30, 7 }
  0x21   : > { %s1119_s5 = scalar_lea.vmem (!%p285_p10), [#allocation3], %s828_s4  ;;  %p337_p11 = scmp.lt.s32.totalorder (!%p285_p10), %s830_s10, 13 }
  0x22   : > { %s829_s20 = sshll.u32 (!%p285_p10), %s291_s30, 5 }
  0x23   : > { %s324_s23 = scalar_lea.vmem (!%p285_p10), [#allocation4], %s829_s20 }
  0x25   : > { %v1027_v16 = vmov 0   ;;  %v929_v17 = vld [vmem:[%s1119_s5 + $0x74] ss:$8 sps:$4 sm:$0xff]   ;;  %v931_v18 = vld [vmem:[%s1119_s5 + $0x70] ss:$8 sps:$4 sm:$0xff]   ;;  %v954_v34 = vld [vmem:[%s1170_s0 + $0x8] sm:$0xff]   ;;  %v558_v35 = vlaneseq }
  0x26   : > { %508 = vmatprep.mubr.bf16.mxu0 %v1027_v16  ;;  %518 = vmatprep.mubr.bf16.mxu1 %v1027_v16  ;;  %v932_v19 = vld [vmem:[%s1119_s5 + $0x64] ss:$8 sps:$4 sm:$0xff]   ;;  %v934_v20 = vld [vmem:[%s1119_s5 + $0x60] ss:$8 sps:$4 sm:$0xff]   ;;  %v935_v21 = vld [vmem:[%s1119_s5 + $0x54] ss:$8 sps:$4 sm:$0xff]  }
  0x27   : > { %476 = vmatprep.subr.bf16.mxu0 %v929_v17  ;;  %872 = vmatprep.subr.bf16.mxu1 %v929_v17  ;;  %v937_v22 = vld [vmem:[%s1119_s5 + $0x50] ss:$8 sps:$4 sm:$0xff]   ;;  %v938_v23 = vld [vmem:[%s1119_s5 + $0x44] ss:$8 sps:$4 sm:$0xff]   ;;  %v940_v24 = vld [vmem:[%s1119_s5 + $0x40] ss:$8 sps:$4 sm:$0xff]  }
  0x28   : > { %477 = vmatpush1.bf16.msra.mxu0 %v931_v18  ;;  %880 = vmatpush1.bf16.msra.mxu1 %v931_v18  ;;  %v941_v25 = vld [vmem:[%s1119_s5 + $0x34] ss:$8 sps:$4 sm:$0xff]   ;;  %v943_v26 = vld [vmem:[%s1119_s5 + $0x30] ss:$8 sps:$4 sm:$0xff]   ;;  %v944_v27 = vld [vmem:[%s1119_s5 + $0x24] ss:$8 sps:$4 sm:$0xff]  }
  0x29   : > { %478 = vmatprep.subr.bf16.mxu0 %v932_v19  ;;  %873 = vmatprep.subr.bf16.mxu1 %v932_v19  ;;  %v946_v28 = vld [vmem:[%s1119_s5 + $0x20] ss:$8 sps:$4 sm:$0xff]   ;;  %v947_v29 = vld [vmem:[%s1119_s5 + $0x14] ss:$8 sps:$4 sm:$0xff]   ;;  %v949_v30 = vld [vmem:[%s1119_s5 + $0x10] ss:$8 sps:$4 sm:$0xff]  }
  0x2a   : > { %v950_v31 = vld [vmem:[%s1119_s5 + $0x4] ss:$8 sps:$4 sm:$0xff]   ;;  %v952_v32 = vld [vmem:[%s1119_s5] ss:$8 sps:$4 sm:$0xff]   ;;  %v953_v33 = vld [vmem:[%s1170_s0] sm:$0xff]   ;;  %s1182_s10 = smov (!%p337_p11, %s830_s10), 13 }
  0x2b   : > { %v559_v36 = vshrl.u32 %v558_v35, 7  ;;  %s339_s19 = scalar_lea.vmem %s1172_s2, %s1182_s10  ;;  %s871_s12 = sshll.u32 (%p1083_p6), %s1017_s14, 3 }
  0x2c   : > { %479 = vmatpush1.bf16.msra.mxu0 %v934_v20  ;;  %881 = vmatpush1.bf16.msra.mxu1 %v934_v20  ;;  %v556_v38 = vld [vmem:[%s339_s19] sm:$0x3]  ;;  %s672_s26 = scalar_lea.vmem (%p1083_p6), %s1173_s3, %s871_s12 }
  0x2d   : > { %480 = vmatprep.subr.bf16.mxu0 %v935_v21  ;;  %874 = vmatprep.subr.bf16.mxu1 %v935_v21  ;;  %v560_v37 = vsub.s32 0, %v559_v36  ;;  %v564_v39 = vsub.s32 1, %v559_v36 }
  0x2f   : > { %v561_v40 = vrot.slane %v556_v38, %v560_v37  ;;  %v565_v41 = vrot.slane %v556_v38, %v564_v39 }
  0x30   : > { %481 = vmatpush1.bf16.msra.mxu0 %v937_v22  ;;  %882 = vmatpush1.bf16.msra.mxu1 %v937_v22 }
  0x31   : > { %482 = vmatprep.subr.bf16.mxu0 %v938_v23  ;;  %875 = vmatprep.subr.bf16.mxu1 %v938_v23 }
  0x34   : > { %483 = vmatpush1.bf16.msra.mxu0 %v940_v24  ;;  %883 = vmatpush1.bf16.msra.mxu1 %v940_v24 }
  0x35   : > { %484 = vmatprep.subr.bf16.mxu0 %v941_v25  ;;  %876 = vmatprep.subr.bf16.mxu1 %v941_v25 }
  0x38   : > { %485 = vmatpush1.bf16.msra.mxu0 %v943_v26  ;;  %884 = vmatpush1.bf16.msra.mxu1 %v943_v26 }
  0x39   : > { %486 = vmatprep.subr.bf16.mxu0 %v944_v27  ;;  %877 = vmatprep.subr.bf16.mxu1 %v944_v27 }
  0x3c   : > { %487 = vmatpush1.bf16.msra.mxu0 %v946_v28  ;;  %885 = vmatpush1.bf16.msra.mxu1 %v946_v28 }
  0x3d   : > { %488 = vmatprep.subr.bf16.mxu0 %v947_v29  ;;  %878 = vmatprep.subr.bf16.mxu1 %v947_v29 }
  0x40   : > { %489 = vmatpush1.bf16.msra.mxu0 %v949_v30  ;;  %886 = vmatpush1.bf16.msra.mxu1 %v949_v30 }
  0x41   : > { %490 = vmatprep.subr.bf16.mxu0 %v950_v31  ;;  %879 = vmatprep.subr.bf16.mxu1 %v950_v31 }
  0x44   : > { %491 = vmatpush1.bf16.msra.mxu0 %v952_v32  ;;  %887 = vmatpush1.bf16.msra.mxu1 %v952_v32 }
  0x47   : > { %509 = vmatmul.mubr.bf16.vlgmr.msra.gmra.mxu0 %v953_v33  ;;  %519 = vmatmul.mubr.bf16.vlgmr.msra.gmra.mxu1 %v954_v34 }
 0x107   : > { %v510_v42 = vpop.f32.mrf.mxu0  ;;  %v520_v43 = vpop.f32.mrf.mxu1 }
 0x108   : > { %v568_v44 = vadd.f32 %v561_v40, %v510_v42  ;;  %v572_v45 = vadd.f32 %v561_v40, %v520_v43 }
 0x109   : > { %v512_v46 = vpop.f32.mrf.mxu0  ;;  %v522_v47 = vpop.f32.mrf.mxu1 }
 0x10a   : > { %v849_v48 = vmul.f32 -1.442695, %v568_v44  ;;  %v853_v49 = vmul.f32 -1.442695, %v572_v45  ;;  %v569_v50 = vadd.f32 %v565_v41, %v512_v46  ;;  %v573_v51 = vadd.f32 %v565_v41, %v522_v47 }
 0x10b   : > { %v514_v52 = vpop.f32.mrf.mxu0  ;;  %v524_v53 = vpop.f32.mrf.mxu1 }
 0x10c   : > { %955 = vpow2.f32 %v849_v48  ;;  %v850_v54 = vmul.f32 -1.442695, %v569_v50  ;;  %v854_v55 = vmul.f32 -1.442695, %v573_v51  ;;  %v570_v56 = vadd.f32 %v561_v40, %v514_v52 }
 0x10d   : > { %957 = vpow2.f32 %v853_v49  ;;  %v574_v57 = vadd.f32 %v561_v40, %v524_v53  ;;  %v516_v58 = vpop.f32.mrf.mxu0  ;;  %v526_v59 = vpop.f32.mrf.mxu1 }
 0x10e   : > { %959 = vpow2.f32 %v850_v54  ;;  %v851_v60 = vmul.f32 -1.442695, %v570_v56  ;;  %v571_v61 = vadd.f32 %v565_v41, %v516_v58  ;;  %v575_v62 = vadd.f32 %v565_v41, %v526_v59 }
 0x10f   : > { %961 = vpow2.f32 %v854_v55  ;;  %v855_v63 = vmul.f32 -1.442695, %v574_v57 }
 0x110   : > { %963 = vpow2.f32 %v851_v60  ;;  %v852_v0 = vmul.f32 -1.442695, %v571_v61  ;;  %v856_v1 = vmul.f32 -1.442695, %v575_v62 }
 0x111   : > { %965 = vpow2.f32 %v855_v63 }
 0x112   : > { %967 = vpow2.f32 %v852_v0 }
 0x113   : > { %969 = vpow2.f32 %v856_v1 }
 0x119   : > { %v956_v2 = vpop.eup %955 }
 0x11a   : > { %v958_v3 = vpop.eup %957  ;;  %v600_v4 = vadd.f32 1.0, %v956_v2 }
 0x11b   : > { %v960_v5 = vpop.eup %959  ;;  %v604_v6 = vadd.f32 1.0, %v958_v3 }
 0x11c   : > { %v962_v7 = vpop.eup %961  ;;  %971 = vrcp.f32 %v600_v4  ;;  %v601_v8 = vadd.f32 1.0, %v960_v5 }
 0x11d   : > { %v964_v9 = vpop.eup %963  ;;  %973 = vrcp.f32 %v604_v6  ;;  %v605_v10 = vadd.f32 1.0, %v962_v7 }
 0x11e   : > { %v966_v11 = vpop.eup %965  ;;  %975 = vrcp.f32 %v601_v8  ;;  %v602_v12 = vadd.f32 1.0, %v964_v9 }
 0x11f   : > { %v968_v13 = vpop.eup %967  ;;  %977 = vrcp.f32 %v605_v10  ;;  %v606_v14 = vadd.f32 1.0, %v966_v11 }
 0x120   : > { %v970_v15 = vpop.eup %969  ;;  %979 = vrcp.f32 %v602_v12  ;;  %v603_v16 = vadd.f32 1.0, %v968_v13 }
 0x121   : > { %981 = vrcp.f32 %v606_v14  ;;  %v607_v17 = vadd.f32 1.0, %v970_v15 }
 0x122   : > { %983 = vrcp.f32 %v603_v16 }
 0x123   : > { %985 = vrcp.f32 %v607_v17 }
 0x129   : > { %v972_v18 = vpop.eup %971 }
 0x12a   : > { %v974_v19 = vpop.eup %973  ;;  %v624_v22 = vmul.f32 %v972_v18, %v568_v44 }
 0x12b   : > { %v976_v20 = vpop.eup %975  ;;  %v628_v25 = vmul.f32 %v974_v19, %v572_v45 }
 0x12c   : > { %v978_v21 = vpop.eup %977  ;;  %v625_v23 = vmul.f32 %v976_v20, %v569_v50 }
 0x12d   : > { %v980_v24 = vpop.eup %979  ;;  %v629_v26 = vmul.f32 %v978_v21, %v573_v51 }
 0x12e   : > { %v982_v27 = vpop.eup %981  ;;  %v867_v28 = vpack.c.bf16 %v625_v23, %v624_v22  ;;  %v626_v32 = vmul.f32 %v980_v24, %v570_v56 }
 0x12f   : > { %v984_v29 = vpop.eup %983  ;;  %v869_v30 = vpack.c.bf16 %v629_v26, %v628_v25  ;;  %v630_v34 = vmul.f32 %v982_v27, %v574_v57 }
 0x130   : > { %v986_v31 = vpop.eup %985  ;;  %656 = vst [vmem:[%s324_s23] sm:$0xff] %v867_v28  ;;  %v627_v33 = vmul.f32 %v984_v29, %v571_v61 }
 0x131   : > { %658 = vst [vmem:[%s324_s23 + $0x10] sm:$0xff] %v869_v30  ;;  %v631_v35 = vmul.f32 %v986_v31, %v575_v62  ;;  %666 = sbr.rel (!%p1083_p6) target bundleno = 318 (0x13e), region = 82 }
 0x132   : > { %v868_v36 = vpack.c.bf16 %v627_v33, %v626_v32 }
 0x133   : > { %v870_v37 = vpack.c.bf16 %v631_v35, %v630_v34 }
 0x134   : > { %657 = vst [vmem:[%s324_s23 + $0x8] sm:$0xff] %v868_v36 }
 0x135   : > { %659 = vst [vmem:[%s324_s23 + $0x18] sm:$0xff] %v870_v37 }
 0x137   : > { %v707_v38 = vld [vmem:[%s324_s23] sm:$0xff] }
 0x138   : > { %v711_v40 = vld [vmem:[%s324_s23 + $0x10] sm:$0xff]  ;;  %708 = vst [vmem:[%s672_s26] sm:$0xff] %v707_v38 }
 0x139   : > { %712 = vst [vmem:[%s672_s26 + $0x70] sm:$0xff] %v711_v40 }
 0x13b   : > { %v709_v39 = vld [vmem:[%s324_s23 + $0x8] sm:$0xff] }
 0x13c   : > { %v713_v41 = vld [vmem:[%s324_s23 + $0x18] sm:$0xff]  ;;  %710 = vst [vmem:[%s672_s26 + $0x38] sm:$0xff] %v709_v39 }
 0x13d   : > { %714 = vst [vmem:[%s672_s26 + $0xa8] sm:$0xff] %v713_v41 }
 0x13e PF: > { %s13_s16 = sadd.s32 1, %s1025_s16   ;;  %s1175_s12 = smov %s1013_s13 }
 0x13f   : > { %p10_p12 = scmp.ge.s32.totalorder %s13_s16, 9   ;;  %s1176_s13 = smov %s1088_s22 }
 0x140   : > { %s1177_s14 = smov %s1021_s15  ;;  %s1178_s15 = smov %s1180_s17 }
 0x141   :  { %12 = sbr.rel (!%p10_p12) target bundleno = 3 (0x3), region = 157 }

// kernel: effnetv2_forward.21
= control target key start
LH: loop header
LB: loop body
LE: loop exit
PB: predicated region body
PF: predicated region fallthrough
CT: control target
= control target key end

     0   :  { %s955_s15 = smov 0   ;;  %s957_s16 = smov 0   ;;  %s1116_s0 = inlined_call_operand.vmem [shape: bf16[1,2,1,6,6,128], index: 0, kind: input, shape index: {}]   ;;  %s1117_s1 = inlined_call_operand.vmem [shape: f32[9,128], index: 1, kind: input, shape index: {}]   ;;  %s1118_s2 = inlined_call_operand.vmem [shape: f32[1,128], index: 2, kind: input, shape index: {}]   ;;  %s1119_s3 = inlined_call_operand.vmem [shape: bf16[2,4,4,128], index: 3, kind: output, shape index: {0}]   ;;  %s1120_s4 = inlined_call_operand.vmem [shape: f32[2,1,8,128], index: 4, kind: output, shape index: {1}]  }
   0x1   :  { %s959_s17 = smov 0  }
   0x2 LB: > { %s34_s18 = sadd.s32 1, %s924_s16  ;;  %p827_p0 = scmp.ge.s32.totalorder %s928_s17, 1  ;;  %s928_s17 = sphi %s959_s17, %s15_s17   ;;  %s924_s16 = sphi %s957_s16, %s1122_s16   ;;  %s920_s15 = sphi %s955_s15, %s1121_s15  }
   0x3   : > { %p36_p1 = scmp.ge.s32.totalorder %s34_s18, 2  ;;  %p220_p2 = scmp.lt.s32.totalorder %s928_s17, 3 }
   0x5   : > { %s1124_s18 = smov (%p36_p1, %s34_s18), 0  ;;  %p221_p3 = pnand %p827_p0, %p220_p2 }
   0x6   : > { %p277_p4 = scmp.lt.s32.totalorder (!%p221_p3), %s920_s15, 1 }
   0x7   : > { %224 = sbr.rel (%p221_p3) target bundleno = 116 (0x74), region = 32 }
   0xc   : > { %v329_v0 = vlaneseq  ;;  %s1126_s15 = smov (!%p277_p4, %s920_s15), 1  ;;  %v319_v2 = vld [vmem:[%s1117_s1] sm:$0xff]  ;;  %v1016_v39 = vld [vmem:[%s1117_s1 + $0x8] ss:$0 sm:$0xff]  ;;  %vm622_vm0 = vcmask 1043456  }
   0xd   : > { %s865_s21 = smul.u32 24, %s1126_s15  ;;  %s864_s29 = sshll.u32 %s1126_s15, 3 }
   0xe   : > { %v330_v1 = vshrl.u32 %v329_v0, 7  ;;  %s307_s6 = scalar_lea.vmem %s1119_s3, %s864_s29  ;;  %s318_s9 = scalar_lea.vmem %s1120_s4, %s864_s29 }
   0xf   : > { %s982_s24 = scalar_lea.vmem %s1116_s0, %s865_s21 }
  0x10   : > { %v331_v3 = vsub.s32 0, %v330_v1  ;;  %v351_v4 = vsub.s32 1, %v330_v1  ;;  %v383_v5 = vsub.s32 2, %v330_v1  ;;  %v416_v6 = vsub.s32 3, %v330_v1  ;;  %v321_v14 = vld [vmem:[%s982_s24] sm:$0x3] }
  0x11   : > { %v436_v7 = vsub.s32 4, %v330_v1  ;;  %v468_v8 = vsub.s32 5, %v330_v1  ;;  %v501_v9 = vsub.s32 6, %v330_v1  ;;  %v521_v10 = vsub.s32 7, %v330_v1  ;;  %v341_v15 = vld [vmem:[%s982_s24] sm:$0x7] }
  0x12   : > { %v984_v11 = vrot.slane %v319_v2, %v331_v3  ;;  %v986_v12 = vrot.slane %v319_v2, %v351_v4  ;;  %v988_v13 = vrot.slane %v319_v2, %v383_v5  ;;  %v373_v16 = vld [vmem:[%s982_s24] sm:$0x6]  ;;  %v993_v17 = vrot.slane %v319_v2, %v416_v6  ;;  %v832_v23 = vld [vmem:[%s982_s24 + $0x4] sm:$0x3]  ;;  %v844_v30 = vld [vmem:[%s982_s24 + $0x8] sm:$0x3] }
  0x13   : > { %v995_v18 = vrot.slane %v319_v2, %v436_v7  ;;  %v997_v19 = vrot.slane %v319_v2, %v468_v8  ;;  %v325_v20 = vunpack.c.l.bf16 %v321_v14  ;;  %v345_v21 = vunpack.c.l.bf16 %v341_v15  ;;  %v836_v24 = vld [vmem:[%s982_s24 + $0x4] sm:$0x7]  ;;  %v848_v31 = vld [vmem:[%s982_s24 + $0x8] sm:$0x7]  ;;  %v845_v59 = vld [vmem:[%s982_s24 + $0xc] sm:$0x3] }
  0x14   : > { %v377_v22 = vunpack.c.l.bf16 %v373_v16  ;;  %v840_v25 = vld [vmem:[%s982_s24 + $0x4] sm:$0x6]  ;;  %v1002_v26 = vrot.slane %v319_v2, %v501_v9  ;;  %v410_v27 = vunpack.c.l.bf16 %v832_v23  ;;  %v430_v28 = vunpack.c.l.bf16 %v836_v24  ;;  %v852_v33 = vld [vmem:[%s982_s24 + $0x8] sm:$0x6]  ;;  %v849_v0 = vld [vmem:[%s982_s24 + $0xc] sm:$0x7] }
  0x15   : > { %v462_v29 = vunpack.c.l.bf16 %v840_v25  ;;  %v1006_v32 = vrot.slane %v319_v2, %v521_v10  ;;  %v333_v34 = vmul.f32 %v984_v11, %v325_v20  ;;  %v353_v35 = vmul.f32 %v986_v12, %v345_v21  ;;  %v322_v38 = vld [vmem:[%s982_s24 + $0x4] sm:$0x3]  ;;  %v833_v48 = vld [vmem:[%s982_s24 + $0x8] sm:$0x3]  ;;  %v853_v5 = vld [vmem:[%s982_s24 + $0xc] sm:$0x6] }
  0x16   : > { %v385_v36 = vmul.f32 %v988_v13, %v377_v22  ;;  %v495_v37 = vunpack.c.l.bf16 %v844_v30  ;;  %v438_v40 = vmul.f32 %v995_v18, %v430_v28  ;;  %v515_v42 = vunpack.c.l.bf16 %v848_v31  ;;  %v342_v43 = vld [vmem:[%s982_s24 + $0x4] sm:$0x7]  ;;  %v837_v49 = vld [vmem:[%s982_s24 + $0x8] sm:$0x7] }
  0x17   : > { %v470_v41 = vmul.f32 %v997_v19, %v462_v29  ;;  %v374_v44 = vld [vmem:[%s982_s24 + $0x4] sm:$0x6]  ;;  %v361_v45 = vrot.slane %v353_v35, 1  ;;  %v547_v47 = vunpack.c.l.bf16 %v852_v33  ;;  %v418_v50 = vmul.f32 %v993_v17, %v410_v27  ;;  %v841_v58 = vld [vmem:[%s982_s24 + $0x8] sm:$0x6] }
  0x18   : > { %v393_v46 = vrot.slane %v385_v36, 2  ;;  %v503_v51 = vmul.f32 %v1002_v26, %v495_v37  ;;  %v1027_v52 = vmul.f32 %v1006_v32, %v515_v42  ;;  %v326_v53 = vunpack.c.l.bf16 %v322_v38  ;;  %v323_v10 = vld [vmem:[%s982_s24 + $0x8] sm:$0x3]  ;;  %v834_v33 = vld [vmem:[%s982_s24 + $0xc] sm:$0x3] }
  0x19   : > { %v369_v54 = vadd.f32 %v361_v45, %v333_v34  ;;  %v446_v55 = vrot.slane %v438_v40, 1  ;;  %v346_v56 = vunpack.c.l.bf16 %v342_v43  ;;  %v378_v57 = vunpack.c.l.bf16 %v374_v44  ;;  %v343_v21 = vld [vmem:[%s982_s24 + $0x8] sm:$0x7]  ;;  %v838_v38 = vld [vmem:[%s982_s24 + $0xc] sm:$0x7] }
  0x1a   : > { %v478_v60 = vrot.slane %v470_v41, 2  ;;  %v1032_v61 = vmul.f32 %v1016_v39, %v547_v47  ;;  %v411_v62 = vunpack.c.l.bf16 %v833_v48  ;;  %v431_v63 = vunpack.c.l.bf16 %v837_v49  ;;  %v375_v22 = vld [vmem:[%s982_s24 + $0x8] sm:$0x6]  ;;  %v842_v40 = vld [vmem:[%s982_s24 + $0xc] sm:$0x6] }
  0x1b   : > { %v401_v1 = vadd.f32 %v393_v46, %v369_v54  ;;  %v334_v2 = vmul.f32 %v984_v11, %v326_v53  ;;  %v354_v3 = vmul.f32 %v986_v12, %v346_v56  ;;  %v386_v4 = vmul.f32 %v988_v13, %v378_v57  ;;  %v846_v45 = vld [vmem:[%s982_s24 + $0x10] sm:$0x3] }
  0x1c   : > { %v531_v6 = vrot.slane %v1027_v52, 1  ;;  %v439_v7 = vmul.f32 %v995_v18, %v431_v63  ;;  %v463_v8 = vunpack.c.l.bf16 %v841_v58  ;;  %v496_v9 = vunpack.c.l.bf16 %v845_v59  ;;  %v854_v56 = vld [vmem:[%s982_s24 + $0x10] sm:$0x6] }
  0x1d   : > { %v422_v14 = vadd.f32 %v418_v50, %v401_v1  ;;  %v362_v15 = vrot.slane %v354_v3, 1  ;;  %v394_v16 = vrot.slane %v386_v4, 2  ;;  %v516_v20 = vunpack.c.l.bf16 %v849_v0  ;;  %v324_v1 = vld [vmem:[%s982_s24 + $0xc] sm:$0x3] }
  0x1e   : > { %v563_v23 = vrot.slane %v1032_v61, 2  ;;  %v419_v24 = vmul.f32 %v993_v17, %v411_v62  ;;  %v471_v25 = vmul.f32 %v997_v19, %v463_v8  ;;  %v548_v27 = vunpack.c.l.bf16 %v853_v5 }
  0x1f   : > { %v454_v28 = vadd.f32 %v446_v55, %v422_v14  ;;  %v370_v29 = vadd.f32 %v362_v15, %v334_v2  ;;  %v447_v30 = vrot.slane %v439_v7, 1  ;;  %v327_v31 = vunpack.c.l.bf16 %v323_v10  ;;  %v850_v55 = vld [vmem:[%s982_s24 + $0x10] sm:$0x7]  ;;  %v344_v7 = vld [vmem:[%s982_s24 + $0xc] sm:$0x7] }
  0x20   : > { %v504_v34 = vmul.f32 %v1002_v26, %v496_v9  ;;  %v524_v35 = vmul.f32 %v1006_v32, %v516_v20  ;;  %v347_v36 = vunpack.c.l.bf16 %v343_v21  ;;  %v379_v37 = vunpack.c.l.bf16 %v375_v22 }
  0x21   : > { %v486_v41 = vadd.f32 %v478_v60, %v454_v28  ;;  %v402_v42 = vadd.f32 %v394_v16, %v370_v29  ;;  %v479_v43 = vrot.slane %v471_v25, 2  ;;  %v556_v44 = vmul.f32 %v1016_v39, %v548_v27  ;;  %v835_v28 = vld [vmem:[%s982_s24 + $0x10] sm:$0x3] }
  0x22   : > { %v335_v46 = vmul.f32 %v984_v11, %v327_v31  ;;  %v355_v47 = vmul.f32 %v986_v12, %v347_v36  ;;  %v387_v48 = vmul.f32 %v988_v13, %v379_v37  ;;  %v412_v49 = vunpack.c.l.bf16 %v834_v33  ;;  %v839_v29 = vld [vmem:[%s982_s24 + $0x10] sm:$0x7] }
  0x23   : > { %v507_v50 = vadd.f32 %v503_v51, %v486_v41  ;;  %v423_v52 = vadd.f32 %v419_v24, %v402_v42  ;;  %v432_v53 = vunpack.c.l.bf16 %v838_v38  ;;  %v464_v54 = vunpack.c.l.bf16 %v842_v40  ;;  %v1065_v51 = vld [vmem:[%s1118_s2] ss:$0 sm:$0xff] }
  0x24   : > { %v532_v57 = vrot.slane %v524_v35, 1  ;;  %v363_v58 = vrot.slane %v355_v47, 1  ;;  %v395_v59 = vrot.slane %v387_v48, 2  ;;  %v497_v60 = vunpack.c.l.bf16 %v846_v45  ;;  %v847_v48 = vld [vmem:[%s982_s24 + $0x14] sm:$0x3] }
  0x25   : > { %v539_v61 = vadd.f32 %v531_v6, %v507_v50  ;;  %v455_v62 = vadd.f32 %v447_v30, %v423_v52  ;;  %v440_v63 = vmul.f32 %v995_v18, %v432_v53  ;;  %v472_v0 = vmul.f32 %v997_v19, %v464_v54  ;;  %v376_v6 = vld [vmem:[%s982_s24 + $0xc] sm:$0x6]  ;;  %v843_v30 = vld [vmem:[%s982_s24 + $0x10] sm:$0x6] }
  0x26   : > { %v371_v2 = vadd.f32 %v363_v58, %v335_v46  ;;  %v420_v3 = vmul.f32 %v993_v17, %v412_v49  ;;  %v517_v4 = vunpack.c.l.bf16 %v850_v55  ;;  %v549_v5 = vunpack.c.l.bf16 %v854_v56 }
  0x27   : > { %v571_v8 = vadd.f32 %v563_v23, %v539_v61  ;;  %v487_v9 = vadd.f32 %v479_v43, %v455_v62  ;;  %v564_v10 = vrot.slane %v556_v44, 2  ;;  %v505_v14 = vmul.f32 %v1002_v26, %v497_v60  ;;  %v851_v44 = vld [vmem:[%s982_s24 + $0x14] sm:$0x7] }
  0x28   : > { %v403_v15 = vadd.f32 %v395_v59, %v371_v2  ;;  %v448_v16 = vrot.slane %v440_v63, 1  ;;  %v480_v20 = vrot.slane %v472_v0, 2  ;;  %v328_v21 = vunpack.c.l.bf16 %v324_v1 }
  0x29   : > { %v1072_v22 = vadd.f32 %v1065_v51, %v571_v8  ;;  %v508_v24 = vadd.f32 %v504_v34, %v487_v9  ;;  %v348_v25 = vunpack.c.l.bf16 %v344_v7  ;;  %v380_v27 = vunpack.c.l.bf16 %v376_v6 }
  0x2a   : > { %v424_v31 = vadd.f32 %v420_v3, %v403_v15  ;;  %v525_v23 = vmul.f32 %v1006_v32, %v517_v4  ;;  %v557_v33 = vmul.f32 %v1016_v39, %v549_v5  ;;  %v336_v35 = vmul.f32 %v984_v11, %v328_v21 }
  0x2b   : > { %v858_v36 = vmul.f32 -1.442695, %v1072_v22  ;;  %v540_v37 = vadd.f32 %v532_v57, %v508_v24  ;;  %v356_v38 = vmul.f32 %v986_v12, %v348_v25  ;;  %v388_v34 = vmul.f32 %v988_v13, %v380_v27  ;;  %v855_v12 = vld [vmem:[%s982_s24 + $0x14] sm:$0x6] }
  0x2c   : > { %v456_v40 = vadd.f32 %v448_v16, %v424_v31  ;;  %v413_v41 = vunpack.c.l.bf16 %v835_v28  ;;  %v433_v42 = vunpack.c.l.bf16 %v839_v29  ;;  %v465_v43 = vunpack.c.l.bf16 %v843_v30 }
  0x2d   : > { %890 = vpow2.f32 %v858_v36  ;;  %v572_v45 = vadd.f32 %v564_v10, %v540_v37  ;;  %v364_v46 = vrot.slane %v356_v38, 1  ;;  %v396_v47 = vrot.slane %v388_v34, 2 }
  0x2e   : > { %v488_v49 = vadd.f32 %v480_v20, %v456_v40  ;;  %v533_v11 = vrot.slane %v525_v23, 1  ;;  %v421_v50 = vmul.f32 %v993_v17, %v413_v41  ;;  %v441_v52 = vmul.f32 %v995_v18, %v433_v42 }
  0x2f   : > { %v583_v53 = vadd.f32 %v1065_v51, %v572_v45  ;;  %v372_v13 = vadd.f32 %v364_v46, %v336_v35  ;;  %v473_v54 = vmul.f32 %v997_v19, %v465_v43  ;;  %v518_v55 = vunpack.c.l.bf16 %v851_v44 }
  0x30   : > { %v509_v56 = vadd.f32 %v505_v14, %v488_v49  ;;  %v565_v57 = vrot.slane %v557_v33, 2  ;;  %v498_v58 = vunpack.c.l.bf16 %v847_v48  ;;  %v449_v61 = vrot.slane %v441_v52, 1 }
  0x31   : > { %v859_v59 = vmul.f32 -1.442695, %v583_v53  ;;  %v404_v60 = vadd.f32 %v396_v47, %v372_v13  ;;  %v550_v62 = vunpack.c.l.bf16 %v855_v12  ;;  %v481_v17 = vrot.slane %v473_v54, 2 }
  0x32   : > { %v541_v63 = vadd.f32 %v533_v11, %v509_v56  ;;  %v526_v18 = vmul.f32 %v1006_v32, %v518_v55  ;;  %v506_v3 = vmul.f32 %v1002_v26, %v498_v58 }
  0x33   : > { %892 = vpow2.f32 %v859_v59  ;;  %v425_v0 = vadd.f32 %v421_v50, %v404_v60  ;;  %v558_v19 = vmul.f32 %v1016_v39, %v550_v62 }
  0x34   : > { %v573_v1 = vadd.f32 %v565_v57, %v541_v63  ;;  %v534_v7 = vrot.slane %v526_v18, 1 }
  0x35   : > { %v457_v2 = vadd.f32 %v449_v61, %v425_v0  ;;  %v566_v9 = vrot.slane %v558_v19, 2 }
  0x36   : > { %v584_v4 = vadd.f32 %v1065_v51, %v573_v1 }
  0x37   : > { %v489_v5 = vadd.f32 %v481_v17, %v457_v2 }
  0x38   : > { %v860_v6 = vmul.f32 -1.442695, %v584_v4 }
  0x39   : > { %v510_v8 = vadd.f32 %v506_v3, %v489_v5 }
  0x3a   : > { %v891_v10 = vpop.eup %890  ;;  %894 = vpow2.f32 %v860_v6 }
  0x3b   : > { %v598_v14 = vadd.f32 1.0, %v891_v10  ;;  %v542_v15 = vadd.f32 %v534_v7, %v510_v8 }
  0x3d   : > { %896 = vrcp.f32 %v598_v14  ;;  %v574_v32 = vadd.f32 %v566_v9, %v542_v15 }
  0x3f   : > { %v585_v16 = vadd.f32 %v1065_v51, %v574_v32 }
  0x40   : > { %v893_v26 = vpop.eup %892 }
  0x41   : > { %v599_v20 = vadd.f32 1.0, %v893_v26  ;;  %v861_v39 = vmul.f32 -1.442695, %v585_v16 }
  0x43   : > { %898 = vrcp.f32 %v599_v20 }
  0x44   : > { %900 = vpow2.f32 %v861_v39 }
  0x47   : > { %v895_v21 = vpop.eup %894 }
  0x48   : > { %v600_v24 = vadd.f32 1.0, %v895_v21 }
  0x4a   : > { %v897_v25 = vpop.eup %896  ;;  %902 = vrcp.f32 %v600_v24 }
  0x4b   : > { %v610_v27 = vmul.f32 %v897_v25, %v1072_v22 }
  0x4d   : > { %v614_v28 = vpack.c.bf16 %v610_v27, %v610_v27  ;;  %v623_v36 = vsel %vm622_vm0, %v610_v27, 0.0 }
  0x4f   : > { %618 = vst [vmem:[%s307_s6] sm:$0x3] %v614_v28 }
  0x50   : > { %v899_v51 = vpop.eup %898 }
  0x51   : > { %v901_v29 = vpop.eup %900  ;;  %v611_v30 = vmul.f32 %v899_v51, %v583_v53 }
  0x52   : > { %v601_v31 = vadd.f32 1.0, %v901_v29 }
  0x53   : > { %v615_v23 = vpack.c.bf16 %v611_v30, %v611_v30  ;;  %v624_v37 = vsel %vm622_vm0, %v611_v30, 0.0 }
  0x54   : > { %904 = vrcp.f32 %v601_v31  ;;  %v625_v38 = vadd.f32 %v624_v37, %v623_v36 }
  0x55   : > { %619 = vst [vmem:[%s307_s6 + $0x2] sm:$0x3] %v615_v23 }
  0x57   : > { %v903_v33 = vpop.eup %902 }
  0x58   : > { %v612_v35 = vmul.f32 %v903_v33, %v584_v4 }
  0x5a   : > { %v616_v22 = vpack.c.bf16 %v612_v35, %v612_v35  ;;  %v626_v34 = vsel %vm622_vm0, %v612_v35, 0.0 }
  0x5b   : > { %v627_v41 = vadd.f32 %v626_v34, %v625_v38 }
  0x5c   : > { %620 = vst [vmem:[%s307_s6 + $0x4] sm:$0x3] %v616_v22 }
  0x61   : > { %v905_v40 = vpop.eup %904 }
  0x62   : > { %v613_v42 = vmul.f32 %v905_v40, %v585_v16 }
  0x64   : > { %v617_v43 = vpack.c.bf16 %v613_v42, %v613_v42  ;;  %v628_v44 = vsel %vm622_vm0, %v613_v42, 0.0 }
  0x65   : > { %v629_v45 = vadd.f32 %v628_v44, %v627_v41 }
  0x66   : > { %621 = vst [vmem:[%s307_s6 + $0x6] sm:$0x3] %v617_v43 }
  0x67   : > { %v630_v46 = vrot.slane %v629_v45, 4 }
  0x69   : > { %v631_v47 = vadd.f32 %v630_v46, %v629_v45 }
  0x6b   : > { %v632_v48 = vrot.slane %v631_v47, 2 }
  0x6d   : > { %v633_v49 = vadd.f32 %v632_v48, %v631_v47 }
  0x6f   : > { %v634_v11 = vrot.slane %v633_v49, 1 }
  0x71   : > { %v635_v50 = vadd.f32 %v634_v11, %v633_v49 }
  0x73   : > { %636 = vst [vmem:[%s318_s9] sm:$0xff] %v635_v50 }
  0x74 PF: > { %s15_s17 = sadd.s32 1, %s928_s17   ;;  %s1121_s15 = smov %s924_s16 }
  0x75   : > { %p12_p5 = scmp.ge.s32.totalorder %s15_s17, 4   ;;  %s1122_s16 = smov %s1124_s18 }
  0x77   :  { %14 = sbr.rel (!%p12_p5) target bundleno = 2 (0x2), region = 82 }

// kernel: effnetv2_forward.25
= control target key start
LH: loop header
LB: loop body
LE: loop exit
PB: predicated region body
PF: predicated region fallthrough
CT: control target
= control target key end

     0   :  { %v1594_v6 = vmov 0.0   ;;  %v340_v41 = vlaneseq  ;;  %v1595_v57 = vmov 1983009808   ;;  %vm458_vm0 = vcmask 1041409   ;;  %s2493_s0 = inlined_call_operand.vmem [shape: bf16[2,16,1792], index: 0, kind: input, shape index: {}]   ;;  %s2494_s1 = inlined_call_operand.vmem [shape: f32[1792,128], index: 1, kind: input, shape index: {}]   ;;  %s2495_s2 = inlined_call_operand.vmem [shape: f32[1,128], index: 2, kind: input, shape index: {}]   ;;  %s2496_s3 = inlined_call_operand.hbm [shape: f32[2,128], index: 3, kind: output, shape index: {}]  }
   0x1   :  { %v541_v0 = vld [vmem:[%s2494_s1 + $0xf8] sm:$0xff]  ;;  %v540_v2 = vld [vmem:[%s2494_s1 + $0xf0] sm:$0xff]  ;;  %22 = vst [vmem:[#allocation2 + $0x18] sm:$0xf] %v1594_v6  ;;  %v539_v7 = vld [vmem:[%s2494_s1 + $0xe8] sm:$0xff]  ;;  %v1776_v58 = vunpack.c.l.s4 %v1595_v57  ;;  %vm460_vm1 = vcmask 1043459  }
   0x2   :  { %v525_v1 = vld [vmem:[%s2494_s1 + $0x78] sm:$0xff]  ;;  %1324 = vmatprep.subr.mxu0 %v541_v0  ;;  %v524_v4 = vld [vmem:[%s2494_s1 + $0x70] sm:$0xff]  ;;  %v523_v9 = vld [vmem:[%s2494_s1 + $0x68] sm:$0xff]  ;;  %v1778_v59 = vshrl.u32 %v340_v41, 7  ;;  %vm462_vm2 = vcmask 1045509   ;;  %vm464_vm3 = vcmask 1047559  }
   0x3   :  { %v573_v3 = vld [vmem:[%s2494_s1 + $0x1f8] sm:$0xff]  ;;  %1325 = vmatpush3.msra.mxu0 %v525_v1  ;;  %v572_v8 = vld [vmem:[%s2494_s1 + $0x1f0] sm:$0xff]  ;;  %v571_v11 = vld [vmem:[%s2494_s1 + $0x1e8] sm:$0xff] }
   0x4   :  { %v557_v5 = vld [vmem:[%s2494_s1 + $0x178] sm:$0xff]  ;;  %1359 = vmatprep.subr.mxu1 %v573_v3  ;;  %1326 = vmatprep.subr.mxu0 %v540_v2  ;;  %v556_v10 = vld [vmem:[%s2494_s1 + $0x170] sm:$0xff]  ;;  %v538_v12 = vld [vmem:[%s2494_s1 + $0xe0] sm:$0xff] }
   0x5   :  { %1360 = vmatpush3.msra.mxu1 %v557_v5  ;;  %1327 = vmatpush3.msra.mxu0 %v524_v4  ;;  %v555_v13 = vld [vmem:[%s2494_s1 + $0x168] sm:$0xff]  ;;  %v522_v14 = vld [vmem:[%s2494_s1 + $0x60] sm:$0xff]  ;;  %v537_v16 = vld [vmem:[%s2494_s1 + $0xd8] sm:$0xff] }
   0x6   :  { %1361 = vmatprep.subr.mxu1 %v572_v8  ;;  %1328 = vmatprep.subr.mxu0 %v539_v7  ;;  %v570_v15 = vld [vmem:[%s2494_s1 + $0x1e0] sm:$0xff]  ;;  %v521_v18 = vld [vmem:[%s2494_s1 + $0x58] sm:$0xff]  ;;  %v536_v20 = vld [vmem:[%s2494_s1 + $0xd0] sm:$0xff] }
   0x7   :  { %1362 = vmatpush3.msra.mxu1 %v556_v10  ;;  %1329 = vmatpush3.msra.mxu0 %v523_v9  ;;  %v554_v17 = vld [vmem:[%s2494_s1 + $0x160] sm:$0xff]  ;;  %v569_v19 = vld [vmem:[%s2494_s1 + $0x1d8] sm:$0xff]  ;;  %v520_v22 = vld [vmem:[%s2494_s1 + $0x50] sm:$0xff] }
   0x8   :  { %1363 = vmatprep.subr.mxu1 %v571_v11  ;;  %1330 = vmatprep.subr.mxu0 %v538_v12  ;;  %v553_v21 = vld [vmem:[%s2494_s1 + $0x158] sm:$0xff]  ;;  %v568_v23 = vld [vmem:[%s2494_s1 + $0x1d0] sm:$0xff]  ;;  %v535_v24 = vld [vmem:[%s2494_s1 + $0xc8] sm:$0xff] }
   0x9   :  { %1364 = vmatpush3.msra.mxu1 %v555_v13  ;;  %1331 = vmatpush3.msra.mxu0 %v522_v14  ;;  %v552_v25 = vld [vmem:[%s2494_s1 + $0x150] sm:$0xff]  ;;  %v519_v26 = vld [vmem:[%s2494_s1 + $0x48] sm:$0xff]  ;;  %v534_v28 = vld [vmem:[%s2494_s1 + $0xc0] sm:$0xff] }
   0xa   :  { %1365 = vmatprep.subr.mxu1 %v570_v15  ;;  %1332 = vmatprep.subr.mxu0 %v537_v16  ;;  %v567_v27 = vld [vmem:[%s2494_s1 + $0x1c8] sm:$0xff]  ;;  %v518_v30 = vld [vmem:[%s2494_s1 + $0x40] sm:$0xff]  ;;  %v533_v32 = vld [vmem:[%s2494_s1 + $0xb8] sm:$0xff] }
   0xb   :  { %1366 = vmatpush3.msra.mxu1 %v554_v17  ;;  %1333 = vmatpush3.msra.mxu0 %v521_v18  ;;  %v551_v29 = vld [vmem:[%s2494_s1 + $0x148] sm:$0xff]  ;;  %v566_v31 = vld [vmem:[%s2494_s1 + $0x1c0] sm:$0xff]  ;;  %v517_v34 = vld [vmem:[%s2494_s1 + $0x38] sm:$0xff] }
   0xc   :  { %1367 = vmatprep.subr.mxu1 %v569_v19  ;;  %1334 = vmatprep.subr.mxu0 %v536_v20  ;;  %v550_v33 = vld [vmem:[%s2494_s1 + $0x140] sm:$0xff]  ;;  %v565_v35 = vld [vmem:[%s2494_s1 + $0x1b8] sm:$0xff]  ;;  %v532_v36 = vld [vmem:[%s2494_s1 + $0xb0] sm:$0xff] }
   0xd   :  { %1368 = vmatpush3.msra.mxu1 %v553_v21  ;;  %1335 = vmatpush3.msra.mxu0 %v520_v22  ;;  %v549_v37 = vld [vmem:[%s2494_s1 + $0x138] sm:$0xff]  ;;  %v516_v38 = vld [vmem:[%s2494_s1 + $0x30] sm:$0xff]  ;;  %v531_v39 = vld [vmem:[%s2494_s1 + $0xa8] sm:$0xff] }
   0xe   :  { %1369 = vmatprep.subr.mxu1 %v568_v23  ;;  %1336 = vmatprep.subr.mxu0 %v535_v24  ;;  %v564_v40 = vld [vmem:[%s2494_s1 + $0x1b0] sm:$0xff]  ;;  %v515_v42 = vld [vmem:[%s2494_s1 + $0x28] sm:$0xff]  ;;  %v530_v44 = vld [vmem:[%s2494_s1 + $0xa0] sm:$0xff] }
   0xf   :  { %1370 = vmatpush3.msra.mxu1 %v552_v25  ;;  %1337 = vmatpush3.msra.mxu0 %v519_v26  ;;  %v548_v43 = vld [vmem:[%s2494_s1 + $0x130] sm:$0xff]  ;;  %v563_v45 = vld [vmem:[%s2494_s1 + $0x1a8] sm:$0xff]  ;;  %v514_v46 = vld [vmem:[%s2494_s1 + $0x20] sm:$0xff] }
  0x10   :  { %1371 = vmatprep.subr.mxu1 %v567_v27  ;;  %1338 = vmatprep.subr.mxu0 %v534_v28  ;;  %v547_v47 = vld [vmem:[%s2494_s1 + $0x128] sm:$0xff]  ;;  %v529_v48 = vld [vmem:[%s2494_s1 + $0x98] sm:$0xff]  ;;  %v562_v49 = vld [vmem:[%s2494_s1 + $0x1a0] sm:$0xff]  ;;  %v339_v27 = vunpack.c.0.s8 %v1776_v58 }
  0x11   :  { %1372 = vmatpush3.msra.mxu1 %v551_v29  ;;  %1339 = vmatpush3.msra.mxu0 %v518_v30  ;;  %v546_v50 = vld [vmem:[%s2494_s1 + $0x120] sm:$0xff]  ;;  %v28_v52 = vld [vmem:[%s2493_s0 + $0x8] sm:$0xff]  ;;  %v34_v53 = vld [vmem:[%s2493_s0 + $0x38] sm:$0xff] }
  0x12   :  { %1373 = vmatprep.subr.mxu1 %v566_v31  ;;  %1340 = vmatprep.subr.mxu0 %v533_v32  ;;  %v27_v51 = vld [vmem:[%s2493_s0] sm:$0xff]  ;;  %v41_v60 = vld [vmem:[%s2493_s0 + $0x70] sm:$0xff]  ;;  %v42_v61 = vld [vmem:[%s2493_s0 + $0x78] sm:$0xff]  ;;  %v57_v63 = vunpack.c.l.bf16 %v28_v52  ;;  %v58_v0 = vunpack.c.h.bf16 %v28_v52  ;;  %v69_v1 = vunpack.c.l.bf16 %v34_v53  ;;  %v70_v2 = vunpack.c.h.bf16 %v34_v53 }
  0x13   :  { %1374 = vmatpush3.msra.mxu1 %v550_v33  ;;  %1341 = vmatpush3.msra.mxu0 %v517_v34  ;;  %v35_v54 = vld [vmem:[%s2493_s0 + $0x40] sm:$0xff]  ;;  %v55_v55 = vunpack.c.l.bf16 %v27_v51  ;;  %v56_v56 = vunpack.c.h.bf16 %v27_v51  ;;  %v48_v62 = vld [vmem:[%s2493_s0 + $0xa8] sm:$0xff]  ;;  %v513_v3 = vld [vmem:[%s2494_s1 + $0x18] sm:$0xff]  ;;  %v83_v8 = vunpack.c.l.bf16 %v41_v60  ;;  %v84_v9 = vunpack.c.h.bf16 %v41_v60 }
  0x14   :  { %1375 = vmatprep.subr.mxu1 %v565_v35  ;;  %1342 = vmatprep.subr.mxu0 %v532_v36  ;;  %v561_v4 = vld [vmem:[%s2494_s1 + $0x198] sm:$0xff]  ;;  %v49_v5 = vld [vmem:[%s2493_s0 + $0xb0] sm:$0xff]  ;;  %v71_v6 = vunpack.c.l.bf16 %v35_v54  ;;  %v72_v7 = vunpack.c.h.bf16 %v35_v54  ;;  %v85_v12 = vunpack.c.l.bf16 %v42_v61  ;;  %v86_v13 = vunpack.c.h.bf16 %v42_v61  ;;  %v527_v22 = vld [vmem:[%s2494_s1 + $0x88] sm:$0xff] }
  0x15   :  { %1376 = vmatpush3.msra.mxu1 %v549_v37  ;;  %1343 = vmatpush3.msra.mxu0 %v516_v38  ;;  %v528_v10 = vld [vmem:[%s2494_s1 + $0x90] sm:$0xff]  ;;  %v545_v11 = vld [vmem:[%s2494_s1 + $0x118] sm:$0xff]  ;;  %v97_v14 = vunpack.c.l.bf16 %v48_v62  ;;  %v98_v15 = vunpack.c.h.bf16 %v48_v62  ;;  %v99_v18 = vunpack.c.l.bf16 %v49_v5  ;;  %v100_v19 = vunpack.c.h.bf16 %v49_v5  ;;  %v511_v28 = vld [vmem:[%s2494_s1 + $0x8] sm:$0xff] }
  0x16   :  { %1377 = vmatprep.subr.mxu1 %v564_v40  ;;  %1344 = vmatprep.subr.mxu0 %v531_v39  ;;  %v512_v16 = vld [vmem:[%s2494_s1 + $0x10] sm:$0xff]  ;;  %v111_v20 = vadd.f32 %v69_v1, %v55_v55  ;;  %v118_v21 = vadd.f32 %v70_v2, %v56_v56  ;;  %v125_v24 = vadd.f32 %v71_v6, %v57_v63  ;;  %v559_v29 = vld [vmem:[%s2494_s1 + $0x188] sm:$0xff]  ;;  %v526_v34 = vld [vmem:[%s2494_s1 + $0x80] sm:$0xff] }
  0x17   :  { %1378 = vmatpush3.msra.mxu1 %v548_v43  ;;  %1345 = vmatpush3.msra.mxu0 %v515_v42  ;;  %v560_v17 = vld [vmem:[%s2494_s1 + $0x190] sm:$0xff]  ;;  %v132_v25 = vadd.f32 %v72_v7, %v58_v0  ;;  %v209_v26 = vadd.f32 %v97_v14, %v83_v8  ;;  %v216_v32 = vadd.f32 %v98_v15, %v84_v9  ;;  %v543_v35 = vld [vmem:[%s2494_s1 + $0x108] sm:$0xff]  ;;  %v510_v40 = vld [vmem:[%s2494_s1] sm:$0xff] }
  0x18   :  { %1379 = vmatprep.subr.mxu1 %v563_v45  ;;  %1346 = vmatprep.subr.mxu0 %v530_v44  ;;  %v544_v23 = vld [vmem:[%s2494_s1 + $0x110] sm:$0xff]  ;;  %v112_v30 = vrot.slane %v111_v20, 4  ;;  %v119_v31 = vrot.slane %v118_v21, 4  ;;  %v223_v33 = vadd.f32 %v99_v18, %v85_v12  ;;  %v126_v36 = vrot.slane %v125_v24, 4  ;;  %v558_v45 = vld [vmem:[%s2494_s1 + $0x180] sm:$0xff]  ;;  %v637_v56 = vld [vmem:[%s2494_s1 + $0x3f8] sm:$0xff] }
  0x19   :  { %1380 = vmatpush3.msra.mxu1 %v547_v47  ;;  %1347 = vmatpush3.msra.mxu0 %v514_v46  ;;  %v133_v37 = vrot.slane %v132_v25, 4  ;;  %v210_v38 = vrot.slane %v209_v26, 4  ;;  %v230_v39 = vadd.f32 %v100_v19, %v86_v13  ;;  %v217_v43 = vrot.slane %v216_v32, 4  ;;  %v542_v51 = vld [vmem:[%s2494_s1 + $0x100] sm:$0xff]  ;;  %v29_v58 = vld [vmem:[%s2493_s0 + $0x10] sm:$0xff] }
  0x1a   :  { %1381 = vmatprep.subr.mxu1 %v562_v49  ;;  %1348 = vmatprep.subr.mxu0 %v529_v48  ;;  %v113_v41 = vadd.f32 %v112_v30, %v111_v20  ;;  %v120_v42 = vadd.f32 %v119_v31, %v118_v21  ;;  %v224_v44 = vrot.slane %v223_v33, 4  ;;  %v127_v46 = vadd.f32 %v126_v36, %v125_v24 }
  0x1b   :  { %1382 = vmatpush3.msra.mxu1 %v546_v50  ;;  %1349 = vmatpush3.msra.mxu0 %v513_v3  ;;  %v134_v47 = vadd.f32 %v133_v37, %v132_v25  ;;  %v211_v48 = vadd.f32 %v210_v38, %v209_v26  ;;  %v231_v49 = vrot.slane %v230_v39, 4  ;;  %v605_v50 = vld [vmem:[%s2494_s1 + $0x2f8] sm:$0xff]  ;;  %v218_v54 = vadd.f32 %v217_v43, %v216_v32  ;;  %v37_v37 = vld [vmem:[%s2493_s0 + $0x50] sm:$0xff]  ;;  %v43_v38 = vld [vmem:[%s2493_s0 + $0x80] sm:$0xff] }
  0x1c   :  { %1383 = vmatprep.subr.mxu1 %v561_v4  ;;  %1350 = vmatprep.subr.mxu0 %v528_v10  ;;  %v114_v52 = vrot.slane %v113_v41, 2  ;;  %v121_v53 = vrot.slane %v120_v42, 2  ;;  %v225_v55 = vadd.f32 %v224_v44, %v223_v33  ;;  %v128_v57 = vrot.slane %v127_v46, 2  ;;  %v1871_v44 = vld [vmem:[%s2493_s0 + $0x88] sm:$0xff] }
  0x1d   :  { %1384 = vmatpush3.msra.mxu1 %v545_v11  ;;  %1351 = vmatpush3.msra.mxu0 %v512_v16  ;;  %v135_v60 = vrot.slane %v134_v47, 2  ;;  %v212_v61 = vrot.slane %v211_v48, 2  ;;  %v232_v62 = vadd.f32 %v231_v49, %v230_v39  ;;  %v219_v1 = vrot.slane %v218_v54, 2 }
  0x1e   :  { %1385 = vmatprep.subr.mxu1 %v560_v17  ;;  %1352 = vmatprep.subr.mxu0 %v527_v22  ;;  %v115_v63 = vadd.f32 %v114_v52, %v113_v41  ;;  %v122_v0 = vadd.f32 %v121_v53, %v120_v42  ;;  %v226_v2 = vrot.slane %v225_v55, 2  ;;  %v129_v3 = vadd.f32 %v128_v57, %v127_v46  ;;  %v1879_v46 = vld [vmem:[%s2493_s0 + $0xc0] sm:$0xff] }
  0x1f   :  { %1386 = vmatpush3.msra.mxu1 %v544_v23  ;;  %1353 = vmatpush3.msra.mxu0 %v511_v28  ;;  %v136_v4 = vadd.f32 %v135_v60, %v134_v47  ;;  %v213_v5 = vadd.f32 %v212_v61, %v211_v48  ;;  %v233_v6 = vrot.slane %v232_v62, 2  ;;  %v220_v9 = vadd.f32 %v219_v1, %v218_v54 }
  0x20   :  { %1387 = vmatprep.subr.mxu1 %v559_v29  ;;  %1354 = vmatprep.subr.mxu0 %v526_v34  ;;  %v116_v7 = vrot.slane %v115_v63, 1  ;;  %v123_v8 = vrot.slane %v122_v0, 1  ;;  %v227_v10 = vadd.f32 %v226_v2, %v225_v55  ;;  %v130_v11 = vrot.slane %v129_v3, 1 }
  0x21   :  { %1388 = vmatpush3.msra.mxu1 %v543_v35  ;;  %1355 = vmatpush3.msra.mxu0 %v510_v40  ;;  %v137_v12 = vrot.slane %v136_v4, 1  ;;  %v214_v13 = vrot.slane %v213_v5, 1  ;;  %v234_v14 = vadd.f32 %v233_v6, %v232_v62  ;;  %v221_v17 = vrot.slane %v220_v9, 1 }
  0x22   :  { %1389 = vmatprep.subr.mxu1 %v558_v45  ;;  %1394 = vmatprep.subr.mxu0 %v605_v50  ;;  %v117_v15 = vadd.f32 %v116_v7, %v115_v63  ;;  %v124_v16 = vadd.f32 %v123_v8, %v122_v0  ;;  %v228_v18 = vrot.slane %v227_v10, 1  ;;  %v131_v19 = vadd.f32 %v130_v11, %v129_v3  ;;  %v50_v45 = vld [vmem:[%s2493_s0 + $0xb8] sm:$0xff] }
  0x23   :  { %1390 = vmatpush3.msra.mxu1 %v542_v51  ;;  %v138_v20 = vadd.f32 %v137_v12, %v136_v4  ;;  %v215_v21 = vadd.f32 %v214_v13, %v213_v5  ;;  %v235_v22 = vrot.slane %v234_v14, 1  ;;  %v222_v23 = vadd.f32 %v221_v17, %v220_v9 }
  0x24   :  { %1429 = vmatprep.subr.mxu1 %v637_v56  ;;  %v229_v24 = vadd.f32 %v228_v18, %v227_v10  ;;  %v335_v25 = vcombine.low %v117_v15, %v124_v16  ;;  %v1847_v26 = vsub.s32 %v339_v27, %v1778_v59  ;;  %v30_v59 = vld [vmem:[%s2493_s0 + $0x18] sm:$0xff]  ;;  %v36_v27 = vld [vmem:[%s2493_s0 + $0x48] sm:$0xff]  ;;  %v59_v39 = vunpack.c.l.bf16 %v29_v58 }
  0x25   :  { %v236_v28 = vadd.f32 %v235_v22, %v234_v14  ;;  %v336_v29 = vcombine.low %v131_v19, %v138_v20  ;;  %v394_v31 = vcombine.low %v215_v21, %v222_v23  ;;  %v60_v40 = vunpack.c.h.bf16 %v29_v58 }
  0x26   :  { %v343_v30 = vrot.slane %v335_v25, %v1847_v26  ;;  %v61_v41 = vunpack.c.l.bf16 %v30_v59  ;;  %v62_v42 = vunpack.c.h.bf16 %v30_v59  ;;  %v73_v47 = vunpack.c.l.bf16 %v36_v27 }
  0x27   :  { %v350_v32 = vrot.slane %v336_v29, %v1847_v26  ;;  %v395_v33 = vcombine.low %v229_v24, %v236_v28  ;;  %v402_v34 = vrot.slane %v394_v31, %v1847_v26  ;;  %v74_v48 = vunpack.c.h.bf16 %v36_v27 }
  0x28   :  { %v75_v49 = vunpack.c.l.bf16 %v37_v37  ;;  %v76_v50 = vunpack.c.h.bf16 %v37_v37  ;;  %v87_v51 = vunpack.c.l.bf16 %v43_v38  ;;  %v88_v52 = vunpack.c.h.bf16 %v43_v38 }
  0x29   :  { %v351_v35 = vcombine.low %v343_v30, %v350_v32  ;;  %v409_v36 = vrot.slane %v395_v33, %v1847_v26  ;;  %v89_v53 = vunpack.c.l.bf16 %v1871_v44  ;;  %v90_v55 = vunpack.c.h.bf16 %v1871_v44  ;;  %v620_v44 = vld [vmem:[%s2494_s1 + $0x370] sm:$0xff] }
  0x2a   :  { %v101_v56 = vunpack.c.l.bf16 %v50_v45  ;;  %v102_v57 = vunpack.c.h.bf16 %v50_v45  ;;  %v103_v60 = vunpack.c.l.bf16 %v1879_v46  ;;  %v104_v61 = vunpack.c.h.bf16 %v1879_v46 }
  0x2b   :  { %v410_v43 = vcombine.low %v402_v34, %v409_v36  ;;  %v139_v62 = vadd.f32 %v73_v47, %v59_v39  ;;  %v146_v63 = vadd.f32 %v74_v48, %v60_v40  ;;  %v153_v1 = vadd.f32 %v75_v49, %v61_v41  ;;  %v604_v49 = vld [vmem:[%s2494_s1 + $0x2f0] sm:$0xff] }
  0x2c   :  { %v160_v2 = vadd.f32 %v76_v50, %v62_v42  ;;  %v237_v3 = vadd.f32 %v101_v56, %v87_v51  ;;  %v244_v7 = vadd.f32 %v102_v57, %v88_v52  ;;  %v251_v22 = vadd.f32 %v103_v60, %v89_v53  ;;  %v589_v42 = vld [vmem:[%s2494_s1 + $0x278] sm:$0xff]  ;;  %v588_v53 = vld [vmem:[%s2494_s1 + $0x270] sm:$0xff] }
  0x2d   :  { %v457_v54 = vrot.slane %v410_v43, 7  ;;  %v140_v5 = vrot.slane %v139_v62, 4  ;;  %v147_v6 = vrot.slane %v146_v63, 4  ;;  %v154_v9 = vrot.slane %v153_v1, 4 }
  0x2e   :  { %v161_v10 = vrot.slane %v160_v2, 4  ;;  %v238_v11 = vrot.slane %v237_v3, 4  ;;  %v245_v15 = vrot.slane %v244_v7, 4  ;;  %v252_v32 = vrot.slane %v251_v22, 4 }
  0x2f   :  { %v459_v0 = vsel %vm458_vm0, %v457_v54, %v351_v35  ;;  %v141_v13 = vadd.f32 %v140_v5, %v139_v62  ;;  %v148_v14 = vadd.f32 %v147_v6, %v146_v63  ;;  %v155_v16 = vadd.f32 %v154_v9, %v153_v1  ;;  %v603_v63 = vld [vmem:[%s2494_s1 + $0x2e8] sm:$0xff]  ;;  %v601_v9 = vld [vmem:[%s2494_s1 + $0x2d8] sm:$0xff] }
  0x30   :  { %v461_v4 = vsel %vm460_vm1, %v457_v54, %v459_v0  ;;  %v162_v17 = vadd.f32 %v161_v10, %v160_v2  ;;  %v239_v18 = vadd.f32 %v238_v11, %v237_v3  ;;  %v246_v21 = vadd.f32 %v245_v15, %v244_v7  ;;  %v636_v0 = vld [vmem:[%s2494_s1 + $0x3f0] sm:$0xff]  ;;  %v587_v1 = vld [vmem:[%s2494_s1 + $0x268] sm:$0xff]  ;;  %v586_v7 = vld [vmem:[%s2494_s1 + $0x260] sm:$0xff] }
  0x31   :  { %v463_v8 = vsel %vm462_vm2, %v457_v54, %v461_v4  ;;  %v142_v19 = vrot.slane %v141_v13, 2  ;;  %v149_v20 = vrot.slane %v148_v14, 2  ;;  %v156_v24 = vrot.slane %v155_v16, 2 }
  0x32   :  { %v465_v12 = vsel %vm464_vm3, %v457_v54, %v463_v8  ;;  %v163_v25 = vrot.slane %v162_v17, 2  ;;  %v240_v28 = vrot.slane %v239_v18, 2  ;;  %v247_v31 = vrot.slane %v246_v21, 2  ;;  %v621_v54 = vld [vmem:[%s2494_s1 + $0x378] sm:$0xff]  ;;  %v619_v8 = vld [vmem:[%s2494_s1 + $0x368] sm:$0xff] }
  0x33   :  { %v506_v23 = vmul.f32 0.0625, %v465_v12  ;;  %v143_v29 = vadd.f32 %v142_v19, %v141_v13  ;;  %v150_v30 = vadd.f32 %v149_v20, %v148_v14  ;;  %v157_v35 = vadd.f32 %v156_v24, %v155_v16  ;;  %v634_v12 = vld [vmem:[%s2494_s1 + $0x3e0] sm:$0xff]  ;;  %v585_v13 = vld [vmem:[%s2494_s1 + $0x258] sm:$0xff]  ;;  %v600_v16 = vld [vmem:[%s2494_s1 + $0x2d0] sm:$0xff] }
  0x34   :  { %v164_v36 = vadd.f32 %v163_v25, %v162_v17  ;;  %v241_v27 = vadd.f32 %v240_v28, %v239_v18  ;;  %v248_v37 = vadd.f32 %v247_v31, %v246_v21  ;;  %v253_v52 = vadd.f32 %v252_v32, %v251_v22  ;;  %v618_v14 = vld [vmem:[%s2494_s1 + $0x360] sm:$0xff]  ;;  %v633_v17 = vld [vmem:[%s2494_s1 + $0x3d8] sm:$0xff]  ;;  %v52_v31 = vld [vmem:[%s2493_s0 + $0xc8] sm:$0xff] }
  0x35   :  { %v752_v33 = vrot.slane %v506_v23, %v1847_v26  ;;  %v745_v34 = vcombine.high %v506_v23, %v506_v23  ;;  %v144_v58 = vrot.slane %v143_v29, 1  ;;  %v151_v59 = vrot.slane %v150_v30, 1  ;;  %v31_v19 = vld [vmem:[%s2493_s0 + $0x20] sm:$0xff]  ;;  %v32_v23 = vld [vmem:[%s2493_s0 + $0x28] sm:$0xff]  ;;  %v38_v24 = vld [vmem:[%s2493_s0 + $0x58] sm:$0xff] }
  0x36   :  { %v158_v40 = vrot.slane %v157_v35, 1  ;;  %v165_v41 = vrot.slane %v164_v36, 1  ;;  %v242_v46 = vrot.slane %v241_v27, 1  ;;  %v249_v47 = vrot.slane %v248_v37, 1  ;;  %v39_v25 = vld [vmem:[%s2493_s0 + $0x60] sm:$0xff] }
  0x37   :  { %v760_v38 = vcombine.high %v752_v33, %v752_v33  ;;  %v759_v39 = vrot.slane %v745_v34, %v1847_v26  ;;  %v145_v43 = vadd.f32 %v144_v58, %v143_v29  ;;  %v152_v45 = vadd.f32 %v151_v59, %v150_v30  ;;  %v45_v29 = vld [vmem:[%s2493_s0 + $0x90] sm:$0xff]  ;;  %v1976_v30 = vld [vmem:[%s2493_s0 + $0x98] sm:$0xff] }
  0x38   :  { %v159_v50 = vadd.f32 %v158_v40, %v157_v35  ;;  %v166_v51 = vadd.f32 %v165_v41, %v164_v36  ;;  %v243_v56 = vadd.f32 %v242_v46, %v241_v27  ;;  %v250_v57 = vadd.f32 %v249_v47, %v248_v37  ;;  %v584_v36 = vld [vmem:[%s2494_s1 + $0x250] sm:$0xff]  ;;  %v617_v58 = vld [vmem:[%s2494_s1 + $0x358] sm:$0xff]  ;;  %v599_v40 = vld [vmem:[%s2494_s1 + $0x2c8] sm:$0xff] }
  0x39   :  { %882 = vmatprep.mubr.f32.mxu0 %v760_v38  ;;  %v761_v48 = vcombine.high %v759_v39, %v759_v39  ;;  %v258_v60 = vadd.f32 %v104_v61, %v90_v55  ;;  %v352_v62 = vcombine.low %v145_v43, %v152_v45  ;;  %v254_v2 = vrot.slane %v253_v52, 2  ;;  %v602_v55 = vld [vmem:[%s2494_s1 + $0x2e0] sm:$0xff]  ;;  %v635_v61 = vld [vmem:[%s2494_s1 + $0x3e8] sm:$0xff]  ;;  %v1990_v27 = vld [vmem:[%s2493_s0 + $0xd0] sm:$0xff] }
  0x3a   :  { %883 = vmatmul.mubr.f32.vlgmr.msra.gmra.mxu0 %v752_v33  ;;  %v353_v3 = vcombine.low %v159_v50, %v166_v51  ;;  %v411_v6 = vcombine.low %v243_v56, %v250_v57  ;;  %v63_v28 = vunpack.c.l.bf16 %v31_v19  ;;  %v64_v32 = vunpack.c.h.bf16 %v31_v19  ;;  %v632_v41 = vld [vmem:[%s2494_s1 + $0x3d0] sm:$0xff]  ;;  %v583_v47 = vld [vmem:[%s2494_s1 + $0x248] sm:$0xff] }
  0x3b   :  { %1395 = vmatpush3.msra.mxu0 %v589_v42  ;;  %952 = vmatprep.mubr.f32.mxu1 %v761_v48  ;;  %v259_v4 = vrot.slane %v258_v60, 4  ;;  %v1924_v5 = vrot.slane %v352_v62, %v1847_v26  ;;  %v255_v10 = vadd.f32 %v254_v2, %v253_v52  ;;  %v65_v33 = vunpack.c.l.bf16 %v32_v23  ;;  %v616_v48 = vld [vmem:[%s2494_s1 + $0x350] sm:$0xff]  ;;  %v582_v62 = vld [vmem:[%s2494_s1 + $0x240] sm:$0xff] }
  0x3c   :  { %1396 = vmatprep.subr.mxu0 %v604_v49  ;;  %953 = vmatmul.mubr.f32.vlgmr.msra.gmra.mxu1 %v759_v39  ;;  %v1936_v11 = vrot.slane %v353_v3, %v1847_v26  ;;  %v1959_v22 = vrot.slane %v411_v6, %v1847_v26  ;;  %v66_v34 = vunpack.c.h.bf16 %v32_v23  ;;  %v77_v35 = vunpack.c.l.bf16 %v38_v24  ;;  %v597_v3 = vld [vmem:[%s2494_s1 + $0x2b8] sm:$0xff] }
  0x3d   :  { %1397 = vmatpush3.msra.mxu0 %v588_v53  ;;  %1430 = vmatpush3.msra.mxu1 %v621_v54  ;;  %v260_v15 = vadd.f32 %v259_v4, %v258_v60  ;;  %v256_v18 = vrot.slane %v255_v10, 1  ;;  %v78_v37 = vunpack.c.h.bf16 %v38_v24  ;;  %v79_v38 = vunpack.c.l.bf16 %v39_v25  ;;  %v598_v53 = vld [vmem:[%s2494_s1 + $0x2c0] sm:$0xff]  ;;  %v631_v54 = vld [vmem:[%s2494_s1 + $0x3c8] sm:$0xff]  ;;  %v613_v23 = vld [vmem:[%s2494_s1 + $0x338] sm:$0xff] }
  0x3e   :  { %1398 = vmatprep.subr.mxu0 %v603_v63  ;;  %1431 = vmatprep.subr.mxu1 %v636_v0  ;;  %v368_v21 = vcombine.low %v1924_v5, %v1936_v11  ;;  %v80_v39 = vunpack.c.h.bf16 %v39_v25  ;;  %v91_v43 = vunpack.c.l.bf16 %v45_v29  ;;  %v92_v45 = vunpack.c.h.bf16 %v45_v29  ;;  %v615_v63 = vld [vmem:[%s2494_s1 + $0x348] sm:$0xff] }
  0x3f   :  { %1399 = vmatpush3.msra.mxu0 %v587_v1  ;;  %1432 = vmatpush3.msra.mxu1 %v620_v44  ;;  %v261_v20 = vrot.slane %v260_v15, 2  ;;  %v257_v42 = vadd.f32 %v256_v18, %v255_v10  ;;  %v93_v46 = vunpack.c.l.bf16 %v1976_v30  ;;  %v105_v50 = vunpack.c.l.bf16 %v52_v31  ;;  %v630_v44 = vld [vmem:[%s2494_s1 + $0x3c0] sm:$0xff] }
  0x40   :  { %1400 = vmatprep.subr.mxu0 %v602_v55  ;;  %1433 = vmatprep.subr.mxu1 %v635_v61  ;;  %v106_v51 = vunpack.c.h.bf16 %v52_v31  ;;  %v107_v52 = vunpack.c.l.bf16 %v1990_v27  ;;  %v167_v56 = vadd.f32 %v77_v35, %v63_v28  ;;  %v174_v57 = vadd.f32 %v78_v37, %v64_v32  ;;  %v595_v31 = vld [vmem:[%s2494_s1 + $0x2a8] sm:$0xff]  ;;  %v628_v32 = vld [vmem:[%s2494_s1 + $0x3b0] sm:$0xff] }
  0x41   :  { %1401 = vmatpush3.msra.mxu0 %v586_v7  ;;  %1434 = vmatpush3.msra.mxu1 %v619_v8  ;;  %v262_v59 = vadd.f32 %v261_v20, %v260_v15  ;;  %v181_v60 = vadd.f32 %v79_v38, %v65_v33  ;;  %v188_v1 = vadd.f32 %v80_v39, %v66_v34  ;;  %v581_v7 = vld [vmem:[%s2494_s1 + $0x238] sm:$0xff]  ;;  %v614_v8 = vld [vmem:[%s2494_s1 + $0x340] sm:$0xff]  ;;  %v580_v20 = vld [vmem:[%s2494_s1 + $0x230] sm:$0xff] }
  0x42   :  { %1402 = vmatprep.subr.mxu0 %v601_v9  ;;  %1435 = vmatprep.subr.mxu1 %v634_v12  ;;  %v265_v2 = vadd.f32 %v105_v50, %v91_v43  ;;  %v168_v55 = vrot.slane %v167_v56, 4  ;;  %v175_v61 = vrot.slane %v174_v57, 4  ;;  %v272_v6 = vadd.f32 %v106_v51, %v92_v45  ;;  %v629_v15 = vld [vmem:[%s2494_s1 + $0x3b8] sm:$0xff] }
  0x43   :  { %1403 = vmatpush3.msra.mxu0 %v585_v13  ;;  %1436 = vmatpush3.msra.mxu1 %v618_v14  ;;  %v263_v49 = vrot.slane %v262_v59, 1  ;;  %v182_v4 = vrot.slane %v181_v60, 4  ;;  %v189_v10 = vrot.slane %v188_v1, 4  ;;  %v279_v13 = vadd.f32 %v107_v52, %v93_v46  ;;  %v596_v14 = vld [vmem:[%s2494_s1 + $0x2b0] sm:$0xff]  ;;  %v593_v51 = vld [vmem:[%s2494_s1 + $0x298] sm:$0xff]  ;;  %v626_v52 = vld [vmem:[%s2494_s1 + $0x3a0] sm:$0xff] }
  0x44   :  { %1404 = vmatprep.subr.mxu0 %v600_v16  ;;  %1437 = vmatprep.subr.mxu1 %v633_v17  ;;  %v266_v12 = vrot.slane %v265_v2, 4  ;;  %v169_v16 = vadd.f32 %v168_v55, %v167_v56  ;;  %v176_v17 = vadd.f32 %v175_v61, %v174_v57  ;;  %v273_v19 = vrot.slane %v272_v6, 4 }
  0x45   :  { %1405 = vmatpush3.msra.mxu0 %v584_v36  ;;  %1438 = vmatpush3.msra.mxu1 %v617_v58  ;;  %v264_v0 = vadd.f32 %v263_v49, %v262_v59  ;;  %v183_v18 = vadd.f32 %v182_v4, %v181_v60  ;;  %v190_v25 = vadd.f32 %v189_v10, %v188_v1  ;;  %v280_v29 = vrot.slane %v279_v13, 4  ;;  %v579_v58 = vld [vmem:[%s2494_s1 + $0x228] sm:$0xff]  ;;  %v612_v59 = vld [vmem:[%s2494_s1 + $0x330] sm:$0xff]  ;;  %v577_v60 = vld [vmem:[%s2494_s1 + $0x218] sm:$0xff] }
  0x46   :  { %1406 = vmatprep.subr.mxu0 %v599_v40  ;;  %1439 = vmatprep.subr.mxu1 %v632_v41  ;;  %v267_v28 = vadd.f32 %v266_v12, %v265_v2  ;;  %v170_v33 = vrot.slane %v169_v16, 2  ;;  %v177_v34 = vrot.slane %v176_v17, 2  ;;  %v274_v36 = vadd.f32 %v273_v19, %v272_v6  ;;  %v594_v41 = vld [vmem:[%s2494_s1 + $0x2a0] sm:$0xff] }
  0x47   :  { %1407 = vmatpush3.msra.mxu0 %v583_v47  ;;  %1440 = vmatpush3.msra.mxu1 %v616_v48  ;;  %v412_v9 = vcombine.low %v257_v42, %v264_v0  ;;  %v184_v35 = vrot.slane %v183_v18, 2  ;;  %v191_v38 = vrot.slane %v190_v25, 2  ;;  %v281_v40 = vadd.f32 %v280_v29, %v279_v13  ;;  %v627_v42 = vld [vmem:[%s2494_s1 + $0x3a8] sm:$0xff] }
  0x48   :  { %1408 = vmatprep.subr.mxu0 %v598_v53  ;;  %1441 = vmatprep.subr.mxu1 %v631_v54  ;;  %v268_v39 = vrot.slane %v267_v28, 2  ;;  %v171_v43 = vadd.f32 %v170_v33, %v169_v16  ;;  %v178_v45 = vadd.f32 %v177_v34, %v176_v17  ;;  %v275_v47 = vrot.slane %v274_v36, 2  ;;  %v611_v48 = vld [vmem:[%s2494_s1 + $0x328] sm:$0xff] }
  0x49   :  { %1409 = vmatpush3.msra.mxu0 %v582_v62  ;;  %1442 = vmatpush3.msra.mxu1 %v615_v63  ;;  %v426_v24 = vrot.slane %v412_v9, %v1847_v26  ;;  %v185_v46 = vadd.f32 %v184_v35, %v183_v18  ;;  %v2068_v50 = vadd.f32 %v191_v38, %v190_v25  ;;  %v94_v53 = vunpack.c.h.bf16 %v1976_v30  ;;  %v610_v62 = vld [vmem:[%s2494_s1 + $0x320] sm:$0xff] }
  0x4a   :  { %1410 = vmatprep.subr.mxu0 %v597_v3  ;;  %1443 = vmatprep.subr.mxu1 %v630_v44  ;;  %v172_v54 = vrot.slane %v171_v43, 1  ;;  %v2077_v56 = vadd.f32 %v268_v39, %v267_v28  ;;  %v282_v57 = vrot.slane %v281_v40, 2  ;;  %v108_v30 = vunpack.c.h.bf16 %v1990_v27 }
  0x4b   :  { %1411 = vmatpush3.msra.mxu0 %v581_v7  ;;  %1444 = vmatpush3.msra.mxu1 %v614_v8  ;;  %v427_v37 = vcombine.low %v1959_v22, %v426_v24  ;;  %v578_v22 = vld [vmem:[%s2494_s1 + $0x220] sm:$0xff]  ;;  %v179_v0 = vrot.slane %v178_v45, 1  ;;  %v2090_v1 = vadd.f32 %v275_v47, %v274_v36 }
  0x4c   :  { %1412 = vmatprep.subr.mxu0 %v596_v14  ;;  %1445 = vmatprep.subr.mxu1 %v629_v15 }
  0x4d   :  { %1413 = vmatpush3.msra.mxu0 %v580_v20  ;;  %1446 = vmatpush3.msra.mxu1 %v613_v23  ;;  %v468_v49 = vrot.slane %v427_v37, 7 }
  0x4e   :  { %1414 = vmatprep.subr.mxu0 %v595_v31  ;;  %1447 = vmatprep.subr.mxu1 %v628_v32 }
  0x4f   :  { %1415 = vmatpush3.msra.mxu0 %v579_v58  ;;  %1448 = vmatpush3.msra.mxu1 %v612_v59  ;;  %v469_v63 = vsel %vm458_vm0, %v468_v49, %v368_v21 }
  0x50   :  { %1416 = vmatprep.subr.mxu0 %v594_v41  ;;  %1449 = vmatprep.subr.mxu1 %v627_v42 }
  0x51   :  { %8 = vsyncpa [#allocation4], 0  ;;  %1417 = vmatpush3.msra.mxu0 %v578_v22  ;;  %1450 = vmatpush3.msra.mxu1 %v611_v48  ;;  %v592_v2 = vld [vmem:[%s2494_s1 + $0x290] sm:$0xff]  ;;  %v625_v3 = vld [vmem:[%s2494_s1 + $0x398] sm:$0xff]  ;;  %v470_v11 = vsel %vm460_vm1, %v468_v49, %v469_v63  ;;  %v186_v21 = vrot.slane %v185_v46, 1  ;;  %v193_v55 = vrot.slane %v2068_v50, 1  ;;  %v2120_v9 = vadd.f32 %v172_v54, %v171_v43 }
  0x52   :  { %v576_v5 = vld [vmem:[%s2494_s1 + $0x210] sm:$0xff]  ;;  %1418 = vmatprep.subr.mxu0 %v593_v51  ;;  %1451 = vmatprep.subr.mxu1 %v626_v52  ;;  %v609_v27 = vld [vmem:[%s2494_s1 + $0x318] sm:$0xff]  ;;  %v471_v44 = vsel %vm462_vm2, %v468_v49, %v470_v11  ;;  %v40_v4 = vld [vmem:[%s2493_s0 + $0x68] sm:$0xff]  ;;  %v270_v10 = vrot.slane %v2077_v56, 1  ;;  %v2123_v12 = vadd.f32 %v282_v57, %v281_v40  ;;  %v2134_v16 = vadd.f32 %v179_v0, %v178_v45 }
  0x53   :  { %v33_v61 = vld [vmem:[%s2493_s0 + $0x30] sm:$0xff]  ;;  %1419 = vmatpush3.msra.mxu0 %v577_v60  ;;  %1452 = vmatpush3.msra.mxu1 %v610_v62  ;;  %v591_v6 = vld [vmem:[%s2494_s1 + $0x288] sm:$0xff]  ;;  %v472_v8 = vsel %vm464_vm3, %v468_v49, %v471_v44  ;;  %v47_v13 = vld [vmem:[%s2493_s0 + $0xa0] sm:$0xff]  ;;  %v277_v17 = vrot.slane %v2090_v1, 1  ;;  %v286_v18 = vadd.f32 %v108_v30, %v94_v53  ;;  %v2143_v23 = vadd.f32 %v186_v21, %v185_v46 }
  0x54   :  { %v624_v7 = vld [vmem:[%s2494_s1 + $0x390] sm:$0xff]  ;;  %1420 = vmatprep.subr.mxu0 %v592_v2  ;;  %1453 = vmatprep.subr.mxu1 %v625_v3  ;;  %v575_v14 = vld [vmem:[%s2494_s1 + $0x208] sm:$0xff]  ;;  %v590_v19 = vld [vmem:[%s2494_s1 + $0x280] sm:$0xff]  ;;  %v67_v25 = vunpack.c.l.bf16 %v33_v61  ;;  %v68_v28 = vunpack.c.h.bf16 %v33_v61  ;;  %v81_v29 = vunpack.c.l.bf16 %v40_v4  ;;  %v507_v32 = vmul.f32 0.0625, %v472_v8 }
  0x55   :  { %v608_v15 = vld [vmem:[%s2494_s1 + $0x310] sm:$0xff]  ;;  %1421 = vmatpush3.msra.mxu0 %v576_v5  ;;  %1454 = vmatpush3.msra.mxu1 %v609_v27  ;;  %v623_v20 = vld [vmem:[%s2494_s1 + $0x388] sm:$0xff]  ;;  %v54_v24 = vld [vmem:[%s2493_s0 + $0xd8] sm:$0xff]  ;;  %v287_v34 = vrot.slane %v286_v18, 4  ;;  %v82_v35 = vunpack.c.h.bf16 %v40_v4  ;;  %v95_v36 = vunpack.c.l.bf16 %v47_v13  ;;  %v2161_v37 = vadd.f32 %v193_v55, %v2068_v50 }
  0x56   :  { %1422 = vmatprep.subr.mxu0 %v591_v6  ;;  %1455 = vmatprep.subr.mxu1 %v624_v7  ;;  %v574_v31 = vld [vmem:[%s2494_s1 + $0x200] sm:$0xff]  ;;  %v607_v33 = vld [vmem:[%s2494_s1 + $0x308] sm:$0xff]  ;;  %v669_v59 = vld [vmem:[%s2494_s1 + $0x4f8] sm:$0xff]  ;;  %v2164_v38 = vadd.f32 %v270_v10, %v2077_v56  ;;  %v284_v39 = vrot.slane %v2123_v12, 1  ;;  %v96_v40 = vunpack.c.h.bf16 %v47_v13  ;;  %v769_v41 = vrot.slane %v507_v32, %v1847_v26 }
  0x57   :  { %1423 = vmatpush3.msra.mxu0 %v575_v14  ;;  %1456 = vmatpush3.msra.mxu1 %v608_v15  ;;  %v622_v58 = vld [vmem:[%s2494_s1 + $0x380] sm:$0xff]  ;;  %v762_v43 = vcombine.high %v507_v32, %v507_v32  ;;  %v288_v45 = vadd.f32 %v287_v34, %v286_v18  ;;  %v109_v46 = vunpack.c.l.bf16 %v54_v24  ;;  %v701_v47 = vld [vmem:[%s2494_s1 + $0x5f8] sm:$0xff]  ;;  %v2175_v22 = vadd.f32 %v277_v17, %v2090_v1  ;;  %v668_v30 = vld [vmem:[%s2494_s1 + $0x4f0] sm:$0xff] }
  0x58   :  { %1424 = vmatprep.subr.mxu0 %v590_v19  ;;  %1457 = vmatprep.subr.mxu1 %v623_v20  ;;  %v606_v42 = vld [vmem:[%s2494_s1 + $0x300] sm:$0xff]  ;;  %v110_v48 = vunpack.c.h.bf16 %v54_v24  ;;  %v195_v49 = vadd.f32 %v81_v29, %v67_v25  ;;  %v202_v50 = vadd.f32 %v82_v35, %v68_v28  ;;  %v777_v51 = vcombine.high %v769_v41, %v769_v41  ;;  %v653_v56 = vld [vmem:[%s2494_s1 + $0x478] sm:$0xff]  ;;  %v652_v3 = vld [vmem:[%s2494_s1 + $0x470] sm:$0xff] }
  0x59   :  { %1425 = vmatpush3.msra.mxu0 %v574_v31  ;;  %1458 = vmatpush3.msra.mxu1 %v607_v33  ;;  %v776_v52 = vrot.slane %v762_v43, %v1847_v26  ;;  %v289_v53 = vrot.slane %v288_v45, 2  ;;  %v293_v54 = vadd.f32 %v109_v46, %v95_v36  ;;  %v369_v1 = vcombine.low %v2120_v9, %v2134_v16  ;;  %v685_v5 = vld [vmem:[%s2494_s1 + $0x578] sm:$0xff]  ;;  %v667_v55 = vld [vmem:[%s2494_s1 + $0x4e8] sm:$0xff]  ;;  %v700_v61 = vld [vmem:[%s2494_s1 + $0x5f0] sm:$0xff] }
  0x5a   :  { %1459 = vmatprep.subr.mxu1 %v622_v58  ;;  %1464 = vmatprep.subr.mxu0 %v669_v59  ;;  %v196_v57 = vrot.slane %v195_v49, 4  ;;  %v203_v60 = vrot.slane %v202_v50, 4  ;;  %v300_v62 = vadd.f32 %v110_v48, %v96_v40  ;;  %v370_v11 = vcombine.low %v2143_v23, %v2161_v37  ;;  %v651_v9 = vld [vmem:[%s2494_s1 + $0x468] sm:$0xff]  ;;  %v684_v10 = vld [vmem:[%s2494_s1 + $0x570] sm:$0xff]  ;;  %v650_v20 = vld [vmem:[%s2494_s1 + $0x460] sm:$0xff] }
  0x5b   :  { %1460 = vmatpush3.msra.mxu1 %v606_v42  ;;  %1022 = vmatprep.mubr.f32.mxu0 %v777_v51  ;;  %v778_v63 = vcombine.high %v776_v52, %v776_v52  ;;  %v290_v0 = vadd.f32 %v289_v53, %v288_v45  ;;  %v294_v2 = vrot.slane %v293_v54, 4  ;;  %v285_v4 = vadd.f32 %v284_v39, %v2123_v12  ;;  %v666_v12 = vld [vmem:[%s2494_s1 + $0x4e0] sm:$0xff]  ;;  %v699_v16 = vld [vmem:[%s2494_s1 + $0x5e8] sm:$0xff]  ;;  %v665_v31 = vld [vmem:[%s2494_s1 + $0x4d8] sm:$0xff] }
  0x5c   :  { %1499 = vmatprep.subr.mxu1 %v701_v47  ;;  %1023 = vmatmul.mubr.f32.vlgmr.msra.gmra.mxu0 %v769_v41  ;;  %v197_v21 = vadd.f32 %v196_v57, %v195_v49  ;;  %v204_v27 = vadd.f32 %v203_v60, %v202_v50  ;;  %v301_v44 = vrot.slane %v300_v62, 4  ;;  %v428_v7 = vcombine.low %v2164_v38, %v2175_v22  ;;  %v683_v23 = vld [vmem:[%s2494_s1 + $0x568] sm:$0xff]  ;;  %v698_v32 = vld [vmem:[%s2494_s1 + $0x5e0] sm:$0xff]  ;;  %v649_v36 = vld [vmem:[%s2494_s1 + $0x458] sm:$0xff] }
  0x5d   :  { %1092 = vmatprep.mubr.f32.mxu1 %v778_v63  ;;  %1465 = vmatpush3.msra.mxu0 %v653_v56  ;;  %v291_v6 = vrot.slane %v290_v0, 1  ;;  %v295_v8 = vadd.f32 %v294_v2, %v293_v54  ;;  %v2216_v18 = vrot.slane %v369_v1, %v1847_v26  ;;  %v384_v24 = vrot.slane %v370_v11, %v1847_v26  ;;  %v682_v58 = vld [vmem:[%s2494_s1 + $0x560] sm:$0xff]  ;;  %v664_v39 = vld [vmem:[%s2494_s1 + $0x4d0] sm:$0xff]  ;;  %v697_v40 = vld [vmem:[%s2494_s1 + $0x5d8] sm:$0xff] }
  0x5e   :  { %1093 = vmatmul.mubr.f32.vlgmr.msra.gmra.mxu1 %v776_v52  ;;  %1466 = vmatprep.subr.mxu0 %v668_v30  ;;  %v198_v13 = vrot.slane %v197_v21, 2  ;;  %v205_v14 = vrot.slane %v204_v27, 2  ;;  %v302_v15 = vadd.f32 %v301_v44, %v300_v62  ;;  %v436_v34 = vrot.slane %v428_v7, %v1847_v26  ;;  %v648_v43 = vld [vmem:[%s2494_s1 + $0x450] sm:$0xff]  ;;  %v681_v45 = vld [vmem:[%s2494_s1 + $0x558] sm:$0xff]  ;;  %v663_v48 = vld [vmem:[%s2494_s1 + $0x4c8] sm:$0xff] }
  0x5f   :  { %1467 = vmatpush3.msra.mxu0 %v652_v3  ;;  %1500 = vmatpush3.msra.mxu1 %v685_v5  ;;  %v292_v17 = vadd.f32 %v291_v6, %v290_v0  ;;  %v296_v19 = vrot.slane %v295_v8, 2  ;;  %v696_v49 = vld [vmem:[%s2494_s1 + $0x5d0] sm:$0xff]  ;;  %v385_v50 = vcombine.low %v2216_v18, %v384_v24  ;;  %v647_v53 = vld [vmem:[%s2494_s1 + $0x448] sm:$0xff]  ;;  %v662_v60 = vld [vmem:[%s2494_s1 + $0x4c0] sm:$0xff] }
  0x60   :  { %1468 = vmatprep.subr.mxu0 %v667_v55  ;;  %1501 = vmatprep.subr.mxu1 %v700_v61  ;;  %v199_v25 = vadd.f32 %v198_v13, %v197_v21  ;;  %v206_v28 = vadd.f32 %v205_v14, %v204_v27  ;;  %v303_v29 = vrot.slane %v302_v15, 2  ;;  %v680_v54 = vld [vmem:[%s2494_s1 + $0x550] sm:$0xff]  ;;  %v695_v62 = vld [vmem:[%s2494_s1 + $0x5c8] sm:$0xff]  ;;  %v646_v30 = vld [vmem:[%s2494_s1 + $0x440] sm:$0xff] }
  0x61   :  { %1469 = vmatpush3.msra.mxu0 %v651_v9  ;;  %1502 = vmatpush3.msra.mxu1 %v684_v10  ;;  %v429_v33 = vcombine.low %v285_v4, %v292_v17  ;;  %v297_v35 = vadd.f32 %v296_v19, %v295_v8  ;;  %v679_v0 = vld [vmem:[%s2494_s1 + $0x548] sm:$0xff]  ;;  %v661_v2 = vld [vmem:[%s2494_s1 + $0x4b8] sm:$0xff]  ;;  %v694_v3 = vld [vmem:[%s2494_s1 + $0x5c0] sm:$0xff] }
  0x62   :  { %1470 = vmatprep.subr.mxu0 %v666_v12  ;;  %1503 = vmatprep.subr.mxu1 %v699_v16  ;;  %v200_v59 = vrot.slane %v199_v25, 1  ;;  %v207_v37 = vrot.slane %v206_v28, 1  ;;  %v304_v38 = vadd.f32 %v303_v29, %v302_v15  ;;  %v645_v11 = vld [vmem:[%s2494_s1 + $0x438] sm:$0xff]  ;;  %v678_v21 = vld [vmem:[%s2494_s1 + $0x540] sm:$0xff]  ;;  %v660_v61 = vld [vmem:[%s2494_s1 + $0x4b0] sm:$0xff] }
  0x63   :  { %1471 = vmatpush3.msra.mxu0 %v650_v20  ;;  %1504 = vmatpush3.msra.mxu1 %v683_v23  ;;  %v443_v41 = vrot.slane %v429_v33, %v1847_v26  ;;  %v298_v42 = vrot.slane %v297_v35, 1  ;;  %v693_v4 = vld [vmem:[%s2494_s1 + $0x5b8] sm:$0xff]  ;;  %v644_v7 = vld [vmem:[%s2494_s1 + $0x430] sm:$0xff]  ;;  %v659_v13 = vld [vmem:[%s2494_s1 + $0x4a8] sm:$0xff] }
  0x64   :  { %1472 = vmatprep.subr.mxu0 %v665_v31  ;;  %1505 = vmatprep.subr.mxu1 %v698_v32  ;;  %v201_v46 = vadd.f32 %v200_v59, %v199_v25  ;;  %v208_v47 = vadd.f32 %v207_v37, %v206_v28  ;;  %v305_v22 = vrot.slane %v304_v38, 1  ;;  %v677_v8 = vld [vmem:[%s2494_s1 + $0x538] sm:$0xff]  ;;  %v692_v14 = vld [vmem:[%s2494_s1 + $0x5b0] sm:$0xff]  ;;  %v643_v15 = vld [vmem:[%s2494_s1 + $0x428] sm:$0xff] }
  0x65   :  { %1473 = vmatpush3.msra.mxu0 %v649_v36  ;;  %1506 = vmatpush3.msra.mxu1 %v682_v58  ;;  %v444_v51 = vcombine.low %v436_v34, %v443_v41  ;;  %v299_v52 = vadd.f32 %v298_v42, %v297_v35  ;;  %v676_v12 = vld [vmem:[%s2494_s1 + $0x530] sm:$0xff]  ;;  %v658_v17 = vld [vmem:[%s2494_s1 + $0x4a0] sm:$0xff]  ;;  %v691_v18 = vld [vmem:[%s2494_s1 + $0x5a8] sm:$0xff] }
  0x66   :  { %1474 = vmatprep.subr.mxu0 %v664_v39  ;;  %1507 = vmatprep.subr.mxu1 %v697_v40  ;;  %v306_v56 = vadd.f32 %v305_v22, %v304_v38  ;;  %v386_v57 = vcombine.low %v201_v46, %v208_v47  ;;  %v26_v20 = vld [vmem:[#allocation2 + $0x18] sm:$0xf]  ;;  %v675_v25 = vld [vmem:[%s2494_s1 + $0x528] sm:$0xff]  ;;  %v657_v29 = vld [vmem:[%s2494_s1 + $0x498] sm:$0xff] }
  0x67   :  { %1475 = vmatpush3.msra.mxu0 %v648_v43  ;;  %1508 = vmatpush3.msra.mxu1 %v681_v45  ;;  %v475_v63 = vrot.slane %v444_v51, 7  ;;  %v642_v24 = vld [vmem:[%s2494_s1 + $0x420] sm:$0xff]  ;;  %v641_v33 = vld [vmem:[%s2494_s1 + $0x418] sm:$0xff]  ;;  %v656_v58 = vld [vmem:[%s2494_s1 + $0x490] sm:$0xff] }
  0x68   :  { %1476 = vmatprep.subr.mxu0 %v663_v48  ;;  %1509 = vmatprep.subr.mxu1 %v696_v49  ;;  %v445_v1 = vcombine.low %v299_v52, %v306_v56  ;;  %v393_v44 = vrot.slane %v386_v57, %v1847_v26  ;;  %v690_v31 = vld [vmem:[%s2494_s1 + $0x5a0] sm:$0xff]  ;;  %v689_v59 = vld [vmem:[%s2494_s1 + $0x598] sm:$0xff]  ;;  %v640_v38 = vld [vmem:[%s2494_s1 + $0x410] sm:$0xff] }
  0x69   :  { %1477 = vmatpush3.msra.mxu0 %v647_v53  ;;  %1510 = vmatpush3.msra.mxu1 %v680_v54  ;;  %v476_v5 = vsel %vm458_vm0, %v475_v63, %v385_v50  ;;  %v674_v34 = vld [vmem:[%s2494_s1 + $0x520] sm:$0xff]  ;;  %v673_v39 = vld [vmem:[%s2494_s1 + $0x518] sm:$0xff]  ;;  %v655_v40 = vld [vmem:[%s2494_s1 + $0x488] sm:$0xff] }
  0x6a   :  { %1478 = vmatprep.subr.mxu0 %v662_v60  ;;  %1511 = vmatprep.subr.mxu1 %v695_v62  ;;  %v477_v27 = vsel %vm460_vm1, %v475_v63, %v476_v5  ;;  %v452_v55 = vrot.slane %v445_v1, %v1847_v26  ;;  %v688_v41 = vld [vmem:[%s2494_s1 + $0x590] sm:$0xff]  ;;  %v639_v42 = vld [vmem:[%s2494_s1 + $0x408] sm:$0xff]  ;;  %v654_v46 = vld [vmem:[%s2494_s1 + $0x480] sm:$0xff] }
  0x6b   :  { %1479 = vmatpush3.msra.mxu0 %v646_v30  ;;  %1512 = vmatpush3.msra.mxu1 %v679_v0  ;;  %v478_v6 = vsel %vm462_vm2, %v475_v63, %v477_v27  ;;  %v672_v43 = vld [vmem:[%s2494_s1 + $0x510] sm:$0xff]  ;;  %v687_v47 = vld [vmem:[%s2494_s1 + $0x588] sm:$0xff]  ;;  %v638_v48 = vld [vmem:[%s2494_s1 + $0x400] sm:$0xff] }
  0x6c   :  { %1480 = vmatprep.subr.mxu0 %v661_v2  ;;  %1513 = vmatprep.subr.mxu1 %v694_v3  ;;  %v479_v9 = vsel %vm464_vm3, %v475_v63, %v478_v6  ;;  %v482_v10 = vrot.slane %v452_v55, 7  ;;  %v671_v49 = vld [vmem:[%s2494_s1 + $0x508] sm:$0xff]  ;;  %v686_v50 = vld [vmem:[%s2494_s1 + $0x580] sm:$0xff]  ;;  %v733_v51 = vld [vmem:[%s2494_s1 + $0x6f8] sm:$0xff] }
  0x6d   :  { %1481 = vmatpush3.msra.mxu0 %v645_v11  ;;  %1514 = vmatpush3.msra.mxu1 %v678_v21  ;;  %v508_v19 = vmul.f32 0.0625, %v479_v9  ;;  %v670_v53 = vld [vmem:[%s2494_s1 + $0x500] sm:$0xff]  ;;  %v717_v56 = vld [vmem:[%s2494_s1 + $0x678] sm:$0xff]  ;;  %v732_v60 = vld [vmem:[%s2494_s1 + $0x6f0] sm:$0xff] }
  0x6e   :  { %1482 = vmatprep.subr.mxu0 %v660_v61  ;;  %1515 = vmatprep.subr.mxu1 %v693_v4  ;;  %v483_v16 = vsel %vm458_vm0, %v482_v10, %v393_v44  ;;  %v716_v62 = vld [vmem:[%s2494_s1 + $0x670] sm:$0xff]  ;;  %v731_v30 = vld [vmem:[%s2494_s1 + $0x6e8] sm:$0xff]  ;;  %v730_v2 = vld [vmem:[%s2494_s1 + $0x6e0] sm:$0xff] }
  0x6f   :  { %1483 = vmatpush3.msra.mxu0 %v644_v7  ;;  %1516 = vmatpush3.msra.mxu1 %v677_v8  ;;  %v484_v23 = vsel %vm460_vm1, %v482_v10, %v483_v16  ;;  %v779_v35 = vcombine.high %v508_v19, %v508_v19  ;;  %v786_v37 = vrot.slane %v508_v19, %v1847_v26  ;;  %v715_v0 = vld [vmem:[%s2494_s1 + $0x668] sm:$0xff]  ;;  %v729_v3 = vld [vmem:[%s2494_s1 + $0x6d8] sm:$0xff]  ;;  %v728_v11 = vld [vmem:[%s2494_s1 + $0x6d0] sm:$0xff] }
  0x70   :  { %1484 = vmatprep.subr.mxu0 %v659_v13  ;;  %1517 = vmatprep.subr.mxu1 %v692_v14  ;;  %v485_v28 = vsel %vm462_vm2, %v482_v10, %v484_v23  ;;  %v713_v5 = vld [vmem:[%s2494_s1 + $0x658] sm:$0xff]  ;;  %v712_v21 = vld [vmem:[%s2494_s1 + $0x650] sm:$0xff]  ;;  %v727_v27 = vld [vmem:[%s2494_s1 + $0x6c8] sm:$0xff] }
  0x71   :  { %1485 = vmatpush3.msra.mxu0 %v643_v15  ;;  %1518 = vmatpush3.msra.mxu1 %v676_v12  ;;  %v486_v32 = vsel %vm464_vm3, %v482_v10, %v485_v28  ;;  %v793_v45 = vrot.slane %v779_v35, %v1847_v26  ;;  %v794_v22 = vcombine.high %v786_v37, %v786_v37  ;;  %v711_v44 = vld [vmem:[%s2494_s1 + $0x648] sm:$0xff]  ;;  %v726_v55 = vld [vmem:[%s2494_s1 + $0x6c0] sm:$0xff]  ;;  %v725_v4 = vld [vmem:[%s2494_s1 + $0x6b8] sm:$0xff] }
  0x72   :  { %1486 = vmatprep.subr.mxu0 %v658_v17  ;;  %1519 = vmatprep.subr.mxu1 %v691_v18  ;;  %v494_v36 = vadd.f32 %v486_v32, %v26_v20  ;;  %v710_v61 = vld [vmem:[%s2494_s1 + $0x640] sm:$0xff]  ;;  %v709_v6 = vld [vmem:[%s2494_s1 + $0x638] sm:$0xff]  ;;  %v724_v7 = vld [vmem:[%s2494_s1 + $0x6b0] sm:$0xff] }
  0x73   :  { %1487 = vmatpush3.msra.mxu0 %v642_v24  ;;  %1520 = vmatpush3.msra.mxu1 %v675_v25  ;;  %v795_v52 = vcombine.high %v793_v45, %v793_v45  ;;  %v708_v8 = vld [vmem:[%s2494_s1 + $0x630] sm:$0xff]  ;;  %v723_v9 = vld [vmem:[%s2494_s1 + $0x6a8] sm:$0xff]  ;;  %v722_v13 = vld [vmem:[%s2494_s1 + $0x6a0] sm:$0xff] }
  0x74   :  { %1488 = vmatprep.subr.mxu0 %v657_v29  ;;  %1521 = vmatprep.subr.mxu1 %v690_v31  ;;  %498 = vst [vmem:[#allocation2 + $0x18] sm:$0xf] %v494_v36  ;;  %v707_v10 = vld [vmem:[%s2494_s1 + $0x628] sm:$0xff]  ;;  %v706_v14 = vld [vmem:[%s2494_s1 + $0x620] sm:$0xff]  ;;  %v721_v15 = vld [vmem:[%s2494_s1 + $0x698] sm:$0xff] }
  0x75   :  { %1489 = vmatpush3.msra.mxu0 %v641_v33  ;;  %1522 = vmatpush3.msra.mxu1 %v674_v34  ;;  %v705_v12 = vld [vmem:[%s2494_s1 + $0x618] sm:$0xff]  ;;  %v720_v16 = vld [vmem:[%s2494_s1 + $0x690] sm:$0xff]  ;;  %v719_v18 = vld [vmem:[%s2494_s1 + $0x688] sm:$0xff] }
  0x76   :  { %1490 = vmatprep.subr.mxu0 %v656_v58  ;;  %1523 = vmatprep.subr.mxu1 %v689_v59  ;;  %v704_v17 = vld [vmem:[%s2494_s1 + $0x610] sm:$0xff]  ;;  %v703_v19 = vld [vmem:[%s2494_s1 + $0x608] sm:$0xff]  ;;  %v718_v20 = vld [vmem:[%s2494_s1 + $0x680] sm:$0xff] }
  0x77   :  { %1491 = vmatpush3.msra.mxu0 %v640_v38  ;;  %1524 = vmatpush3.msra.mxu1 %v673_v39  ;;  %v702_v23 = vld [vmem:[%s2494_s1 + $0x600] sm:$0xff] }
  0x78   :  { %1492 = vmatprep.subr.mxu0 %v655_v40  ;;  %1525 = vmatprep.subr.mxu1 %v688_v41  ;;  %v1323_v32 = vld [vmem:[%s2495_s2] ss:$0 sm:$0xff] }
  0x79   :  { %1493 = vmatpush3.msra.mxu0 %v639_v42  ;;  %1526 = vmatpush3.msra.mxu1 %v672_v43 }
  0x7a   :  { %1494 = vmatprep.subr.mxu0 %v654_v46  ;;  %1527 = vmatprep.subr.mxu1 %v687_v47 }
  0x7b   :  { %1495 = vmatpush3.msra.mxu0 %v638_v48  ;;  %1162 = vmatprep.mubr.f32.mxu0 %v794_v22  ;;  %v505_v54 = vld [vmem:[#allocation2 + $0x18] sm:$0xf] }
  0x7c   :  { %1528 = vmatpush3.msra.mxu1 %v671_v49  ;;  %1163 = vmatmul.mubr.f32.vlgmr.msra.gmra.mxu0 %v786_v37  ;;  %v509_v57 = vmul.f32 0.0625, %v505_v54 }
  0x7d   :  { %1529 = vmatprep.subr.mxu1 %v686_v50  ;;  %1534 = vmatprep.subr.mxu0 %v733_v51 }
  0x7e   :  { %1530 = vmatpush3.msra.mxu1 %v670_v53  ;;  %1232 = vmatprep.mubr.f32.mxu1 %v795_v52  ;;  %v802_v63 = vrot.slane %v509_v57, %v1847_v26  ;;  %v714_v26 = vld [vmem:[%s2494_s1 + $0x660] sm:$0xff]  ;;  %s1596_s1 = smov [#allocation3]  }
  0x7f   :  { %1535 = vmatpush3.msra.mxu0 %v717_v56  ;;  %1233 = vmatmul.mubr.f32.vlgmr.msra.gmra.mxu1 %v793_v45  ;;  %s1315_s2 = sshll.u32 %s1596_s1, 4  ;;  %s1316_s2 = int_to_ptr.vmem [resolvable:$true] %s1315_s2 }
  0x80   :  { %1536 = vmatprep.subr.mxu0 %v732_v60  ;;  %v803_v1 = vcombine.high %v802_v63, %v802_v63  ;;  %s1572_s24 = scalar_lea.vmem %s1316_s2, 32  ;;  %p1577_p1 = scmp.lt.s32.totalorder %s1316_s2, %s1316_s2 }
  0x81   :  { %1537 = vmatpush3.msra.mxu0 %v716_v62  ;;  %p1573_p0 = scmp.ne.s32.totalorder %s1316_s2, %s1572_s24  ;;  %p1578_p2 = scmp.lt.s32.totalorder %s1572_s24, %s1572_s24 }
  0x82   :  { %1538 = vmatprep.subr.mxu0 %v731_v30  ;;  %1302 = vmatprep.mubr.f32.mxu0 %v803_v1 }
  0x83   :  { %1539 = vmatpush3.msra.mxu0 %v715_v0  ;;  %p1579_p3 = por %p1578_p2, %p1577_p1 }
  0x84   :  { %1540 = vmatprep.subr.mxu0 %v730_v2 }
  0x85   :  { %1541 = vmatpush3.msra.mxu0 %v714_v26  ;;  %p1580_p4 = pnand %p1579_p3, %p1573_p0 }
  0x86   :  { %1542 = vmatprep.subr.mxu0 %v729_v3 }
  0x87   :  { %1543 = vmatpush3.msra.mxu0 %v713_v5 }
  0x88   :  { %1544 = vmatprep.subr.mxu0 %v728_v11 }
  0x89   :  { %1545 = vmatpush3.msra.mxu0 %v712_v21 }
  0x8a   :  { %1546 = vmatprep.subr.mxu0 %v727_v27 }
  0x8b   :  { %1547 = vmatpush3.msra.mxu0 %v711_v44 }
  0x8c   :  { %1548 = vmatprep.subr.mxu0 %v726_v55 }
  0x8d   :  { %1549 = vmatpush3.msra.mxu0 %v710_v61 }
  0x8e   :  { %1550 = vmatprep.subr.mxu0 %v725_v4 }
  0x8f   :  { %1551 = vmatpush3.msra.mxu0 %v709_v6 }
  0x90   :  { %1552 = vmatprep.subr.mxu0 %v724_v7 }
  0x91   :  { %1553 = vmatpush3.msra.mxu0 %v708_v8 }
  0x92   :  { %1554 = vmatprep.subr.mxu0 %v723_v9 }
  0x93   :  { %1555 = vmatpush3.msra.mxu0 %v707_v10 }
  0x94   :  { %1556 = vmatprep.subr.mxu0 %v722_v13 }
  0x95   :  { %1557 = vmatpush3.msra.mxu0 %v706_v14 }
  0x96   :  { %1558 = vmatprep.subr.mxu0 %v721_v15 }
  0x97   :  { %1559 = vmatpush3.msra.mxu0 %v705_v12 }
  0x98   :  { %1560 = vmatprep.subr.mxu0 %v720_v16 }
  0x99   :  { %1561 = vmatpush3.msra.mxu0 %v704_v17 }
  0x9a   :  { %1562 = vmatprep.subr.mxu0 %v719_v18 }
  0x9b   :  { %1563 = vmatpush3.msra.mxu0 %v703_v19 }
  0x9c   :  { %1564 = vmatprep.subr.mxu0 %v718_v20 }
  0x9d   :  { %1565 = vmatpush3.msra.mxu0 %v702_v23 }
  0x9e   :  { %1303 = vmatmul.mubr.f32.vlgmr.msra.gmra.mxu0 %v802_v63 }
  0xfa   :  { %v1356_v24 = vpop.f32.mrf.mxu0 }
  0xfc   :  { %v1357_v25 = vpop.f32.mrf.mxu0  ;;  %v1391_v28 = vpop.f32.mrf.mxu1 }
  0xfd   :  { %v1358_v31 = vadd.f32 %v1357_v25, %v1356_v24 }
  0xfe   :  { %v1392_v33 = vpop.f32.mrf.mxu1 }
  0xff   :  { %v885_v36 = vadd.f32 %v1358_v31, %v1323_v32  ;;  %v1393_v58 = vadd.f32 %v1392_v33, %v1391_v28 }
 0x101   :  { %v955_v39 = vadd.f32 %v1393_v58, %v885_v36 }
 0x11c   :  { %v1426_v29 = vpop.f32.mrf.mxu0 }
 0x11e   :  { %v1427_v34 = vpop.f32.mrf.mxu0  ;;  %v1461_v35 = vpop.f32.mrf.mxu1 }
 0x11f   :  { %v1428_v37 = vadd.f32 %v1427_v34, %v1426_v29 }
 0x120   :  { %v1462_v38 = vpop.f32.mrf.mxu1 }
 0x121   :  { %v1025_v42 = vadd.f32 %v1428_v37, %v955_v39  ;;  %v1463_v43 = vadd.f32 %v1462_v38, %v1461_v35 }
 0x123   :  { %v1095_v47 = vadd.f32 %v1463_v43, %v1025_v42 }
 0x13c   :  { %v1496_v59 = vpop.f32.mrf.mxu0 }
 0x13e   :  { %v1497_v40 = vpop.f32.mrf.mxu0 }
 0x13f   :  { %v1531_v41 = vpop.f32.mrf.mxu1  ;;  %v1498_v45 = vadd.f32 %v1497_v40, %v1496_v59 }
 0x141   :  { %v1532_v46 = vpop.f32.mrf.mxu1  ;;  %v1165_v22 = vadd.f32 %v1498_v45, %v1095_v47 }
 0x142   :  { %v1533_v48 = vadd.f32 %v1532_v46, %v1531_v41 }
 0x144   :  { %v1235_v51 = vadd.f32 %v1533_v48, %v1165_v22 }
 0x15e   :  { %v1566_v49 = vpop.f32.mrf.mxu0 }
 0x160   :  { %v1567_v50 = vpop.f32.mrf.mxu0 }
 0x161   :  { %v1568_v52 = vadd.f32 %v1567_v50, %v1566_v49 }
 0x163   :  { %v1305_v53 = vadd.f32 %v1568_v52, %v1235_v51 }
 0x165   :  { %1308 = vst [vmem:[#allocation3] sm:$0x3] %v1305_v53 }
 0x166   :  { %1583 = shalt.err (!%p1580_p4)
}
 0x167   :  { %1318 = dma.vmem_to_hbm [thread:$0]  %s1316_s2, 32, %s2496_s3, [#allocation4]  }
 0x168   :  { %1592 = dma.done.wait [#allocation4], 32  }
 0x169   :  { %1593 = vsyncadd [#allocation4], 4294967264 }
 0x16a   :  { %1322 = vsyncpa [#allocation4], 1 }

</bundles_post_ra>
